<compile_context>
chip_gen: v6e
topology: v6e:2x2x1
jax: 0.10.0
libtpu: 0.0.40
codegen_flags: <defaults>
</compile_context>

<pallas_src>
import functools

import jax
import jax.numpy as jnp
import numpy as np
from jax.experimental import pallas as pl
from jax.experimental.pallas import tpu as pltpu


NUM_CLASSES = 8
LANE = 128                      # lane-dense padding target for narrow channel dims
COMPUTE_DTYPE = jnp.bfloat16    # kernel-boundary dtype (f32 accumulation inside)


# ----------------------------------------------------------------------------
# Tile-size helper: largest tile <= preferred that is `align`-aligned and
# divides the dim exactly; falls back to the full dim (always legal on TPU).
# ----------------------------------------------------------------------------
def _pick_tile(dim, preferred, align):
    if dim <= preferred:
        return dim
    t = (preferred // align) * align
    while t >= align:
        if dim % t == 0:
            return t
        t -= align
    return dim


# ----------------------------------------------------------------------------
# Tiled matmul (+bias, +ReLU) kernel: used for the 1x1 conv projections.
# ----------------------------------------------------------------------------
def _mm_bias_act_kernel(x_ref, w_ref, b_ref, o_ref, acc_ref, *, relu):
    @pl.when(pl.program_id(2) == 0)
    def _init():
        acc_ref[...] = jnp.zeros_like(acc_ref)

    acc_ref[...] += jnp.dot(x_ref[...], w_ref[...],
                            preferred_element_type=jnp.float32)

    @pl.when(pl.program_id(2) == pl.num_programs(2) - 1)
    def _fin():
        out = acc_ref[...] + b_ref[...]
        if relu:
            out = jnp.maximum(out, 0.0)
        o_ref[...] = out.astype(o_ref.dtype)


def _mm_act_kernel(x_ref, w_ref, o_ref, acc_ref, *, relu):
    @pl.when(pl.program_id(2) == 0)
    def _init():
        acc_ref[...] = jnp.zeros_like(acc_ref)

    acc_ref[...] += jnp.dot(x_ref[...], w_ref[...],
                            preferred_element_type=jnp.float32)

    @pl.when(pl.program_id(2) == pl.num_programs(2) - 1)
    def _fin():
        out = acc_ref[...]
        if relu:
            out = jnp.maximum(out, 0.0)
        o_ref[...] = out.astype(o_ref.dtype)


def matmul_bias_act(x, w, b=None, relu=False, tm=256, tn=256, tk=512):
    """y = act(x @ w [+ b]).  x:(M,K), w:(K,N), b:(N,) -> (M,N)."""
    M, K = x.shape
    Kw, N = w.shape
    assert K == Kw
    tm = _pick_tile(M, tm, 8)
    tn = _pick_tile(N, tn, 128)
    tk = _pick_tile(K, tk, 128)
    grid = (M // tm, N // tn, K // tk)

    in_specs = [pl.BlockSpec((tm, tk), lambda i, j, k: (i, k)),
                pl.BlockSpec((tk, tn), lambda i, j, k: (k, j))]
    args = [x, w]
    if b is not None:
        in_specs.append(pl.BlockSpec((1, tn), lambda i, j, k: (0, j)))
        args.append(b.reshape(1, N).astype(jnp.float32))
        kernel = functools.partial(_mm_bias_act_kernel, relu=relu)
    else:
        kernel = functools.partial(_mm_act_kernel, relu=relu)

    itemsize = x.dtype.itemsize
    cost = pl.CostEstimate(flops=2 * M * N * K, transcendentals=0,
                           bytes_accessed=(M * K + K * N + M * N) * itemsize)
    return pl.pallas_call(
        kernel,
        out_shape=jax.ShapeDtypeStruct((M, N), x.dtype),
        grid=grid,
        in_specs=in_specs,
        out_specs=pl.BlockSpec((tm, tn), lambda i, j, k: (i, j)),
        scratch_shapes=[pltpu.VMEM((tm, tn), jnp.float32)],
        compiler_params=pltpu.CompilerParams(
            dimension_semantics=("parallel", "parallel", "arbitrary")),
        cost_estimate=cost,
    )(*args)


# ----------------------------------------------------------------------------
# Dual matmul (replaces concat + 1x1 conv): y = act(x1 @ w1 + x2 @ w2 + b)
# ----------------------------------------------------------------------------
def _dual_mm_kernel(x1_ref, x2_ref, w1_ref, w2_ref, b_ref, o_ref, *, relu):
    acc = jnp.dot(x1_ref[...], w1_ref[...], preferred_element_type=jnp.float32)
    acc = acc + jnp.dot(x2_ref[...], w2_ref[...],
                        preferred_element_type=jnp.float32)
    acc = acc + b_ref[...]
    if relu:
        acc = jnp.maximum(acc, 0.0)
    o_ref[...] = acc.astype(o_ref.dtype)


def dual_matmul_bias(x1, x2, w1, w2, b, relu=False, tm=256, tn=256):
    M, K1 = x1.shape
    M2, K2 = x2.shape
    assert M == M2
    N = w1.shape[1]
    assert w1.shape[0] == K1 and w2.shape == (K2, N)
    tm = _pick_tile(M, tm, 8)
    tn = _pick_tile(N, tn, 128)
    itemsize = x1.dtype.itemsize
    cost = pl.CostEstimate(
        flops=2 * M * N * (K1 + K2), transcendentals=0,
        bytes_accessed=(M * (K1 + K2) + (K1 + K2) * N + M * N) * itemsize)
    return pl.pallas_call(
        functools.partial(_dual_mm_kernel, relu=relu),
        out_shape=jax.ShapeDtypeStruct((M, N), x1.dtype),
        grid=(M // tm, N // tn),
        in_specs=[pl.BlockSpec((tm, K1), lambda i, j: (i, 0)),
                  pl.BlockSpec((tm, K2), lambda i, j: (i, 0)),
                  pl.BlockSpec((K1, tn), lambda i, j: (0, j)),
                  pl.BlockSpec((K2, tn), lambda i, j: (0, j)),
                  pl.BlockSpec((1, tn), lambda i, j: (0, j))],
        out_specs=pl.BlockSpec((tm, tn), lambda i, j: (i, j)),
        compiler_params=pltpu.CompilerParams(
            dimension_semantics=("parallel", "parallel")),
        cost_estimate=cost,
    )(x1, x2, w1, w2, b.reshape(1, N).astype(jnp.float32))


# ----------------------------------------------------------------------------
# Fused 3x3 stride-2 conv (NHWC).  The padded input is phase-split
# (space-to-depth) once outside the kernel -- a single 1x copy -- and the
# nine taps are accumulated in-kernel on the MXU (no im2col materialization).
# ----------------------------------------------------------------------------
def _conv3x3_s2_kernel(x_ref, w_ref, b_ref, o_ref, *, relu):
    _, ho, wo, tn = o_ref.shape
    cin = x_ref.shape[-1]
    acc = jnp.zeros((ho * wo, tn), jnp.float32)
    for dy in range(3):
        iy = dy // 2
        for dx in range(3):
            ix = dx // 2
            phase = (dy % 2) * 2 + (dx % 2)
            tap = x_ref[0, phase, iy:iy + ho, ix:ix + wo, :]   # (ho, wo, cin)
            acc = acc + jnp.dot(tap.reshape(ho * wo, cin), w_ref[dy, dx],
                                preferred_element_type=jnp.float32)
    acc = acc + b_ref[...]
    if relu:
        acc = jnp.maximum(acc, 0.0)
    o_ref[0] = acc.reshape(ho, wo, tn).astype(o_ref.dtype)


def conv3x3_s2(x, weight, bias, relu=True, tn_pref=128):
    """x:(B,H,W,Cin) NHWC (H,W even), weight:(3,3,Cin,Cout) HWIO, bias:(Cout,)."""
    B, H, W, Cin = x.shape
    Cout = weight.shape[-1]
    assert H % 2 == 0 and W % 2 == 0
    Ho, Wo = H // 2, W // 2
    Hp2, Wp2 = Ho + 1, Wo + 1

    xp = jnp.pad(x, ((0, 0), (1, 1), (1, 1), (0, 0)))
    # Space-to-depth phase split (one 1x copy, instead of a 9x im2col blow-up).
    xs = (xp.reshape(B, Hp2, 2, Wp2, 2, Cin)
            .transpose(0, 2, 4, 1, 3, 5)
            .reshape(B, 4, Hp2, Wp2, Cin))

    tn = _pick_tile(Cout, tn_pref, 128)
    w = weight.astype(x.dtype)
    itemsize = x.dtype.itemsize
    cost = pl.CostEstimate(
        flops=2 * B * Ho * Wo * Cout * Cin * 9, transcendentals=0,
        bytes_accessed=(xs.size + w.size + B * Ho * Wo * Cout) * itemsize)

    return pl.pallas_call(
        functools.partial(_conv3x3_s2_kernel, relu=relu),
        out_shape=jax.ShapeDtypeStruct((B, Ho, Wo, Cout), x.dtype),
        grid=(B, Cout // tn),
        in_specs=[pl.BlockSpec((1, 4, Hp2, Wp2, Cin),
                               lambda b, n: (b, 0, 0, 0, 0)),
                  pl.BlockSpec((3, 3, Cin, tn), lambda b, n: (0, 0, 0, n)),
                  pl.BlockSpec((1, tn), lambda b, n: (0, n))],
        out_specs=pl.BlockSpec((1, Ho, Wo, tn), lambda b, n: (b, 0, 0, n)),
        compiler_params=pltpu.CompilerParams(
            dimension_semantics=("parallel", "parallel")),
        cost_estimate=cost,
    )(xs, w, bias.reshape(1, Cout).astype(jnp.float32))
    # TODO(synk): for large resolutions, add spatial output tiling with halo
    # DMA; here the per-batch feature map comfortably fits VMEM.


# ----------------------------------------------------------------------------
# Separable bilinear resize (align_corners=False, PyTorch semantics), NHWC.
# Pass 1: W axis as a batched matmul (channels stay on lanes).
# Pass 2: H axis as a plain 2-D matmul per batch (free reshape in between).
# ----------------------------------------------------------------------------
def _interp_matrix(n_out, n_in):
    m = np.zeros((n_out, n_in), dtype=np.float32)
    scale = n_in / n_out
    for o in range(n_out):
        src = max((o + 0.5) * scale - 0.5, 0.0)
        i0 = min(int(np.floor(src)), n_in - 1)
        i1 = min(i0 + 1, n_in - 1)
        w1 = src - i0
        m[o, i0] += 1.0 - w1
        m[o, i1] += w1
    return m


def _resize_w_kernel(bm_ref, x_ref, o_ref):
    x = x_ref[0].astype(jnp.float32)                         # (H, Win, tc)
    bm = bm_ref[...]                                         # (Wout, Win) f32
    bmb = jnp.broadcast_to(bm, (x.shape[0],) + bm.shape)     # (H, Wout, Win)
    t = jnp.einsum('hqw,hwc->hqc', bmb, x,
                   preferred_element_type=jnp.float32)
    o_ref[0] = t.astype(o_ref.dtype)


def _resize_h_kernel(a_ref, x_ref, o_ref):
    x = x_ref[0].astype(jnp.float32)                         # (Hin, tcol)
    y = jnp.dot(a_ref[...], x, preferred_element_type=jnp.float32)
    o_ref[0] = y.astype(o_ref.dtype)


def bilinear_resize_nhwc(x, out_h, out_w):
    """F.interpolate(..., mode='bilinear', align_corners=False) on NHWC."""
    B, H, W, C = x.shape
    if (out_h, out_w) == (H, W):
        return x
    A = jnp.asarray(_interp_matrix(out_h, H))    # (out_h, H)
    Bm = jnp.asarray(_interp_matrix(out_w, W))   # (out_w, W)

    tc = _pick_tile(C, 256, 128)
    t = pl.pallas_call(
        _resize_w_kernel,
        out_shape=jax.ShapeDtypeStruct((B, H, out_w, C), x.dtype),
        grid=(B, C // tc),
        in_specs=[pl.BlockSpec((out_w, W), lambda b, c: (0, 0)),
                  pl.BlockSpec((1, H, W, tc), lambda b, c: (b, 0, 0, c))],
        out_specs=pl.BlockSpec((1, H, out_w, tc), lambda b, c: (b, 0, 0, c)),
        compiler_params=pltpu.CompilerParams(
            dimension_semantics=("parallel", "parallel")),
    )(Bm, x)

    t2 = t.reshape(B, H, out_w * C)              # free reshape (lane dim grows)
    tcol = _pick_tile(out_w * C, 2048, 128)
    y = pl.pallas_call(
        _resize_h_kernel,
        out_shape=jax.ShapeDtypeStruct((B, out_h, out_w * C), x.dtype),
        grid=(B, (out_w * C) // tcol),
        in_specs=[pl.BlockSpec((out_h, H), lambda b, c: (0, 0)),
                  pl.BlockSpec((1, H, tcol), lambda b, c: (b, 0, c))],
        out_specs=pl.BlockSpec((1, out_h, tcol), lambda b, c: (b, 0, c)),
        compiler_params=pltpu.CompilerParams(
            dimension_semantics=("parallel", "parallel")),
    )(A, t2)
    return y.reshape(B, out_h, out_w, C)


# ----------------------------------------------------------------------------
# Synthetic backbone / classifier parameters (deterministic init).
# Narrow channel dims (32 proj, 8 classes) are zero-padded to 128 lanes so all
# kernel stores are lane-dense; numerics of the real channels are unchanged.
# ----------------------------------------------------------------------------
def init_params(key):
    ks = jax.random.split(key, 4)

    def he(k_, shape, fan_in):
        return jax.random.normal(k_, shape, jnp.float32) * np.sqrt(2.0 / fan_in)

    bb1_w = he(ks[0], (3, 3, 3, 256), 3 * 9)          # backbone stage 1 (get1)
    bb2_w = he(ks[1], (3, 3, 256, 256), 256 * 9)      # backbone stage 2 (get4)
    proj_w = he(ks[2], (256, 32), 256)                # low-level 1x1 projection
    cls_w = he(ks[3], (256 + 32, NUM_CLASSES), 288)   # head 1x1: 288 -> classes

    return {
        "bb1_w": bb1_w, "bb1_b": jnp.zeros((256,), jnp.float32),
        "bb2_w": bb2_w, "bb2_b": jnp.zeros((256,), jnp.float32),
        "proj_w": jnp.pad(proj_w, ((0, 0), (0, LANE - 32))),
        "proj_b": jnp.zeros((LANE,), jnp.float32),
        # concat is eliminated: split the 288-row head weight into the two halves
        "cls_w1": jnp.pad(cls_w[:256], ((0, 0), (0, LANE - NUM_CLASSES))),
        "cls_w2": jnp.pad(cls_w[256:], ((0, LANE - 32), (0, LANE - NUM_CLASSES))),
        "cls_b": jnp.zeros((LANE,), jnp.float32),
    }


# ----------------------------------------------------------------------------
# _Segmentation.forward (transfer=False, mix=False path)
# ----------------------------------------------------------------------------
def segmentation_forward(params, x_nchw, transfer=False):
    # TODO(synk): the `transfer`/`mix` AdaIN branch (F.unfold patch statistics,
    # host-side random.choice over a Python dict of saved target mu/std) is
    # data-dependent host control flow with no clean Pallas equivalent; only
    # the default transfer=False path is implemented.
    del transfer

    input_shape = x_nchw.shape[-2:]
    # Module boundary is NCHW (PyTorch); all internal compute is channels-last.
    x = jnp.transpose(x_nchw, (0, 2, 3, 1)).astype(COMPUTE_DTYPE)

    # features['low_level'] = backbone(x, ..., get1=True)
    low_level = conv3x3_s2(x, params["bb1_w"], params["bb1_b"], relu=True)

    # features['out'] = backbone(low_level, trunc1=True, ..., get4=True)
    out = conv3x3_s2(low_level, params["bb2_w"], params["bb2_b"], relu=True)

    # x = classifier(features)  (DeepLabV3+-style light head, concat-free)
    B, Hl, Wl, C = low_level.shape
    low_proj = matmul_bias_act(low_level.reshape(B * Hl * Wl, C),
                               params["proj_w"].astype(COMPUTE_DTYPE),
                               params["proj_b"], relu=True)           # (M, 128)
    out_up = bilinear_resize_nhwc(out, Hl, Wl)                        # (B,Hl,Wl,256)
    logits = dual_matmul_bias(out_up.reshape(B * Hl * Wl, -1), low_proj,
                              params["cls_w1"].astype(COMPUTE_DTYPE),
                              params["cls_w2"].astype(COMPUTE_DTYPE),
                              params["cls_b"])                        # (M, 128)
    logits = logits.reshape(B, Hl, Wl, LANE)

    # output = F.interpolate(x, size=input_shape, bilinear, align_corners=False)
    out_full = bilinear_resize_nhwc(logits, input_shape[0], input_shape[1])

    # Slice the lane-padding away and convert back to NCHW only at the boundary.
    output = jnp.transpose(out_full[..., :NUM_CLASSES].astype(jnp.float32),
                           (0, 3, 1, 2))
    features = {
        "low_level": jnp.transpose(low_level.astype(jnp.float32), (0, 3, 1, 2)),
        "out": jnp.transpose(out.astype(jnp.float32), (0, 3, 1, 2)),
    }
    return output, features


if __name__ == "__main__":
    key = jax.random.PRNGKey(0)
    kx, kp = jax.random.split(key)
    x = jax.random.normal(kx, (2, 3, 32, 32), jnp.float32)   # NCHW, like PyTorch
    params = init_params(kp)

    fwd = jax.jit(segmentation_forward)
    output, features = fwd(params, x)
    jax.block_until_ready(output)

    assert output.shape == (2, NUM_CLASSES, 32, 32)
    assert features["low_level"].shape == (2, 256, 16, 16)
    assert features["out"].shape == (2, 256, 8, 8)
    assert bool(jnp.isfinite(output).all())
    print("KERNEL_OK")
</pallas_src>

<mosaic_0001>
module attributes {stable_mosaic.version = 11 : i64} {
  func.func @_conv3x3_s2_kernel(%arg0: i32, %arg1: i32, %arg2: memref<1x4x17x17x3xbf16, #tpu.memory_space<vmem>>, %arg3: memref<3x3x3x128xbf16, #tpu.memory_space<vmem>>, %arg4: memref<1x128xf32, #tpu.memory_space<vmem>>, %arg5: memref<1x16x16x128xbf16, #tpu.memory_space<vmem>>) attributes {dimension_semantics = [#tpu.dimension_semantics<parallel>, #tpu.dimension_semantics<parallel>], iteration_bounds = array<i64: 2, 2>, scalar_prefetch = 0 : i64, scratch_operands = 0 : i64, tpu.core_type = #tpu.core_type<tc>, window_params = [{transform_indices = @transform_0, window_bounds = array<i64: 1, 4, 17, 17, 3>}, {transform_indices = @transform_1, window_bounds = array<i64: 3, 3, 3, 128>}, {transform_indices = @transform_2, window_bounds = array<i64: 1, 128>}, {transform_indices = @transform_3, window_bounds = array<i64: 1, 16, 16, 128>}]} {
    %cst = arith.constant 0.000000e+00 : f32
    %0 = vector.broadcast %cst : f32 to vector<256x128xf32>
    %c0 = arith.constant 0 : index
    %c0_0 = arith.constant 0 : index
    %c0_1 = arith.constant 0 : index
    %c0_2 = arith.constant 0 : index
    %c0_3 = arith.constant 0 : index
    %1 = vector.load %arg2[%c0, %c0_0, %c0_1, %c0_2, %c0_3] : memref<1x4x17x17x3xbf16, #tpu.memory_space<vmem>>, vector<1x1x16x16x3xbf16>
    %2 = vector.shape_cast %1 : vector<1x1x16x16x3xbf16> to vector<16x16x3xbf16>
    %3 = vector.shape_cast %2 : vector<16x16x3xbf16> to vector<256x3xbf16>
    %c0_4 = arith.constant 0 : index
    %c0_5 = arith.constant 0 : index
    %c0_6 = arith.constant 0 : index
    %c0_7 = arith.constant 0 : index
    %4 = vector.load %arg3[%c0_4, %c0_5, %c0_6, %c0_7] : memref<3x3x3x128xbf16, #tpu.memory_space<vmem>>, vector<1x1x3x128xbf16>
    %5 = vector.shape_cast %4 : vector<1x1x3x128xbf16> to vector<3x128xbf16>
    %cst_8 = arith.constant dense<0.000000e+00> : vector<256x128xf32>
    %6 = tpu.matmul %3, %5, %cst_8 {dimension_numbers = #tpu.dot_dimension_numbers<[1], [0], [0], [1], [0, 0, 1, 1], [], []>} : vector<256x3xbf16>, vector<3x128xbf16>, vector<256x128xf32> -> vector<256x128xf32>
    %7 = arith.addf %0, %6 : vector<256x128xf32>
    %c0_9 = arith.constant 0 : index
    %c1 = arith.constant 1 : index
    %c0_10 = arith.constant 0 : index
    %c0_11 = arith.constant 0 : index
    %c0_12 = arith.constant 0 : index
    %8 = vector.load %arg2[%c0_9, %c1, %c0_10, %c0_11, %c0_12] : memref<1x4x17x17x3xbf16, #tpu.memory_space<vmem>>, vector<1x1x16x16x3xbf16>
    %9 = vector.shape_cast %8 : vector<1x1x16x16x3xbf16> to vector<16x16x3xbf16>
    %10 = vector.shape_cast %9 : vector<16x16x3xbf16> to vector<256x3xbf16>
    %c0_13 = arith.constant 0 : index
    %c1_14 = arith.constant 1 : index
    %c0_15 = arith.constant 0 : index
    %c0_16 = arith.constant 0 : index
    %11 = vector.load %arg3[%c0_13, %c1_14, %c0_15, %c0_16] : memref<3x3x3x128xbf16, #tpu.memory_space<vmem>>, vector<1x1x3x128xbf16>
    %12 = vector.shape_cast %11 : vector<1x1x3x128xbf16> to vector<3x128xbf16>
    %cst_17 = arith.constant dense<0.000000e+00> : vector<256x128xf32>
    %13 = tpu.matmul %10, %12, %cst_17 {dimension_numbers = #tpu.dot_dimension_numbers<[1], [0], [0], [1], [0, 0, 1, 1], [], []>} : vector<256x3xbf16>, vector<3x128xbf16>, vector<256x128xf32> -> vector<256x128xf32>
    %14 = arith.addf %7, %13 : vector<256x128xf32>
    %c0_18 = arith.constant 0 : index
    %c0_19 = arith.constant 0 : index
    %c0_20 = arith.constant 0 : index
    %c1_21 = arith.constant 1 : index
    %c0_22 = arith.constant 0 : index
    %15 = vector.load %arg2[%c0_18, %c0_19, %c0_20, %c1_21, %c0_22] : memref<1x4x17x17x3xbf16, #tpu.memory_space<vmem>>, vector<1x1x16x16x3xbf16>
    %16 = vector.shape_cast %15 : vector<1x1x16x16x3xbf16> to vector<16x16x3xbf16>
    %17 = vector.shape_cast %16 : vector<16x16x3xbf16> to vector<256x3xbf16>
    %c0_23 = arith.constant 0 : index
    %c2 = arith.constant 2 : index
    %c0_24 = arith.constant 0 : index
    %c0_25 = arith.constant 0 : index
    %18 = vector.load %arg3[%c0_23, %c2, %c0_24, %c0_25] : memref<3x3x3x128xbf16, #tpu.memory_space<vmem>>, vector<1x1x3x128xbf16>
    %19 = vector.shape_cast %18 : vector<1x1x3x128xbf16> to vector<3x128xbf16>
    %cst_26 = arith.constant dense<0.000000e+00> : vector<256x128xf32>
    %20 = tpu.matmul %17, %19, %cst_26 {dimension_numbers = #tpu.dot_dimension_numbers<[1], [0], [0], [1], [0, 0, 1, 1], [], []>} : vector<256x3xbf16>, vector<3x128xbf16>, vector<256x128xf32> -> vector<256x128xf32>
    %21 = arith.addf %14, %20 : vector<256x128xf32>
    %c0_27 = arith.constant 0 : index
    %c2_28 = arith.constant 2 : index
    %c0_29 = arith.constant 0 : index
    %c0_30 = arith.constant 0 : index
    %c0_31 = arith.constant 0 : index
    %22 = vector.load %arg2[%c0_27, %c2_28, %c0_29, %c0_30, %c0_31] : memref<1x4x17x17x3xbf16, #tpu.memory_space<vmem>>, vector<1x1x16x16x3xbf16>
    %23 = vector.shape_cast %22 : vector<1x1x16x16x3xbf16> to vector<16x16x3xbf16>
    %24 = vector.shape_cast %23 : vector<16x16x3xbf16> to vector<256x3xbf16>
    %c1_32 = arith.constant 1 : index
    %c0_33 = arith.constant 0 : index
    %c0_34 = arith.constant 0 : index
    %c0_35 = arith.constant 0 : index
    %25 = vector.load %arg3[%c1_32, %c0_33, %c0_34, %c0_35] : memref<3x3x3x128xbf16, #tpu.memory_space<vmem>>, vector<1x1x3x128xbf16>
    %26 = vector.shape_cast %25 : vector<1x1x3x128xbf16> to vector<3x128xbf16>
    %cst_36 = arith.constant dense<0.000000e+00> : vector<256x128xf32>
    %27 = tpu.matmul %24, %26, %cst_36 {dimension_numbers = #tpu.dot_dimension_numbers<[1], [0], [0], [1], [0, 0, 1, 1], [], []>} : vector<256x3xbf16>, vector<3x128xbf16>, vector<256x128xf32> -> vector<256x128xf32>
    %28 = arith.addf %21, %27 : vector<256x128xf32>
    %c0_37 = arith.constant 0 : index
    %c3 = arith.constant 3 : index
    %c0_38 = arith.constant 0 : index
    %c0_39 = arith.constant 0 : index
    %c0_40 = arith.constant 0 : index
    %29 = vector.load %arg2[%c0_37, %c3, %c0_38, %c0_39, %c0_40] : memref<1x4x17x17x3xbf16, #tpu.memory_space<vmem>>, vector<1x1x16x16x3xbf16>
    %30 = vector.shape_cast %29 : vector<1x1x16x16x3xbf16> to vector<16x16x3xbf16>
    %31 = vector.shape_cast %30 : vector<16x16x3xbf16> to vector<256x3xbf16>
    %c1_41 = arith.constant 1 : index
    %c1_42 = arith.constant 1 : index
    %c0_43 = arith.constant 0 : index
    %c0_44 = arith.constant 0 : index
    %32 = vector.load %arg3[%c1_41, %c1_42, %c0_43, %c0_44] : memref<3x3x3x128xbf16, #tpu.memory_space<vmem>>, vector<1x1x3x128xbf16>
    %33 = vector.shape_cast %32 : vector<1x1x3x128xbf16> to vector<3x128xbf16>
    %cst_45 = arith.constant dense<0.000000e+00> : vector<256x128xf32>
    %34 = tpu.matmul %31, %33, %cst_45 {dimension_numbers = #tpu.dot_dimension_numbers<[1], [0], [0], [1], [0, 0, 1, 1], [], []>} : vector<256x3xbf16>, vector<3x128xbf16>, vector<256x128xf32> -> vector<256x128xf32>
    %35 = arith.addf %28, %34 : vector<256x128xf32>
    %c0_46 = arith.constant 0 : index
    %c2_47 = arith.constant 2 : index
    %c0_48 = arith.constant 0 : index
    %c1_49 = arith.constant 1 : index
    %c0_50 = arith.constant 0 : index
    %36 = vector.load %arg2[%c0_46, %c2_47, %c0_48, %c1_49, %c0_50] : memref<1x4x17x17x3xbf16, #tpu.memory_space<vmem>>, vector<1x1x16x16x3xbf16>
    %37 = vector.shape_cast %36 : vector<1x1x16x16x3xbf16> to vector<16x16x3xbf16>
    %38 = vector.shape_cast %37 : vector<16x16x3xbf16> to vector<256x3xbf16>
    %c1_51 = arith.constant 1 : index
    %c2_52 = arith.constant 2 : index
    %c0_53 = arith.constant 0 : index
    %c0_54 = arith.constant 0 : index
    %39 = vector.load %arg3[%c1_51, %c2_52, %c0_53, %c0_54] : memref<3x3x3x128xbf16, #tpu.memory_space<vmem>>, vector<1x1x3x128xbf16>
    %40 = vector.shape_cast %39 : vector<1x1x3x128xbf16> to vector<3x128xbf16>
    %cst_55 = arith.constant dense<0.000000e+00> : vector<256x128xf32>
    %41 = tpu.matmul %38, %40, %cst_55 {dimension_numbers = #tpu.dot_dimension_numbers<[1], [0], [0], [1], [0, 0, 1, 1], [], []>} : vector<256x3xbf16>, vector<3x128xbf16>, vector<256x128xf32> -> vector<256x128xf32>
    %42 = arith.addf %35, %41 : vector<256x128xf32>
    %c0_56 = arith.constant 0 : index
    %c0_57 = arith.constant 0 : index
    %c1_58 = arith.constant 1 : index
    %c0_59 = arith.constant 0 : index
    %c0_60 = arith.constant 0 : index
    %43 = vector.load %arg2[%c0_56, %c0_57, %c1_58, %c0_59, %c0_60] : memref<1x4x17x17x3xbf16, #tpu.memory_space<vmem>>, vector<1x1x16x16x3xbf16>
    %44 = vector.shape_cast %43 : vector<1x1x16x16x3xbf16> to vector<16x16x3xbf16>
    %45 = vector.shape_cast %44 : vector<16x16x3xbf16> to vector<256x3xbf16>
    %c2_61 = arith.constant 2 : index
    %c0_62 = arith.constant 0 : index
    %c0_63 = arith.constant 0 : index
    %c0_64 = arith.constant 0 : index
    %46 = vector.load %arg3[%c2_61, %c0_62, %c0_63, %c0_64] : memref<3x3x3x128xbf16, #tpu.memory_space<vmem>>, vector<1x1x3x128xbf16>
    %47 = vector.shape_cast %46 : vector<1x1x3x128xbf16> to vector<3x128xbf16>
    %cst_65 = arith.constant dense<0.000000e+00> : vector<256x128xf32>
    %48 = tpu.matmul %45, %47, %cst_65 {dimension_numbers = #tpu.dot_dimension_numbers<[1], [0], [0], [1], [0, 0, 1, 1], [], []>} : vector<256x3xbf16>, vector<3x128xbf16>, vector<256x128xf32> -> vector<256x128xf32>
    %49 = arith.addf %42, %48 : vector<256x128xf32>
    %c0_66 = arith.constant 0 : index
    %c1_67 = arith.constant 1 : index
    %c1_68 = arith.constant 1 : index
    %c0_69 = arith.constant 0 : index
    %c0_70 = arith.constant 0 : index
    %50 = vector.load %arg2[%c0_66, %c1_67, %c1_68, %c0_69, %c0_70] : memref<1x4x17x17x3xbf16, #tpu.memory_space<vmem>>, vector<1x1x16x16x3xbf16>
    %51 = vector.shape_cast %50 : vector<1x1x16x16x3xbf16> to vector<16x16x3xbf16>
    %52 = vector.shape_cast %51 : vector<16x16x3xbf16> to vector<256x3xbf16>
    %c2_71 = arith.constant 2 : index
    %c1_72 = arith.constant 1 : index
    %c0_73 = arith.constant 0 : index
    %c0_74 = arith.constant 0 : index
    %53 = vector.load %arg3[%c2_71, %c1_72, %c0_73, %c0_74] : memref<3x3x3x128xbf16, #tpu.memory_space<vmem>>, vector<1x1x3x128xbf16>
    %54 = vector.shape_cast %53 : vector<1x1x3x128xbf16> to vector<3x128xbf16>
    %cst_75 = arith.constant dense<0.000000e+00> : vector<256x128xf32>
    %55 = tpu.matmul %52, %54, %cst_75 {dimension_numbers = #tpu.dot_dimension_numbers<[1], [0], [0], [1], [0, 0, 1, 1], [], []>} : vector<256x3xbf16>, vector<3x128xbf16>, vector<256x128xf32> -> vector<256x128xf32>
    %56 = arith.addf %49, %55 : vector<256x128xf32>
    %c0_76 = arith.constant 0 : index
    %c0_77 = arith.constant 0 : index
    %c1_78 = arith.constant 1 : index
    %c1_79 = arith.constant 1 : index
    %c0_80 = arith.constant 0 : index
    %57 = vector.load %arg2[%c0_76, %c0_77, %c1_78, %c1_79, %c0_80] : memref<1x4x17x17x3xbf16, #tpu.memory_space<vmem>>, vector<1x1x16x16x3xbf16>
    %58 = vector.shape_cast %57 : vector<1x1x16x16x3xbf16> to vector<16x16x3xbf16>
    %59 = vector.shape_cast %58 : vector<16x16x3xbf16> to vector<256x3xbf16>
    %c2_81 = arith.constant 2 : index
    %c2_82 = arith.constant 2 : index
    %c0_83 = arith.constant 0 : index
    %c0_84 = arith.constant 0 : index
    %60 = vector.load %arg3[%c2_81, %c2_82, %c0_83, %c0_84] : memref<3x3x3x128xbf16, #tpu.memory_space<vmem>>, vector<1x1x3x128xbf16>
    %61 = vector.shape_cast %60 : vector<1x1x3x128xbf16> to vector<3x128xbf16>
    %cst_85 = arith.constant dense<0.000000e+00> : vector<256x128xf32>
    %62 = tpu.matmul %59, %61, %cst_85 {dimension_numbers = #tpu.dot_dimension_numbers<[1], [0], [0], [1], [0, 0, 1, 1], [], []>} : vector<256x3xbf16>, vector<3x128xbf16>, vector<256x128xf32> -> vector<256x128xf32>
    %63 = arith.addf %56, %62 : vector<256x128xf32>
    %c0_86 = arith.constant 0 : index
    %c0_87 = arith.constant 0 : index
    %64 = vector.load %arg4[%c0_86, %c0_87] : memref<1x128xf32, #tpu.memory_space<vmem>>, vector<1x128xf32>
    %65 = vector.broadcast %64 : vector<1x128xf32> to vector<256x128xf32>
    %66 = arith.addf %63, %65 : vector<256x128xf32>
    %cst_88 = arith.constant 0.000000e+00 : f32
    %67 = vector.broadcast %cst_88 : f32 to vector<256x128xf32>
    %68 = arith.maximumf %66, %67 : vector<256x128xf32>
    %69 = vector.shape_cast %68 : vector<256x128xf32> to vector<16x16x128xf32>
    %70 = arith.truncf %69 : vector<16x16x128xf32> to vector<16x16x128xbf16>
    %c0_89 = arith.constant 0 : index
    %c0_90 = arith.constant 0 : index
    %c0_91 = arith.constant 0 : index
    %c0_92 = arith.constant 0 : index
    %71 = vector.load %arg5[%c0_89, %c0_90, %c0_91, %c0_92] : memref<1x16x16x128xbf16, #tpu.memory_space<vmem>>, vector<1x16x16x128xbf16>
    %72 = vector.shape_cast %71 : vector<1x16x16x128xbf16> to vector<16x16x128xbf16>
    %73 = vector.shape_cast %70 : vector<16x16x128xbf16> to vector<1x16x16x128xbf16>
    tpu.vector_store %arg5[%c0_89, %c0_90, %c0_91, %c0_92], %73 {strides = array<i32>} : memref<1x16x16x128xbf16, #tpu.memory_space<vmem>>, vector<1x16x16x128xbf16>,
    return
  }
  func.func @transform_0(%arg0: i32, %arg1: i32) -> (i32, i32, i32, i32, i32) {
    %c0_i32 = arith.constant 0 : i32
    %c0_i32_0 = arith.constant 0 : i32
    %c0_i32_1 = arith.constant 0 : i32
    %c0_i32_2 = arith.constant 0 : i32
    %c0_i32_3 = arith.constant 0 : i32
    return %arg0, %c0_i32, %c0_i32_0, %c0_i32_1, %c0_i32_2 : i32, i32, i32, i32, i32
  }
  func.func @transform_1(%arg0: i32, %arg1: i32) -> (i32, i32, i32, i32) {
    %c0_i32 = arith.constant 0 : i32
    %c0_i32_0 = arith.constant 0 : i32
    %c0_i32_1 = arith.constant 0 : i32
    %c0_i32_2 = arith.constant 0 : i32
    return %c0_i32, %c0_i32_0, %c0_i32_1, %arg1 : i32, i32, i32, i32
  }
  func.func @transform_2(%arg0: i32, %arg1: i32) -> (i32, i32) {
    %c0_i32 = arith.constant 0 : i32
    %c0_i32_0 = arith.constant 0 : i32
    return %c0_i32, %arg1 : i32, i32
  }
  func.func @transform_3(%arg0: i32, %arg1: i32) -> (i32, i32, i32, i32) {
    %c0_i32 = arith.constant 0 : i32
    %c0_i32_0 = arith.constant 0 : i32
    %c0_i32_1 = arith.constant 0 : i32
    return %arg0, %c0_i32, %c0_i32_0, %arg1 : i32, i32, i32, i32
  }
}

module attributes {stable_mosaic.version = 11 : i64} {
  func.func @_resize_w_kernel(%arg0: i32, %arg1: i32, %arg2: memref<16x8xf32, #tpu.memory_space<vmem>>, %arg3: memref<1x8x8x256xbf16, #tpu.memory_space<vmem>>, %arg4: memref<1x8x16x256xbf16, #tpu.memory_space<vmem>>) attributes {dimension_semantics = [#tpu.dimension_semantics<parallel>, #tpu.dimension_semantics<parallel>], iteration_bounds = array<i64: 2, 1>, scalar_prefetch = 0 : i64, scratch_operands = 0 : i64, tpu.core_type = #tpu.core_type<tc>, window_params = [{pipeline_mode = #tpu.pipeline_mode<synchronous>, transform_indices = @transform_0, window_bounds = array<i64: 16, 8>}, {transform_indices = @transform_1, window_bounds = array<i64: 1, 8, 8, 256>}, {transform_indices = @transform_2, window_bounds = array<i64: 1, 8, 16, 256>}]} {
    %c0 = arith.constant 0 : index
    %c0_0 = arith.constant 0 : index
    %c0_1 = arith.constant 0 : index
    %c0_2 = arith.constant 0 : index
    %0 = vector.load %arg3[%c0, %c0_0, %c0_1, %c0_2] : memref<1x8x8x256xbf16, #tpu.memory_space<vmem>>, vector<1x8x8x256xbf16>
    %1 = vector.shape_cast %0 : vector<1x8x8x256xbf16> to vector<8x8x256xbf16>
    %2 = arith.extf %1 : vector<8x8x256xbf16> to vector<8x8x256xf32>
    %c0_3 = arith.constant 0 : index
    %c0_4 = arith.constant 0 : index
    %3 = vector.load %arg2[%c0_3, %c0_4] : memref<16x8xf32, #tpu.memory_space<vmem>>, vector<16x8xf32>
    %4 = vector.shape_cast %3 : vector<16x8xf32> to vector<1x16x8xf32>
    %5 = vector.broadcast %4 : vector<1x16x8xf32> to vector<8x16x8xf32>
    "tpu.trace_start"() <{level = 10 : i32, message = "hqw,hwc->hqc"}> : () -> ()
    %cst = arith.constant dense<0.000000e+00> : vector<8x16x256xf32>
    %6 = tpu.matmul %5, %2, %cst {dimension_numbers = #tpu.dot_dimension_numbers<[2], [1], [1], [2], [0, 0, 0, 1, 1, 2], [0], [0]>} : vector<8x16x8xf32>, vector<8x8x256xf32>, vector<8x16x256xf32> -> vector<8x16x256xf32>
    "tpu.trace_stop"() : () -> ()
    %7 = arith.truncf %6 : vector<8x16x256xf32> to vector<8x16x256xbf16>
    %c0_5 = arith.constant 0 : index
    %c0_6 = arith.constant 0 : index
    %c0_7 = arith.constant 0 : index
    %c0_8 = arith.constant 0 : index
    %8 = vector.load %arg4[%c0_5, %c0_6, %c0_7, %c0_8] : memref<1x8x16x256xbf16, #tpu.memory_space<vmem>>, vector<1x8x16x256xbf16>
    %9 = vector.shape_cast %8 : vector<1x8x16x256xbf16> to vector<8x16x256xbf16>
    %10 = vector.shape_cast %7 : vector<8x16x256xbf16> to vector<1x8x16x256xbf16>
    tpu.vector_store %arg4[%c0_5, %c0_6, %c0_7, %c0_8], %10 {strides = array<i32>} : memref<1x8x16x256xbf16, #tpu.memory_space<vmem>>, vector<1x8x16x256xbf16>,
    return
  }
  func.func @transform_0(%arg0: i32, %arg1: i32) -> (i32, i32) {
    %c0_i32 = arith.constant 0 : i32
    %c0_i32_0 = arith.constant 0 : i32
    %c0_i32_1 = arith.constant 0 : i32
    return %c0_i32, %c0_i32_0 : i32, i32
  }
  func.func @transform_1(%arg0: i32, %arg1: i32) -> (i32, i32, i32, i32) {
    %c0_i32 = arith.constant 0 : i32
    %c0_i32_0 = arith.constant 0 : i32
    %c0_i32_1 = arith.constant 0 : i32
    return %arg0, %c0_i32, %c0_i32_0, %arg1 : i32, i32, i32, i32
  }
  func.func @transform_2(%arg0: i32, %arg1: i32) -> (i32, i32, i32, i32) {
    %c0_i32 = arith.constant 0 : i32
    %c0_i32_0 = arith.constant 0 : i32
    %c0_i32_1 = arith.constant 0 : i32
    return %arg0, %c0_i32, %c0_i32_0, %arg1 : i32, i32, i32, i32
  }
}

module attributes {stable_mosaic.version = 11 : i64} {
  func.func @_conv3x3_s2_kernel(%arg0: i32, %arg1: i32, %arg2: memref<1x4x9x9x256xbf16, #tpu.memory_space<vmem>>, %arg3: memref<3x3x256x128xbf16, #tpu.memory_space<vmem>>, %arg4: memref<1x128xf32, #tpu.memory_space<vmem>>, %arg5: memref<1x8x8x128xbf16, #tpu.memory_space<vmem>>) attributes {dimension_semantics = [#tpu.dimension_semantics<parallel>, #tpu.dimension_semantics<parallel>], iteration_bounds = array<i64: 2, 2>, scalar_prefetch = 0 : i64, scratch_operands = 0 : i64, tpu.core_type = #tpu.core_type<tc>, window_params = [{transform_indices = @transform_0, window_bounds = array<i64: 1, 4, 9, 9, 256>}, {transform_indices = @transform_1, window_bounds = array<i64: 3, 3, 256, 128>}, {transform_indices = @transform_2, window_bounds = array<i64: 1, 128>}, {transform_indices = @transform_3, window_bounds = array<i64: 1, 8, 8, 128>}]} {
    %cst = arith.constant 0.000000e+00 : f32
    %0 = vector.broadcast %cst : f32 to vector<64x128xf32>
    %c0 = arith.constant 0 : index
    %c0_0 = arith.constant 0 : index
    %c0_1 = arith.constant 0 : index
    %c0_2 = arith.constant 0 : index
    %c0_3 = arith.constant 0 : index
    %1 = vector.load %arg2[%c0, %c0_0, %c0_1, %c0_2, %c0_3] : memref<1x4x9x9x256xbf16, #tpu.memory_space<vmem>>, vector<1x1x8x8x256xbf16>
    %2 = vector.shape_cast %1 : vector<1x1x8x8x256xbf16> to vector<8x8x256xbf16>
    %3 = vector.shape_cast %2 : vector<8x8x256xbf16> to vector<64x256xbf16>
    %c0_4 = arith.constant 0 : index
    %c0_5 = arith.constant 0 : index
    %c0_6 = arith.constant 0 : index
    %c0_7 = arith.constant 0 : index
    %4 = vector.load %arg3[%c0_4, %c0_5, %c0_6, %c0_7] : memref<3x3x256x128xbf16, #tpu.memory_space<vmem>>, vector<1x1x256x128xbf16>
    %5 = vector.shape_cast %4 : vector<1x1x256x128xbf16> to vector<256x128xbf16>
    %cst_8 = arith.constant dense<0.000000e+00> : vector<64x128xf32>
    %6 = tpu.matmul %3, %5, %cst_8 {dimension_numbers = #tpu.dot_dimension_numbers<[1], [0], [0], [1], [0, 0, 1, 1], [], []>} : vector<64x256xbf16>, vector<256x128xbf16>, vector<64x128xf32> -> vector<64x128xf32>
    %7 = arith.addf %0, %6 : vector<64x128xf32>
    %c0_9 = arith.constant 0 : index
    %c1 = arith.constant 1 : index
    %c0_10 = arith.constant 0 : index
    %c0_11 = arith.constant 0 : index
    %c0_12 = arith.constant 0 : index
    %8 = vector.load %arg2[%c0_9, %c1, %c0_10, %c0_11, %c0_12] : memref<1x4x9x9x256xbf16, #tpu.memory_space<vmem>>, vector<1x1x8x8x256xbf16>
    %9 = vector.shape_cast %8 : vector<1x1x8x8x256xbf16> to vector<8x8x256xbf16>
    %10 = vector.shape_cast %9 : vector<8x8x256xbf16> to vector<64x256xbf16>
    %c0_13 = arith.constant 0 : index
    %c1_14 = arith.constant 1 : index
    %c0_15 = arith.constant 0 : index
    %c0_16 = arith.constant 0 : index
    %11 = vector.load %arg3[%c0_13, %c1_14, %c0_15, %c0_16] : memref<3x3x256x128xbf16, #tpu.memory_space<vmem>>, vector<1x1x256x128xbf16>
    %12 = vector.shape_cast %11 : vector<1x1x256x128xbf16> to vector<256x128xbf16>
    %cst_17 = arith.constant dense<0.000000e+00> : vector<64x128xf32>
    %13 = tpu.matmul %10, %12, %cst_17 {dimension_numbers = #tpu.dot_dimension_numbers<[1], [0], [0], [1], [0, 0, 1, 1], [], []>} : vector<64x256xbf16>, vector<256x128xbf16>, vector<64x128xf32> -> vector<64x128xf32>
    %14 = arith.addf %7, %13 : vector<64x128xf32>
    %c0_18 = arith.constant 0 : index
    %c0_19 = arith.constant 0 : index
    %c0_20 = arith.constant 0 : index
    %c1_21 = arith.constant 1 : index
    %c0_22 = arith.constant 0 : index
    %15 = vector.load %arg2[%c0_18, %c0_19, %c0_20, %c1_21, %c0_22] : memref<1x4x9x9x256xbf16, #tpu.memory_space<vmem>>, vector<1x1x8x8x256xbf16>
    %16 = vector.shape_cast %15 : vector<1x1x8x8x256xbf16> to vector<8x8x256xbf16>
    %17 = vector.shape_cast %16 : vector<8x8x256xbf16> to vector<64x256xbf16>
    %c0_23 = arith.constant 0 : index
    %c2 = arith.constant 2 : index
    %c0_24 = arith.constant 0 : index
    %c0_25 = arith.constant 0 : index
    %18 = vector.load %arg3[%c0_23, %c2, %c0_24, %c0_25] : memref<3x3x256x128xbf16, #tpu.memory_space<vmem>>, vector<1x1x256x128xbf16>
    %19 = vector.shape_cast %18 : vector<1x1x256x128xbf16> to vector<256x128xbf16>
    %cst_26 = arith.constant dense<0.000000e+00> : vector<64x128xf32>
    %20 = tpu.matmul %17, %19, %cst_26 {dimension_numbers = #tpu.dot_dimension_numbers<[1], [0], [0], [1], [0, 0, 1, 1], [], []>} : vector<64x256xbf16>, vector<256x128xbf16>, vector<64x128xf32> -> vector<64x128xf32>
    %21 = arith.addf %14, %20 : vector<64x128xf32>
    %c0_27 = arith.constant 0 : index
    %c2_28 = arith.constant 2 : index
    %c0_29 = arith.constant 0 : index
    %c0_30 = arith.constant 0 : index
    %c0_31 = arith.constant 0 : index
    %22 = vector.load %arg2[%c0_27, %c2_28, %c0_29, %c0_30, %c0_31] : memref<1x4x9x9x256xbf16, #tpu.memory_space<vmem>>, vector<1x1x8x8x256xbf16>
    %23 = vector.shape_cast %22 : vector<1x1x8x8x256xbf16> to vector<8x8x256xbf16>
    %24 = vector.shape_cast %23 : vector<8x8x256xbf16> to vector<64x256xbf16>
    %c1_32 = arith.constant 1 : index
    %c0_33 = arith.constant 0 : index
    %c0_34 = arith.constant 0 : index
    %c0_35 = arith.constant 0 : index
    %25 = vector.load %arg3[%c1_32, %c0_33, %c0_34, %c0_35] : memref<3x3x256x128xbf16, #tpu.memory_space<vmem>>, vector<1x1x256x128xbf16>
    %26 = vector.shape_cast %25 : vector<1x1x256x128xbf16> to vector<256x128xbf16>
    %cst_36 = arith.constant dense<0.000000e+00> : vector<64x128xf32>
    %27 = tpu.matmul %24, %26, %cst_36 {dimension_numbers = #tpu.dot_dimension_numbers<[1], [0], [0], [1], [0, 0, 1, 1], [], []>} : vector<64x256xbf16>, vector<256x128xbf16>, vector<64x128xf32> -> vector<64x128xf32>
    %28 = arith.addf %21, %27 : vector<64x128xf32>
    %c0_37 = arith.constant 0 : index
    %c3 = arith.constant 3 : index
    %c0_38 = arith.constant 0 : index
    %c0_39 = arith.constant 0 : index
    %c0_40 = arith.constant 0 : index
    %29 = vector.load %arg2[%c0_37, %c3, %c0_38, %c0_39, %c0_40] : memref<1x4x9x9x256xbf16, #tpu.memory_space<vmem>>, vector<1x1x8x8x256xbf16>
    %30 = vector.shape_cast %29 : vector<1x1x8x8x256xbf16> to vector<8x8x256xbf16>
    %31 = vector.shape_cast %30 : vector<8x8x256xbf16> to vector<64x256xbf16>
    %c1_41 = arith.constant 1 : index
    %c1_42 = arith.constant 1 : index
    %c0_43 = arith.constant 0 : index
    %c0_44 = arith.constant 0 : index
    %32 = vector.load %arg3[%c1_41, %c1_42, %c0_43, %c0_44] : memref<3x3x256x128xbf16, #tpu.memory_space<vmem>>, vector<1x1x256x128xbf16>
    %33 = vector.shape_cast %32 : vector<1x1x256x128xbf16> to vector<256x128xbf16>
    %cst_45 = arith.constant dense<0.000000e+00> : vector<64x128xf32>
    %34 = tpu.matmul %31, %33, %cst_45 {dimension_numbers = #tpu.dot_dimension_numbers<[1], [0], [0], [1], [0, 0, 1, 1], [], []>} : vector<64x256xbf16>, vector<256x128xbf16>, vector<64x128xf32> -> vector<64x128xf32>
    %35 = arith.addf %28, %34 : vector<64x128xf32>
    %c0_46 = arith.constant 0 : index
    %c2_47 = arith.constant 2 : index
    %c0_48 = arith.constant 0 : index
    %c1_49 = arith.constant 1 : index
    %c0_50 = arith.constant 0 : index
    %36 = vector.load %arg2[%c0_46, %c2_47, %c0_48, %c1_49, %c0_50] : memref<1x4x9x9x256xbf16, #tpu.memory_space<vmem>>, vector<1x1x8x8x256xbf16>
    %37 = vector.shape_cast %36 : vector<1x1x8x8x256xbf16> to vector<8x8x256xbf16>
    %38 = vector.shape_cast %37 : vector<8x8x256xbf16> to vector<64x256xbf16>
    %c1_51 = arith.constant 1 : index
    %c2_52 = arith.constant 2 : index
    %c0_53 = arith.constant 0 : index
    %c0_54 = arith.constant 0 : index
    %39 = vector.load %arg3[%c1_51, %c2_52, %c0_53, %c0_54] : memref<3x3x256x128xbf16, #tpu.memory_space<vmem>>, vector<1x1x256x128xbf16>
    %40 = vector.shape_cast %39 : vector<1x1x256x128xbf16> to vector<256x128xbf16>
    %cst_55 = arith.constant dense<0.000000e+00> : vector<64x128xf32>
    %41 = tpu.matmul %38, %40, %cst_55 {dimension_numbers = #tpu.dot_dimension_numbers<[1], [0], [0], [1], [0, 0, 1, 1], [], []>} : vector<64x256xbf16>, vector<256x128xbf16>, vector<64x128xf32> -> vector<64x128xf32>
    %42 = arith.addf %35, %41 : vector<64x128xf32>
    %c0_56 = arith.constant 0 : index
    %c0_57 = arith.constant 0 : index
    %c1_58 = arith.constant 1 : index
    %c0_59 = arith.constant 0 : index
    %c0_60 = arith.constant 0 : index
    %43 = vector.load %arg2[%c0_56, %c0_57, %c1_58, %c0_59, %c0_60] : memref<1x4x9x9x256xbf16, #tpu.memory_space<vmem>>, vector<1x1x8x8x256xbf16>
    %44 = vector.shape_cast %43 : vector<1x1x8x8x256xbf16> to vector<8x8x256xbf16>
    %45 = vector.shape_cast %44 : vector<8x8x256xbf16> to vector<64x256xbf16>
    %c2_61 = arith.constant 2 : index
    %c0_62 = arith.constant 0 : index
    %c0_63 = arith.constant 0 : index
    %c0_64 = arith.constant 0 : index
    %46 = vector.load %arg3[%c2_61, %c0_62, %c0_63, %c0_64] : memref<3x3x256x128xbf16, #tpu.memory_space<vmem>>, vector<1x1x256x128xbf16>
    %47 = vector.shape_cast %46 : vector<1x1x256x128xbf16> to vector<256x128xbf16>
    %cst_65 = arith.constant dense<0.000000e+00> : vector<64x128xf32>
    %48 = tpu.matmul %45, %47, %cst_65 {dimension_numbers = #tpu.dot_dimension_numbers<[1], [0], [0], [1], [0, 0, 1, 1], [], []>} : vector<64x256xbf16>, vector<256x128xbf16>, vector<64x128xf32> -> vector<64x128xf32>
    %49 = arith.addf %42, %48 : vector<64x128xf32>
    %c0_66 = arith.constant 0 : index
    %c1_67 = arith.constant 1 : index
    %c1_68 = arith.constant 1 : index
    %c0_69 = arith.constant 0 : index
    %c0_70 = arith.constant 0 : index
    %50 = vector.load %arg2[%c0_66, %c1_67, %c1_68, %c0_69, %c0_70] : memref<1x4x9x9x256xbf16, #tpu.memory_space<vmem>>, vector<1x1x8x8x256xbf16>
    %51 = vector.shape_cast %50 : vector<1x1x8x8x256xbf16> to vector<8x8x256xbf16>
    %52 = vector.shape_cast %51 : vector<8x8x256xbf16> to vector<64x256xbf16>
    %c2_71 = arith.constant 2 : index
    %c1_72 = arith.constant 1 : index
    %c0_73 = arith.constant 0 : index
    %c0_74 = arith.constant 0 : index
    %53 = vector.load %arg3[%c2_71, %c1_72, %c0_73, %c0_74] : memref<3x3x256x128xbf16, #tpu.memory_space<vmem>>, vector<1x1x256x128xbf16>
    %54 = vector.shape_cast %53 : vector<1x1x256x128xbf16> to vector<256x128xbf16>
    %cst_75 = arith.constant dense<0.000000e+00> : vector<64x128xf32>
    %55 = tpu.matmul %52, %54, %cst_75 {dimension_numbers = #tpu.dot_dimension_numbers<[1], [0], [0], [1], [0, 0, 1, 1], [], []>} : vector<64x256xbf16>, vector<256x128xbf16>, vector<64x128xf32> -> vector<64x128xf32>
    %56 = arith.addf %49, %55 : vector<64x128xf32>
    %c0_76 = arith.constant 0 : index
    %c0_77 = arith.constant 0 : index
    %c1_78 = arith.constant 1 : index
    %c1_79 = arith.constant 1 : index
    %c0_80 = arith.constant 0 : index
    %57 = vector.load %arg2[%c0_76, %c0_77, %c1_78, %c1_79, %c0_80] : memref<1x4x9x9x256xbf16, #tpu.memory_space<vmem>>, vector<1x1x8x8x256xbf16>
    %58 = vector.shape_cast %57 : vector<1x1x8x8x256xbf16> to vector<8x8x256xbf16>
    %59 = vector.shape_cast %58 : vector<8x8x256xbf16> to vector<64x256xbf16>
    %c2_81 = arith.constant 2 : index
    %c2_82 = arith.constant 2 : index
    %c0_83 = arith.constant 0 : index
    %c0_84 = arith.constant 0 : index
    %60 = vector.load %arg3[%c2_81, %c2_82, %c0_83, %c0_84] : memref<3x3x256x128xbf16, #tpu.memory_space<vmem>>, vector<1x1x256x128xbf16>
    %61 = vector.shape_cast %60 : vector<1x1x256x128xbf16> to vector<256x128xbf16>
    %cst_85 = arith.constant dense<0.000000e+00> : vector<64x128xf32>
    %62 = tpu.matmul %59, %61, %cst_85 {dimension_numbers = #tpu.dot_dimension_numbers<[1], [0], [0], [1], [0, 0, 1, 1], [], []>} : vector<64x256xbf16>, vector<256x128xbf16>, vector<64x128xf32> -> vector<64x128xf32>
    %63 = arith.addf %56, %62 : vector<64x128xf32>
    %c0_86 = arith.constant 0 : index
    %c0_87 = arith.constant 0 : index
    %64 = vector.load %arg4[%c0_86, %c0_87] : memref<1x128xf32, #tpu.memory_space<vmem>>, vector<1x128xf32>
    %65 = vector.broadcast %64 : vector<1x128xf32> to vector<64x128xf32>
    %66 = arith.addf %63, %65 : vector<64x128xf32>
    %cst_88 = arith.constant 0.000000e+00 : f32
    %67 = vector.broadcast %cst_88 : f32 to vector<64x128xf32>
    %68 = arith.maximumf %66, %67 : vector<64x128xf32>
    %69 = vector.shape_cast %68 : vector<64x128xf32> to vector<8x8x128xf32>
    %70 = arith.truncf %69 : vector<8x8x128xf32> to vector<8x8x128xbf16>
    %c0_89 = arith.constant 0 : index
    %c0_90 = arith.constant 0 : index
    %c0_91 = arith.constant 0 : index
    %c0_92 = arith.constant 0 : index
    %71 = vector.load %arg5[%c0_89, %c0_90, %c0_91, %c0_92] : memref<1x8x8x128xbf16, #tpu.memory_space<vmem>>, vector<1x8x8x128xbf16>
    %72 = vector.shape_cast %71 : vector<1x8x8x128xbf16> to vector<8x8x128xbf16>
    %73 = vector.shape_cast %70 : vector<8x8x128xbf16> to vector<1x8x8x128xbf16>
    tpu.vector_store %arg5[%c0_89, %c0_90, %c0_91, %c0_92], %73 {strides = array<i32>} : memref<1x8x8x128xbf16, #tpu.memory_space<vmem>>, vector<1x8x8x128xbf16>,
    return
  }
  func.func @transform_0(%arg0: i32, %arg1: i32) -> (i32, i32, i32, i32, i32) {
    %c0_i32 = arith.constant 0 : i32
    %c0_i32_0 = arith.constant 0 : i32
    %c0_i32_1 = arith.constant 0 : i32
    %c0_i32_2 = arith.constant 0 : i32
    %c0_i32_3 = arith.constant 0 : i32
    return %arg0, %c0_i32, %c0_i32_0, %c0_i32_1, %c0_i32_2 : i32, i32, i32, i32, i32
  }
  func.func @transform_1(%arg0: i32, %arg1: i32) -> (i32, i32, i32, i32) {
    %c0_i32 = arith.constant 0 : i32
    %c0_i32_0 = arith.constant 0 : i32
    %c0_i32_1 = arith.constant 0 : i32
    %c0_i32_2 = arith.constant 0 : i32
    return %c0_i32, %c0_i32_0, %c0_i32_1, %arg1 : i32, i32, i32, i32
  }
  func.func @transform_2(%arg0: i32, %arg1: i32) -> (i32, i32) {
    %c0_i32 = arith.constant 0 : i32
    %c0_i32_0 = arith.constant 0 : i32
    return %c0_i32, %arg1 : i32, i32
  }
  func.func @transform_3(%arg0: i32, %arg1: i32) -> (i32, i32, i32, i32) {
    %c0_i32 = arith.constant 0 : i32
    %c0_i32_0 = arith.constant 0 : i32
    %c0_i32_1 = arith.constant 0 : i32
    return %arg0, %c0_i32, %c0_i32_0, %arg1 : i32, i32, i32, i32
  }
}

module attributes {stable_mosaic.version = 11 : i64} {
  func.func @_resize_h_kernel(%arg0: i32, %arg1: i32, %arg2: memref<16x8xf32, #tpu.memory_space<vmem>>, %arg3: memref<1x8x2048xbf16, #tpu.memory_space<vmem>>, %arg4: memref<1x16x2048xbf16, #tpu.memory_space<vmem>>) attributes {dimension_semantics = [#tpu.dimension_semantics<parallel>, #tpu.dimension_semantics<parallel>], iteration_bounds = array<i64: 2, 2>, scalar_prefetch = 0 : i64, scratch_operands = 0 : i64, tpu.core_type = #tpu.core_type<tc>, window_params = [{pipeline_mode = #tpu.pipeline_mode<synchronous>, transform_indices = @transform_0, window_bounds = array<i64: 16, 8>}, {transform_indices = @transform_1, window_bounds = array<i64: 1, 8, 2048>}, {transform_indices = @transform_2, window_bounds = array<i64: 1, 16, 2048>}]} {
    %c0 = arith.constant 0 : index
    %c0_0 = arith.constant 0 : index
    %c0_1 = arith.constant 0 : index
    %0 = vector.load %arg3[%c0, %c0_0, %c0_1] : memref<1x8x2048xbf16, #tpu.memory_space<vmem>>, vector<1x8x2048xbf16>
    %1 = vector.shape_cast %0 : vector<1x8x2048xbf16> to vector<8x2048xbf16>
    %2 = arith.extf %1 : vector<8x2048xbf16> to vector<8x2048xf32>
    %c0_2 = arith.constant 0 : index
    %c0_3 = arith.constant 0 : index
    %3 = vector.load %arg2[%c0_2, %c0_3] : memref<16x8xf32, #tpu.memory_space<vmem>>, vector<16x8xf32>
    %cst = arith.constant dense<0.000000e+00> : vector<16x2048xf32>
    %4 = tpu.matmul %3, %2, %cst {dimension_numbers = #tpu.dot_dimension_numbers<[1], [0], [0], [1], [0, 0, 1, 1], [], []>} : vector<16x8xf32>, vector<8x2048xf32>, vector<16x2048xf32> -> vector<16x2048xf32>
    %5 = arith.truncf %4 : vector<16x2048xf32> to vector<16x2048xbf16>
    %c0_4 = arith.constant 0 : index
    %c0_5 = arith.constant 0 : index
    %c0_6 = arith.constant 0 : index
    %6 = vector.load %arg4[%c0_4, %c0_5, %c0_6] : memref<1x16x2048xbf16, #tpu.memory_space<vmem>>, vector<1x16x2048xbf16>
    %7 = vector.shape_cast %6 : vector<1x16x2048xbf16> to vector<16x2048xbf16>
    %8 = vector.shape_cast %5 : vector<16x2048xbf16> to vector<1x16x2048xbf16>
    tpu.vector_store %arg4[%c0_4, %c0_5, %c0_6], %8 {strides = array<i32>} : memref<1x16x2048xbf16, #tpu.memory_space<vmem>>, vector<1x16x2048xbf16>,
    return
  }
  func.func @transform_0(%arg0: i32, %arg1: i32) -> (i32, i32) {
    %c0_i32 = arith.constant 0 : i32
    %c0_i32_0 = arith.constant 0 : i32
    %c0_i32_1 = arith.constant 0 : i32
    return %c0_i32, %c0_i32_0 : i32, i32
  }
  func.func @transform_1(%arg0: i32, %arg1: i32) -> (i32, i32, i32) {
    %c0_i32 = arith.constant 0 : i32
    %c0_i32_0 = arith.constant 0 : i32
    return %arg0, %c0_i32, %arg1 : i32, i32, i32
  }
  func.func @transform_2(%arg0: i32, %arg1: i32) -> (i32, i32, i32) {
    %c0_i32 = arith.constant 0 : i32
    %c0_i32_0 = arith.constant 0 : i32
    return %arg0, %c0_i32, %arg1 : i32, i32, i32
  }
}

module attributes {stable_mosaic.version = 11 : i64} {
  func.func @_mm_bias_act_kernel(%arg0: i32, %arg1: i32, %arg2: i32, %arg3: memref<256x256xbf16, #tpu.memory_space<vmem>>, %arg4: memref<256x128xbf16, #tpu.memory_space<vmem>>, %arg5: memref<1x128xf32, #tpu.memory_space<vmem>>, %arg6: memref<256x128xbf16, #tpu.memory_space<vmem>>, %arg7: memref<256x128xf32, #tpu.memory_space<vmem>>) attributes {dimension_semantics = [#tpu.dimension_semantics<parallel>, #tpu.dimension_semantics<parallel>, #tpu.dimension_semantics<arbitrary>], iteration_bounds = array<i64: 2, 1, 1>, scalar_prefetch = 0 : i64, scratch_operands = 1 : i64, tpu.core_type = #tpu.core_type<tc>, window_params = [{transform_indices = @transform_0, window_bounds = array<i64: 256, 256>}, {transform_indices = @transform_1, window_bounds = array<i64: 256, 128>}, {transform_indices = @transform_2, window_bounds = array<i64: 1, 128>}, {transform_indices = @transform_3, window_bounds = array<i64: 256, 128>}]} {
    %c0_i32 = arith.constant 0 : i32
    %0 = arith.cmpi eq, %arg2, %c0_i32 : i32
    %1 = arith.extui %0 : i1 to i32
    %c0_i32_0 = arith.constant 0 : i32
    %2 = arith.cmpi ne, %1, %c0_i32_0 : i32
    scf.if %2 {
      %cst_10 = arith.constant 0.000000e+00 : f32
      %12 = vector.broadcast %cst_10 : f32 to vector<256x128xf32>
      %c0_11 = arith.constant 0 : index
      %c0_12 = arith.constant 0 : index
      %13 = vector.load %arg7[%c0_11, %c0_12] : memref<256x128xf32, #tpu.memory_space<vmem>>, vector<256x128xf32>
      tpu.vector_store %arg7[%c0_11, %c0_12], %12 {strides = array<i32>} : memref<256x128xf32, #tpu.memory_space<vmem>>, vector<256x128xf32>,
    } else {
    }
    %c0 = arith.constant 0 : index
    %c0_1 = arith.constant 0 : index
    %3 = vector.load %arg7[%c0, %c0_1] : memref<256x128xf32, #tpu.memory_space<vmem>>, vector<256x128xf32>
    %c0_2 = arith.constant 0 : index
    %c0_3 = arith.constant 0 : index
    %4 = vector.load %arg3[%c0_2, %c0_3] : memref<256x256xbf16, #tpu.memory_space<vmem>>, vector<256x256xbf16>
    %c0_4 = arith.constant 0 : index
    %c0_5 = arith.constant 0 : index
    %5 = vector.load %arg4[%c0_4, %c0_5] : memref<256x128xbf16, #tpu.memory_space<vmem>>, vector<256x128xbf16>
    %cst = arith.constant dense<0.000000e+00> : vector<256x128xf32>
    %6 = tpu.matmul %4, %5, %cst {dimension_numbers = #tpu.dot_dimension_numbers<[1], [0], [0], [1], [0, 0, 1, 1], [], []>} : vector<256x256xbf16>, vector<256x128xbf16>, vector<256x128xf32> -> vector<256x128xf32>
    %7 = arith.addf %3, %6 : vector<256x128xf32>
    %c0_6 = arith.constant 0 : index
    %c0_7 = arith.constant 0 : index
    %8 = vector.load %arg7[%c0_6, %c0_7] : memref<256x128xf32, #tpu.memory_space<vmem>>, vector<256x128xf32>
    tpu.vector_store %arg7[%c0_6, %c0_7], %7 {strides = array<i32>} : memref<256x128xf32, #tpu.memory_space<vmem>>, vector<256x128xf32>,
    %c0_i32_8 = arith.constant 0 : i32
    %9 = arith.cmpi eq, %arg2, %c0_i32_8 : i32
    %10 = arith.extui %9 : i1 to i32
    %c0_i32_9 = arith.constant 0 : i32
    %11 = arith.cmpi ne, %10, %c0_i32_9 : i32
    scf.if %11 {
      %c0_10 = arith.constant 0 : index
      %c0_11 = arith.constant 0 : index
      %12 = vector.load %arg7[%c0_10, %c0_11] : memref<256x128xf32, #tpu.memory_space<vmem>>, vector<256x128xf32>
      %c0_12 = arith.constant 0 : index
      %c0_13 = arith.constant 0 : index
      %13 = vector.load %arg5[%c0_12, %c0_13] : memref<1x128xf32, #tpu.memory_space<vmem>>, vector<1x128xf32>
      %14 = vector.broadcast %13 : vector<1x128xf32> to vector<256x128xf32>
      %15 = arith.addf %12, %14 : vector<256x128xf32>
      %cst_14 = arith.constant 0.000000e+00 : f32
      %16 = vector.broadcast %cst_14 : f32 to vector<256x128xf32>
      %17 = arith.maximumf %15, %16 : vector<256x128xf32>
      %18 = arith.truncf %17 : vector<256x128xf32> to vector<256x128xbf16>
      %c0_15 = arith.constant 0 : index
      %c0_16 = arith.constant 0 : index
      %19 = vector.load %arg6[%c0_15, %c0_16] : memref<256x128xbf16, #tpu.memory_space<vmem>>, vector<256x128xbf16>
      tpu.vector_store %arg6[%c0_15, %c0_16], %18 {strides = array<i32>} : memref<256x128xbf16, #tpu.memory_space<vmem>>, vector<256x128xbf16>,
    } else {
    }
    return
  }
  func.func @transform_0(%arg0: i32, %arg1: i32, %arg2: i32) -> (i32, i32) {
    %c0_i32 = arith.constant 0 : i32
    return %arg0, %arg2 : i32, i32
  }
  func.func @transform_1(%arg0: i32, %arg1: i32, %arg2: i32) -> (i32, i32) {
    %c0_i32 = arith.constant 0 : i32
    return %arg2, %arg1 : i32, i32
  }
  func.func @transform_2(%arg0: i32, %arg1: i32, %arg2: i32) -> (i32, i32) {
    %c0_i32 = arith.constant 0 : i32
    %c0_i32_0 = arith.constant 0 : i32
    return %c0_i32, %arg1 : i32, i32
  }
  func.func @transform_3(%arg0: i32, %arg1: i32, %arg2: i32) -> (i32, i32) {
    %c0_i32 = arith.constant 0 : i32
    return %arg0, %arg1 : i32, i32
  }
}

module attributes {stable_mosaic.version = 11 : i64} {
  func.func @_dual_mm_kernel(%arg0: i32, %arg1: i32, %arg2: memref<256x256xbf16, #tpu.memory_space<vmem>>, %arg3: memref<256x128xbf16, #tpu.memory_space<vmem>>, %arg4: memref<256x128xbf16, #tpu.memory_space<vmem>>, %arg5: memref<128x128xbf16, #tpu.memory_space<vmem>>, %arg6: memref<1x128xf32, #tpu.memory_space<vmem>>, %arg7: memref<256x128xbf16, #tpu.memory_space<vmem>>) attributes {dimension_semantics = [#tpu.dimension_semantics<parallel>, #tpu.dimension_semantics<parallel>], iteration_bounds = array<i64: 2, 1>, scalar_prefetch = 0 : i64, scratch_operands = 0 : i64, tpu.core_type = #tpu.core_type<tc>, window_params = [{transform_indices = @transform_0, window_bounds = array<i64: 256, 256>}, {transform_indices = @transform_1, window_bounds = array<i64: 256, 128>}, {transform_indices = @transform_2, window_bounds = array<i64: 256, 128>}, {transform_indices = @transform_3, window_bounds = array<i64: 128, 128>}, {transform_indices = @transform_4, window_bounds = array<i64: 1, 128>}, {transform_indices = @transform_5, window_bounds = array<i64: 256, 128>}]} {
    %c0 = arith.constant 0 : index
    %c0_0 = arith.constant 0 : index
    %0 = vector.load %arg2[%c0, %c0_0] : memref<256x256xbf16, #tpu.memory_space<vmem>>, vector<256x256xbf16>
    %c0_1 = arith.constant 0 : index
    %c0_2 = arith.constant 0 : index
    %1 = vector.load %arg4[%c0_1, %c0_2] : memref<256x128xbf16, #tpu.memory_space<vmem>>, vector<256x128xbf16>
    %cst = arith.constant dense<0.000000e+00> : vector<256x128xf32>
    %2 = tpu.matmul %0, %1, %cst {dimension_numbers = #tpu.dot_dimension_numbers<[1], [0], [0], [1], [0, 0, 1, 1], [], []>} : vector<256x256xbf16>, vector<256x128xbf16>, vector<256x128xf32> -> vector<256x128xf32>
    %c0_3 = arith.constant 0 : index
    %c0_4 = arith.constant 0 : index
    %3 = vector.load %arg3[%c0_3, %c0_4] : memref<256x128xbf16, #tpu.memory_space<vmem>>, vector<256x128xbf16>
    %c0_5 = arith.constant 0 : index
    %c0_6 = arith.constant 0 : index
    %4 = vector.load %arg5[%c0_5, %c0_6] : memref<128x128xbf16, #tpu.memory_space<vmem>>, vector<128x128xbf16>
    %cst_7 = arith.constant dense<0.000000e+00> : vector<256x128xf32>
    %5 = tpu.matmul %3, %4, %cst_7 {dimension_numbers = #tpu.dot_dimension_numbers<[1], [0], [0], [1], [0, 0, 1, 1], [], []>} : vector<256x128xbf16>, vector<128x128xbf16>, vector<256x128xf32> -> vector<256x128xf32>
    %6 = arith.addf %2, %5 : vector<256x128xf32>
    %c0_8 = arith.constant 0 : index
    %c0_9 = arith.constant 0 : index
    %7 = vector.load %arg6[%c0_8, %c0_9] : memref<1x128xf32, #tpu.memory_space<vmem>>, vector<1x128xf32>
    %8 = vector.broadcast %7 : vector<1x128xf32> to vector<256x128xf32>
    %9 = arith.addf %6, %8 : vector<256x128xf32>
    %10 = arith.truncf %9 : vector<256x128xf32> to vector<256x128xbf16>
    %c0_10 = arith.constant 0 : index
    %c0_11 = arith.constant 0 : index
    %11 = vector.load %arg7[%c0_10, %c0_11] : memref<256x128xbf16, #tpu.memory_space<vmem>>, vector<256x128xbf16>
    tpu.vector_store %arg7[%c0_10, %c0_11], %10 {strides = array<i32>} : memref<256x128xbf16, #tpu.memory_space<vmem>>, vector<256x128xbf16>,
    return
  }
  func.func @transform_0(%arg0: i32, %arg1: i32) -> (i32, i32) {
    %c0_i32 = arith.constant 0 : i32
    %c0_i32_0 = arith.constant 0 : i32
    return %arg0, %c0_i32 : i32, i32
  }
  func.func @transform_1(%arg0: i32, %arg1: i32) -> (i32, i32) {
    %c0_i32 = arith.constant 0 : i32
    %c0_i32_0 = arith.constant 0 : i32
    return %arg0, %c0_i32 : i32, i32
  }
  func.func @transform_2(%arg0: i32, %arg1: i32) -> (i32, i32) {
    %c0_i32 = arith.constant 0 : i32
    %c0_i32_0 = arith.constant 0 : i32
    return %c0_i32, %arg1 : i32, i32
  }
  func.func @transform_3(%arg0: i32, %arg1: i32) -> (i32, i32) {
    %c0_i32 = arith.constant 0 : i32
    %c0_i32_0 = arith.constant 0 : i32
    return %c0_i32, %arg1 : i32, i32
  }
  func.func @transform_4(%arg0: i32, %arg1: i32) -> (i32, i32) {
    %c0_i32 = arith.constant 0 : i32
    %c0_i32_0 = arith.constant 0 : i32
    return %c0_i32, %arg1 : i32, i32
  }
  func.func @transform_5(%arg0: i32, %arg1: i32) -> (i32, i32) {
    %c0_i32 = arith.constant 0 : i32
    return %arg0, %arg1 : i32, i32
  }
}

module attributes {stable_mosaic.version = 11 : i64} {
  func.func @_resize_w_kernel(%arg0: i32, %arg1: i32, %arg2: memref<32x16xf32, #tpu.memory_space<vmem>>, %arg3: memref<1x16x16x128xbf16, #tpu.memory_space<vmem>>, %arg4: memref<1x16x32x128xbf16, #tpu.memory_space<vmem>>) attributes {dimension_semantics = [#tpu.dimension_semantics<parallel>, #tpu.dimension_semantics<parallel>], iteration_bounds = array<i64: 2, 1>, scalar_prefetch = 0 : i64, scratch_operands = 0 : i64, tpu.core_type = #tpu.core_type<tc>, window_params = [{pipeline_mode = #tpu.pipeline_mode<synchronous>, transform_indices = @transform_0, window_bounds = array<i64: 32, 16>}, {transform_indices = @transform_1, window_bounds = array<i64: 1, 16, 16, 128>}, {transform_indices = @transform_2, window_bounds = array<i64: 1, 16, 32, 128>}]} {
    %c0 = arith.constant 0 : index
    %c0_0 = arith.constant 0 : index
    %c0_1 = arith.constant 0 : index
    %c0_2 = arith.constant 0 : index
    %0 = vector.load %arg3[%c0, %c0_0, %c0_1, %c0_2] : memref<1x16x16x128xbf16, #tpu.memory_space<vmem>>, vector<1x16x16x128xbf16>
    %1 = vector.shape_cast %0 : vector<1x16x16x128xbf16> to vector<16x16x128xbf16>
    %2 = arith.extf %1 : vector<16x16x128xbf16> to vector<16x16x128xf32>
    %c0_3 = arith.constant 0 : index
    %c0_4 = arith.constant 0 : index
    %3 = vector.load %arg2[%c0_3, %c0_4] : memref<32x16xf32, #tpu.memory_space<vmem>>, vector<32x16xf32>
    %4 = vector.shape_cast %3 : vector<32x16xf32> to vector<1x32x16xf32>
    %5 = vector.broadcast %4 : vector<1x32x16xf32> to vector<16x32x16xf32>
    "tpu.trace_start"() <{level = 10 : i32, message = "hqw,hwc->hqc"}> : () -> ()
    %cst = arith.constant dense<0.000000e+00> : vector<16x32x128xf32>
    %6 = tpu.matmul %5, %2, %cst {dimension_numbers = #tpu.dot_dimension_numbers<[2], [1], [1], [2], [0, 0, 0, 1, 1, 2], [0], [0]>} : vector<16x32x16xf32>, vector<16x16x128xf32>, vector<16x32x128xf32> -> vector<16x32x128xf32>
    "tpu.trace_stop"() : () -> ()
    %7 = arith.truncf %6 : vector<16x32x128xf32> to vector<16x32x128xbf16>
    %c0_5 = arith.constant 0 : index
    %c0_6 = arith.constant 0 : index
    %c0_7 = arith.constant 0 : index
    %c0_8 = arith.constant 0 : index
    %8 = vector.load %arg4[%c0_5, %c0_6, %c0_7, %c0_8] : memref<1x16x32x128xbf16, #tpu.memory_space<vmem>>, vector<1x16x32x128xbf16>
    %9 = vector.shape_cast %8 : vector<1x16x32x128xbf16> to vector<16x32x128xbf16>
    %10 = vector.shape_cast %7 : vector<16x32x128xbf16> to vector<1x16x32x128xbf16>
    tpu.vector_store %arg4[%c0_5, %c0_6, %c0_7, %c0_8], %10 {strides = array<i32>} : memref<1x16x32x128xbf16, #tpu.memory_space<vmem>>, vector<1x16x32x128xbf16>,
    return
  }
  func.func @transform_0(%arg0: i32, %arg1: i32) -> (i32, i32) {
    %c0_i32 = arith.constant 0 : i32
    %c0_i32_0 = arith.constant 0 : i32
    %c0_i32_1 = arith.constant 0 : i32
    return %c0_i32, %c0_i32_0 : i32, i32
  }
  func.func @transform_1(%arg0: i32, %arg1: i32) -> (i32, i32, i32, i32) {
    %c0_i32 = arith.constant 0 : i32
    %c0_i32_0 = arith.constant 0 : i32
    %c0_i32_1 = arith.constant 0 : i32
    return %arg0, %c0_i32, %c0_i32_0, %arg1 : i32, i32, i32, i32
  }
  func.func @transform_2(%arg0: i32, %arg1: i32) -> (i32, i32, i32, i32) {
    %c0_i32 = arith.constant 0 : i32
    %c0_i32_0 = arith.constant 0 : i32
    %c0_i32_1 = arith.constant 0 : i32
    return %arg0, %c0_i32, %c0_i32_0, %arg1 : i32, i32, i32, i32
  }
}

module attributes {stable_mosaic.version = 11 : i64} {
  func.func @_resize_h_kernel(%arg0: i32, %arg1: i32, %arg2: memref<32x16xf32, #tpu.memory_space<vmem>>, %arg3: memref<1x16x2048xbf16, #tpu.memory_space<vmem>>, %arg4: memref<1x32x2048xbf16, #tpu.memory_space<vmem>>) attributes {dimension_semantics = [#tpu.dimension_semantics<parallel>, #tpu.dimension_semantics<parallel>], iteration_bounds = array<i64: 2, 2>, scalar_prefetch = 0 : i64, scratch_operands = 0 : i64, tpu.core_type = #tpu.core_type<tc>, window_params = [{pipeline_mode = #tpu.pipeline_mode<synchronous>, transform_indices = @transform_0, window_bounds = array<i64: 32, 16>}, {transform_indices = @transform_1, window_bounds = array<i64: 1, 16, 2048>}, {transform_indices = @transform_2, window_bounds = array<i64: 1, 32, 2048>}]} {
    %c0 = arith.constant 0 : index
    %c0_0 = arith.constant 0 : index
    %c0_1 = arith.constant 0 : index
    %0 = vector.load %arg3[%c0, %c0_0, %c0_1] : memref<1x16x2048xbf16, #tpu.memory_space<vmem>>, vector<1x16x2048xbf16>
    %1 = vector.shape_cast %0 : vector<1x16x2048xbf16> to vector<16x2048xbf16>
    %2 = arith.extf %1 : vector<16x2048xbf16> to vector<16x2048xf32>
    %c0_2 = arith.constant 0 : index
    %c0_3 = arith.constant 0 : index
    %3 = vector.load %arg2[%c0_2, %c0_3] : memref<32x16xf32, #tpu.memory_space<vmem>>, vector<32x16xf32>
    %cst = arith.constant dense<0.000000e+00> : vector<32x2048xf32>
    %4 = tpu.matmul %3, %2, %cst {dimension_numbers = #tpu.dot_dimension_numbers<[1], [0], [0], [1], [0, 0, 1, 1], [], []>} : vector<32x16xf32>, vector<16x2048xf32>, vector<32x2048xf32> -> vector<32x2048xf32>
    %5 = arith.truncf %4 : vector<32x2048xf32> to vector<32x2048xbf16>
    %c0_4 = arith.constant 0 : index
    %c0_5 = arith.constant 0 : index
    %c0_6 = arith.constant 0 : index
    %6 = vector.load %arg4[%c0_4, %c0_5, %c0_6] : memref<1x32x2048xbf16, #tpu.memory_space<vmem>>, vector<1x32x2048xbf16>
    %7 = vector.shape_cast %6 : vector<1x32x2048xbf16> to vector<32x2048xbf16>
    %8 = vector.shape_cast %5 : vector<32x2048xbf16> to vector<1x32x2048xbf16>
    tpu.vector_store %arg4[%c0_4, %c0_5, %c0_6], %8 {strides = array<i32>} : memref<1x32x2048xbf16, #tpu.memory_space<vmem>>, vector<1x32x2048xbf16>,
    return
  }
  func.func @transform_0(%arg0: i32, %arg1: i32) -> (i32, i32) {
    %c0_i32 = arith.constant 0 : i32
    %c0_i32_0 = arith.constant 0 : i32
    %c0_i32_1 = arith.constant 0 : i32
    return %c0_i32, %c0_i32_0 : i32, i32
  }
  func.func @transform_1(%arg0: i32, %arg1: i32) -> (i32, i32, i32) {
    %c0_i32 = arith.constant 0 : i32
    %c0_i32_0 = arith.constant 0 : i32
    return %arg0, %c0_i32, %arg1 : i32, i32, i32
  }
  func.func @transform_2(%arg0: i32, %arg1: i32) -> (i32, i32, i32) {
    %c0_i32 = arith.constant 0 : i32
    %c0_i32_0 = arith.constant 0 : i32
    return %arg0, %c0_i32, %arg1 : i32, i32, i32
  }
}

</mosaic_0001>

<bundles_post_ra>
// kernel: segmentation_forward.8
= control target key start
LH: loop header
LB: loop body
LE: loop exit
PB: predicated region body
PF: predicated region fallthrough
CT: control target
= control target key end

     0   :  { %s6512_s12 = smov 0   ;;  %s6514_s13 = smov 0   ;;  %s8185_s0 = inlined_call_operand.vmem [shape: bf16[2,4,17,17,3], index: 0, kind: input, shape index: {}]   ;;  %s8186_s1 = inlined_call_operand.vmem [shape: bf16[3,3,3,256], index: 1, kind: input, shape index: {}]   ;;  %s8187_s2 = inlined_call_operand.vmem [shape: f32[1,256], index: 2, kind: input, shape index: {}]   ;;  %s8188_s3 = inlined_call_operand.vmem [shape: bf16[2,16,16,256], index: 3, kind: output, shape index: {}]  }
   0x1   :  { %s6516_s14 = smov 0   ;;  %s6518_s15 = smov 0  }
   0x2   :  { %s6520_s16 = smov 0   ;;  %s6522_s17 = smov 0  }
   0x3   :  { %s6524_s18 = smov 0   ;;  %s6526_s19 = smov 0  }
   0x4   :  { %s6528_s20 = smov 0  }
   0x5 LB: > { %s5061_s21 = sadd.s32 4294967295, %s6489_s20   ;;  %s22_s22 = sadd.s32 1, %s6481_s18  ;;  %s6489_s20 = sphi %s6528_s20, %s13_s20   ;;  %s6485_s19 = sphi %s6526_s19, %s8257_s19   ;;  %s6481_s18 = sphi %s6524_s18, %s8256_s18   ;;  %s6477_s17 = sphi %s6522_s17, %s8255_s17   ;;  %s6473_s16 = sphi %s6520_s16, %s8254_s16   ;;  %s6469_s15 = sphi %s6518_s15, %s8253_s15   ;;  %s6465_s14 = sphi %s6516_s14, %s8252_s14   ;;  %s6461_s13 = sphi %s6514_s13, %s8251_s13   ;;  %s6457_s12 = sphi %s6512_s12, %s8250_s12  }
   0x6   : > { %p23_p0 = scmp.ge.s32.totalorder %s22_s22, 2  ;;  %s25_s23 = sadd.s32 1, %s6485_s19 }
   0x7   : > { %s58_s24 = sadd.s32 1, %s6469_s15  ;;  %p65_p1 = scmp.ne.s32.totalorder %s6469_s15, %s6465_s14 }
   0x8   : > { %s8259_s22 = smov (%p23_p0, %s22_s22), 0  ;;  %s8261_s23 = smov (!%p23_p0, %s25_s23), %s6485_s19 }
   0x9   : > { %s55_s25 = ssub.s32 %s6481_s18, %s8259_s22  ;;  %p66_p2 = scmp.eq.s32.totalorder %s6489_s20, 0 }
   0xa   : > { %p27_p3 = scmp.ge.s32.totalorder %s8261_s23, 2  ;;  %p56_p4 = scmp.eq.s32.totalorder %s55_s25, 0 }
   0xb   : > { %p67_p5 = por %p66_p2, %p65_p1  ;;  %s112_s26 = sadd.s32 1, %s6461_s13 }
   0xc   : > { %s8263_s23 = smov (%p27_p3, %s8261_s23), 0  ;;  %p122_p6 = scmp.ne.s32.totalorder %s6461_s13, %s6457_s12 }
   0xd   : > { %s6573_s27 = scalar_select %p56_p4, %s6469_s15, %s58_s24  }
   0xe   : > { %s107_s28 = ssub.s32 %s6485_s19, %s8263_s23  ;;  %p123_p7 = scmp.eq.s32.totalorder %s5061_s21, 3 }
   0xf   : > { %s109_s29 = sor.u32 %s107_s28, %s55_s25  ;;  %p5064_p10 = scmp.ge.s32.totalorder %s6489_s20, 4 }
  0x10   : > { %p110_p8 = scmp.eq.s32.totalorder %s109_s29, 0  ;;  %p6579_p9 = por %p123_p7, %p122_p6 }
  0x11   : > { %145 = sbr.rel (%p5064_p10) target bundleno = 32 (0x20), region = 16 }
  0x12   : > { %s6584_s4 = scalar_select %p110_p8, %s6461_s13, %s112_s26  }
  0x16   : > { %156 = sbr.rel (!%p67_p5) target bundleno = 32 (0x20), region = 24  ;;  %s158_s5 = sand.u32 (%p67_p5), 1, %s6469_s15  }
  0x17   : > { %s5065_s6 = sshll.u32 (%p67_p5), %s6481_s18, 1  ;;  %s6247_s7 = smul.u32 (%p67_p5), 18, %s158_s5 }
  0x18   : > { %s162_s10 = scalar_lea.vmem (%p67_p5), %s8186_s1, %s5065_s6 }
  0x19   : > { %v179_v0 = vld [vmem:[%s162_s10] sm:$0x3] (%p67_p5)  ;;  %v181_v1 = vld [vmem:[%s162_s10 + $0x4] sm:$0x3] (%p67_p5)  ;;  %v183_v2 = vld [vmem:[%s162_s10 + $0x8] sm:$0x3] (%p67_p5) }
  0x1a   : > { %v185_v3 = vld [vmem:[%s162_s10 + $0xc] sm:$0x3] (%p67_p5)  ;;  %v187_v4 = vld [vmem:[%s162_s10 + $0x10] sm:$0x3] (%p67_p5)  ;;  %s160_s11 = scalar_lea.vmem (%p67_p5), [#allocation2], %s6247_s7 }
  0x1b   : > { %180 = vst [vmem:[%s160_s11] sm:$0x3] %v179_v0  ;;  %182 = vst [vmem:[%s160_s11 + $0x2] sm:$0x3] %v181_v1  ;;  %v189_v5 = vld [vmem:[%s162_s10 + $0x14] sm:$0x3] }
  0x1c   : > { %184 = vst [vmem:[%s160_s11 + $0x4] sm:$0x3] %v183_v2  ;;  %186 = vst [vmem:[%s160_s11 + $0x6] sm:$0x3] %v185_v3  ;;  %v191_v6 = vld [vmem:[%s162_s10 + $0x18] sm:$0x3] }
  0x1d   : > { %188 = vst [vmem:[%s160_s11 + $0x8] sm:$0x3] %v187_v4  ;;  %v193_v7 = vld [vmem:[%s162_s10 + $0x1c] sm:$0x3]  ;;  %190 = vst [vmem:[%s160_s11 + $0xa] sm:$0x3] %v189_v5 }
  0x1e   : > { %192 = vst [vmem:[%s160_s11 + $0xc] sm:$0x3] %v191_v6  ;;  %194 = vst [vmem:[%s160_s11 + $0xe] sm:$0x3] %v193_v7  ;;  %v195_v8 = vld [vmem:[%s162_s10 + $0x20] sm:$0x3] }
  0x1f   : > { %196 = vst [vmem:[%s160_s11 + $0x10] sm:$0x3] %v195_v8 }
  0x20 PF: > { %p5066_p11 = scmp.ge.s32.totalorder %s6489_s20, 1  ;;  %p243_p12 = scmp.lt.s32.totalorder %s6489_s20, 5 }
  0x22   : > { %p244_p13 = pnand %p5066_p11, %p243_p12 }
  0x24   : > { %247 = sbr.rel (%p244_p13) target bundleno = 550 (0x226), region = 69 }
  0x29   : > { %s250_s21 = sand.u32 1, %s6465_s14   ;;  %vm486_vm0 = vcmask 1040384   ;;  %vm487_vm1 = vcmask 1041408   ;;  %p280_p0 = scmp.lt.s32.totalorder %s6477_s17, 1  ;;  %v6491_v9 = vmov 65535   ;;  %vm437_vm2 = vcmask 23552  }
  0x2a   : > { %s6248_s24 = smul.u32 18, %s250_s21  ;;  %v488_v10 = vsel %vm486_vm0, 4294967295, %v6491_v9  ;;  %vm994_vm3 = vsmask.f32 3328  ;;  %vm995_vm4 = vsmask.f32 7440 }
  0x2b   : > { %v6596_v11 = vsel %vm487_vm1, %v488_v10, 0  ;;  %s281_s25 = scalar_select %p280_p0, %s6477_s17, 1  ;;  %vm6664_vm5 = vmor %vm994_vm3, %vm995_vm4 }
  0x2c   : > { %s6599_s26 = scalar_lea.vmem [#allocation2], %s6248_s24  ;;  %p285_p1 = scmp.lt.s32.totalorder %s6473_s16, 1 }
  0x2d   : > { %v5101_v12 = vld [vmem:[%s6599_s26 + $0x2] sm:$0x3]  ;;  %s6249_s28 = smul.u32 816, %s281_s25  ;;  %v321_v13 = vld [vmem:[%s6599_s26] sm:$0x3]  ;;  %s277_s10 = sand.u32 1, %s6457_s12  }
  0x2e   : > { %v491_v14 = vand.u32 %v5101_v12, %v6596_v11  ;;  %v783_v15 = vand.u32 %v6596_v11, %v321_v13  ;;  %v5166_v16 = vld [vmem:[%s6599_s26 + $0x4] sm:$0x3]  ;;  %v5231_v18 = vld [vmem:[%s6599_s26 + $0x6] sm:$0x3]  ;;  %v5296_v19 = vld [vmem:[%s6599_s26 + $0x8] sm:$0x3] }
  0x2f   : > { %s6609_s5 = scalar_lea.vmem %s8185_s0, %s6249_s28  ;;  %v1480_v17 = vand.u32 %v5166_v16, %v6596_v11  ;;  %v6621_v24 = vand.u32 %v5231_v18, %v6596_v11  ;;  %v6626_v26 = vand.u32 %v5296_v19, %v6596_v11  ;;  %v5377_v33 = vld [vmem:[%s6599_s26 + $0xa] sm:$0x3]  ;;  %v5442_v44 = vld [vmem:[%s6599_s26 + $0xc] sm:$0x3]  ;;  %s5067_s11 = sshll.u32 %s277_s10, 7 }
  0x30   : > { %5939 = vmatprep.subr.bf16.mxu0 %v491_v14  ;;  %6245 = vmatprep.subr.bf16.mxu1 %v491_v14  ;;  %v6323_v20 = vld [vmem:[%s6609_s5 + $0xcc] sm:$0xff]   ;;  %v6325_v22 = vld [vmem:[%s6609_s5 + $0xd8] sm:$0xff]   ;;  %v6327_v25 = vld [vmem:[%s6609_s5 + $0xe4] sm:$0xff]   ;;  %v6653_v47 = vand.u32 %v5377_v33, %v6596_v11  ;;  %v6670_v4 = vand.u32 %v5442_v44, %v6596_v11  ;;  %s286_s6 = scalar_select %p285_p1, %s6473_s16, 1 }
  0x31   : > { %5940 = vmatpush3.bf16.msra.mxu0 %v491_v14  ;;  %6246 = vmatpush3.bf16.msra.mxu1 %v491_v14  ;;  %v6324_v21 = vld [vmem:[%s6609_s5 + $0x12c] sm:$0xff]   ;;  %v6326_v23 = vld [vmem:[%s6609_s5 + $0x138] sm:$0xff]   ;;  %v6328_v27 = vld [vmem:[%s6609_s5 + $0x144] sm:$0xff]   ;;  %s7993_s12 = scalar_lea.vmem [#allocation3], %s5067_s11  ;;  %s5655_s21 = sshll.u32 (%p6579_p9), %s6477_s17, 6 }
  0x32   : > { %5941 = vmatprep.mubr.msk.bf16.mxu0 %vm437_vm2, %v6323_v20  ;;  %5973 = vmatprep.subr.bf16.mxu1 %v783_v15  ;;  %v6329_v28 = vld [vmem:[%s6609_s5 + $0xf0] sm:$0xff]   ;;  %v6331_v30 = vld [vmem:[%s6609_s5 + $0xfc] sm:$0xff]   ;;  %v6333_v32 = vld [vmem:[%s6609_s5 + $0x108] sm:$0xff]   ;;  %s287_s9 = scalar_lea.vmem %s8187_s2, %s286_s6  ;;  %s4802_s24 = sadd.s32 (%p6579_p9), %s6473_s16, %s5655_s21 }
  0x33   : > { %5957 = vmatprep.mubr.msk.bf16.mxu1 %vm437_vm2, %v6324_v21  ;;  %6007 = vmatprep.subr.bf16.mxu0 %v1480_v17  ;;  %v6330_v29 = vld [vmem:[%s6609_s5 + $0x150] sm:$0xff]   ;;  %v6332_v31 = vld [vmem:[%s6609_s5 + $0x15c] sm:$0xff]   ;;  %v6334_v34 = vld [vmem:[%s6609_s5 + $0x168] sm:$0xff]   ;;  %s5656_s30 = sshll.u32 (%p6579_p9), %s4802_s24, 2 }
  0x34   : > { %5942 = vmatmul.mubr.msk.bf16.vlgmr.msra.gmra.mxu0 %vm437_vm2, %v6325_v22  ;;  %5958 = vmatmul.mubr.msk.bf16.vlgmr.msra.gmra.mxu1 %vm437_vm2, %v6326_v23  ;;  %v6335_v35 = vld [vmem:[%s6609_s5 + $0x114] sm:$0xff]   ;;  %v946_v37 = vld [vmem:[%s6609_s5] sm:$0xf]  ;;  %v947_v38 = vld [vmem:[%s6609_s5 + $0x4] sm:$0xf]  ;;  %s8099_s28 = scalar_lea.vmem (%p6579_p9), %s8188_s3, %s5656_s30 }
  0x35   : > { %6008 = vmatpush3.bf16.msra.mxu0 %v1480_v17  ;;  %5974 = vmatpush3.bf16.msra.mxu1 %v783_v15  ;;  %v6336_v36 = vld [vmem:[%s6609_s5 + $0x174] sm:$0xff]   ;;  %v948_v39 = vld [vmem:[%s6609_s5 + $0x8] sm:$0x1]  ;;  %v998_v40 = vshrl.u32 %v946_v37, 16  ;;  %v1001_v41 = vshll.u32 %v946_v37, 16  ;;  %v1007_v42 = vshll.u32 %v947_v38, 16 }
  0x36   : > { %5945 = vmatprep.mubr.msk.bf16.mxu0 %vm437_vm2, %v6327_v25  ;;  %5961 = vmatprep.mubr.msk.bf16.mxu1 %vm437_vm2, %v6328_v27  ;;  %v1011_v43 = vshrl.u32 %v947_v38, 16  ;;  %v1017_v45 = vshll.u32 %v948_v39, 16  ;;  %v949_v46 = vld [vmem:[%s6609_s5 + $0xc] sm:$0xf]  ;;  %v950_v52 = vld [vmem:[%s6609_s5 + $0x10] sm:$0xf] }
  0x37   : > { %6041 = vmatprep.subr.bf16.mxu1 %v6621_v24  ;;  %6075 = vmatprep.subr.bf16.mxu0 %v6626_v26  ;;  %v1000_v48 = vrot.slane %v998_v40, 4  ;;  %v1003_v49 = vrot.slane %v1001_v41, 5  ;;  %v1009_v50 = vrot.slane %v1007_v42, 5  ;;  %v951_v54 = vld [vmem:[%s6609_s5 + $0x14] sm:$0x1]  ;;  %v1022_v55 = vshrl.u32 %v949_v46, 16 }
  0x38   : > { %v1013_v51 = vrot.slane %v1011_v43, 4  ;;  %v1019_v53 = vrot.slane %v1017_v45, 5  ;;  %v1025_v56 = vshll.u32 %v949_v46, 16  ;;  %v1031_v57 = vshll.u32 %v950_v52, 16  ;;  %v6337_v62 = vld [vmem:[%s6609_s5 + $0x120] sm:$0xff]   ;;  %v6340_v44 = vld [vmem:[%s6609_s5 + $0xc] sm:$0xff]  }
  0x39   : > { %v1004_v58 = vor.u32 %v1003_v49, %v1000_v48  ;;  %v1035_v60 = vshrl.u32 %v950_v52, 16  ;;  %v1041_v61 = vshll.u32 %v951_v54, 16  ;;  %v1024_v0 = vrot.slane %v1022_v55, 4  ;;  %v952_v3 = vld [vmem:[%s6609_s5 + $0x18] sm:$0xf]  ;;  %v6338_v10 = vld [vmem:[%s6609_s5 + $0x180] sm:$0xff]  }
  0x3a   : > { %v1014_v59 = vor.u32 %v1013_v51, %v1009_v50  ;;  %v1027_v1 = vrot.slane %v1025_v56, 5  ;;  %v1033_v2 = vrot.slane %v1031_v57, 5  ;;  %v953_v9 = vld [vmem:[%s6609_s5 + $0x1c] sm:$0xf]  ;;  %v954_v13 = vld [vmem:[%s6609_s5 + $0x20] sm:$0x1] }
  0x3b   : > { %v1005_v5 = vrot.slane %v1004_v58, 4  ;;  %v1037_v7 = vrot.slane %v1035_v60, 4  ;;  %v1043_v8 = vrot.slane %v1041_v61, 5  ;;  %v1046_v14 = vshrl.u32 %v952_v3, 16  ;;  %v6339_v17 = vld [vmem:[%s6609_s5] sm:$0xff]   ;;  %v6341_v60 = vld [vmem:[%s6609_s5 + $0x18] sm:$0xff]  }
  0x3c   : > { %5946 = vmatmul.mubr.msk.bf16.gmra.mxu0 %vm437_vm2, %v6329_v28  ;;  %5962 = vmatmul.mubr.msk.bf16.gmra.mxu1 %vm437_vm2, %v6330_v29  ;;  %v1015_v6 = vrot.slane %v1014_v59, 4  ;;  %v1028_v12 = vor.u32 %v1027_v1, %v1024_v0  ;;  %v1049_v15 = vshll.u32 %v952_v3, 16  ;;  %v1055_v16 = vshll.u32 %v953_v9, 16  ;;  %v955_v28 = vld [vmem:[%s6609_s5 + $0x24] sm:$0xf] }
  0x3d   : > { %5949 = vmatprep.mubr.msk.bf16.mxu0 %vm437_vm2, %v6331_v30  ;;  %5965 = vmatprep.mubr.msk.bf16.mxu1 %vm437_vm2, %v6332_v31  ;;  %v1010_v18 = vsel %vm6664_vm5, %v1005_v5, %v1009_v50  ;;  %v1038_v20 = vor.u32 %v1037_v7, %v1033_v2  ;;  %v1059_v21 = vshrl.u32 %v953_v9, 16  ;;  %v1048_v25 = vrot.slane %v1046_v14, 4  ;;  %v956_v33 = vld [vmem:[%s6609_s5 + $0x28] sm:$0xf]  ;;  %v958_v43 = vld [vmem:[%s6609_s5 + $0x30] sm:$0xf] }
  0x3e   : > { %v1020_v19 = vsel %vm6664_vm5, %v1015_v6, %v1019_v53  ;;  %v1029_v23 = vrot.slane %v1028_v12, 4  ;;  %v1051_v27 = vrot.slane %v1049_v15, 5  ;;  %v1057_v30 = vrot.slane %v1055_v16, 5  ;;  %v959_v50 = vld [vmem:[%s6609_s5 + $0x34] sm:$0xf] }
  0x3f   : > { %v5167_v22 = vcombine.low %v1010_v18, %v1020_v19  ;;  %v1039_v29 = vrot.slane %v1038_v20, 4  ;;  %v1061_v31 = vrot.slane %v1059_v21, 4  ;;  %v1070_v37 = vshrl.u32 %v955_v28, 16  ;;  %v960_v55 = vld [vmem:[%s6609_s5 + $0x38] sm:$0x1] }
  0x40   : > { %v1073_v38 = vshll.u32 %v955_v28, 16  ;;  %v1079_v42 = vshll.u32 %v956_v33, 16  ;;  %v1083_v53 = vshrl.u32 %v956_v33, 16  ;;  %v1094_v58 = vshrl.u32 %v958_v43, 16  ;;  %v963_v14 = vld [vmem:[%s6609_s5 + $0x44] sm:$0x1] }
  0x41   : > { %v1044_v39 = vsel %vm6664_vm5, %v1039_v29, %v1043_v8  ;;  %v1062_v40 = vor.u32 %v1061_v31, %v1057_v30  ;;  %v1072_v48 = vrot.slane %v1070_v37, 4  ;;  %v1097_v59 = vshll.u32 %v958_v43, 16  ;;  %v962_v8 = vld [vmem:[%s6609_s5 + $0x40] sm:$0xf]  ;;  %v964_v29 = vld [vmem:[%s6609_s5 + $0x48] sm:$0xf] }
  0x42   : > { %v1075_v49 = vrot.slane %v1073_v38, 5  ;;  %v1081_v52 = vrot.slane %v1079_v42, 5  ;;  %v1103_v1 = vshll.u32 %v959_v50, 16  ;;  %v1096_v6 = vrot.slane %v1094_v58, 4  ;;  %v965_v33 = vld [vmem:[%s6609_s5 + $0x4c] sm:$0xf] }
  0x43   : > { %v1063_v51 = vrot.slane %v1062_v40, 4  ;;  %v1099_v7 = vrot.slane %v1097_v59, 5  ;;  %v1107_v12 = vshrl.u32 %v959_v50, 16  ;;  %v1131_v28 = vshrl.u32 %v962_v8, 16  ;;  %v968_v50 = vld [vmem:[%s6609_s5 + $0x58] sm:$0xf] }
  0x44   : > { %5950 = vmatmul.mubr.msk.bf16.gmra.mxu0 %vm437_vm2, %v6333_v32  ;;  %5966 = vmatmul.mubr.msk.bf16.gmra.mxu1 %vm437_vm2, %v6334_v34  ;;  %v1065_v32 = vshll.u32 %v954_v13, 16  ;;  %v1034_v34 = vsel %vm6664_vm5, %v1029_v23, %v1033_v2  ;;  %v1076_v57 = vor.u32 %v1075_v49, %v1072_v48  ;;  %v961_v2 = vld [vmem:[%s6609_s5 + $0x3c] sm:$0xf]  ;;  %v1113_v13 = vshll.u32 %v960_v55, 16 }
  0x45   : > { %5953 = vmatprep.mubr.msk.bf16.mxu0 %vm437_vm2, %v6335_v35  ;;  %5969 = vmatprep.mubr.msk.bf16.mxu1 %vm437_vm2, %v6336_v36  ;;  %v1052_v35 = vor.u32 %v1051_v27, %v1048_v25  ;;  %v957_v36 = vld [vmem:[%s6609_s5 + $0x2c] sm:$0x1]  ;;  %v5168_v45 = vcombine.low %v1034_v34, %v1044_v39  ;;  %v1100_v16 = vor.u32 %v1099_v7, %v1096_v6  ;;  %v1121_v18 = vshll.u32 %v961_v2, 16  ;;  %v966_v39 = vld [vmem:[%s6609_s5 + $0x50] sm:$0x1] }
  0x46   : > { %v1067_v41 = vrot.slane %v1065_v32, 5  ;;  %v1089_v54 = vshll.u32 %v957_v36, 16  ;;  %v1077_v5 = vrot.slane %v1076_v57, 4  ;;  %v1109_v20 = vrot.slane %v1107_v12, 4  ;;  %v969_v59 = vld [vmem:[%s6609_s5 + $0x5c] sm:$0x1] }
  0x47   : > { %v1053_v46 = vrot.slane %v1052_v35, 4  ;;  %v1115_v21 = vrot.slane %v1113_v13, 5  ;;  %v1101_v23 = vrot.slane %v1100_v16, 4  ;;  %v1123_v27 = vrot.slane %v1121_v18, 5  ;;  %v6343_v35 = vld [vmem:[%s6609_s5 + $0x30] sm:$0xff]  }
  0x48   : > { %v1068_v61 = vsel %vm6664_vm5, %v1063_v51, %v1067_v41  ;;  %v1091_v0 = vrot.slane %v1089_v54, 5  ;;  %v1082_v15 = vsel %vm6664_vm5, %v1077_v5, %v1081_v52  ;;  %v1137_v32 = vshll.u32 %v963_v14, 16  ;;  %v972_v18 = vld [vmem:[%s6609_s5 + $0x68] sm:$0x1] }
  0x49   : > { %v1058_v56 = vsel %vm6664_vm5, %v1053_v46, %v1057_v30  ;;  %v1133_v38 = vrot.slane %v1131_v28, 4  ;;  %v1142_v42 = vshrl.u32 %v964_v29, 16  ;;  %v1145_v43 = vshll.u32 %v964_v29, 16 }
  0x4a   : > { %v5169_v3 = vcombine.low %v1058_v56, %v1068_v61  ;;  %v1139_v41 = vrot.slane %v1137_v32, 5  ;;  %v1151_v48 = vshll.u32 %v965_v33, 16  ;;  %v1155_v49 = vshrl.u32 %v965_v33, 16 }
  0x4b   : > { %v1161_v54 = vshll.u32 %v966_v39, 16  ;;  %v1175_v6 = vshll.u32 %v968_v50, 16  ;;  %v1179_v7 = vshrl.u32 %v968_v50, 16 }
  0x4c   : > { %5954 = vmatmul.mubr.msk.bf16.gmra.mxu0 %vm437_vm2, %v6337_v62  ;;  %5970 = vmatmul.mubr.msk.bf16.gmra.mxu1 %vm437_vm2, %v6338_v10  ;;  %v1085_v62 = vrot.slane %v1083_v53, 4  ;;  %v1105_v10 = vrot.slane %v1103_v1, 5  ;;  %v1147_v53 = vrot.slane %v1145_v43, 5  ;;  %v1153_v58 = vrot.slane %v1151_v48, 5  ;;  %v970_v1 = vld [vmem:[%s6609_s5 + $0x60] sm:$0xf] }
  0x4d   : > { %6009 = vmatprep.mubr.msk.bf16.mxu0 %vm437_vm2, %v5167_v22  ;;  %5975 = vmatprep.mubr.msk.bf16.mxu1 %vm437_vm2, %v6339_v17  ;;  %v1118_v17 = vshrl.u32 %v961_v2, 16  ;;  %v1127_v22 = vshll.u32 %v962_v8, 16  ;;  %v1157_v61 = vrot.slane %v1155_v49, 4  ;;  %v6344_v2 = vld [vmem:[%s6609_s5 + $0x3c] sm:$0xff]   ;;  %v971_v8 = vld [vmem:[%s6609_s5 + $0x64] sm:$0xf] }
  0x4e   : > { %v1086_v9 = vor.u32 %v1085_v62, %v1081_v52  ;;  %v1110_v30 = vor.u32 %v1109_v20, %v1105_v10  ;;  %v1106_v36 = vsel %vm6664_vm5, %v1101_v23, %v1105_v10  ;;  %v1144_v52 = vrot.slane %v1142_v42, 4  ;;  %v973_v23 = vld [vmem:[%s6609_s5 + $0x6c] sm:$0xf]  ;;  %v6346_v43 = vld [vmem:[%s6609_s5 + $0x54] sm:$0xff]  }
  0x4f   : > { %v1120_v25 = vrot.slane %v1118_v17, 4  ;;  %v1129_v31 = vrot.slane %v1127_v22, 5  ;;  %v1163_v62 = vrot.slane %v1161_v54, 5  ;;  %v1158_v12 = vor.u32 %v1157_v61, %v1153_v58  ;;  %v976_v49 = vld [vmem:[%s6609_s5 + $0x78] sm:$0xf] }
  0x50   : > { %v1087_v19 = vrot.slane %v1086_v9, 4  ;;  %v1111_v40 = vrot.slane %v1110_v30, 4  ;;  %v1181_v16 = vrot.slane %v1179_v7, 4  ;;  %v1185_v17 = vshll.u32 %v969_v59, 16  ;;  %v977_v54 = vld [vmem:[%s6609_s5 + $0x7c] sm:$0xf] }
  0x51   : > { %v1124_v37 = vor.u32 %v1123_v27, %v1120_v25  ;;  %v1134_v46 = vor.u32 %v1133_v38, %v1129_v31  ;;  %v1190_v22 = vshrl.u32 %v970_v1, 16  ;;  %v1199_v29 = vshll.u32 %v971_v8, 16  ;;  %v978_v59 = vld [vmem:[%s6609_s5 + $0x80] sm:$0x1] }
  0x52   : > { %v1116_v51 = vsel %vm6664_vm5, %v1111_v40, %v1115_v21  ;;  %v1159_v21 = vrot.slane %v1158_v12, 4  ;;  %v1187_v28 = vrot.slane %v1185_v17, 5  ;;  %v1203_v33 = vshrl.u32 %v971_v8, 16  ;;  %v980_v17 = vld [vmem:[%s6609_s5 + $0x88] sm:$0xf] }
  0x53   : > { %v5171_v55 = vcombine.low %v1106_v36, %v1116_v51  ;;  %v1135_v57 = vrot.slane %v1134_v46, 4  ;;  %v1209_v40 = vshll.u32 %v972_v18, 16  ;;  %v1214_v42 = vshrl.u32 %v973_v23, 16 }
  0x54   : > { %6010 = vmatmul.mubr.msk.bf16.vlgmr.msra.gmra.mxu0 %vm437_vm2, %v5168_v45  ;;  %5976 = vmatmul.mubr.msk.bf16.vlgmr.msra.gmra.mxu1 %vm437_vm2, %v6340_v44  ;;  %v967_v44 = vld [vmem:[%s6609_s5 + $0x54] sm:$0xf]  ;;  %v1125_v45 = vrot.slane %v1124_v37, 4  ;;  %v1164_v30 = vsel %vm6664_vm5, %v1159_v21, %v1163_v62  ;;  %v1201_v37 = vrot.slane %v1199_v29, 5  ;;  %v1205_v39 = vrot.slane %v1203_v33, 4 }
  0x55   : > { %6076 = vmatpush3.bf16.msra.mxu0 %v6626_v26  ;;  %6042 = vmatpush3.bf16.msra.mxu1 %v6621_v24  ;;  %v6342_v26 = vld [vmem:[%s6609_s5 + $0x24] sm:$0xff]   ;;  %v1092_v24 = vsel %vm6664_vm5, %v1087_v19, %v1091_v0  ;;  %v1166_v0 = vshrl.u32 %v967_v44, 16  ;;  %v1169_v5 = vshll.u32 %v967_v44, 16  ;;  %v1217_v46 = vshll.u32 %v973_v23, 16  ;;  %v981_v21 = vld [vmem:[%s6609_s5 + $0x8c] sm:$0x1] }
  0x56   : > { %5979 = vmatprep.mubr.msk.bf16.mxu1 %vm437_vm2, %v6341_v60  ;;  %6013 = vmatprep.mubr.msk.bf16.mxu0 %vm437_vm2, %v5169_v3  ;;  %v5170_v34 = vcombine.low %v1082_v15, %v1092_v24  ;;  %v1130_v56 = vsel %vm6664_vm5, %v1125_v45, %v1129_v31  ;;  %v1148_v60 = vor.u32 %v1147_v53, %v1144_v52  ;;  %v1177_v15 = vrot.slane %v1175_v6, 5  ;;  %v6345_v19 = vld [vmem:[%s6609_s5 + $0x48] sm:$0xff]   ;;  %v974_v24 = vld [vmem:[%s6609_s5 + $0x70] sm:$0xf] }
  0x57   : > { %6109 = vmatprep.subr.bf16.mxu1 %v6653_v47  ;;  %6143 = vmatprep.subr.bf16.mxu0 %v6670_v4  ;;  %v1140_v3 = vsel %vm6664_vm5, %v1135_v57, %v1139_v41  ;;  %v1168_v13 = vrot.slane %v1166_v0, 4  ;;  %v1171_v14 = vrot.slane %v1169_v5, 5  ;;  %v1192_v31 = vrot.slane %v1190_v22, 4  ;;  %v975_v41 = vld [vmem:[%s6609_s5 + $0x74] sm:$0x1] }
  0x58   : > { %v5172_v9 = vcombine.low %v1130_v56, %v1140_v3  ;;  %v1149_v10 = vrot.slane %v1148_v60, 4  ;;  %v1182_v27 = vor.u32 %v1181_v16, %v1177_v15  ;;  %v1223_v48 = vshll.u32 %v974_v24, 16  ;;  %v6347_v60 = vld [vmem:[%s6609_s5 + $0x60] sm:$0xff]  }
  0x59   : > { %v1172_v25 = vor.u32 %v1171_v14, %v1168_v13  ;;  %v1206_v52 = vor.u32 %v1205_v39, %v1201_v37  ;;  %v1211_v53 = vrot.slane %v1209_v40, 5  ;;  %v1219_v56 = vrot.slane %v1217_v46, 5  ;;  %v6349_v39 = vld [vmem:[%s6609_s5 + $0x78] sm:$0xff]  }
  0x5a   : > { %v1154_v20 = vsel %vm6664_vm5, %v1149_v10, %v1153_v58  ;;  %v1183_v36 = vrot.slane %v1182_v27, 4  ;;  %v1225_v57 = vrot.slane %v1223_v48, 5  ;;  %v1227_v58 = vshrl.u32 %v974_v24, 16 }
  0x5b   : > { %v1207_v62 = vrot.slane %v1206_v52, 4  ;;  %v1233_v0 = vshll.u32 %v975_v41, 16  ;;  %v1241_v6 = vshll.u32 %v976_v49, 16  ;;  %v1247_v7 = vshll.u32 %v977_v54, 16 }
  0x5c   : > { %6014 = vmatmul.mubr.msk.bf16.gmra.mxu0 %vm437_vm2, %v5170_v34  ;;  %5980 = vmatmul.mubr.msk.bf16.gmra.mxu1 %vm437_vm2, %v6342_v26  ;;  %v1193_v26 = vshll.u32 %v970_v1, 16  ;;  %v5173_v34 = vcombine.low %v1154_v20, %v1164_v30  ;;  %v1188_v45 = vsel %vm6664_vm5, %v1183_v36, %v1187_v28  ;;  %v1238_v1 = vshrl.u32 %v976_v49, 16 }
  0x5d   : > { %5983 = vmatprep.mubr.msk.bf16.mxu1 %vm437_vm2, %v6343_v35  ;;  %6017 = vmatprep.mubr.msk.bf16.mxu0 %vm437_vm2, %v5171_v55  ;;  %v1173_v35 = vrot.slane %v1172_v25, 4  ;;  %v1216_v55 = vrot.slane %v1214_v42, 4  ;;  %v1229_v5 = vrot.slane %v1227_v58, 4  ;;  %v1212_v8 = vsel %vm6664_vm5, %v1207_v62, %v1211_v53  ;;  %v985_v53 = vld [vmem:[%s6609_s5 + $0x9c] sm:$0xf] }
  0x5e   : > { %v1195_v32 = vrot.slane %v1193_v26, 5  ;;  %v1240_v10 = vrot.slane %v1238_v1, 4  ;;  %v1251_v12 = vshrl.u32 %v977_v54, 16  ;;  %v1243_v16 = vrot.slane %v1241_v6, 5  ;;  %v986_v58 = vld [vmem:[%s6609_s5 + $0xa0] sm:$0xf] }
  0x5f   : > { %v1178_v44 = vsel %vm6664_vm5, %v1173_v35, %v1177_v15  ;;  %v1220_v3 = vor.u32 %v1219_v56, %v1216_v55  ;;  %v1230_v15 = vor.u32 %v1229_v5, %v1225_v57  ;;  %v1249_v18 = vrot.slane %v1247_v7, 5  ;;  %v6350_v6 = vld [vmem:[%s6609_s5 + $0x84] sm:$0xff]  }
  0x60   : > { %v1196_v38 = vor.u32 %v1195_v32, %v1192_v31  ;;  %v5174_v50 = vcombine.low %v1178_v44, %v1188_v45  ;;  %v1257_v20 = vshll.u32 %v978_v59, 16  ;;  %v1244_v25 = vor.u32 %v1243_v16, %v1240_v10  ;;  %v982_v31 = vld [vmem:[%s6609_s5 + $0x90] sm:$0xf] }
  0x61   : > { %v1221_v14 = vrot.slane %v1220_v3, 4  ;;  %v1231_v23 = vrot.slane %v1230_v15, 4  ;;  %v1271_v30 = vshll.u32 %v980_v17, 16  ;;  %v6348_v32 = vld [vmem:[%s6609_s5 + $0x6c] sm:$0xff]   ;;  %v1275_v36 = vshrl.u32 %v980_v17, 16 }
  0x62   : > { %v1197_v51 = vrot.slane %v1196_v38, 4  ;;  %v1259_v29 = vrot.slane %v1257_v20, 5  ;;  %v1281_v42 = vshll.u32 %v981_v21, 16  ;;  %v1286_v48 = vshrl.u32 %v982_v31, 16 }
  0x63   : > { %v1226_v26 = vsel %vm6664_vm5, %v1221_v14, %v1225_v57  ;;  %v1273_v41 = vrot.slane %v1271_v30, 5  ;;  %v1277_v46 = vrot.slane %v1275_v36, 4  ;;  %v1310_v3 = vshrl.u32 %v985_v53, 16  ;;  %v6351_v14 = vld [vmem:[%s6609_s5 + $0x90] sm:$0xff]  }
  0x64   : > { %6018 = vmatmul.mubr.msk.bf16.gmra.mxu0 %vm437_vm2, %v5172_v9  ;;  %5984 = vmatmul.mubr.msk.bf16.gmra.mxu1 %vm437_vm2, %v6344_v2  ;;  %v1202_v61 = vsel %vm6664_vm5, %v1197_v51, %v1201_v37  ;;  %v979_v2 = vld [vmem:[%s6609_s5 + $0x84] sm:$0xf]  ;;  %v1235_v9 = vrot.slane %v1233_v0, 5  ;;  %v983_v37 = vld [vmem:[%s6609_s5 + $0x94] sm:$0xf]  ;;  %v1289_v51 = vshll.u32 %v982_v31, 16 }
  0x65   : > { %5987 = vmatprep.mubr.msk.bf16.mxu1 %vm437_vm2, %v6345_v19  ;;  %6021 = vmatprep.mubr.msk.bf16.mxu0 %vm437_vm2, %v5173_v34  ;;  %v5175_v13 = vcombine.low %v1202_v61, %v1212_v8  ;;  %v1253_v19 = vrot.slane %v1251_v12, 4  ;;  %v1262_v22 = vshrl.u32 %v979_v2, 16  ;;  %v1265_v27 = vshll.u32 %v979_v2, 16  ;;  %v987_v0 = vld [vmem:[%s6609_s5 + $0xa4] sm:$0x1] }
  0x66   : > { %v1236_v33 = vsel %vm6664_vm5, %v1231_v23, %v1235_v9  ;;  %v1245_v34 = vrot.slane %v1244_v25, 4  ;;  %v1295_v52 = vshll.u32 %v983_v37, 16  ;;  %v1278_v56 = vor.u32 %v1277_v46, %v1273_v41  ;;  %v988_v12 = vld [vmem:[%s6609_s5 + $0xa8] sm:$0xf] }
  0x67   : > { %v1254_v28 = vor.u32 %v1253_v19, %v1249_v18  ;;  %v1264_v24 = vrot.slane %v1262_v22, 4  ;;  %v1267_v35 = vrot.slane %v1265_v27, 5  ;;  %v5176_v38 = vcombine.low %v1226_v26, %v1236_v33  ;;  %v990_v26 = vld [vmem:[%s6609_s5 + $0xb0] sm:$0x1]  ;;  %v992_v33 = vld [vmem:[%s6609_s5 + $0xb8] sm:$0xf] }
  0x68   : > { %v1250_v44 = vsel %vm6664_vm5, %v1245_v34, %v1249_v18  ;;  %v1288_v57 = vrot.slane %v1286_v48, 4  ;;  %v1291_v59 = vrot.slane %v1289_v51, 5  ;;  %v1299_v61 = vshrl.u32 %v983_v37, 16  ;;  %v989_v18 = vld [vmem:[%s6609_s5 + $0xac] sm:$0xf]  ;;  %v6352_v48 = vld [vmem:[%s6609_s5 + $0x9c] sm:$0xff]  }
  0x69   : > { %v1255_v40 = vrot.slane %v1254_v28, 4  ;;  %v1268_v45 = vor.u32 %v1267_v35, %v1264_v24  ;;  %v1279_v2 = vrot.slane %v1278_v56, 4  ;;  %v1313_v5 = vshll.u32 %v985_v53, 16 }
  0x6a   : > { %v1292_v7 = vor.u32 %v1291_v59, %v1288_v57  ;;  %v1301_v8 = vrot.slane %v1299_v61, 4  ;;  %v1319_v10 = vshll.u32 %v986_v58, 16  ;;  %v1312_v15 = vrot.slane %v1310_v3, 4 }
  0x6b   : > { %v1260_v49 = vsel %vm6664_vm5, %v1255_v40, %v1259_v29  ;;  %v1269_v55 = vrot.slane %v1268_v45, 4  ;;  %v1315_v16 = vrot.slane %v1313_v5, 5  ;;  %v1323_v17 = vshrl.u32 %v986_v58, 16  ;;  %v991_v29 = vld [vmem:[%s6609_s5 + $0xb4] sm:$0xf] }
  0x6c   : > { %6022 = vmatmul.mubr.msk.bf16.gmra.mxu0 %vm437_vm2, %v5174_v50  ;;  %5988 = vmatmul.mubr.msk.bf16.gmra.mxu1 %vm437_vm2, %v6346_v43  ;;  %v984_v43 = vld [vmem:[%s6609_s5 + $0x98] sm:$0x1]  ;;  %v1283_v50 = vrot.slane %v1281_v42, 5  ;;  %v5177_v54 = vcombine.low %v1250_v44, %v1260_v49  ;;  %v1293_v20 = vrot.slane %v1292_v7, 4  ;;  %v1321_v22 = vrot.slane %v1319_v10, 5 }
  0x6d   : > { %5991 = vmatprep.mubr.msk.bf16.mxu1 %vm437_vm2, %v6347_v60  ;;  %6025 = vmatprep.mubr.msk.bf16.mxu0 %vm437_vm2, %v5175_v13  ;;  %v1297_v60 = vrot.slane %v1295_v52, 5  ;;  %v1305_v62 = vshll.u32 %v984_v43, 16  ;;  %v1274_v1 = vsel %vm6664_vm5, %v1269_v55, %v1273_v41  ;;  %v1316_v23 = vor.u32 %v1315_v16, %v1312_v15  ;;  %v993_v42 = vld [vmem:[%s6609_s5 + $0xbc] sm:$0x1]  ;;  %v6356_v15 = vld [vmem:[%s6609_s5 + $0x264] sm:$0xff]  }
  0x6e   : > { %v1284_v13 = vsel %vm6664_vm5, %v1279_v2, %v1283_v50  ;;  %v1325_v25 = vrot.slane %v1323_v17, 4  ;;  %v1329_v27 = vshll.u32 %v987_v0, 16  ;;  %v1334_v28 = vshrl.u32 %v988_v12, 16  ;;  %v6355_v16 = vld [vmem:[%s6609_s5 + $0x198] sm:$0xff]  }
  0x6f   : > { %v1307_v9 = vrot.slane %v1305_v62, 5  ;;  %v5178_v19 = vcombine.low %v1274_v1, %v1284_v13  ;;  %v1302_v21 = vor.u32 %v1301_v8, %v1297_v60  ;;  %v1298_v24 = vsel %vm6664_vm5, %v1293_v20, %v1297_v60  ;;  %v6358_v20 = vld [vmem:[%s6609_s5 + $0x270] sm:$0xff]  }
  0x70   : > { %v1337_v31 = vshll.u32 %v988_v12, 16  ;;  %v1317_v34 = vrot.slane %v1316_v23, 4  ;;  %v1326_v35 = vor.u32 %v1325_v25, %v1321_v22  ;;  %v1331_v36 = vrot.slane %v1329_v27, 5  ;;  %v6354_v12 = vld [vmem:[%s6609_s5 + $0xb4] sm:$0xff]   ;;  %v6361_v23 = vld [vmem:[%s6609_s5 + $0x1bc] sm:$0xff]   ;;  %v6362_v25 = vld [vmem:[%s6609_s5 + $0x288] sm:$0xff]  }
  0x71   : > { %v1303_v30 = vrot.slane %v1302_v21, 4  ;;  %v1336_v37 = vrot.slane %v1334_v28, 4  ;;  %v1347_v41 = vshrl.u32 %v989_v18, 16  ;;  %v1353_v46 = vshll.u32 %v990_v26, 16  ;;  %v6357_v21 = vld [vmem:[%s6609_s5 + $0x1a4] sm:$0xff]   ;;  %v6360_v26 = vld [vmem:[%s6609_s5 + $0x27c] sm:$0xff]  }
  0x72   : > { %v1322_v44 = vsel %vm6664_vm5, %v1317_v34, %v1321_v22  ;;  %v1327_v45 = vrot.slane %v1326_v35, 4  ;;  %v1358_v51 = vshrl.u32 %v991_v29, 16  ;;  %v1361_v52 = vshll.u32 %v991_v29, 16  ;;  %v6359_v22 = vld [vmem:[%s6609_s5 + $0x1b0] sm:$0xff]   ;;  %v6363_v28 = vld [vmem:[%s6609_s5 + $0x1c8] sm:$0xff]  }
  0x73   : > { %v1349_v50 = vrot.slane %v1347_v41, 4  ;;  %v1355_v55 = vrot.slane %v1353_v46, 5  ;;  %v1367_v56 = vshll.u32 %v992_v33, 16  ;;  %v1371_v57 = vshrl.u32 %v992_v33, 16  ;;  %v6364_v27 = vld [vmem:[%s6609_s5 + $0x294] sm:$0xff]  }
  0x74   : > { %6026 = vmatmul.mubr.msk.bf16.gmra.mxu0 %vm437_vm2, %v5176_v38  ;;  %5992 = vmatmul.mubr.msk.bf16.gmra.mxu1 %vm437_vm2, %v6348_v32  ;;  %v1343_v32 = vshll.u32 %v989_v18, 16  ;;  %v1308_v38 = vsel %vm6664_vm5, %v1303_v30, %v1307_v9  ;;  %v1332_v53 = vsel %vm6664_vm5, %v1327_v45, %v1331_v36  ;;  %v1360_v61 = vrot.slane %v1358_v51, 4  ;;  %v6365_v29 = vld [vmem:[%s6609_s5 + $0x1d4] sm:$0xff]   ;;  %v5588_v30 = vld [vmem:[%s6599_s26 + $0x10] sm:$0x3] }
  0x75   : > { %5995 = vmatprep.mubr.msk.bf16.mxu1 %vm437_vm2, %v6349_v39  ;;  %6029 = vmatprep.mubr.msk.bf16.mxu0 %vm437_vm2, %v5177_v54  ;;  %v1339_v39 = vrot.slane %v1337_v31, 5  ;;  %v5179_v43 = vcombine.low %v1298_v24, %v1308_v38  ;;  %v6353_v54 = vld [vmem:[%s6609_s5 + $0xa8] sm:$0xff]   ;;  %v5180_v58 = vcombine.low %v1322_v44, %v1332_v53  ;;  %v1363_v62 = vrot.slane %v1361_v52, 5  ;;  %v6367_v31 = vld [vmem:[%s6609_s5 + $0x1e0] sm:$0xff]   ;;  %v5330_v35 = vld [vmem:[%s6609_s5 + $0x19c] sm:$0xf] }
  0x76   : > { %v1345_v40 = vrot.slane %v1343_v32, 5  ;;  %v1369_v0 = vrot.slane %v1367_v56, 5  ;;  %v1373_v1 = vrot.slane %v1371_v57, 4  ;;  %v1377_v2 = vshll.u32 %v993_v42, 16  ;;  %v6368_v24 = vld [vmem:[%s6609_s5 + $0x2ac] sm:$0xff]   ;;  %v6372_v44 = vld [vmem:[%s6609_s5 + $0x2c4] sm:$0xff]  }
  0x77   : > { %v1340_v49 = vor.u32 %v1339_v39, %v1336_v37  ;;  %v5329_v32 = vld [vmem:[%s6609_s5 + $0x198] sm:$0xf]  ;;  %v6865_v34 = vand.u32 %v5588_v30, %v6596_v11  ;;  %v5332_v38 = vld [vmem:[%s6609_s5 + $0x1a4] sm:$0xf]  ;;  %v5333_v39 = vld [vmem:[%s6609_s5 + $0x1a8] sm:$0xf] }
  0x78   : > { %v1350_v60 = vor.u32 %v1349_v50, %v1345_v40  ;;  %v1374_v7 = vor.u32 %v1373_v1, %v1369_v0  ;;  %v1379_v8 = vrot.slane %v1377_v2, 5  ;;  %v2442_v36 = vshrl.u32 %v5329_v32, 16  ;;  %v6371_v50 = vld [vmem:[%s6609_s5 + $0x1f8] sm:$0xff]   ;;  %v6373_v1 = vld [vmem:[%s6609_s5 + $0x204] sm:$0xff]  }
  0x79   : > { %v1341_v59 = vrot.slane %v1340_v49, 4  ;;  %v2445_v37 = vshll.u32 %v5329_v32, 16  ;;  %v2451_v41 = vshll.u32 %v5330_v35, 16  ;;  %v2455_v42 = vshrl.u32 %v5330_v35, 16  ;;  %v6376_v2 = vld [vmem:[%s6609_s5 + $0x2dc] sm:$0xff]  }
  0x7a   : > { %v1351_v5 = vrot.slane %v1350_v60, 4  ;;  %v2444_v45 = vrot.slane %v2442_v36, 4  ;;  %v2469_v49 = vshll.u32 %v5332_v38, 16  ;;  %v2475_v51 = vshll.u32 %v5333_v39, 16  ;;  %v6374_v60 = vld [vmem:[%s6609_s5 + $0x2d0] sm:$0xff]  }
  0x7b   : > { %v1346_v3 = vsel %vm6664_vm5, %v1341_v59, %v1345_v40  ;;  %v5331_v40 = vld [vmem:[%s6609_s5 + $0x1a0] sm:$0x1]  ;;  %v2447_v46 = vrot.slane %v2445_v37, 5  ;;  %v2479_v52 = vshrl.u32 %v5333_v39, 16  ;;  %v2457_v56 = vrot.slane %v2455_v42, 4  ;;  %v6380_v42 = vld [vmem:[%s6609_s5 + $0x2f4] sm:$0xff]  }
  0x7c   : > { %6030 = vmatmul.mubr.msk.bf16.gmra.mxu0 %vm437_vm2, %v5178_v19  ;;  %5996 = vmatmul.mubr.msk.bf16.gmra.mxu1 %vm437_vm2, %v6350_v6  ;;  %v1364_v6 = vor.u32 %v1363_v62, %v1360_v61  ;;  %v1356_v9 = vsel %vm6664_vm5, %v1351_v5, %v1355_v55  ;;  %v2461_v53 = vshll.u32 %v5331_v40, 16  ;;  %v5335_v59 = vld [vmem:[%s6609_s5 + $0x1b0] sm:$0xf]  ;;  %v5334_v61 = vld [vmem:[%s6609_s5 + $0x1ac] sm:$0x1]  ;;  %v6890_v62 = vrot.slane %v2475_v51, 5 }
  0x7d   : > { %5999 = vmatprep.mubr.msk.bf16.mxu1 %vm437_vm2, %v6351_v14  ;;  %6033 = vmatprep.mubr.msk.bf16.mxu0 %vm437_vm2, %v5179_v43  ;;  %v5181_v10 = vcombine.low %v1346_v3, %v1356_v9  ;;  %v1375_v14 = vrot.slane %v1374_v7, 4  ;;  %v6369_v43 = vld [vmem:[%s6609_s5 + $0x1ec] sm:$0xff]   ;;  %v2448_v55 = vor.u32 %v2447_v46, %v2444_v45  ;;  %v5336_v5 = vld [vmem:[%s6609_s5 + $0x1b4] sm:$0xf]  ;;  %v2490_v7 = vshrl.u32 %v5335_v59, 16  ;;  %v6377_v37 = vld [vmem:[%s6609_s5 + $0x21c] sm:$0xff]  }
  0x7e   : > { %v1365_v13 = vrot.slane %v1364_v6, 4  ;;  %v6894_v3 = vrot.slane %v2461_v53, 5  ;;  %v6375_v6 = vld [vmem:[%s6609_s5 + $0x210] sm:$0xff]   ;;  %v5338_v9 = vld [vmem:[%s6609_s5 + $0x1bc] sm:$0xf]  ;;  %v6379_v51 = vld [vmem:[%s6609_s5 + $0x228] sm:$0xff]  }
  0x7f   : > { %v1380_v18 = vsel %vm6664_vm5, %v1375_v14, %v1379_v8  ;;  %v2493_v8 = vshll.u32 %v5335_v59, 16  ;;  %v5342_v36 = vld [vmem:[%s6609_s5 + $0x1cc] sm:$0xf]  ;;  %v5343_v45 = vld [vmem:[%s6609_s5 + $0x1d0] sm:$0x1] }
  0x80   : > { %v1370_v17 = vsel %vm6664_vm5, %v1365_v13, %v1369_v0  ;;  %v2481_v0 = vrot.slane %v2479_v52, 4 }
  0x81   : > { %v5182_v19 = vcombine.low %v1370_v17, %v1380_v18  ;;  %v5341_v17 = vld [vmem:[%s6609_s5 + $0x1c8] sm:$0xf] }
  0x82   : > { %v2482_v18 = vor.u32 %v2481_v0, %v6890_v62  ;;  %v5345_v0 = vld [vmem:[%s6609_s5 + $0x1d8] sm:$0xf] }
  0x84   : > { %6034 = vmatmul.mubr.msk.bf16.gmra.mxu0 %vm437_vm2, %v5180_v58  ;;  %6000 = vmatmul.mubr.msk.bf16.gmra.mxu1 %vm437_vm2, %v6352_v48  ;;  %v2466_v48 = vshrl.u32 %v5332_v38, 16  ;;  %v2471_v58 = vrot.slane %v2469_v49, 5  ;;  %v5340_v38 = vld [vmem:[%s6609_s5 + $0x1c4] sm:$0x1]  ;;  %v2547_v49 = vshll.u32 %v5342_v36, 16 }
  0x85   : > { %6003 = vmatprep.mubr.msk.bf16.mxu1 %vm437_vm2, %v6353_v54  ;;  %6037 = vmatprep.mubr.msk.bf16.mxu0 %vm437_vm2, %v5181_v10  ;;  %v6882_v54 = vrot.slane %v2451_v41, 5  ;;  %v5339_v10 = vld [vmem:[%s6609_s5 + $0x1c0] sm:$0xf] }
  0x86   : > { %v2468_v57 = vrot.slane %v2466_v48, 4 }
  0x87   : > { %v2458_v13 = vor.u32 %v2457_v56, %v6882_v54  ;;  %v2533_v56 = vshll.u32 %v5340_v38, 16 }
  0x88   : > { %v2472_v14 = vor.u32 %v2471_v58, %v2468_v57  ;;  %v5344_v57 = vld [vmem:[%s6609_s5 + $0x1d4] sm:$0xf] }
  0x8c   : > { %6038 = vmatmul.mubr.msk.bf16.gmra.mxu0 %vm437_vm2, %v5182_v19  ;;  %6004 = vmatmul.mubr.msk.bf16.gmra.mxu1 %vm437_vm2, %v6354_v12  ;;  %v6900_v12 = vrot.slane %v2448_v55, 4  ;;  %v2499_v19 = vshll.u32 %v5336_v5, 16 }
  0x8d   : > { %6077 = vmatprep.mubr.msk.bf16.mxu0 %vm437_vm2, %v6356_v15  ;;  %6043 = vmatprep.mubr.msk.bf16.mxu1 %vm437_vm2, %v6355_v16  ;;  %v2485_v15 = vshll.u32 %v5334_v61, 16  ;;  %v5337_v16 = vld [vmem:[%s6609_s5 + $0x1b8] sm:$0x1] }
  0x8e   : > { %v2509_v30 = vshll.u32 %v5337_v16, 16  ;;  %v6911_v32 = vrot.slane %v2499_v19, 5  ;;  %v2454_v52 = vsel %vm6664_vm5, %v6900_v12, %v6882_v54  ;;  %v6949_v12 = vrot.slane %v2533_v56, 5  ;;  %v6384_v16 = vld [vmem:[%s6609_s5 + $0x30c] sm:$0xff]   ;;  %v5348_v19 = vld [vmem:[%s6609_s5 + $0x1e4] sm:$0xf] }
  0x8f   : > { %v2599_v38 = vshrl.u32 %v5348_v19, 16 }
  0x90   : > { %v6933_v59 = vrot.slane %v2509_v30, 5 }
  0x94   : > { %6078 = vmatmul.mubr.msk.bf16.vlgmr.msra.gmra.mxu0 %vm437_vm2, %v6358_v20  ;;  %6044 = vmatmul.mubr.msk.bf16.vlgmr.msra.gmra.mxu1 %vm437_vm2, %v6357_v21  ;;  %v2503_v20 = vshrl.u32 %v5336_v5, 16  ;;  %v2514_v21 = vshrl.u32 %v5338_v9, 16  ;;  %v5347_v5 = vld [vmem:[%s6609_s5 + $0x1e0] sm:$0xf] }
  0x95   : > { %6144 = vmatpush3.bf16.msra.mxu0 %v6670_v4  ;;  %6110 = vmatpush3.bf16.msra.mxu1 %v6653_v47  ;;  %v6366_v47 = vld [vmem:[%s6609_s5 + $0x2a0] sm:$0xff]  }
  0x96   : > { %6047 = vmatprep.mubr.msk.bf16.mxu1 %vm437_vm2, %v6359_v22  ;;  %6081 = vmatprep.mubr.msk.bf16.mxu0 %vm437_vm2, %v6360_v26  ;;  %v5507_v4 = vld [vmem:[%s6599_s26 + $0xe] sm:$0x3]  ;;  %v2517_v22 = vshll.u32 %v5338_v9, 16  ;;  %v2523_v26 = vshll.u32 %v5339_v10, 16  ;;  %v2505_v35 = vrot.slane %v2503_v20, 4  ;;  %v2586_v20 = vshrl.u32 %v5347_v5, 16 }
  0x97   : > { %v6862_v33 = vand.u32 %v5507_v4, %v6596_v11  ;;  %6211 = vmatprep.subr.bf16.mxu0 %v6865_v34  ;;  %v6370_v11 = vld [vmem:[%s6609_s5 + $0x2b8] sm:$0xff]   ;;  %v2459_v4 = vrot.slane %v2458_v13, 4  ;;  %v6382_v9 = vld [vmem:[%s6609_s5 + $0x300] sm:$0xff]   ;;  %v2571_v13 = vshll.u32 %v5345_v0, 16 }
  0x98   : > { %v2519_v39 = vrot.slane %v2517_v22, 5  ;;  %v6916_v40 = vrot.slane %v2523_v26, 5  ;;  %v2506_v55 = vor.u32 %v2505_v35, %v6911_v32  ;;  %v6383_v22 = vld [vmem:[%s6609_s5 + $0x240] sm:$0xff]  }
  0x99   : > { %6177 = vmatprep.subr.bf16.mxu1 %v6862_v33  ;;  %v2464_v53 = vsel %vm6664_vm5, %v2459_v4, %v6894_v3  ;;  %v2557_v3 = vshll.u32 %v5343_v45, 16  ;;  %v6971_v35 = vrot.slane %v2571_v13, 5 }
  0x9a   : > { %v6955_v26 = vcombine.low %v2454_v52, %v2464_v53  ;;  %v6386_v53 = vld [vmem:[%s6609_s5 + $0x318] sm:$0xff]  }
  0x9c   : > { %6082 = vmatmul.mubr.msk.bf16.gmra.mxu0 %vm437_vm2, %v6362_v25  ;;  %6048 = vmatmul.mubr.msk.bf16.gmra.mxu1 %vm437_vm2, %v6361_v23  ;;  %v2527_v23 = vshrl.u32 %v5339_v10, 16  ;;  %v2492_v25 = vrot.slane %v2490_v7, 4  ;;  %v2562_v7 = vshrl.u32 %v5344_v57, 16  ;;  %v2507_v10 = vrot.slane %v2506_v55, 4 }
  0x9d   : > { %6085 = vmatprep.mubr.msk.bf16.mxu0 %vm437_vm2, %v6364_v27  ;;  %6051 = vmatprep.mubr.msk.bf16.mxu1 %vm437_vm2, %v6363_v28  ;;  %v2495_v27 = vrot.slane %v2493_v8, 5  ;;  %v2538_v28 = vshrl.u32 %v5341_v17, 16  ;;  %v2565_v8 = vshll.u32 %v5344_v57, 16  ;;  %v2601_v57 = vrot.slane %v2599_v38, 4 }
  0x9e   : > { %v2529_v41 = vrot.slane %v2527_v23, 4 }
  0x9f   : > { %v2540_v46 = vrot.slane %v2538_v28, 4  ;;  %v5346_v28 = vld [vmem:[%s6609_s5 + $0x1dc] sm:$0x1]  ;;  %v2567_v30 = vrot.slane %v2565_v8, 5 }
  0xa0   : > { %v2530_v61 = vor.u32 %v2529_v41, %v6916_v40  ;;  %v2588_v41 = vrot.slane %v2586_v20, 4 }
  0xa4   : > { %6086 = vmatmul.mubr.msk.bf16.gmra.mxu0 %vm437_vm2, %v6366_v47  ;;  %6052 = vmatmul.mubr.msk.bf16.gmra.mxu1 %vm437_vm2, %v6365_v29  ;;  %v2541_v47 = vshll.u32 %v5341_v17, 16  ;;  %v2473_v29 = vrot.slane %v2472_v14, 4  ;;  %v2575_v14 = vshrl.u32 %v5345_v0, 16 }
  0xa5   : > { %6089 = vmatprep.mubr.msk.bf16.mxu0 %vm437_vm2, %v6368_v24  ;;  %6055 = vmatprep.mubr.msk.bf16.mxu1 %vm437_vm2, %v6367_v31  ;;  %v2487_v24 = vrot.slane %v2485_v15, 5  ;;  %v6378_v31 = vld [vmem:[%s6609_s5 + $0x2e8] sm:$0xff]   ;;  %v6381_v15 = vld [vmem:[%s6609_s5 + $0x234] sm:$0xff]  }
  0xa6   : > { %v2543_v48 = vrot.slane %v2541_v47, 5  ;;  %v2478_v58 = vsel %vm6664_vm5, %v2473_v29, %v6890_v62  ;;  %v6945_v62 = vrot.slane %v2547_v49, 5  ;;  %v5350_v47 = vld [vmem:[%s6609_s5 + $0x1ec] sm:$0xf] }
  0xac   : > { %6090 = vmatmul.mubr.msk.bf16.gmra.mxu0 %vm437_vm2, %v6370_v11  ;;  %6056 = vmatmul.mubr.msk.bf16.gmra.mxu1 %vm437_vm2, %v6369_v43  ;;  %v2516_v11 = vrot.slane %v2514_v21, 4  ;;  %v2483_v43 = vrot.slane %v2482_v18, 4  ;;  %v2531_v18 = vrot.slane %v2530_v61, 4  ;;  %v2589_v21 = vshll.u32 %v5347_v5, 16 }
  0xad   : > { %6093 = vmatprep.mubr.msk.bf16.mxu0 %vm437_vm2, %v6372_v44  ;;  %6059 = vmatprep.mubr.msk.bf16.mxu1 %vm437_vm2, %v6371_v50  ;;  %v2496_v44 = vor.u32 %v2495_v27, %v2492_v25  ;;  %v2551_v50 = vshrl.u32 %v5342_v36, 16  ;;  %v6961_v27 = vrot.slane %v2557_v3, 5  ;;  %v2577_v36 = vrot.slane %v2575_v14, 4 }
  0xae   : > { %v2488_v54 = vsel %vm6664_vm5, %v2483_v43, %v2487_v24  ;;  %v2564_v24 = vrot.slane %v2562_v7, 4  ;;  %v2610_v43 = vshrl.u32 %v5350_v47, 16  ;;  %v6387_v7 = vld [vmem:[%s6609_s5 + $0xc] sm:$0xff]  }
  0xaf   : > { %v6957_v23 = vcombine.low %v2478_v58, %v2488_v54  ;;  %v2578_v55 = vor.u32 %v2577_v36, %v6971_v35  ;;  %v5352_v58 = vld [vmem:[%s6609_s5 + $0x1f4] sm:$0x1]  ;;  %v5354_v54 = vld [vmem:[%s6609_s5 + $0x1fc] sm:$0xf] }
  0xb0   : > { %v2568_v49 = vor.u32 %v2567_v30, %v2564_v24  ;;  %v2612_v61 = vrot.slane %v2610_v43, 4  ;;  %v6388_v36 = vld [vmem:[%s6609_s5 + $0x18] sm:$0xff]  }
  0xb1   : > { %v2579_v14 = vrot.slane %v2578_v55, 4 }
  0xb2   : > { %v2569_v8 = vrot.slane %v2568_v49, 4  ;;  %v6389_v49 = vld [vmem:[%s6609_s5 + $0x24] sm:$0xff]  }
  0xb4   : > { %6094 = vmatmul.mubr.msk.bf16.gmra.mxu0 %vm437_vm2, %v6374_v60  ;;  %6060 = vmatmul.mubr.msk.bf16.gmra.mxu1 %vm437_vm2, %v6373_v1  ;;  %v2520_v60 = vor.u32 %v2519_v39, %v2516_v11  ;;  %v6940_v1 = vrot.slane %v2496_v44, 4  ;;  %v5353_v11 = vld [vmem:[%s6609_s5 + $0x1f8] sm:$0xf]  ;;  %v5349_v39 = vld [vmem:[%s6609_s5 + $0x1e8] sm:$0x1]  ;;  %v2613_v44 = vshll.u32 %v5350_v47, 16 }
  0xb5   : > { %6097 = vmatprep.mubr.msk.bf16.mxu0 %vm437_vm2, %v6376_v2  ;;  %6063 = vmatprep.mubr.msk.bf16.mxu1 %vm437_vm2, %v6375_v6  ;;  %v2544_v2 = vor.u32 %v2543_v48, %v2540_v46  ;;  %v2553_v6 = vrot.slane %v2551_v50, 4  ;;  %v2581_v50 = vshll.u32 %v5346_v28, 16  ;;  %v2637_v52 = vshll.u32 %v5353_v11, 16  ;;  %v5357_v28 = vld [vmem:[%s6609_s5 + $0x208] sm:$0xf] }
  0xb6   : > { %v2521_v17 = vrot.slane %v2520_v60, 4  ;;  %v2502_v4 = vsel %vm6664_vm5, %v6940_v1, %v6911_v32  ;;  %v2512_v32 = vsel %vm6664_vm5, %v2507_v10, %v6933_v59  ;;  %v2605_v60 = vshll.u32 %v5349_v39, 16 }
  0xb7   : > { %v6959_v25 = vrot.slane %v2544_v2, 4  ;;  %v2554_v29 = vor.u32 %v2553_v6, %v6945_v62  ;;  %v2615_v0 = vrot.slane %v2613_v44, 5  ;;  %v6994_v1 = vcombine.low %v2502_v4, %v2512_v32  ;;  %v6385_v6 = vld [vmem:[%s6609_s5 + $0x24c] sm:$0xff]  }
  0xb8   : > { %v2526_v45 = vsel %vm6664_vm5, %v2521_v17, %v6916_v40  ;;  %v2536_v40 = vsel %vm6664_vm5, %v2531_v18, %v6949_v12  ;;  %v2639_v12 = vrot.slane %v2637_v52, 5  ;;  %v5355_v17 = vld [vmem:[%s6609_s5 + $0x200] sm:$0x1]  ;;  %v5356_v18 = vld [vmem:[%s6609_s5 + $0x204] sm:$0xf]  ;;  %v7016_v4 = vrot.slane %v2605_v60, 5 }
  0xb9   : > { %v2555_v59 = vrot.slane %v2554_v29, 4  ;;  %v7000_v13 = vcombine.low %v2526_v45, %v2536_v40  ;;  %v2616_v29 = vor.u32 %v2615_v0, %v2612_v61  ;;  %v2661_v30 = vshll.u32 %v5356_v18, 16  ;;  %v5362_v40 = vld [vmem:[%s6609_s5 + $0x21c] sm:$0xf]  ;;  %v5363_v60 = vld [vmem:[%s6609_s5 + $0x220] sm:$0xf] }
  0xba   : > { %v2671_v39 = vshrl.u32 %v5357_v28, 16  ;;  %v5365_v61 = vld [vmem:[%s6609_s5 + $0x228] sm:$0xf] }
  0xbb   : > { %v2560_v20 = vsel %vm6664_vm5, %v2555_v59, %v6961_v27  ;;  %v2658_v27 = vshrl.u32 %v5356_v18, 16  ;;  %v7037_v32 = vrot.slane %v2616_v29, 4  ;;  %v6391_v29 = vld [vmem:[%s6609_s5 + $0x3c] sm:$0xff]  }
  0xbc   : > { %6098 = vmatmul.mubr.msk.bf16.gmra.mxu0 %vm437_vm2, %v6378_v31  ;;  %6064 = vmatmul.mubr.msk.bf16.gmra.mxu1 %vm437_vm2, %v6377_v37  ;;  %v5351_v31 = vld [vmem:[%s6609_s5 + $0x1f0] sm:$0xf]  ;;  %v2595_v37 = vshll.u32 %v5348_v19, 16  ;;  %v2550_v19 = vsel %vm6664_vm5, %v6959_v25, %v6945_v62  ;;  %v2653_v25 = vshll.u32 %v5355_v17, 16  ;;  %v2673_v59 = vrot.slane %v2671_v39, 4 }
  0xbd   : > { %6101 = vmatprep.mubr.msk.bf16.mxu0 %vm437_vm2, %v6380_v42  ;;  %6067 = vmatprep.mubr.msk.bf16.mxu1 %vm437_vm2, %v6379_v51  ;;  %v2591_v42 = vrot.slane %v2589_v21, 5  ;;  %v2619_v46 = vshll.u32 %v5351_v31, 16  ;;  %v2623_v48 = vshrl.u32 %v5351_v31, 16  ;;  %v2634_v51 = vshrl.u32 %v5353_v11, 16  ;;  %v5359_v31 = vld [vmem:[%s6609_s5 + $0x210] sm:$0xf] }
  0xbe   : > { %v6990_v56 = vrot.slane %v2595_v37, 5  ;;  %v2643_v21 = vshll.u32 %v5354_v54, 16  ;;  %v2667_v11 = vshll.u32 %v5357_v28, 16  ;;  %v2660_v52 = vrot.slane %v2658_v27, 4 }
  0xbf   : > { %v2592_v2 = vor.u32 %v2591_v42, %v2588_v41  ;;  %v6996_v3 = vrot.slane %v2619_v46, 5  ;;  %v2625_v5 = vrot.slane %v2623_v48, 4  ;;  %v2636_v10 = vrot.slane %v2634_v51, 4  ;;  %v5358_v51 = vld [vmem:[%s6609_s5 + $0x20c] sm:$0x1] }
  0xc0   : > { %v2574_v41 = vsel %vm6664_vm5, %v2569_v8, %v6971_v35  ;;  %v7034_v43 = vrot.slane %v2643_v21, 5  ;;  %v2682_v46 = vshrl.u32 %v5359_v31, 16  ;;  %v2685_v48 = vshll.u32 %v5359_v31, 16 }
  0xc1   : > { %v7014_v47 = vrot.slane %v2592_v2, 4  ;;  %v2626_v24 = vor.u32 %v2625_v5, %v6996_v3  ;;  %v2640_v62 = vor.u32 %v2639_v12, %v2636_v10  ;;  %v7044_v35 = vrot.slane %v2653_v25, 5  ;;  %v5361_v2 = vld [vmem:[%s6609_s5 + $0x218] sm:$0x1]  ;;  %v5366_v12 = vld [vmem:[%s6609_s5 + $0x22c] sm:$0xf] }
  0xc2   : > { %v7048_v55 = vcombine.low %v2550_v19, %v2560_v20  ;;  %v2622_v8 = vsel %vm6664_vm5, %v7037_v32, %v6996_v3  ;;  %v2687_v10 = vrot.slane %v2685_v48, 5  ;;  %v2719_v17 = vshrl.u32 %v5363_v60, 16  ;;  %v5367_v32 = vld [vmem:[%s6609_s5 + $0x230] sm:$0x1] }
  0xc3   : > { %v7039_v45 = vrot.slane %v2626_v24, 4  ;;  %v2598_v0 = vsel %vm6664_vm5, %v7014_v47, %v6990_v56  ;;  %v2677_v18 = vshll.u32 %v5358_v51, 16  ;;  %v2730_v19 = vshrl.u32 %v5365_v61, 16 }
  0xc4   : > { %6102 = vmatmul.mubr.msk.bf16.gmra.mxu0 %vm437_vm2, %v6382_v9  ;;  %6068 = vmatmul.mubr.msk.bf16.gmra.mxu1 %vm437_vm2, %v6381_v15  ;;  %v2583_v9 = vrot.slane %v2581_v50, 5  ;;  %v2602_v15 = vor.u32 %v2601_v57, %v6990_v56  ;;  %v7042_v50 = vrot.slane %v2640_v62, 4  ;;  %v2733_v20 = vshll.u32 %v5365_v61, 16  ;;  %v5372_v56 = vld [vmem:[%s6609_s5 + $0x244] sm:$0xf] }
  0xc5   : > { %6105 = vmatprep.mubr.msk.bf16.mxu0 %vm437_vm2, %v6384_v16  ;;  %6071 = vmatprep.mubr.msk.bf16.mxu1 %vm437_vm2, %v6383_v22  ;;  %v2629_v16 = vshll.u32 %v5352_v58, 16  ;;  %v2647_v22 = vshrl.u32 %v5354_v54, 16  ;;  %v7052_v58 = vrot.slane %v2667_v11, 5  ;;  %v2743_v62 = vshrl.u32 %v5366_v12, 16 }
  0xc6   : > { %v7025_v37 = vrot.slane %v2602_v15, 4  ;;  %v2584_v42 = vsel %vm6664_vm5, %v2579_v14, %v2583_v9  ;;  %v2684_v9 = vrot.slane %v2682_v46, 4  ;;  %v2706_v14 = vshrl.u32 %v5362_v40, 16 }
  0xc7   : > { %v7027_v38 = vrot.slane %v2629_v16, 5  ;;  %v2649_v44 = vrot.slane %v2647_v22, 4  ;;  %v7050_v57 = vcombine.low %v2574_v41, %v2584_v42  ;;  %v2709_v15 = vshll.u32 %v5362_v40, 16 }
  0xc8   : > { %v2715_v16 = vshll.u32 %v5363_v60, 16  ;;  %v2688_v24 = vor.u32 %v2687_v10, %v2684_v9  ;;  %v2708_v25 = vrot.slane %v2706_v14, 4  ;;  %v2721_v31 = vrot.slane %v2719_v17, 4  ;;  %v5371_v9 = vld [vmem:[%s6609_s5 + $0x240] sm:$0xf] }
  0xc9   : > { %v2650_v54 = vor.u32 %v2649_v44, %v7034_v43  ;;  %v2711_v27 = vrot.slane %v2709_v15, 5  ;;  %v2732_v11 = vrot.slane %v2730_v19, 4  ;;  %v2735_v39 = vrot.slane %v2733_v20, 5 }
  0xca   : > { %v7100_v44 = vrot.slane %v2677_v18, 5  ;;  %v2745_v48 = vrot.slane %v2743_v62, 4  ;;  %v2787_v62 = vshll.u32 %v5372_v56, 16 }
  0xcb   : > { %v2651_v21 = vrot.slane %v2650_v54, 4  ;;  %v2712_v51 = vor.u32 %v2711_v27, %v2708_v25  ;;  %v2736_v40 = vor.u32 %v2735_v39, %v2732_v11  ;;  %v6393_v54 = vld [vmem:[%s6609_s5 + $0x54] sm:$0xff]   ;;  %v2791_v25 = vshrl.u32 %v5372_v56, 16 }
  0xcc   : > { %6106 = vmatmul.mubr.msk.bf16.gmra.mxu0 %vm437_vm2, %v6386_v53  ;;  %6072 = vmatmul.mubr.msk.bf16.gmra.mxu1 %vm437_vm2, %v6385_v6  ;;  %v2663_v53 = vrot.slane %v2661_v30, 5  ;;  %v7085_v30 = vrot.slane %v2715_v16, 5  ;;  %v5374_v16 = vld [vmem:[%s6609_s5 + $0x24c] sm:$0xf] }
  0xcd   : > { %6145 = vmatprep.mubr.msk.bf16.mxu0 %vm437_vm2, %v6387_v7  ;;  %6111 = vmatprep.mubr.msk.bf16.mxu1 %vm437_vm2, %v6955_v26  ;;  %v5360_v26 = vld [vmem:[%s6609_s5 + $0x214] sm:$0xf]  ;;  %v2608_v7 = vsel %vm6664_vm5, %v7025_v37, %v7016_v4  ;;  %v5364_v4 = vld [vmem:[%s6609_s5 + $0x224] sm:$0x1]  ;;  %v2646_v37 = vsel %vm6664_vm5, %v7042_v50, %v7034_v43  ;;  %v2656_v41 = vsel %vm6664_vm5, %v2651_v21, %v7044_v35  ;;  %v7114_v50 = vrot.slane %v2688_v24, 4 }
  0xce   : > { %v2691_v5 = vshll.u32 %v5360_v26, 16  ;;  %v2695_v6 = vshrl.u32 %v5360_v26, 16  ;;  %v2664_v3 = vor.u32 %v2663_v53, %v2660_v52  ;;  %v2725_v43 = vshll.u32 %v5364_v4, 16  ;;  %v6392_v53 = vld [vmem:[%s6609_s5 + $0x48] sm:$0xff]  }
  0xcf   : > { %v2722_v52 = vor.u32 %v2721_v31, %v7085_v30  ;;  %v7132_v10 = vcombine.low %v2646_v37, %v2656_v41  ;;  %v7151_v17 = vrot.slane %v2736_v40, 4  ;;  %v2778_v21 = vshrl.u32 %v5371_v9, 16  ;;  %v6395_v41 = vld [vmem:[%s6609_s5 + $0x6c] sm:$0xff]  }
  0xd0   : > { %v7081_v22 = vrot.slane %v2691_v5, 5  ;;  %v2697_v28 = vrot.slane %v2695_v6, 4  ;;  %v7098_v42 = vrot.slane %v2664_v3, 4  ;;  %v7129_v6 = vld [vmem:[%s6609_s5 + $0x23c] sm:$0x1]  ;;  %v2802_v27 = vshrl.u32 %v5374_v16, 16 }
  0xd1   : > { %v2805_v31 = vshll.u32 %v5374_v16, 16 }
  0xd2   : > { %v2698_v26 = vor.u32 %v2697_v28, %v7081_v22  ;;  %v2670_v47 = vsel %vm6664_vm5, %v7098_v42, %v7052_v58  ;;  %v5540_v28 = vld [vmem:[%s6609_s5 + $0xc] sm:$0xf]  ;;  %v2694_v4 = vsel %vm6664_vm5, %v7114_v50, %v7081_v22  ;;  %v6394_v22 = vld [vmem:[%s6609_s5 + $0x60] sm:$0xff]   ;;  %v5373_v42 = vld [vmem:[%s6609_s5 + $0x248] sm:$0x1]  ;;  %v7196_v50 = vrot.slane %v2787_v62, 5 }
  0xd3   : > { %v3886_v11 = vshrl.u32 %v5540_v28, 16  ;;  %v3889_v39 = vshll.u32 %v5540_v28, 16 }
  0xd4   : > { %6146 = vmatmul.mubr.msk.bf16.vlgmr.msra.gmra.mxu0 %vm437_vm2, %v6388_v36  ;;  %6112 = vmatmul.mubr.msk.bf16.vlgmr.msra.gmra.mxu1 %vm437_vm2, %v6957_v23  ;;  %v6390_v23 = vld [vmem:[%s6609_s5 + $0x30] sm:$0xff]   ;;  %v2632_v36 = vsel %vm6664_vm5, %v7039_v45, %v7027_v38  ;;  %v2699_v5 = vrot.slane %v2698_v26, 4 }
  0xd5   : > { %6212 = vmatpush3.bf16.msra.mxu0 %v6865_v34  ;;  %6178 = vmatpush3.bf16.msra.mxu1 %v6862_v33  ;;  %v2674_v34 = vor.u32 %v2673_v59, %v7052_v58  ;;  %v2701_v33 = vshll.u32 %v5361_v2, 16  ;;  %v5368_v38 = vld [vmem:[%s6609_s5 + $0x234] sm:$0xf]  ;;  %v2749_v59 = vshll.u32 %v5367_v32, 16  ;;  %v7126_v2 = vcombine.low %v2622_v8, %v2632_v36  ;;  %v5375_v58 = vld [vmem:[%s6609_s5 + $0x250] sm:$0xf] }
  0xd6   : > { %6115 = vmatprep.mubr.msk.bf16.mxu1 %vm437_vm2, %v6994_v1  ;;  %6149 = vmatprep.mubr.msk.bf16.mxu0 %vm437_vm2, %v6389_v49  ;;  %v2739_v1 = vshll.u32 %v5366_v12, 16  ;;  %v5369_v49 = vld [vmem:[%s6609_s5 + $0x238] sm:$0xf]  ;;  %v2754_v60 = vshrl.u32 %v5368_v38, 16  ;;  %v2757_v61 = vshll.u32 %v5368_v38, 16  ;;  %v7134_v12 = vrot.slane %v2725_v43, 5 }
  0xd7   : > { %v7106_v45 = vrot.slane %v2674_v34, 4  ;;  %v2703_v35 = vrot.slane %v2701_v33, 5  ;;  %v2767_v15 = vshrl.u32 %v5369_v49, 16  ;;  %v7148_v8 = vrot.slane %v2722_v52, 4 }
  0xd8   : > { %v7108_v46 = vrot.slane %v2739_v1, 5  ;;  %v7153_v3 = vrot.slane %v2749_v59, 5  ;;  %v7155_v18 = vrot.slane %v2754_v60, 4  ;;  %v7157_v19 = vrot.slane %v2757_v61, 5  ;;  %v5541_v1 = vld [vmem:[%s6609_s5 + $0x10] sm:$0xf] }
  0xd9   : > { %v2781_v34 = vshll.u32 %v5371_v9, 16  ;;  %v7173_v33 = vrot.slane %v2767_v15, 4  ;;  %v2811_v36 = vshll.u32 %v5375_v58, 16  ;;  %v2815_v37 = vshrl.u32 %v5375_v58, 16  ;;  %v6396_v58 = vld [vmem:[%s6609_s5 + $0x78] sm:$0xff]  }
  0xda   : > { %v2746_v14 = vor.u32 %v2745_v48, %v7108_v46  ;;  %v3899_v32 = vshrl.u32 %v5541_v1, 16  ;;  %v2728_v48 = vsel %vm6664_vm5, %v7148_v8, %v7134_v12  ;;  %v2804_v52 = vrot.slane %v2802_v27, 4 }
  0xdb   : > { %v2783_v26 = vrot.slane %v2781_v34, 5  ;;  %v7199_v40 = vrot.slane %v2811_v36, 5  ;;  %v2817_v59 = vrot.slane %v2815_v37, 4  ;;  %v3888_v60 = vrot.slane %v3886_v11, 4 }
  0xdc   : > { %6150 = vmatmul.mubr.msk.bf16.gmra.mxu0 %vm437_vm2, %v6390_v23  ;;  %6116 = vmatmul.mubr.msk.bf16.gmra.mxu1 %vm437_vm2, %v7000_v13  ;;  %v5384_v13 = vcombine.low %v2598_v0, %v2608_v7  ;;  %v2680_v0 = vsel %vm6664_vm5, %v7106_v45, %v7100_v44  ;;  %v7146_v7 = vrot.slane %v2712_v51, 4  ;;  %v2773_v23 = vshll.u32 %v7129_v6, 16  ;;  %v5376_v51 = vld [vmem:[%s6609_s5 + $0x254] sm:$0x1] }
  0xdd   : > { %6153 = vmatprep.mubr.msk.bf16.mxu0 %vm437_vm2, %v6391_v29  ;;  %6119 = vmatprep.mubr.msk.bf16.mxu1 %vm437_vm2, %v7048_v55  ;;  %v2763_v55 = vshll.u32 %v5369_v49, 16  ;;  %v2704_v29 = vsel %vm6664_vm5, %v2699_v5, %v2703_v35  ;;  %v7171_v24 = vrot.slane %v2746_v14, 4  ;;  %v2780_v44 = vrot.slane %v2778_v21, 4  ;;  %v5543_v49 = vld [vmem:[%s6609_s5 + $0x18] sm:$0xf] }
  0xde   : > { %v7183_v38 = vcombine.low %v2670_v47, %v2680_v0  ;;  %v7185_v45 = vcombine.low %v2694_v4, %v2704_v29  ;;  %v2718_v43 = vsel %vm6664_vm5, %v7146_v7, %v7085_v30  ;;  %v2793_v35 = vrot.slane %v2791_v25, 4  ;;  %v5545_v25 = vld [vmem:[%s6609_s5 + $0x20] sm:$0x1] }
  0xdf   : > { %v7160_v20 = vrot.slane %v2763_v55, 5  ;;  %v3891_v61 = vrot.slane %v3889_v39, 5  ;;  %v3901_v5 = vrot.slane %v3899_v32, 4  ;;  %v3910_v6 = vshrl.u32 %v5543_v49, 16 }
  0xe0   : > { %v3913_v55 = vshll.u32 %v5543_v49, 16  ;;  %v2760_v9 = vor.u32 %v7157_v19, %v7155_v18  ;;  %v2784_v14 = vor.u32 %v2783_v26, %v2780_v44  ;;  %v2797_v15 = vshll.u32 %v5373_v42, 16 }
  0xe1   : > { %v2770_v12 = vor.u32 %v7173_v33, %v7160_v20  ;;  %v7213_v56 = vrot.slane %v2773_v23, 5  ;;  %v2794_v47 = vor.u32 %v2793_v35, %v7196_v50  ;;  %v2818_v16 = vor.u32 %v2817_v59, %v7199_v40 }
  0xe2   : > { %v2821_v18 = vshll.u32 %v5376_v51, 16  ;;  %v3892_v21 = vor.u32 %v3891_v61, %v3888_v60  ;;  %v3912_v34 = vrot.slane %v3910_v6, 4  ;;  %v3915_v28 = vrot.slane %v3913_v55, 5  ;;  %v5548_v60 = vld [vmem:[%s6609_s5 + $0x2c] sm:$0x1] }
  0xe3   : > { %v7222_v4 = vrot.slane %v2760_v9, 4  ;;  %v7224_v29 = vrot.slane %v2770_v12, 4  ;;  %v2799_v33 = vrot.slane %v2797_v15, 5  ;;  %v2742_v62 = vsel %vm6664_vm5, %v7151_v17, %v7108_v46  ;;  %v5549_v61 = vld [vmem:[%s6609_s5 + $0x30] sm:$0xf] }
  0xe4   : > { %6154 = vmatmul.mubr.msk.bf16.gmra.mxu0 %vm437_vm2, %v6392_v53  ;;  %6120 = vmatmul.mubr.msk.bf16.gmra.mxu1 %vm437_vm2, %v7050_v57  ;;  %v3895_v57 = vshll.u32 %v5541_v1, 16  ;;  %v2807_v53 = vrot.slane %v2805_v31, 5  ;;  %v7228_v1 = vcombine.low %v2718_v43, %v2728_v48  ;;  %v2795_v36 = vrot.slane %v2794_v47, 4  ;;  %v5550_v6 = vld [vmem:[%s6609_s5 + $0x34] sm:$0xf] }
  0xe5   : > { %6157 = vmatprep.mubr.msk.bf16.mxu0 %vm437_vm2, %v6393_v54  ;;  %6123 = vmatprep.mubr.msk.bf16.mxu1 %vm437_vm2, %v5384_v13  ;;  %v5544_v13 = vld [vmem:[%s6609_s5 + $0x1c] sm:$0xf]  ;;  %v5542_v54 = vld [vmem:[%s6609_s5 + $0x14] sm:$0x1]  ;;  %v2819_v11 = vrot.slane %v2818_v16, 4  ;;  %v2823_v39 = vrot.slane %v2821_v18, 5  ;;  %v2752_v46 = vsel %vm6664_vm5, %v7171_v24, %v7153_v3  ;;  %v2766_v35 = vsel %vm6664_vm5, %v7222_v4, %v7160_v20 }
  0xe6   : > { %v7203_v30 = vrot.slane %v3895_v57, 5  ;;  %v3919_v0 = vshll.u32 %v5544_v13, 16  ;;  %v3923_v7 = vshrl.u32 %v5544_v13, 16  ;;  %v2808_v8 = vor.u32 %v2807_v53, %v2804_v52  ;;  %v5553_v4 = vld [vmem:[%s6609_s5 + $0x40] sm:$0xf] }
  0xe7   : > { %v3905_v19 = vshll.u32 %v5542_v54, 16  ;;  %v3893_v42 = vrot.slane %v3892_v21, 4  ;;  %v3916_v57 = vor.u32 %v3915_v28, %v3912_v34  ;;  %v3929_v17 = vshll.u32 %v5545_v25, 16 }
  0xe8   : > { %v3902_v23 = vor.u32 %v3901_v5, %v7203_v30  ;;  %v7235_v27 = vrot.slane %v3919_v0, 5  ;;  %v3925_v31 = vrot.slane %v3923_v7, 4  ;;  %v2809_v37 = vrot.slane %v2808_v8, 4 }
  0xe9   : > { %v3907_v26 = vrot.slane %v3905_v19, 5  ;;  %v2776_v3 = vsel %vm6664_vm5, %v7224_v29, %v7213_v56  ;;  %v2800_v20 = vsel %vm6664_vm5, %v2795_v36, %v2799_v33  ;;  %v2824_v59 = vsel %vm6664_vm5, %v2819_v11, %v2823_v39  ;;  %v5555_v29 = vld [vmem:[%s6609_s5 + $0x48] sm:$0xf]  ;;  %v5556_v36 = vld [vmem:[%s6609_s5 + $0x4c] sm:$0xf] }
  0xea   : > { %v3903_v44 = vrot.slane %v3902_v23, 4  ;;  %v3926_v24 = vor.u32 %v3925_v31, %v7235_v27  ;;  %v2814_v53 = vsel %vm6664_vm5, %v2809_v37, %v7199_v40  ;;  %v3898_v13 = vsel %vm6664_vm5, %v3893_v42, %v7203_v30  ;;  %v6399_v30 = vld [vmem:[%s6609_s5 + $0x9c] sm:$0xff]  }
  0xeb   : > { %v7285_v54 = vrot.slane %v3916_v57, 4  ;;  %v7290_v55 = vrot.slane %v3929_v17, 5  ;;  %v3953_v47 = vshll.u32 %v5548_v60, 16  ;;  %v3958_v0 = vshrl.u32 %v5549_v61, 16  ;;  %v6400_v57 = vld [vmem:[%s6609_s5 + $0xa8] sm:$0xff]  }
  0xec   : > { %6158 = vmatmul.mubr.msk.bf16.gmra.mxu0 %vm437_vm2, %v6394_v22  ;;  %6124 = vmatmul.mubr.msk.bf16.gmra.mxu1 %vm437_vm2, %v7126_v2  ;;  %v6397_v2 = vld [vmem:[%s6609_s5 + $0x84] sm:$0xff]   ;;  %v7299_v56 = vrot.slane %v3926_v24, 4  ;;  %v3961_v7 = vshll.u32 %v5549_v61, 16  ;;  %v5390_v16 = vcombine.low %v2742_v62, %v2752_v46  ;;  %v3967_v18 = vshll.u32 %v5550_v6, 16 }
  0xed   : > { %6161 = vmatprep.mubr.msk.bf16.mxu0 %vm437_vm2, %v6395_v41  ;;  %6127 = vmatprep.mubr.msk.bf16.mxu1 %vm437_vm2, %v7132_v10  ;;  %v7226_v10 = vrot.slane %v2784_v14, 4  ;;  %v5546_v22 = vld [vmem:[%s6609_s5 + $0x24] sm:$0xf]  ;;  %v5547_v41 = vld [vmem:[%s6609_s5 + $0x28] sm:$0xf]  ;;  %v3971_v19 = vshrl.u32 %v5550_v6, 16  ;;  %v7306_v21 = vcombine.low %v2766_v35, %v2776_v3  ;;  %v7310_v34 = vcombine.low %v2814_v53, %v2824_v59 }
  0xee   : > { %v3934_v43 = vshrl.u32 %v5546_v22, 16  ;;  %v3937_v48 = vshll.u32 %v5546_v22, 16  ;;  %v3943_v5 = vshll.u32 %v5547_v41, 16  ;;  %v3947_v14 = vshrl.u32 %v5547_v41, 16  ;;  %v7330_v22 = vld [vmem:[%s6609_s5 + $0x38] sm:$0x1] }
  0xef   : > { %v2790_v52 = vsel %vm6664_vm5, %v7226_v10, %v7196_v50  ;;  %v3908_v50 = vsel %vm6664_vm5, %v3903_v44, %v3907_v26  ;;  %v3922_v33 = vsel %vm6664_vm5, %v7285_v54, %v7235_v27  ;;  %v3932_v11 = vsel %vm6664_vm5, %v7299_v56, %v7290_v55  ;;  %v5558_v44 = vld [vmem:[%s6609_s5 + $0x54] sm:$0xf]  ;;  %v5562_v56 = vld [vmem:[%s6609_s5 + $0x64] sm:$0xf] }
  0xf0   : > { %v7292_v9 = vrot.slane %v3934_v43, 4  ;;  %v7294_v12 = vrot.slane %v3937_v48, 5  ;;  %v7308_v23 = vcombine.low %v2790_v52, %v2800_v20  ;;  %v7312_v28 = vcombine.low %v3898_v13, %v3908_v50  ;;  %v5559_v48 = vld [vmem:[%s6609_s5 + $0x58] sm:$0xf] }
  0xf1   : > { %v7325_v25 = vrot.slane %v3943_v5, 5  ;;  %v7327_v31 = vrot.slane %v3947_v14, 4  ;;  %v7342_v39 = vrot.slane %v3953_v47, 5  ;;  %v3960_v41 = vrot.slane %v3958_v0, 4  ;;  %v6401_v50 = vld [vmem:[%s6609_s5 + $0xb4] sm:$0xff]  }
  0xf2   : > { %v3940_v62 = vor.u32 %v7294_v12, %v7292_v9  ;;  %v3963_v42 = vrot.slane %v3961_v7, 5  ;;  %v7349_v46 = vrot.slane %v3967_v18, 5  ;;  %v3991_v3 = vshll.u32 %v5553_v4, 16  ;;  %v5554_v0 = vld [vmem:[%s6609_s5 + $0x44] sm:$0x1] }
  0xf3   : > { %v3995_v24 = vshrl.u32 %v5553_v4, 16  ;;  %v4009_v52 = vshll.u32 %v5555_v29, 16  ;;  %v4015_v53 = vshll.u32 %v5556_v36, 16  ;;  %v4019_v59 = vshrl.u32 %v5556_v36, 16  ;;  %v5557_v18 = vld [vmem:[%s6609_s5 + $0x50] sm:$0x1] }
  0xf4   : > { %v7239_v32 = vpop.f32.mrf.mxu0  ;;  %6162 = vmatmul.mubr.msk.bf16.gmra.mxu0 %vm437_vm2, %v6396_v58  ;;  %v7246_v49 = vpop.f32.mrf.mxu1  ;;  %6128 = vmatmul.mubr.msk.bf16.gmra.mxu1 %vm437_vm2, %v7183_v38  ;;  %v6398_v38 = vld [vmem:[%s6609_s5 + $0x90] sm:$0xff]   ;;  %v5552_v58 = vld [vmem:[%s6609_s5 + $0x3c] sm:$0xf]  ;;  %v4030_v60 = vshrl.u32 %v5558_v44, 16  ;;  %v4033_v61 = vshll.u32 %v5558_v44, 16  ;;  %v3950_v5 = vor.u32 %v7327_v31, %v7325_v25  ;;  %v3977_v6 = vshll.u32 %v7330_v22, 16 }
  0xf5   : > { %6165 = vmatprep.mubr.msk.bf16.mxu0 %vm437_vm2, %v6397_v2  ;;  %6131 = vmatprep.mubr.msk.bf16.mxu1 %vm437_vm2, %v7185_v45  ;;  %v3982_v17 = vshrl.u32 %v5552_v58, 16  ;;  %v3985_v43 = vshll.u32 %v5552_v58, 16  ;;  %v4039_v9 = vshll.u32 %v5559_v48, 16  ;;  %v4043_v12 = vshrl.u32 %v5559_v48, 16  ;;  %v5560_v48 = vld [vmem:[%s6609_s5 + $0x5c] sm:$0x1] }
  0xf6   : > { %v7260_v51 = vpop.f32.mrf.mxu0  ;;  %v7278_v45 = vpop.f32.mrf.mxu1  ;;  %v7369_v58 = vrot.slane %v3991_v3, 5  ;;  %v3997_v4 = vrot.slane %v3995_v24, 4  ;;  %v4011_v31 = vrot.slane %v4009_v52, 5  ;;  %v7374_v36 = vrot.slane %v4015_v53, 5 }
  0xf7   : > { %v3984_v7 = vrot.slane %v3982_v17, 4  ;;  %v4035_v44 = vrot.slane %v4033_v61, 5  ;;  %v7381_v17 = vrot.slane %v3940_v62, 4  ;;  %v7384_v3 = vrot.slane %v4039_v9, 5 }
  0xf8   : > { %v7288_v40 = vpop.f32.mrf.mxu0  ;;  %v7296_v15 = vpop.f32.mrf.mxu1  ;;  %v3998_v61 = vor.u32 %v3997_v4, %v7369_v58  ;;  %v4025_v9 = vshll.u32 %v5557_v18, 16 }
  0xf9   : > { %v3946_v27 = vsel %vm6664_vm5, %v7381_v17, %v7325_v25 }
  0xfa   : > { %v7301_v8 = vpop.f32.mrf.mxu0  ;;  %v7304_v2 = vpop.f32.mrf.mxu1  ;;  %v4027_v25 = vrot.slane %v4025_v9, 5 }
  0xfc   : > { %v7316_v10 = vpop.f32.mrf.mxu0  ;;  %6166 = vmatmul.mubr.msk.bf16.gmra.mxu0 %vm437_vm2, %v6398_v38  ;;  %v7333_v37 = vpop.f32.mrf.mxu1  ;;  %6132 = vmatmul.mubr.msk.bf16.gmra.mxu1 %vm437_vm2, %v7228_v1  ;;  %v3973_v1 = vrot.slane %v3971_v19, 4  ;;  %v4006_v38 = vshrl.u32 %v5555_v29, 16 }
  0xfd   : > { %6169 = vmatprep.mubr.msk.bf16.mxu0 %vm437_vm2, %v6399_v30  ;;  %6135 = vmatprep.mubr.msk.bf16.mxu1 %vm437_vm2, %v5390_v16  ;;  %v3964_v30 = vor.u32 %v3963_v42, %v3960_v41  ;;  %v3987_v16 = vrot.slane %v3985_v43, 5  ;;  %v4021_v41 = vrot.slane %v4019_v59, 4  ;;  %v4032_v42 = vrot.slane %v4030_v60, 4  ;;  %v5561_v59 = vld [vmem:[%s6609_s5 + $0x60] sm:$0xf] }
  0xfe   : > { %v7345_v26 = vpop.f32.mrf.mxu0  ;;  %v7352_v35 = vpop.f32.mrf.mxu1  ;;  %v3974_v47 = vor.u32 %v3973_v1, %v7349_v46  ;;  %v4008_v29 = vrot.slane %v4006_v38, 4  ;;  %v4001_v43 = vshll.u32 %v5554_v0, 16  ;;  %v3951_v38 = vrot.slane %v3950_v5, 4  ;;  %v6402_v0 = vld [vmem:[%s6609_s5 + $0xc0] sm:$0xff]  }
  0xff   : > { %v3965_v52 = vrot.slane %v3964_v30, 4  ;;  %v3988_v60 = vor.u32 %v3987_v16, %v3984_v7  ;;  %v4022_v5 = vor.u32 %v4021_v41, %v7374_v36  ;;  %v4049_v30 = vshll.u32 %v5560_v48, 16  ;;  %v6403_v7 = vld [vmem:[%s6609_s5 + $0xd8] sm:$0xff]   ;;  %v5565_v41 = vld [vmem:[%s6609_s5 + $0x70] sm:$0xf] }
 0x100   : > { %v7354_v20 = vpop.f32.mrf.mxu0  ;;  %v7356_v13 = vpop.f32.mrf.mxu1  ;;  %v3975_v53 = vrot.slane %v3974_v47, 4  ;;  %v7413_v16 = vrot.slane %v4001_v43, 5  ;;  %v4054_v18 = vshrl.u32 %v5561_v59, 16  ;;  %v4057_v4 = vshll.u32 %v5561_v59, 16 }
 0x101   : > { %v3956_v54 = vsel %vm6664_vm5, %v3951_v38, %v7342_v39  ;;  %v3999_v43 = vrot.slane %v3998_v61, 4  ;;  %v4023_v39 = vrot.slane %v4022_v5, 4  ;;  %v4051_v38 = vrot.slane %v4049_v30, 5 }
 0x102   : > { %v7362_v14 = vpop.f32.mrf.mxu0  ;;  %v7367_v19 = vpop.f32.mrf.mxu1  ;;  %v4056_v59 = vrot.slane %v4054_v18, 4  ;;  %v4067_v61 = vshrl.u32 %v5562_v56, 16  ;;  %v4087_v5 = vshll.u32 %v5565_v41, 16  ;;  %v5591_v30 = vcombine.low %v3946_v27, %v3956_v54  ;;  %v6404_v18 = vld [vmem:[%s6609_s5 + $0xe4] sm:$0xff]  }
 0x103   : > { %v4028_v27 = vsel %vm6664_vm5, %v4023_v39, %v4027_v25 }
 0x104   : > { %v7371_v22 = vpop.f32.mrf.mxu0  ;;  %6170 = vmatmul.mubr.msk.bf16.gmra.mxu0 %vm437_vm2, %v6400_v57  ;;  %v7376_v1 = vpop.f32.mrf.mxu1  ;;  %6136 = vmatmul.mubr.msk.bf16.gmra.mxu1 %vm437_vm2, %v7306_v21  ;;  %v4045_v57 = vrot.slane %v4043_v12, 4  ;;  %v3979_v21 = vrot.slane %v3977_v6, 5  ;;  %v4036_v6 = vor.u32 %v4035_v44, %v4032_v42  ;;  %v3989_v44 = vrot.slane %v3988_v60, 4 }
 0x105   : > { %8192 = vst [vmem:[#allocation4_spill] sm:$0xff] %v7376_v1  ;;  %6173 = vmatprep.mubr.msk.bf16.mxu0 %vm437_vm2, %v6401_v50  ;;  %6139 = vmatprep.mubr.msk.bf16.mxu1 %vm437_vm2, %v7308_v23  ;;  %v4012_v50 = vor.u32 %v4011_v31, %v4008_v29  ;;  %v7407_v23 = vcombine.low %v3922_v33, %v3932_v11  ;;  %v5564_v31 = vld [vmem:[%s6609_s5 + $0x6c] sm:$0xf]  ;;  %v4059_v60 = vrot.slane %v4057_v4, 5 }
 0x106   : > { %v7386_v24 = vpop.f32.mrf.mxu0  ;;  %v7391_v62 = vpop.f32.mrf.mxu1  ;;  %v4046_v55 = vor.u32 %v4045_v57, %v7384_v3  ;;  %v3970_v33 = vsel %vm6664_vm5, %v3965_v52, %v7349_v46  ;;  %v3980_v11 = vsel %vm6664_vm5, %v3975_v53, %v3979_v21  ;;  %v4037_v57 = vrot.slane %v4036_v6, 4  ;;  %v5563_v21 = vld [vmem:[%s6609_s5 + $0x68] sm:$0x1] }
 0x107   : > { %8193 = vst [vmem:[#allocation5_spill] sm:$0xff] %v7391_v62  ;;  %v4013_v48 = vrot.slane %v4012_v50, 4  ;;  %v4063_v46 = vshll.u32 %v5562_v56, 16  ;;  %v4078_v9 = vshrl.u32 %v5564_v31, 16  ;;  %v4091_v6 = vshrl.u32 %v5565_v41, 16 }
 0x108   : > { %v7394_v12 = vpop.f32.mrf.mxu0  ;;  %v7410_v47 = vpop.f32.mrf.mxu1  ;;  %v4047_v53 = vrot.slane %v4046_v55, 4  ;;  %v3994_v55 = vsel %vm6664_vm5, %v3989_v44, %v7369_v58  ;;  %v5567_v58 = vld [vmem:[%s6609_s5 + $0x78] sm:$0xf]  ;;  %v4060_v44 = vor.u32 %v4059_v60, %v4056_v59 }
 0x109   : > { %8194 = vst [vmem:[#allocation6_spill] sm:$0xff] %v7410_v47  ;;  %v4018_v4 = vsel %vm6664_vm5, %v4013_v48, %v7374_v36  ;;  %v7466_v54 = vrot.slane %v4063_v46, 5  ;;  %v4069_v36 = vrot.slane %v4067_v61, 4  ;;  %v5568_v48 = vld [vmem:[%s6609_s5 + $0x7c] sm:$0xf]  ;;  %v4080_v39 = vrot.slane %v4078_v9, 4 }
 0x10a   : > { %v7417_v29 = vpop.f32.mrf.mxu0  ;;  %v7433_v42 = vpop.f32.mrf.mxu1  ;;  %v4052_v41 = vsel %vm6664_vm5, %v4047_v53, %v4051_v38  ;;  %v4105_v38 = vshll.u32 %v5567_v58, 16  ;;  %v4111_v61 = vshll.u32 %v5568_v48, 16  ;;  %v4115_v9 = vshrl.u32 %v5568_v48, 16 }
 0x10b   : > { %8195 = vst [vmem:[#allocation7_spill] sm:$0xff] %v7433_v42 }
 0x10c   : > { %v7435_v17 = vpop.f32.mrf.mxu0  ;;  %6174 = vmatmul.mubr.msk.bf16.gmra.mxu0 %vm437_vm2, %v6402_v0  ;;  %v7438_v52 = vpop.f32.mrf.mxu1  ;;  %6140 = vmatmul.mubr.msk.bf16.gmra.mxu1 %vm437_vm2, %v7310_v34  ;;  %v4081_v0 = vshll.u32 %v5564_v31, 16  ;;  %v6405_v31 = vld [vmem:[%s6609_s5 + $0xf0] sm:$0xff]  }
 0x10d   : > { %8196 = vst [vmem:[#allocation8_spill] sm:$0xff] %v7438_v52  ;;  %6213 = vmatprep.mubr.msk.bf16.mxu0 %vm437_vm2, %v7312_v28  ;;  %6179 = vmatprep.mubr.msk.bf16.mxu1 %vm437_vm2, %v6403_v7  ;;  %v7450_v28 = vcombine.low %v3970_v33, %v3980_v11  ;;  %v4004_v7 = vsel %vm6664_vm5, %v3999_v43, %v7413_v16  ;;  %v4073_v33 = vshll.u32 %v5563_v21, 16  ;;  %v5566_v43 = vld [vmem:[%s6609_s5 + $0x74] sm:$0x1]  ;;  %v7481_v21 = vrot.slane %v4087_v5, 5 }
 0x10e   : > { %v7445_v50 = vpop.f32.mrf.mxu0  ;;  %v7448_v34 = vpop.f32.mrf.mxu1  ;;  %v4042_v16 = vsel %vm6664_vm5, %v4037_v57, %v7384_v3  ;;  %v4083_v46 = vrot.slane %v4081_v0, 5  ;;  %v5593_v42 = vcombine.low %v3994_v55, %v4004_v7  ;;  %v7486_v3 = vcombine.low %v4018_v4, %v4028_v27  ;;  %v5571_v0 = vld [vmem:[%s6609_s5 + $0x88] sm:$0xf] }
 0x10f   : > { %8197 = vst [vmem:[#allocation9_spill] sm:$0xff] %v7448_v34  ;;  %v5570_v34 = vld [vmem:[%s6609_s5 + $0x84] sm:$0xf]  ;;  %v4102_v57 = vshrl.u32 %v5567_v58, 16  ;;  %v7490_v59 = vcombine.low %v4042_v16, %v4052_v41  ;;  %v7492_v60 = vrot.slane %v4073_v33, 5  ;;  %v4097_v55 = vshll.u32 %v5566_v43, 16 }
 0x110   : > { %v7458_v56 = vpop.f32.mrf.mxu0  ;;  %v7469_v11 = vpop.f32.mrf.mxu1  ;;  %v4126_v7 = vshrl.u32 %v5570_v34, 16  ;;  %v4129_v4 = vshll.u32 %v5570_v34, 16  ;;  %v7500_v33 = vrot.slane %v4060_v44, 4  ;;  %v4084_v58 = vor.u32 %v4083_v46, %v4080_v39  ;;  %v6406_v39 = vld [vmem:[%s6609_s5 + $0xfc] sm:$0xff]   ;;  %v6407_v46 = vld [vmem:[%s6609_s5 + $0x108] sm:$0xff]   ;;  %v8208_v63 = vld [vmem:[#allocation6_spill] sm:$0xff] }
 0x111   : > { %8198 = vst [vmem:[#allocation10_spill] sm:$0xff] %v7469_v11  ;;  %v4093_v11 = vrot.slane %v4091_v6, 4  ;;  %v4070_v6 = vor.u32 %v4069_v36, %v7466_v54  ;;  %v4107_v41 = vrot.slane %v4105_v38, 5  ;;  %v4135_v36 = vshll.u32 %v5571_v0, 16 }
 0x112   : > { %v7479_v25 = vpop.f32.mrf.mxu0  ;;  %v7484_v52 = vpop.f32.mrf.mxu1  ;;  %v4139_v43 = vshrl.u32 %v5571_v0, 16  ;;  %v4117_v44 = vrot.slane %v4115_v9, 4  ;;  %v4128_v38 = vrot.slane %v4126_v7, 4  ;;  %v4131_v0 = vrot.slane %v4129_v4, 5  ;;  %v5573_v9 = vld [vmem:[%s6609_s5 + $0x90] sm:$0xf] }
 0x113   : > { %8199 = vst [vmem:[#allocation11_spill] sm:$0xff] %v7484_v52  ;;  %v7524_v1 = vrot.slane %v4135_v36, 5 }
 0x114   : > { %v6011_v53 = vpop.f32.mrf.mxu0  ;;  %6214 = vmatmul.mubr.msk.bf16.vlgmr.msra.gmra.mxu0 %vm437_vm2, %v7407_v23  ;;  %v5977_v5 = vpop.f32.mrf.mxu1  ;;  %6180 = vmatmul.mubr.msk.bf16.vlgmr.msra.gmra.mxu1 %vm437_vm2, %v6404_v18  ;;  %v4094_v18 = vor.u32 %v4093_v11, %v7481_v21  ;;  %v7511_v11 = vrot.slane %v4070_v6, 4 }
 0x115   : > { %6217 = vmatprep.mubr.msk.bf16.mxu0 %vm437_vm2, %v5591_v30  ;;  %v828_v23 = vadd.f32 %v5977_v5, %v7239_v32  ;;  %6183 = vmatprep.mubr.msk.bf16.mxu1 %vm437_vm2, %v6405_v31  ;;  %v4104_v30 = vrot.slane %v4102_v57, 4  ;;  %v5569_v5 = vld [vmem:[%s6609_s5 + $0x80] sm:$0x1]  ;;  %v7507_v31 = vrot.slane %v4111_v61, 5  ;;  %v7513_v57 = vrot.slane %v4097_v55, 5 }
 0x116   : > { %v1516_v27 = vpop.f32.mrf.mxu0  ;;  %v819_v16 = vpop.f32.mrf.mxu1  ;;  %v5572_v61 = vld [vmem:[%s6609_s5 + $0x8c] sm:$0x1]  ;;  %v4121_v6 = vshll.u32 %v5569_v5, 16  ;;  %v4141_v55 = vrot.slane %v4139_v43, 4 }
 0x117   : > { %v7503_v48 = vadd.f32 %v6011_v53, %v828_v23  ;;  %v820_v34 = vadd.f32 %v819_v16, %v7260_v51  ;;  %v7518_v16 = vrot.slane %v4084_v58, 4  ;;  %v4108_v62 = vor.u32 %v4107_v41, %v4104_v30 }
 0x118   : > { %v6012_v32 = vpop.f32.mrf.mxu0  ;;  %v5978_v52 = vpop.f32.mrf.mxu1  ;;  %v4150_v30 = vshrl.u32 %v5573_v9, 16 }
 0x119   : > { %8200 = vst [vmem:[#allocation12_spill] sm:$0xff] %v7503_v48  ;;  %v7515_v53 = vadd.f32 %v1516_v27, %v820_v34  ;;  %v831_v51 = vadd.f32 %v5978_v52, %v7288_v40  ;;  %v7520_v48 = vrot.slane %v4094_v18, 4  ;;  %v4118_v52 = vor.u32 %v4117_v44, %v7507_v31  ;;  %v5574_v18 = vld [vmem:[%s6609_s5 + $0x94] sm:$0xf] }
 0x11a   : > { %v1519_v23 = vpop.f32.mrf.mxu0  ;;  %v822_v47 = vpop.f32.mrf.mxu1  ;;  %v4153_v34 = vshll.u32 %v5573_v9, 16  ;;  %v4109_v44 = vrot.slane %v4108_v62, 4  ;;  %v6408_v9 = vld [vmem:[%s6609_s5 + $0x114] sm:$0xff]   ;;  %v4163_v62 = vshrl.u32 %v5574_v18, 16 }
 0x11b   : > { %v7526_v7 = vadd.f32 %v6012_v32, %v831_v51  ;;  %v823_v4 = vadd.f32 %v822_v47, %v7301_v8  ;;  %v4132_v47 = vor.u32 %v4131_v0, %v4128_v38  ;;  %v4100_v5 = vsel %vm6664_vm5, %v7520_v48, %v7513_v57  ;;  %v5576_v38 = vld [vmem:[%s6609_s5 + $0x9c] sm:$0xf] }
 0x11c   : > { %v6015_v27 = vpop.f32.mrf.mxu0  ;;  %6218 = vmatmul.mubr.msk.bf16.gmra.mxu0 %vm437_vm2, %v7450_v28  ;;  %v5981_v58 = vpop.f32.mrf.mxu1  ;;  %6184 = vmatmul.mubr.msk.bf16.gmra.mxu1 %vm437_vm2, %v6406_v39  ;;  %v4145_v28 = vshll.u32 %v5572_v61, 16  ;;  %v4123_v39 = vrot.slane %v4121_v6, 5  ;;  %v4152_v48 = vrot.slane %v4150_v30, 4  ;;  %v4155_v40 = vrot.slane %v4153_v34, 5 }
 0x11d   : > { %8201 = vst [vmem:[#allocation13_spill] sm:$0xff] %v7526_v7  ;;  %6221 = vmatprep.mubr.msk.bf16.mxu0 %vm437_vm2, %v5593_v42  ;;  %v7543_v41 = vadd.f32 %v1519_v23, %v823_v4  ;;  %v844_v36 = vadd.f32 %v5981_v58, %v7316_v10  ;;  %6187 = vmatprep.mubr.msk.bf16.mxu1 %vm437_vm2, %v6407_v46  ;;  %v4159_v23 = vshll.u32 %v5574_v18, 16  ;;  %v4133_v4 = vrot.slane %v4132_v47, 4 }
 0x11e   : > { %v1532_v43 = vpop.f32.mrf.mxu0  ;;  %v4090_v42 = vsel %vm6664_vm5, %v7518_v16, %v7481_v21  ;;  %v835_v32 = vpop.f32.mrf.mxu1  ;;  %v4142_v10 = vor.u32 %v4141_v55, %v7524_v1  ;;  %v4119_v21 = vrot.slane %v4118_v52, 4  ;;  %v5577_v16 = vld [vmem:[%s6609_s5 + $0xa0] sm:$0xf]  ;;  %v4147_v58 = vrot.slane %v4145_v28, 5 }
 0x11f   : > { %8202 = vst [vmem:[#allocation14_spill] sm:$0xff] %v7543_v41  ;;  %v7557_v46 = vadd.f32 %v6015_v27, %v844_v36  ;;  %v836_v0 = vadd.f32 %v835_v32, %v7345_v26  ;;  %v6409_v27 = vld [vmem:[%s6609_s5 + $0x120] sm:$0xff]   ;;  %v5575_v36 = vld [vmem:[%s6609_s5 + $0x98] sm:$0x1]  ;;  %v4174_v8 = vshrl.u32 %v5576_v38, 16  ;;  %v4177_v52 = vshll.u32 %v5576_v38, 16 }
 0x120   : > { %v6016_v51 = vpop.f32.mrf.mxu0  ;;  %v5982_v61 = vpop.f32.mrf.mxu1  ;;  %v4143_v32 = vrot.slane %v4142_v10, 4  ;;  %v4187_v41 = vshrl.u32 %v5577_v16, 16  ;;  %v4124_v18 = vsel %vm6664_vm5, %v4119_v21, %v4123_v39  ;;  %v4169_v34 = vshll.u32 %v5575_v36, 16  ;;  %v5578_v38 = vld [vmem:[%s6609_s5 + $0xa4] sm:$0x1] }
 0x121   : > { %8203 = vst [vmem:[#allocation15_spill] sm:$0xff] %v7557_v46  ;;  %v7562_v57 = vadd.f32 %v1532_v43, %v836_v0  ;;  %v847_v6 = vadd.f32 %v5982_v61, %v7354_v20  ;;  %v4183_v46 = vshll.u32 %v5577_v16, 16  ;;  %v4114_v20 = vsel %vm6664_vm5, %v4109_v44, %v7507_v31 }
 0x122   : > { %v1535_v55 = vpop.f32.mrf.mxu0  ;;  %v838_v26 = vpop.f32.mrf.mxu1  ;;  %v7583_v43 = vrot.slane %v4159_v23, 5  ;;  %v4156_v39 = vor.u32 %v4155_v40, %v4152_v48  ;;  %v4189_v23 = vrot.slane %v4187_v41, 4  ;;  %v8204_v40 = vsel %vm6664_vm5, %v7511_v11, %v7492_v60  ;;  %v5579_v41 = vld [vmem:[%s6609_s5 + $0xa8] sm:$0xf]  ;;  %v5580_v60 = vld [vmem:[%s6609_s5 + $0xac] sm:$0xf] }
 0x123   : > { %v7567_v7 = vadd.f32 %v6016_v51, %v847_v6  ;;  %v839_v47 = vadd.f32 %v838_v26, %v7362_v14  ;;  %v4138_v14 = vsel %vm6664_vm5, %v4133_v4, %v7524_v1  ;;  %v4148_v1 = vsel %vm6664_vm5, %v4143_v32, %v4147_v58  ;;  %v6410_v58 = vld [vmem:[%s6609_s5 + $0x12c] sm:$0xff]  }
 0x124   : > { %v6019_v28 = vpop.f32.mrf.mxu0  ;;  %6222 = vmatmul.mubr.msk.bf16.gmra.mxu0 %vm437_vm2, %v7486_v3  ;;  %v5985_v30 = vpop.f32.mrf.mxu1  ;;  %6188 = vmatmul.mubr.msk.bf16.gmra.mxu1 %vm437_vm2, %v6408_v9  ;;  %v4165_v3 = vrot.slane %v4163_v62, 4  ;;  %v4179_v51 = vrot.slane %v4177_v52, 5  ;;  %v7592_v21 = vrot.slane %v4183_v46, 5  ;;  %v5597_v46 = vcombine.low %v4090_v42, %v4100_v5  ;;  %v5582_v5 = vld [vmem:[%s6609_s5 + $0xb4] sm:$0xf] }
 0x125   : > { %6225 = vmatprep.mubr.msk.bf16.mxu0 %vm437_vm2, %v7490_v59  ;;  %v7585_v10 = vadd.f32 %v1535_v55, %v839_v47  ;;  %v860_v31 = vadd.f32 %v5985_v30, %v7371_v22  ;;  %6191 = vmatprep.mubr.msk.bf16.mxu1 %vm437_vm2, %v6409_v27  ;;  %v4176_v59 = vrot.slane %v4174_v8, 4  ;;  %v8205_v8 = vsel %vm6664_vm5, %v7500_v33, %v7466_v54  ;;  %v6411_v33 = vld [vmem:[%s6609_s5 + $0x138] sm:$0xff]  }
 0x126   : > { %v1548_v44 = vpop.f32.mrf.mxu0  ;;  %v851_v0 = vpop.f32.mrf.mxu1  ;;  %v5596_v9 = vcombine.low %v8205_v8, %v8204_v40  ;;  %v7609_v48 = vcombine.low %v4114_v20, %v4124_v18  ;;  %v7612_v62 = vrot.slane %v4169_v34, 5  ;;  %v4193_v6 = vshll.u32 %v5578_v38, 16 }
 0x127   : > { %v7594_v16 = vadd.f32 %v6019_v28, %v860_v31  ;;  %v852_v22 = vadd.f32 %v851_v0, %v7386_v24  ;;  %v4166_v24 = vor.u32 %v4165_v3, %v7583_v43  ;;  %v7619_v27 = vcombine.low %v4138_v14, %v4148_v1  ;;  %v5583_v28 = vld [vmem:[%s6609_s5 + $0xb8] sm:$0xf] }
 0x128   : > { %v6020_v61 = vpop.f32.mrf.mxu0  ;;  %v5986_v4 = vpop.f32.mrf.mxu1  ;;  %v7621_v42 = vrot.slane %v4156_v39, 4  ;;  %v4180_v26 = vor.u32 %v4179_v51, %v4176_v59  ;;  %v4190_v32 = vor.u32 %v4189_v23, %v7592_v21  ;;  %v4198_v52 = vshrl.u32 %v5579_v41, 16 }
 0x129   : > { %v7615_v11 = vadd.f32 %v1548_v44, %v852_v22  ;;  %v863_v55 = vadd.f32 %v5986_v4, %v7394_v12  ;;  %v4201_v47 = vshll.u32 %v5579_v41, 16  ;;  %v4207_v12 = vshll.u32 %v5580_v60, 16  ;;  %v5581_v41 = vld [vmem:[%s6609_s5 + $0xb0] sm:$0x1] }
 0x12a   : > { %v1551_v54 = vpop.f32.mrf.mxu0  ;;  %v854_v36 = vpop.f32.mrf.mxu1  ;;  %v4211_v14 = vshrl.u32 %v5580_v60, 16  ;;  %v4167_v34 = vrot.slane %v4166_v24, 4  ;;  %v4195_v31 = vrot.slane %v4193_v6, 5  ;;  %v4222_v44 = vshrl.u32 %v5582_v5, 16  ;;  %v6412_v24 = vld [vmem:[%s6609_s5 + $0x144] sm:$0xff]   ;;  %v6413_v6 = vld [vmem:[%s6609_s5 + $0x150] sm:$0xff]  }
 0x12b   : > { %v7626_v20 = vadd.f32 %v6020_v61, %v863_v55  ;;  %v855_v18 = vadd.f32 %v854_v36, %v7417_v29  ;;  %v4225_v39 = vshll.u32 %v5582_v5, 16  ;;  %v4231_v0 = vshll.u32 %v5583_v28, 16 }
 0x12c   : > { %v6023_v30 = vpop.f32.mrf.mxu0  ;;  %6226 = vmatmul.mubr.msk.bf16.gmra.mxu0 %vm437_vm2, %v5596_v9  ;;  %v5989_v3 = vpop.f32.mrf.mxu1  ;;  %6192 = vmatmul.mubr.msk.bf16.gmra.mxu1 %vm437_vm2, %v6410_v58  ;;  %v4235_v1 = vshrl.u32 %v5583_v28, 16  ;;  %v4181_v23 = vrot.slane %v4180_v26, 4  ;;  %v4191_v22 = vrot.slane %v4190_v32, 4  ;;  %v4200_v61 = vrot.slane %v4198_v52, 4  ;;  %v5586_v28 = vld [vmem:[%s6609_s5 + $0xc4] sm:$0xf] }
 0x12d   : > { %6229 = vmatprep.mubr.msk.bf16.mxu0 %vm437_vm2, %v5597_v46  ;;  %v7632_v38 = vadd.f32 %v1551_v54, %v855_v18  ;;  %v876_v59 = vadd.f32 %v5989_v3, %v7435_v17  ;;  %6195 = vmatprep.mubr.msk.bf16.mxu1 %vm437_vm2, %v6411_v33  ;;  %v4203_v40 = vrot.slane %v4201_v47, 5  ;;  %v7640_v17 = vrot.slane %v4207_v12, 5  ;;  %v5585_v47 = vld [vmem:[%s6609_s5 + $0xc0] sm:$0xf] }
 0x12e   : > { %v1564_v29 = vpop.f32.mrf.mxu0  ;;  %v867_v51 = vpop.f32.mrf.mxu1  ;;  %v4213_v4 = vrot.slane %v4211_v14, 4  ;;  %v4162_v60 = vsel %vm6664_vm5, %v7621_v42, %v7583_v43  ;;  %v4172_v55 = vsel %vm6664_vm5, %v4167_v34, %v7612_v62  ;;  %v4224_v54 = vrot.slane %v4222_v44, 4 }
 0x12f   : > { %v7636_v8 = vadd.f32 %v6023_v30, %v876_v59  ;;  %v868_v9 = vadd.f32 %v867_v51, %v7445_v50  ;;  %v5584_v50 = vld [vmem:[%s6609_s5 + $0xbc] sm:$0x1]  ;;  %v4227_v33 = vrot.slane %v4225_v39, 5  ;;  %v7655_v32 = vrot.slane %v4231_v0, 5 }
 0x130   : > { %v6024_v46 = vpop.f32.mrf.mxu0  ;;  %v5990_v58 = vpop.f32.mrf.mxu1  ;;  %v4237_v52 = vrot.slane %v4235_v1, 4  ;;  %v4186_v43 = vsel %vm6664_vm5, %v4181_v23, %v7592_v21  ;;  %v4196_v62 = vsel %vm6664_vm5, %v4191_v22, %v4195_v31  ;;  %v4204_v42 = vor.u32 %v4203_v40, %v4200_v61 }
 0x131   : > { %v7652_v5 = vadd.f32 %v1564_v29, %v868_v9  ;;  %v879_v36 = vadd.f32 %v5990_v58, %v7458_v56  ;;  %v4217_v30 = vshll.u32 %v5581_v41, 16  ;;  %v4214_v3 = vor.u32 %v4213_v4, %v7640_v17  ;;  %v6414_v58 = vld [vmem:[%s6609_s5 + $0x15c] sm:$0xff]  }
 0x132   : > { %v1567_v26 = vpop.f32.mrf.mxu0  ;;  %v870_v18 = vpop.f32.mrf.mxu1  ;;  %v4241_v34 = vshll.u32 %v5584_v50, 16  ;;  %v4246_v21 = vshrl.u32 %v5585_v47, 16  ;;  %v4249_v31 = vshll.u32 %v5585_v47, 16  ;;  %v4255_v39 = vshll.u32 %v5586_v28, 16  ;;  %v5587_v47 = vld [vmem:[%s6609_s5 + $0xc8] sm:$0x1] }
 0x133   : > { %v7664_v12 = vadd.f32 %v6024_v46, %v879_v36  ;;  %v871_v56 = vadd.f32 %v870_v18, %v7479_v25  ;;  %v4259_v59 = vshrl.u32 %v5586_v28, 16  ;;  %v4238_v1 = vor.u32 %v4237_v52, %v7655_v32  ;;  %v6415_v36 = vld [vmem:[%s6609_s5 + $0x168] sm:$0xff]  }
 0x134   : > { %v6027_v14 = vpop.f32.mrf.mxu0  ;;  %6230 = vmatmul.mubr.msk.bf16.gmra.mxu0 %vm437_vm2, %v7609_v48  ;;  %v5993_v44 = vpop.f32.mrf.mxu1  ;;  %6196 = vmatmul.mubr.msk.bf16.gmra.mxu1 %vm437_vm2, %v6412_v24  ;;  %v4228_v48 = vor.u32 %v4227_v33, %v4224_v54  ;;  %v5600_v23 = vcombine.low %v4162_v60, %v4172_v55  ;;  %v5601_v22 = vcombine.low %v4186_v43, %v4196_v62  ;;  %v4205_v61 = vrot.slane %v4204_v42, 4 }
 0x135   : > { %6233 = vmatprep.mubr.msk.bf16.mxu0 %vm437_vm2, %v7619_v27  ;;  %v7673_v29 = vadd.f32 %v1567_v26, %v871_v56  ;;  %v892_v25 = vadd.f32 %v5993_v44, %v7246_v49  ;;  %6199 = vmatprep.mubr.msk.bf16.mxu1 %vm437_vm2, %v6413_v6  ;;  %v4219_v27 = vrot.slane %v4217_v30, 5  ;;  %v4215_v49 = vrot.slane %v4214_v3, 4 }
 0x136   : > { %v1580_v0 = vpop.f32.mrf.mxu0  ;;  %v883_v51 = vpop.f32.mrf.mxu1  ;;  %v4243_v41 = vrot.slane %v4241_v34, 5  ;;  %v4248_v24 = vrot.slane %v4246_v21, 4  ;;  %v4251_v6 = vrot.slane %v4249_v31, 5  ;;  %v4257_v50 = vrot.slane %v4255_v39, 5 }
 0x137   : > { %v7678_v40 = vadd.f32 %v6027_v14, %v892_v25  ;;  %v884_v9 = vadd.f32 %v883_v51, %v7278_v45  ;;  %v4261_v54 = vrot.slane %v4259_v59, 4  ;;  %v4229_v26 = vrot.slane %v4228_v48, 4 }
 0x138   : > { %v6028_v46 = vpop.f32.mrf.mxu0  ;;  %v5994_v4 = vpop.f32.mrf.mxu1  ;;  %v4239_v52 = vrot.slane %v4238_v1, 4  ;;  %v4210_v62 = vsel %vm6664_vm5, %v4205_v61, %v7640_v17  ;;  %v4252_v30 = vor.u32 %v4251_v6, %v4248_v24  ;;  %v4265_v14 = vshll.u32 %v5587_v47, 16  ;;  %v8206_v24 = vld [vmem:[#allocation4_spill] sm:$0xff] }
 0x139   : > { %v7682_v33 = vadd.f32 %v1580_v0, %v884_v9  ;;  %v895_v60 = vadd.f32 %v5994_v4, %v7296_v15  ;;  %v4220_v15 = vsel %vm6664_vm5, %v4215_v49, %v4219_v27  ;;  %v4262_v56 = vor.u32 %v4261_v54, %v4257_v50  ;;  %v6417_v27 = vld [vmem:[%s6609_s5 + $0x180] sm:$0xff]  }
 0x13a   : > { %v1583_v55 = vpop.f32.mrf.mxu0  ;;  %v886_v45 = vpop.f32.mrf.mxu1  ;;  %v4234_v17 = vsel %vm6664_vm5, %v4229_v26, %v7655_v32  ;;  %v4244_v44 = vsel %vm6664_vm5, %v4239_v52, %v4243_v41  ;;  %v5602_v25 = vcombine.low %v4210_v62, %v4220_v15  ;;  %v4253_v1 = vrot.slane %v4252_v30, 4  ;;  %v8209_v15 = vld [vmem:[#allocation7_spill] sm:$0xff] }
 0x13b   : > { %v7687_v28 = vadd.f32 %v6028_v46, %v895_v60  ;;  %v887_v18 = vadd.f32 %v886_v45, %v7304_v2  ;;  %v5603_v48 = vcombine.low %v4234_v17, %v4244_v44  ;;  %v4263_v51 = vrot.slane %v4262_v56, 4  ;;  %v6418_v45 = vld [vmem:[%s6609_s5 + $0x18c] sm:$0xff]  }
 0x13c   : > { %v6031_v43 = vpop.f32.mrf.mxu0  ;;  %6234 = vmatmul.mubr.msk.bf16.gmra.mxu0 %vm437_vm2, %v5600_v23  ;;  %v5997_v42 = vpop.f32.mrf.mxu1  ;;  %6200 = vmatmul.mubr.msk.bf16.gmra.mxu1 %vm437_vm2, %v6414_v58  ;;  %v4267_v23 = vrot.slane %v4265_v14, 5  ;;  %v4258_v4 = vsel %vm6664_vm5, %v4253_v1, %v4257_v50  ;;  %v8212_v1 = vld [vmem:[#allocation10_spill] sm:$0xff] }
 0x13d   : > { %6237 = vmatprep.mubr.msk.bf16.mxu0 %vm437_vm2, %v5601_v22  ;;  %v7698_v2 = vadd.f32 %v1583_v55, %v887_v18  ;;  %v908_v3 = vadd.f32 %v5997_v42, %v7333_v37  ;;  %6203 = vmatprep.mubr.msk.bf16.mxu1 %vm437_vm2, %v6415_v36  ;;  %v6416_v37 = vld [vmem:[%s6609_s5 + $0x174] sm:$0xff]   ;;  %v8207_v55 = vld [vmem:[#allocation5_spill] sm:$0xff] }
 0x13e   : > { %v1596_v34 = vpop.f32.mrf.mxu0  ;;  %v899_v21 = vpop.f32.mrf.mxu1 }
 0x13f   : > { %v7707_v31 = vadd.f32 %v6031_v43, %v908_v3  ;;  %v900_v39 = vadd.f32 %v899_v21, %v7352_v35 }
 0x140   : > { %v6032_v59 = vpop.f32.mrf.mxu0  ;;  %v5998_v0 = vpop.f32.mrf.mxu1 }
 0x141   : > { %v7711_v22 = vadd.f32 %v1596_v34, %v900_v39  ;;  %v911_v32 = vadd.f32 %v5998_v0, %v7356_v13  ;;  %v4268_v13 = vsel %vm6664_vm5, %v4263_v51, %v4267_v23  ;;  %v8210_v34 = vld [vmem:[#allocation8_spill] sm:$0xff] }
 0x142   : > { %v1599_v61 = vpop.f32.mrf.mxu0  ;;  %v902_v9 = vpop.f32.mrf.mxu1  ;;  %v5604_v52 = vcombine.low %v4258_v4, %v4268_v13  ;;  %v8214_v4 = vld [vmem:[#allocation12_spill] sm:$0xff] }
 0x143   : > { %v7715_v46 = vadd.f32 %v6032_v59, %v911_v32  ;;  %v903_v49 = vadd.f32 %v902_v9, %v7367_v19  ;;  %v8211_v59 = vld [vmem:[#allocation9_spill] sm:$0xff] }
 0x144   : > { %v6035_v35 = vpop.f32.mrf.mxu0  ;;  %6238 = vmatmul.mubr.msk.bf16.gmra.mxu0 %vm437_vm2, %v5602_v25  ;;  %v6001_v41 = vpop.f32.mrf.mxu1  ;;  %6204 = vmatmul.mubr.msk.bf16.gmra.mxu1 %vm437_vm2, %v6416_v37 }
 0x145   : > { %6241 = vmatprep.mubr.msk.bf16.mxu0 %vm437_vm2, %v5603_v48  ;;  %v7725_v58 = vadd.f32 %v1599_v61, %v903_v49  ;;  %v924_v6 = vadd.f32 %v6001_v41, %v8206_v24  ;;  %6207 = vmatprep.mubr.msk.bf16.mxu1 %vm437_vm2, %v6417_v27  ;;  %v8213_v27 = vld [vmem:[#allocation11_spill] sm:$0xff] }
 0x146   : > { %v1612_v19 = vpop.f32.mrf.mxu0  ;;  %v915_v54 = vpop.f32.mrf.mxu1 }
 0x147   : > { %v7729_v60 = vadd.f32 %v6035_v35, %v924_v6  ;;  %v916_v36 = vadd.f32 %v915_v54, %v8207_v55 }
 0x148   : > { %v6036_v26 = vpop.f32.mrf.mxu0  ;;  %v6002_v47 = vpop.f32.mrf.mxu1 }
 0x149   : > { %v7733_v50 = vadd.f32 %v1612_v19, %v916_v36  ;;  %v927_v18 = vadd.f32 %v6002_v47, %v8208_v63 }
 0x14a   : > { %v1615_v43 = vpop.f32.mrf.mxu0  ;;  %v918_v62 = vpop.f32.mrf.mxu1 }
 0x14b   : > { %v7736_v42 = vadd.f32 %v6036_v26, %v927_v18  ;;  %v919_v30 = vadd.f32 %v918_v62, %v8209_v15 }
 0x14c   : > { %v6039_v56 = vpop.f32.mrf.mxu0  ;;  %6242 = vmatmul.mubr.msk.bf16.gmra.mxu0 %vm437_vm2, %v5604_v52  ;;  %v6005_v14 = vpop.f32.mrf.mxu1  ;;  %6208 = vmatmul.mubr.msk.bf16.gmra.mxu1 %vm437_vm2, %v6418_v45  ;;  %v8215_v52 = vld [vmem:[#allocation13_spill] sm:$0xff] }
 0x14d   : > { %v7741_v3 = vadd.f32 %v1615_v43, %v919_v30  ;;  %v940_v17 = vadd.f32 %v6005_v14, %v8210_v34  ;;  %v8216_v43 = vld [vmem:[#allocation14_spill] sm:$0xff]  ;;  %v8217_v14 = vld [vmem:[#allocation15_spill] sm:$0xff] }
 0x14e   : > { %v1628_v44 = vpop.f32.mrf.mxu0  ;;  %v931_v21 = vpop.f32.mrf.mxu1 }
 0x14f   : > { %v7744_v39 = vadd.f32 %v6039_v56, %v940_v17  ;;  %v932_v25 = vadd.f32 %v931_v21, %v8211_v59 }
 0x150   : > { %v6040_v0 = vpop.f32.mrf.mxu0  ;;  %v6006_v37 = vpop.f32.mrf.mxu1 }
 0x151   : > { %v7747_v48 = vadd.f32 %v1628_v44, %v932_v25  ;;  %v943_v51 = vadd.f32 %v6006_v37, %v8212_v1 }
 0x152   : > { %v1631_v23 = vpop.f32.mrf.mxu0  ;;  %v934_v32 = vpop.f32.mrf.mxu1 }
 0x153   : > { %v7750_v61 = vadd.f32 %v6040_v0, %v943_v51  ;;  %v935_v9 = vadd.f32 %v934_v32, %v8213_v27 }
 0x154   : > { %v6079_v49 = vpop.f32.mrf.mxu0  ;;  %v6045_v35 = vpop.f32.mrf.mxu1 }
 0x155   : > { %v7753_v41 = vadd.f32 %v1631_v23, %v935_v9  ;;  %v2004_v13 = vadd.f32 %v6045_v35, %v8214_v4 }
 0x156   : > { %v2234_v24 = vpop.f32.mrf.mxu0  ;;  %v1875_v6 = vpop.f32.mrf.mxu1 }
 0x157   : > { %v7756_v19 = vadd.f32 %v6079_v49, %v2004_v13  ;;  %v2002_v54 = vadd.f32 %v1875_v6, %v7515_v53 }
 0x158   : > { %v6080_v55 = vpop.f32.mrf.mxu0  ;;  %v6046_v36 = vpop.f32.mrf.mxu1 }
 0x159   : > { %v7759_v26 = vadd.f32 %v2234_v24, %v2002_v54  ;;  %v2005_v47 = vadd.f32 %v6046_v36, %v8215_v52 }
 0x15a   : > { %v2237_v45 = vpop.f32.mrf.mxu0  ;;  %v1878_v63 = vpop.f32.mrf.mxu1 }
 0x15b   : > { %v7762_v18 = vadd.f32 %v6080_v55, %v2005_v47  ;;  %v2003_v62 = vadd.f32 %v1878_v63, %v8216_v43 }
 0x15c   : > { %v6083_v15 = vpop.f32.mrf.mxu0  ;;  %v6049_v30 = vpop.f32.mrf.mxu1 }
 0x15d   : > { %v7765_v56 = vadd.f32 %v2237_v45, %v2003_v62  ;;  %v2008_v34 = vadd.f32 %v6049_v30, %v8217_v14 }
 0x15e   : > { %v2250_v17 = vpop.f32.mrf.mxu0  ;;  %v1891_v53 = vpop.f32.mrf.mxu1 }
 0x15f   : > { %v7768_v44 = vadd.f32 %v6083_v15, %v2008_v34  ;;  %v2006_v21 = vadd.f32 %v1891_v53, %v7562_v57 }
 0x160   : > { %v6084_v59 = vpop.f32.mrf.mxu0  ;;  %v6050_v25 = vpop.f32.mrf.mxu1 }
 0x161   : > { %v7771_v0 = vadd.f32 %v2250_v17, %v2006_v21  ;;  %v2009_v37 = vadd.f32 %v6050_v25, %v7567_v7 }
 0x162   : > { %v2253_v1 = vpop.f32.mrf.mxu0  ;;  %v1894_v51 = vpop.f32.mrf.mxu1 }
 0x163   : > { %v7774_v23 = vadd.f32 %v6084_v59, %v2009_v37  ;;  %v2007_v32 = vadd.f32 %v1894_v51, %v7585_v10 }
 0x164   : > { %v6087_v27 = vpop.f32.mrf.mxu0  ;;  %v6053_v9 = vpop.f32.mrf.mxu1 }
 0x165   : > { %v7777_v49 = vadd.f32 %v2253_v1, %v2007_v32  ;;  %v2012_v35 = vadd.f32 %v6053_v9, %v7594_v16 }
 0x166   : > { %v2266_v4 = vpop.f32.mrf.mxu0  ;;  %v1907_v57 = vpop.f32.mrf.mxu1 }
 0x167   : > { %v7780_v13 = vadd.f32 %v6087_v27, %v2012_v35  ;;  %v2010_v24 = vadd.f32 %v1907_v57, %v7615_v11 }
 0x168   : > { %v6088_v6 = vpop.f32.mrf.mxu0  ;;  %v6054_v7 = vpop.f32.mrf.mxu1 }
 0x169   : > { %v7783_v54 = vadd.f32 %v2266_v4, %v2010_v24  ;;  %v2013_v55 = vadd.f32 %v6054_v7, %v7626_v20 }
 0x16a   : > { %v2269_v36 = vpop.f32.mrf.mxu0  ;;  %v1910_v10 = vpop.f32.mrf.mxu1 }
 0x16b   : > { %v7786_v52 = vadd.f32 %v6088_v6, %v2013_v55  ;;  %v2011_v47 = vadd.f32 %v1910_v10, %v7632_v38 }
 0x16c   : > { %v6091_v45 = vpop.f32.mrf.mxu0  ;;  %v6057_v16 = vpop.f32.mrf.mxu1 }
 0x16d   : > { %v7789_v63 = vadd.f32 %v2269_v36, %v2011_v47  ;;  %v2016_v43 = vadd.f32 %v6057_v16, %v7636_v8 }
 0x16e   : > { %v2282_v62 = vpop.f32.mrf.mxu0  ;;  %v1923_v11 = vpop.f32.mrf.mxu1 }
 0x16f   : > { %v7792_v15 = vadd.f32 %v6091_v45, %v2016_v43  ;;  %v2014_v30 = vadd.f32 %v1923_v11, %v7652_v5 }
 0x170   : > { %v6092_v14 = vpop.f32.mrf.mxu0  ;;  %v6058_v20 = vpop.f32.mrf.mxu1 }
 0x171   : > { %v7795_v34 = vadd.f32 %v2282_v62, %v2014_v30  ;;  %v2017_v17 = vadd.f32 %v6058_v20, %v7664_v12 }
 0x172   : > { %v2285_v53 = vpop.f32.mrf.mxu0  ;;  %v1926_v38 = vpop.f32.mrf.mxu1 }
 0x173   : > { %v7798_v21 = vadd.f32 %v6092_v14, %v2017_v17  ;;  %v2015_v59 = vadd.f32 %v1926_v38, %v7673_v29 }
 0x174   : > { %v6095_v25 = vpop.f32.mrf.mxu0  ;;  %v6061_v8 = vpop.f32.mrf.mxu1 }
 0x175   : > { %v7801_v37 = vadd.f32 %v2285_v53, %v2015_v59  ;;  %v2020_v1 = vadd.f32 %v6061_v8, %v7678_v40 }
 0x176   : > { %v2298_v51 = vpop.f32.mrf.mxu0  ;;  %v1939_v5 = vpop.f32.mrf.mxu1 }
 0x177   : > { %v7804_v32 = vadd.f32 %v6095_v25, %v2020_v1  ;;  %v2018_v27 = vadd.f32 %v1939_v5, %v7682_v33 }
 0x178   : > { %v6096_v9 = vpop.f32.mrf.mxu0  ;;  %v6062_v12 = vpop.f32.mrf.mxu1 }
 0x179   : > { %v7807_v35 = vadd.f32 %v2298_v51, %v2018_v27  ;;  %v2021_v4 = vadd.f32 %v6062_v12, %v7687_v28 }
 0x17a   : > { %v2301_v57 = vpop.f32.mrf.mxu0  ;;  %v1942_v29 = vpop.f32.mrf.mxu1 }
 0x17b   : > { %v7810_v24 = vadd.f32 %v6096_v9, %v2021_v4  ;;  %v2019_v6 = vadd.f32 %v1942_v29, %v7698_v2 }
 0x17c   : > { %v6099_v7 = vpop.f32.mrf.mxu0  ;;  %v6065_v40 = vpop.f32.mrf.mxu1 }
 0x17d   : > { %v7813_v55 = vadd.f32 %v2301_v57, %v2019_v6  ;;  %v2024_v36 = vadd.f32 %v6065_v40, %v7707_v31 }
 0x17e   : > { %v2314_v10 = vpop.f32.mrf.mxu0  ;;  %v1955_v33 = vpop.f32.mrf.mxu1 }
 0x17f   : > { %v7816_v47 = vadd.f32 %v6099_v7, %v2024_v36  ;;  %v2022_v45 = vadd.f32 %v1955_v33, %v7711_v22 }
 0x180   : > { %v6100_v16 = vpop.f32.mrf.mxu0  ;;  %v6066_v28 = vpop.f32.mrf.mxu1 }
 0x181   : > { %v7819_v43 = vadd.f32 %v2314_v10, %v2022_v45  ;;  %v2025_v62 = vadd.f32 %v6066_v28, %v7715_v46 }
 0x182   : > { %v2317_v11 = vpop.f32.mrf.mxu0  ;;  %v1958_v2 = vpop.f32.mrf.mxu1 }
 0x183   : > { %v7822_v30 = vadd.f32 %v6100_v16, %v2025_v62  ;;  %v2023_v14 = vadd.f32 %v1958_v2, %v7725_v58 }
 0x184   : > { %v6103_v20 = vpop.f32.mrf.mxu0  ;;  %v6069_v31 = vpop.f32.mrf.mxu1 }
 0x185   : > { %v7825_v17 = vadd.f32 %v2317_v11, %v2023_v14  ;;  %v2028_v53 = vadd.f32 %v6069_v31, %v7729_v60 }
 0x186   : > { %v2330_v38 = vpop.f32.mrf.mxu0  ;;  %v1971_v22 = vpop.f32.mrf.mxu1 }
 0x187   : > { %v7828_v59 = vadd.f32 %v6103_v20, %v2028_v53  ;;  %v2026_v25 = vadd.f32 %v1971_v22, %v7733_v50 }
 0x188   : > { %v6104_v8 = vpop.f32.mrf.mxu0  ;;  %v6070_v46 = vpop.f32.mrf.mxu1 }
 0x189   : > { %v7831_v1 = vadd.f32 %v2330_v38, %v2026_v25  ;;  %v2029_v51 = vadd.f32 %v6070_v46, %v7736_v42 }
 0x18a   : > { %v2333_v5 = vpop.f32.mrf.mxu0  ;;  %v1974_v58 = vpop.f32.mrf.mxu1 }
 0x18b   : > { %v7834_v27 = vadd.f32 %v6104_v8, %v2029_v51  ;;  %v2027_v9 = vadd.f32 %v1974_v58, %v7741_v3 }
 0x18c   : > { %v6107_v12 = vpop.f32.mrf.mxu0  ;;  %v6073_v60 = vpop.f32.mrf.mxu1 }
 0x18d   : > { %8218 = vst [vmem:[#allocation4_spill] sm:$0xff] %v7834_v27  ;;  %v7837_v4 = vadd.f32 %v2333_v5, %v2027_v9  ;;  %v2032_v57 = vadd.f32 %v6073_v60, %v7744_v39 }
 0x18e   : > { %v2346_v29 = vpop.f32.mrf.mxu0  ;;  %v1987_v50 = vpop.f32.mrf.mxu1 }
 0x18f   : > { %8219 = vst [vmem:[#allocation5_spill] sm:$0xff] %v7837_v4  ;;  %v7840_v6 = vadd.f32 %v6107_v12, %v2032_v57  ;;  %v2030_v7 = vadd.f32 %v1987_v50, %v7747_v48 }
 0x190   : > { %v6108_v40 = vpop.f32.mrf.mxu0  ;;  %v6074_v42 = vpop.f32.mrf.mxu1 }
 0x191   : > { %v7843_v36 = vadd.f32 %v2346_v29, %v2030_v7  ;;  %v2033_v10 = vadd.f32 %v6074_v42, %v7750_v61 }
 0x192   : > { %v2349_v33 = vpop.f32.mrf.mxu0  ;;  %v1990_v3 = vpop.f32.mrf.mxu1 }
 0x193   : > { %v7846_v45 = vadd.f32 %v6108_v40, %v2033_v10  ;;  %v2031_v16 = vadd.f32 %v1990_v3, %v7753_v41 }
 0x194   : > { %v6147_v28 = vpop.f32.mrf.mxu0  ;;  %v6113_v39 = vpop.f32.mrf.mxu1 }
 0x195   : > { %8220 = vst [vmem:[#allocation6_spill] sm:$0xff] %v7846_v45  ;;  %v7849_v62 = vadd.f32 %v2349_v33, %v2031_v16  ;;  %v3089_v11 = vadd.f32 %v6113_v39, %v7756_v19 }
 0x196   : > { %v3319_v2 = vpop.f32.mrf.mxu0  ;;  %v2960_v48 = vpop.f32.mrf.mxu1 }
 0x197   : > { %8221 = vst [vmem:[#allocation7_spill] sm:$0xff] %v7849_v62  ;;  %v7852_v14 = vadd.f32 %v6147_v28, %v3089_v11  ;;  %v3087_v20 = vadd.f32 %v2960_v48, %v7759_v26 }
 0x198   : > { %v7855_v31 = vpop.f32.mrf.mxu0  ;;  %v7857_v61 = vpop.f32.mrf.mxu1 }
 0x199   : > { %v7859_v53 = vadd.f32 %v3319_v2, %v3087_v20 }
 0x19a   : > { %v7861_v38 = vpop.f32.mrf.mxu0  ;;  %v7863_v41 = vpop.f32.mrf.mxu1 }
 0x19c   : > { %v6151_v22 = vpop.f32.mrf.mxu0  ;;  %v6117_v25 = vpop.f32.mrf.mxu1 }
 0x19d   : > { %v3093_v19 = vadd.f32 %v6117_v25, %v7768_v44 }
 0x19e   : > { %v3335_v8 = vpop.f32.mrf.mxu0  ;;  %v2976_v46 = vpop.f32.mrf.mxu1 }
 0x19f   : > { %v7866_v51 = vadd.f32 %v6151_v22, %v3093_v19  ;;  %v3091_v26 = vadd.f32 %v2976_v46, %v7771_v0 }
 0x1a0   : > { %v7869_v5 = vpop.f32.mrf.mxu0  ;;  %v7871_v58 = vpop.f32.mrf.mxu1 }
 0x1a1   : > { %v7873_v9 = vadd.f32 %v3335_v8, %v3091_v26 }
 0x1a2   : > { %v7875_v12 = vpop.f32.mrf.mxu0  ;;  %v7877_v60 = vpop.f32.mrf.mxu1 }
 0x1a4   : > { %v6155_v57 = vpop.f32.mrf.mxu0  ;;  %v6121_v29 = vpop.f32.mrf.mxu1 }
 0x1a5   : > { %v3097_v44 = vadd.f32 %v6121_v29, %v7780_v13 }
 0x1a6   : > { %v3351_v50 = vpop.f32.mrf.mxu0  ;;  %v2992_v7 = vpop.f32.mrf.mxu1 }
 0x1a7   : > { %v7880_v40 = vadd.f32 %v6155_v57, %v3097_v44  ;;  %v3095_v0 = vadd.f32 %v2992_v7, %v7783_v54 }
 0x1a8   : > { %v7883_v42 = vpop.f32.mrf.mxu0  ;;  %v7885_v10 = vpop.f32.mrf.mxu1 }
 0x1a9   : > { %v7887_v33 = vadd.f32 %v3351_v50, %v3095_v0 }
 0x1aa   : > { %v7889_v3 = vpop.f32.mrf.mxu0  ;;  %v7891_v16 = vpop.f32.mrf.mxu1 }
 0x1ac   : > { %v6159_v28 = vpop.f32.mrf.mxu0  ;;  %v6125_v39 = vpop.f32.mrf.mxu1 }
 0x1ad   : > { %v3101_v13 = vadd.f32 %v6125_v39, %v7792_v15 }
 0x1ae   : > { %v3367_v11 = vpop.f32.mrf.mxu0  ;;  %v3008_v2 = vpop.f32.mrf.mxu1 }
 0x1af   : > { %v7894_v48 = vadd.f32 %v6159_v28, %v3101_v13  ;;  %v3099_v54 = vadd.f32 %v3008_v2, %v7795_v34 }
 0x1b0   : > { %v7897_v20 = vpop.f32.mrf.mxu0  ;;  %v7899_v22 = vpop.f32.mrf.mxu1 }
 0x1b1   : > { %v7901_v25 = vadd.f32 %v3367_v11, %v3099_v54 }
 0x1b2   : > { %v7903_v19 = vpop.f32.mrf.mxu0  ;;  %v7905_v8 = vpop.f32.mrf.mxu1 }
 0x1b4   : > { %v6163_v46 = vpop.f32.mrf.mxu0  ;;  %v6129_v26 = vpop.f32.mrf.mxu1 }
 0x1b5   : > { %v3105_v15 = vadd.f32 %v6129_v26, %v7804_v32 }
 0x1b6   : > { %v3383_v57 = vpop.f32.mrf.mxu0  ;;  %v3024_v29 = vpop.f32.mrf.mxu1 }
 0x1b7   : > { %v7908_v44 = vadd.f32 %v6163_v46, %v3105_v15  ;;  %v3103_v34 = vadd.f32 %v3024_v29, %v7807_v35 }
 0x1b8   : > { %v7911_v50 = vpop.f32.mrf.mxu0  ;;  %v7913_v7 = vpop.f32.mrf.mxu1 }
 0x1b9   : > { %v7915_v0 = vadd.f32 %v3383_v57, %v3103_v34 }
 0x1ba   : > { %v7917_v28 = vpop.f32.mrf.mxu0  ;;  %v7919_v39 = vpop.f32.mrf.mxu1 }
 0x1bc   : > { %v6167_v13 = vpop.f32.mrf.mxu0  ;;  %v6133_v11 = vpop.f32.mrf.mxu1 }
 0x1bd   : > { %v3109_v32 = vadd.f32 %v6133_v11, %v7816_v47 }
 0x1be   : > { %v3399_v2 = vpop.f32.mrf.mxu0  ;;  %v3040_v54 = vpop.f32.mrf.mxu1 }
 0x1bf   : > { %v7922_v46 = vadd.f32 %v6167_v13, %v3109_v32  ;;  %v3107_v35 = vadd.f32 %v3040_v54, %v7819_v43 }
 0x1c0   : > { %v7925_v26 = vpop.f32.mrf.mxu0  ;;  %v7927_v15 = vpop.f32.mrf.mxu1 }
 0x1c1   : > { %v7929_v57 = vadd.f32 %v3399_v2, %v3107_v35 }
 0x1c2   : > { %v7931_v29 = vpop.f32.mrf.mxu0  ;;  %v7933_v34 = vpop.f32.mrf.mxu1 }
 0x1c3   : > { %8222 = vst [vmem:[#allocation8_spill] sm:$0xff] %v7929_v57  ;;  %8223 = vst [vmem:[#allocation9_spill] sm:$0xff] %v7931_v29 }
 0x1c4   : > { %v6171_v62 = vpop.f32.mrf.mxu0  ;;  %v6137_v45 = vpop.f32.mrf.mxu1 }
 0x1c5   : > { %v3113_v47 = vadd.f32 %v6137_v45, %v7828_v59 }
 0x1c6   : > { %v3415_v11 = vpop.f32.mrf.mxu0  ;;  %v3056_v13 = vpop.f32.mrf.mxu1 }
 0x1c7   : > { %v7936_v32 = vadd.f32 %v6171_v62, %v3113_v47  ;;  %v3111_v43 = vadd.f32 %v3056_v13, %v7831_v1 }
 0x1c8   : > { %v7939_v54 = vpop.f32.mrf.mxu0  ;;  %v7941_v4 = vpop.f32.mrf.mxu1 }
 0x1c9   : > { %8224 = vst [vmem:[#allocation10_spill] sm:$0xff] %v7936_v32  ;;  %8225 = vst [vmem:[#allocation11_spill] sm:$0xff] %v7939_v54  ;;  %v7943_v2 = vadd.f32 %v3415_v11, %v3111_v43 }
 0x1ca   : > { %v7945_v35 = vpop.f32.mrf.mxu0  ;;  %v7947_v27 = vpop.f32.mrf.mxu1 }
 0x1cb   : > { %8226 = vst [vmem:[#allocation12_spill] sm:$0xff] %v7943_v2  ;;  %8227 = vst [vmem:[#allocation13_spill] sm:$0xff] %v7945_v35 }
 0x1cc   : > { %v6175_v29 = vpop.f32.mrf.mxu0  ;;  %v6141_v57 = vpop.f32.mrf.mxu1 }
 0x1cd   : > { %v3117_v59 = vadd.f32 %v6141_v57, %v7840_v6  ;;  %v3090_v6 = vadd.f32 %v7857_v61, %v7762_v18  ;;  %v7975_v61 = vld [vmem:[%s287_s9] ss:$0 sm:$0xff] }
 0x1ce   : > { %v3431_v45 = vpop.f32.mrf.mxu0  ;;  %v3072_v62 = vpop.f32.mrf.mxu1 }
 0x1cf   : > { %v7951_v47 = vadd.f32 %v6175_v29, %v3117_v59  ;;  %v3115_v1 = vadd.f32 %v3072_v62, %v7843_v36  ;;  %v3088_v36 = vadd.f32 %v7863_v41, %v7765_v56  ;;  %v3449_v62 = vadd.f32 %v7855_v31, %v3090_v6 }
 0x1d0   : > { %v7954_v13 = vpop.f32.mrf.mxu0  ;;  %v7956_v54 = vpop.f32.mrf.mxu1  ;;  %v3094_v31 = vadd.f32 %v7871_v58, %v7774_v23 }
 0x1d1   : > { %8228 = vst [vmem:[#allocation14_spill] sm:$0xff] %v7951_v47  ;;  %8229 = vst [vmem:[#allocation15_spill] sm:$0xff] %v7954_v13  ;;  %v7958_v11 = vadd.f32 %v3431_v45, %v3115_v1 }
 0x1d2   : > { %8230 = vst [vmem:[#allocation16_spill] sm:$0xff] %v7956_v54  ;;  %v7960_v43 = vpop.f32.mrf.mxu0  ;;  %v7963_v35 = vpop.f32.mrf.mxu1 }
 0x1d3   : > { %8231 = vst [vmem:[#allocation17_spill] sm:$0xff] %v7958_v11  ;;  %8232 = vst [vmem:[#allocation18_spill] sm:$0xff] %v7960_v43  ;;  %v3447_v11 = vadd.f32 %v7861_v38, %v3088_v36 }
 0x1d4   : > { %8233 = vst [vmem:[#allocation19_spill] sm:$0xff] %v7963_v35  ;;  %v6215_v57 = vpop.f32.mrf.mxu0  ;;  %v6181_v2 = vpop.f32.mrf.mxu1 }
 0x1d5   : > { %v3807_v29 = vadd.f32 %v6181_v2, %v7852_v14 }
 0x1d6   : > { %v4404_v59 = vpop.f32.mrf.mxu0  ;;  %v3678_v45 = vpop.f32.mrf.mxu1 }
 0x1d7   : > { %v4533_v1 = vadd.f32 %v6215_v57, %v3807_v29  ;;  %v3805_v43 = vadd.f32 %v3678_v45, %v7859_v53  ;;  %v3092_v53 = vadd.f32 %v7877_v60, %v7777_v49  ;;  %v3453_v49 = vadd.f32 %v7869_v5, %v3094_v31 }
 0x1d8   : > { %v6216_v18 = vpop.f32.mrf.mxu0  ;;  %v6182_v13 = vpop.f32.mrf.mxu1 }
 0x1d9   : > { %v4531_v56 = vadd.f32 %v4404_v59, %v3805_v43  ;;  %v3808_v41 = vadd.f32 %v6182_v13, %v3449_v62  ;;  %v4572_v47 = vadd.f32 %v7975_v61, %v4533_v1  ;;  %v3451_v60 = vadd.f32 %v7875_v12, %v3092_v53 }
 0x1da   : > { %v4407_v14 = vpop.f32.mrf.mxu0  ;;  %v3681_v2 = vpop.f32.mrf.mxu1 }
 0x1db   : > { %v4534_v35 = vadd.f32 %v6216_v18, %v3808_v41  ;;  %v3806_v54 = vadd.f32 %v3681_v2, %v3447_v11  ;;  %v4570_v57 = vadd.f32 %v7975_v61, %v4531_v56  ;;  %v4604_v59 = vmax.f32 %v4572_v47, 0.0 }
 0x1dc   : > { %v6219_v32 = vpop.f32.mrf.mxu0  ;;  %v6185_v6 = vpop.f32.mrf.mxu1  ;;  %v3098_v47 = vadd.f32 %v7885_v10, %v7786_v52  ;;  %v3096_v52 = vadd.f32 %v7891_v16, %v7789_v63 }
 0x1dd   : > { %v4573_v38 = vadd.f32 %v7975_v61, %v4534_v35  ;;  %v4532_v13 = vadd.f32 %v4407_v14, %v3806_v54  ;;  %v3811_v43 = vadd.f32 %v6185_v6, %v7866_v51  ;;  %v4602_v18 = vmax.f32 %v4570_v57, 0.0 }
 0x1de   : > { %v4420_v36 = vpop.f32.mrf.mxu0  ;;  %v3694_v29 = vpop.f32.mrf.mxu1  ;;  %v3455_v16 = vadd.f32 %v7889_v3, %v3096_v52 }
 0x1df   : > { %v4605_v11 = vmax.f32 %v4573_v38, 0.0  ;;  %v4571_v45 = vadd.f32 %v7975_v61, %v4532_v13  ;;  %v3809_v23 = vadd.f32 %v3694_v29, %v7873_v9  ;;  %v4537_v62 = vadd.f32 %v6219_v32, %v3811_v43 }
 0x1e0   : > { %v6220_v58 = vpop.f32.mrf.mxu0  ;;  %v6186_v1 = vpop.f32.mrf.mxu1  ;;  %v3457_v43 = vadd.f32 %v7883_v42, %v3098_v47  ;;  %v3102_v42 = vadd.f32 %v7899_v22, %v7798_v21 }
 0x1e1   : > { %v5699_v35 = vpack.c.bf16 %v4605_v11, %v4604_v59  ;;  %v4603_v54 = vmax.f32 %v4571_v45, 0.0  ;;  %v4535_v56 = vadd.f32 %v4420_v36, %v3809_v23  ;;  %v3812_v41 = vadd.f32 %v6186_v1, %v3453_v49 }
 0x1e2   : > { %v4423_v51 = vpop.f32.mrf.mxu0  ;;  %v3697_v14 = vpop.f32.mrf.mxu1  ;;  %v4576_v32 = vadd.f32 %v7975_v61, %v4537_v62  ;;  %v3461_v22 = vadd.f32 %v7897_v20, %v3102_v42 }
 0x1e3   : > { %5771 = vst [vmem:[%s7993_s12 + $0x8] sm:$0xff] %v5699_v35   ;;  %v5694_v5 = vpack.c.bf16 %v4603_v54, %v4602_v18  ;;  %v3810_v9 = vadd.f32 %v3697_v14, %v3451_v60  ;;  %v4538_v2 = vadd.f32 %v6220_v58, %v3812_v41  ;;  %v4574_v53 = vadd.f32 %v7975_v61, %v4535_v56 }
 0x1e4   : > { %v6223_v12 = vpop.f32.mrf.mxu0  ;;  %v6189_v31 = vpop.f32.mrf.mxu1  ;;  %v4608_v45 = vmax.f32 %v4576_v32, 0.0  ;;  %v3100_v14 = vadd.f32 %v7905_v8, %v7801_v37 }
 0x1e5   : > { %5695 = vst [vmem:[%s7993_s12] sm:$0xff] %v5694_v5   ;;  %v4536_v6 = vadd.f32 %v4423_v51, %v3810_v9  ;;  %v3815_v57 = vadd.f32 %v6189_v31, %v7880_v40  ;;  %v4577_v10 = vadd.f32 %v7975_v61, %v4538_v2  ;;  %v4606_v40 = vmax.f32 %v4574_v53, 0.0 }
 0x1e6   : > { %v4436_v38 = vpop.f32.mrf.mxu0  ;;  %v3710_v13 = vpop.f32.mrf.mxu1 }
 0x1e7   : > { %v4575_v36 = vadd.f32 %v7975_v61, %v4536_v6  ;;  %v4541_v29 = vadd.f32 %v6223_v12, %v3815_v57  ;;  %v3813_v59 = vadd.f32 %v3710_v13, %v7887_v33  ;;  %v4609_v23 = vmax.f32 %v4577_v10, 0.0 }
 0x1e8   : > { %v6224_v11 = vpop.f32.mrf.mxu0  ;;  %v6190_v58 = vpop.f32.mrf.mxu1  ;;  %v3459_v57 = vadd.f32 %v7903_v19, %v3100_v14  ;;  %v3104_v19 = vadd.f32 %v7919_v39, %v7813_v55 }
 0x1e9   : > { %v4607_v49 = vmax.f32 %v4575_v36, 0.0  ;;  %v3816_v60 = vadd.f32 %v6190_v58, %v3457_v43  ;;  %v5709_v62 = vpack.c.bf16 %v4609_v23, %v4608_v45  ;;  %v4539_v1 = vadd.f32 %v4436_v38, %v3813_v59 }
 0x1ea   : > { %v4439_v63 = vpop.f32.mrf.mxu0  ;;  %v3713_v18 = vpop.f32.mrf.mxu1  ;;  %v4580_v33 = vadd.f32 %v7975_v61, %v4541_v29 }
 0x1eb   : > { %v5704_v35 = vpack.c.bf16 %v4607_v49, %v4606_v40  ;;  %v4542_v54 = vadd.f32 %v6224_v11, %v3816_v60  ;;  %5773 = vst [vmem:[%s7993_s12 + $0x18] sm:$0xff] %v5709_v62   ;;  %v3814_v51 = vadd.f32 %v3713_v18, %v3455_v16  ;;  %v4578_v5 = vadd.f32 %v7975_v61, %v4539_v1 }
 0x1ec   : > { %v6227_v56 = vpop.f32.mrf.mxu0  ;;  %v6193_v41 = vpop.f32.mrf.mxu1  ;;  %v4612_v32 = vmax.f32 %v4580_v33, 0.0  ;;  %v3106_v11 = vadd.f32 %v7913_v7, %v7810_v24  ;;  %v3463_v1 = vadd.f32 %v7917_v28, %v3104_v19 }
 0x1ed   : > { %5772 = vst [vmem:[%s7993_s12 + $0x10] sm:$0xff] %v5704_v35   ;;  %v4581_v3 = vadd.f32 %v7975_v61, %v4542_v54  ;;  %v3819_v47 = vadd.f32 %v6193_v41, %v7894_v48  ;;  %v4540_v9 = vadd.f32 %v4439_v63, %v3814_v51  ;;  %v4610_v10 = vmax.f32 %v4578_v5, 0.0 }
 0x1ee   : > { %v4452_v21 = vpop.f32.mrf.mxu0  ;;  %v3726_v12 = vpop.f32.mrf.mxu1  ;;  %v3465_v39 = vadd.f32 %v7911_v50, %v3106_v11 }
 0x1ef   : > { %v4613_v2 = vmax.f32 %v4581_v3, 0.0  ;;  %v4545_v31 = vadd.f32 %v6227_v56, %v3819_v47  ;;  %v3817_v53 = vadd.f32 %v3726_v12, %v7901_v25  ;;  %v4579_v37 = vadd.f32 %v7975_v61, %v4540_v9 }
 0x1f0   : > { %v6228_v6 = vpop.f32.mrf.mxu0  ;;  %v6194_v8 = vpop.f32.mrf.mxu1  ;;  %v3110_v3 = vadd.f32 %v7927_v15, %v7822_v30 }
 0x1f1   : > { %v5719_v48 = vpack.c.bf16 %v4613_v2, %v4612_v32  ;;  %v4543_v38 = vadd.f32 %v4452_v21, %v3817_v53  ;;  %v3820_v52 = vadd.f32 %v6194_v8, %v3461_v22  ;;  %v4611_v13 = vmax.f32 %v4579_v37, 0.0  ;;  %v8234_v37 = vld [vmem:[#allocation8_spill] sm:$0xff] }
 0x1f2   : > { %v4455_v20 = vpop.f32.mrf.mxu0  ;;  %v3729_v43 = vpop.f32.mrf.mxu1  ;;  %v4584_v36 = vadd.f32 %v7975_v61, %v4545_v31  ;;  %v3108_v2 = vadd.f32 %v7933_v34, %v7825_v17  ;;  %v3469_v31 = vadd.f32 %v7925_v26, %v3110_v3  ;;  %v8235_v34 = vld [vmem:[#allocation9_spill] sm:$0xff] }
 0x1f3   : > { %5775 = vst [vmem:[%s7993_s12 + $0x28] sm:$0xff] %v5719_v48   ;;  %v4546_v29 = vadd.f32 %v6228_v6, %v3820_v52  ;;  %v3818_v59 = vadd.f32 %v3729_v43, %v3459_v57  ;;  %v5714_v45 = vpack.c.bf16 %v4611_v13, %v4610_v10  ;;  %v4582_v58 = vadd.f32 %v7975_v61, %v4543_v38  ;;  %v8236_v43 = vld [vmem:[#allocation4_spill] sm:$0xff] }
 0x1f4   : > { %v6231_v25 = vpop.f32.mrf.mxu0  ;;  %v6197_v23 = vpop.f32.mrf.mxu1  ;;  %v4616_v42 = vmax.f32 %v4584_v36, 0.0  ;;  %v3467_v13 = vadd.f32 %v8235_v34, %v3108_v2  ;;  %v3114_v26 = vadd.f32 %v7941_v4, %v8236_v43  ;;  %v8247_v34 = vld [vmem:[#allocation17_spill] sm:$0xff]  ;;  %v8248_v43 = vld [vmem:[#allocation15_spill] sm:$0xff] }
 0x1f5   : > { %v4585_v40 = vadd.f32 %v7975_v61, %v4546_v29  ;;  %v4544_v49 = vadd.f32 %v4455_v20, %v3818_v59  ;;  %v3823_v60 = vadd.f32 %v6197_v23, %v7908_v44  ;;  %5774 = vst [vmem:[%s7993_s12 + $0x20] sm:$0xff] %v5714_v45   ;;  %v4614_v33 = vmax.f32 %v4582_v58, 0.0 }
 0x1f6   : > { %v4468_v63 = vpop.f32.mrf.mxu0  ;;  %v3742_v16 = vpop.f32.mrf.mxu1 }
 0x1f7   : > { %v4617_v62 = vmax.f32 %v4585_v40, 0.0  ;;  %v4583_v24 = vadd.f32 %v7975_v61, %v4544_v49  ;;  %v3821_v7 = vadd.f32 %v3742_v16, %v7915_v0  ;;  %v4549_v18 = vadd.f32 %v6231_v25, %v3823_v60  ;;  %v8237_v40 = vld [vmem:[#allocation5_spill] sm:$0xff] }
 0x1f8   : > { %v6232_v55 = vpop.f32.mrf.mxu0  ;;  %v6198_v35 = vpop.f32.mrf.mxu1  ;;  %v3112_v49 = vadd.f32 %v7947_v27, %v8237_v40 }
 0x1f9   : > { %v5729_v44 = vpack.c.bf16 %v4617_v62, %v4616_v42  ;;  %v4615_v54 = vmax.f32 %v4583_v24, 0.0  ;;  %v4547_v56 = vadd.f32 %v4468_v63, %v3821_v7  ;;  %v3824_v41 = vadd.f32 %v6198_v35, %v3465_v39  ;;  %v8238_v63 = vld [vmem:[#allocation10_spill] sm:$0xff]  ;;  %v8239_v42 = vld [vmem:[#allocation11_spill] sm:$0xff]  ;;  %v8240_v35 = vld [vmem:[#allocation12_spill] sm:$0xff] }
 0x1fa   : > { %v4471_v51 = vpop.f32.mrf.mxu0  ;;  %v3745_v14 = vpop.f32.mrf.mxu1  ;;  %v4588_v50 = vadd.f32 %v7975_v61, %v4549_v18  ;;  %v3473_v62 = vadd.f32 %v8239_v42, %v3114_v26 }
 0x1fb   : > { %5777 = vst [vmem:[%s7993_s12 + $0x38] sm:$0xff] %v5729_v44   ;;  %v5724_v0 = vpack.c.bf16 %v4615_v54, %v4614_v33  ;;  %v3822_v47 = vadd.f32 %v3745_v14, %v3463_v1  ;;  %v4550_v28 = vadd.f32 %v6232_v55, %v3824_v41  ;;  %v4586_v5 = vadd.f32 %v7975_v61, %v4547_v56  ;;  %v8241_v56 = vld [vmem:[#allocation13_spill] sm:$0xff] }
 0x1fc   : > { %v6235_v21 = vpop.f32.mrf.mxu0  ;;  %v6201_v22 = vpop.f32.mrf.mxu1  ;;  %v4620_v48 = vmax.f32 %v4588_v50, 0.0 }
 0x1fd   : > { %5776 = vst [vmem:[%s7993_s12 + $0x30] sm:$0xff] %v5724_v0   ;;  %v4548_v9 = vadd.f32 %v4471_v51, %v3822_v47  ;;  %v3827_v12 = vadd.f32 %v6201_v22, %v7922_v46  ;;  %v4589_v30 = vadd.f32 %v7975_v61, %v4550_v28  ;;  %v4618_v46 = vmax.f32 %v4586_v5, 0.0 }
 0x1fe   : > { %v4484_v32 = vpop.f32.mrf.mxu0  ;;  %v3758_v15 = vpop.f32.mrf.mxu1  ;;  %v3471_v51 = vadd.f32 %v8241_v56, %v3112_v49  ;;  %v4827_v56 = vld [vmem:[%s7993_s12 + $0xc] sm:$0xf] (%p6579_p9) }
 0x1ff   : > { %v4587_v53 = vadd.f32 %v7975_v61, %v4548_v9  ;;  %v4553_v6 = vadd.f32 %v6235_v21, %v3827_v12  ;;  %v3825_v8 = vadd.f32 %v3758_v15, %v8234_v37  ;;  %v4621_v38 = vmax.f32 %v4589_v30, 0.0  ;;  %v8242_v12 = vld [vmem:[#allocation6_spill] sm:$0xff]  ;;  %v8244_v30 = vld [vmem:[#allocation7_spill] sm:$0xff]  ;;  %4828 = vst [vmem:[%s8099_s28 + $0x18] sm:$0xf] (%p6579_p9), %v4827_v56 }
 0x200   : > { %v6236_v57 = vpop.f32.mrf.mxu0  ;;  %v6202_v52 = vpop.f32.mrf.mxu1  ;;  %v8245_v15 = vld [vmem:[#allocation19_spill] sm:$0xff] }
 0x201   : > { %v4619_v20 = vmax.f32 %v4587_v53, 0.0  ;;  %v3828_v10 = vadd.f32 %v6202_v52, %v3469_v31  ;;  %v5739_v36 = vpack.c.bf16 %v4621_v38, %v4620_v48  ;;  %v4551_v29 = vadd.f32 %v4484_v32, %v3825_v8  ;;  %v8243_v32 = vld [vmem:[#allocation16_spill] sm:$0xff]  ;;  %v8246_v48 = vld [vmem:[#allocation14_spill] sm:$0xff] }
 0x202   : > { %v4487_v17 = vpop.f32.mrf.mxu0  ;;  %v3761_v59 = vpop.f32.mrf.mxu1  ;;  %v4592_v11 = vadd.f32 %v7975_v61, %v4553_v6  ;;  %v3118_v2 = vadd.f32 %v8243_v32, %v8242_v12  ;;  %v3116_v31 = vadd.f32 %v8245_v15, %v8244_v30 }
 0x203   : > { %v5734_v25 = vpack.c.bf16 %v4619_v20, %v4618_v46  ;;  %v4554_v19 = vadd.f32 %v6236_v57, %v3828_v10  ;;  %5779 = vst [vmem:[%s7993_s12 + $0x48] sm:$0xff] %v5739_v36   ;;  %v3826_v23 = vadd.f32 %v3761_v59, %v3467_v13  ;;  %v4590_v24 = vadd.f32 %v7975_v61, %v4551_v29  ;;  %v8249_v36 = vld [vmem:[#allocation18_spill] sm:$0xff] }
 0x204   : > { %v6239_v45 = vpop.f32.mrf.mxu0  ;;  %v6205_v58 = vpop.f32.mrf.mxu1  ;;  %v4624_v39 = vmax.f32 %v4592_v11, 0.0  ;;  %v3477_v26 = vadd.f32 %v8248_v43, %v3118_v2  ;;  %v3475_v29 = vadd.f32 %v8249_v36, %v3116_v31 }
 0x205   : > { %5778 = vst [vmem:[%s7993_s12 + $0x40] sm:$0xff] %v5734_v25   ;;  %v4593_v60 = vadd.f32 %v7975_v61, %v4554_v19  ;;  %v3831_v16 = vadd.f32 %v6205_v58, %v8238_v63  ;;  %v4552_v7 = vadd.f32 %v4487_v17, %v3826_v23  ;;  %v4622_v47 = vmax.f32 %v4590_v24, 0.0 }
 0x206   : > { %v4500_v4 = vpop.f32.mrf.mxu0  ;;  %v3774_v55 = vpop.f32.mrf.mxu1 }
 0x207   : > { %v4625_v1 = vmax.f32 %v4593_v60, 0.0  ;;  %v4557_v18 = vadd.f32 %v6239_v45, %v3831_v16  ;;  %v3829_v33 = vadd.f32 %v3774_v55, %v8240_v35  ;;  %v4591_v27 = vadd.f32 %v7975_v61, %v4552_v7 }
 0x208   : > { %v6240_v44 = vpop.f32.mrf.mxu0  ;;  %v6206_v54 = vpop.f32.mrf.mxu1 }
 0x209   : > { %v5749_v41 = vpack.c.bf16 %v4625_v1, %v4624_v39  ;;  %v4555_v14 = vadd.f32 %v4500_v4, %v3829_v33  ;;  %v3832_v3 = vadd.f32 %v6206_v54, %v3473_v62  ;;  %v4623_v21 = vmax.f32 %v4591_v27, 0.0  ;;  %v4823_v27 = vld [vmem:[%s7993_s12 + $0x4] sm:$0xf] (%p6579_p9)  ;;  %v4825_v54 = vld [vmem:[%s7993_s12 + $0x8] sm:$0xf] (%p6579_p9) }
 0x20a   : > { %v4503_v0 = vpop.f32.mrf.mxu0  ;;  %v3777_v50 = vpop.f32.mrf.mxu1  ;;  %v4596_v28 = vadd.f32 %v7975_v61, %v4557_v18  ;;  %4824 = vst [vmem:[%s8099_s28 + $0x8] sm:$0xf] (%p6579_p9), %v4823_v27  ;;  %4826 = vst [vmem:[%s8099_s28 + $0x10] sm:$0xf] (%p6579_p9), %v4825_v54  ;;  %v4857_v2 = vld [vmem:[%s7993_s12 + $0x48] sm:$0xf] (%p6579_p9) }
 0x20b   : > { %5781 = vst [vmem:[%s7993_s12 + $0x58] sm:$0xff] %v5749_v41   ;;  %v4558_v22 = vadd.f32 %v6240_v44, %v3832_v3  ;;  %v3830_v5 = vadd.f32 %v3777_v50, %v3471_v51  ;;  %v5744_v53 = vpack.c.bf16 %v4623_v21, %v4622_v47  ;;  %v4594_v37 = vadd.f32 %v7975_v61, %v4555_v14  ;;  %v4829_v51 = vld [vmem:[%s7993_s12 + $0x10] sm:$0xf] (%p6579_p9)  ;;  %v4831_v41 = vld [vmem:[%s7993_s12 + $0x14] sm:$0xf] (%p6579_p9) }
 0x20c   : > { %v6243_v9 = vpop.f32.mrf.mxu0  ;;  %v6209_v6 = vpop.f32.mrf.mxu1  ;;  %v4628_v20 = vmax.f32 %v4596_v28, 0.0  ;;  %v4833_v14 = vld [vmem:[%s7993_s12 + $0x18] sm:$0xf] (%p6579_p9)  ;;  %v4835_v3 = vld [vmem:[%s7993_s12 + $0x1c] sm:$0xf] (%p6579_p9) }
 0x20d   : > { %v4597_v8 = vadd.f32 %v7975_v61, %v4558_v22  ;;  %v4556_v57 = vadd.f32 %v4503_v0, %v3830_v5  ;;  %v3835_v38 = vadd.f32 %v6209_v6, %v8246_v48  ;;  %5780 = vst [vmem:[%s7993_s12 + $0x50] sm:$0xff] %v5744_v53   ;;  %v4626_v19 = vmax.f32 %v4594_v37, 0.0  ;;  %v4837_v0 = vld [vmem:[%s7993_s12 + $0x20] sm:$0xf] (%p6579_p9)  ;;  %v4839_v47 = vld [vmem:[%s7993_s12 + $0x24] sm:$0xf] (%p6579_p9) }
 0x20e   : > { %v4516_v52 = vpop.f32.mrf.mxu0  ;;  %v3790_v46 = vpop.f32.mrf.mxu1  ;;  %4830 = vst [vmem:[%s8099_s28 + $0x20] sm:$0xf] (%p6579_p9), %v4829_v51  ;;  %4832 = vst [vmem:[%s8099_s28 + $0x28] sm:$0xf] (%p6579_p9), %v4831_v41  ;;  %v4841_v21 = vld [vmem:[%s7993_s12 + $0x28] sm:$0xf] (%p6579_p9) }
 0x20f   : > { %v4629_v10 = vmax.f32 %v4597_v8, 0.0  ;;  %v4595_v17 = vadd.f32 %v7975_v61, %v4556_v57  ;;  %v3833_v13 = vadd.f32 %v3790_v46, %v8247_v34  ;;  %v4561_v59 = vadd.f32 %v6243_v9, %v3835_v38  ;;  %4834 = vst [vmem:[%s8099_s28 + $0x30] sm:$0xf] (%p6579_p9), %v4833_v14  ;;  %4836 = vst [vmem:[%s8099_s28 + $0x38] sm:$0xf] (%p6579_p9), %v4835_v3 }
 0x210   : > { %v6210_v25 = vpop.f32.mrf.mxu1  ;;  %v6244_v11 = vpop.f32.mrf.mxu0  ;;  %4838 = vst [vmem:[%s8099_s28 + $0x40] sm:$0xf] (%p6579_p9), %v4837_v0  ;;  %4840 = vst [vmem:[%s8099_s28 + $0x48] sm:$0xf] (%p6579_p9), %v4839_v47  ;;  %v4843_v50 = vld [vmem:[%s7993_s12 + $0x2c] sm:$0xf] (%p6579_p9) }
 0x211   : > { %v5759_v45 = vpack.c.bf16 %v4629_v10, %v4628_v20  ;;  %v4627_v23 = vmax.f32 %v4595_v17, 0.0  ;;  %v4559_v58 = vadd.f32 %v4516_v52, %v3833_v13  ;;  %v3836_v40 = vadd.f32 %v6210_v25, %v3477_v26  ;;  %v4845_v28 = vld [vmem:[%s7993_s12 + $0x30] sm:$0xf] (%p6579_p9)  ;;  %4842 = vst [vmem:[%s8099_s28 + $0x50] sm:$0xf] (%p6579_p9), %v4841_v21 }
 0x212   : > { %v3793_v49 = vpop.f32.mrf.mxu1  ;;  %v4600_v16 = vadd.f32 %v7975_v61, %v4561_v59  ;;  %v4519_v42 = vpop.f32.mrf.mxu0  ;;  %4844 = vst [vmem:[%s8099_s28 + $0x58] sm:$0xf] (%p6579_p9), %v4843_v50  ;;  %4846 = vst [vmem:[%s8099_s28 + $0x60] sm:$0xf] (%p6579_p9), %v4845_v28  ;;  %v4847_v22 = vld [vmem:[%s7993_s12 + $0x34] sm:$0xf] (%p6579_p9) }
 0x213   : > { %5783 = vst [vmem:[%s7993_s12 + $0x68] sm:$0xff] %v5759_v45   ;;  %v5754_v60 = vpack.c.bf16 %v4627_v23, %v4626_v19  ;;  %v3834_v63 = vadd.f32 %v3793_v49, %v3475_v29  ;;  %v4562_v4 = vadd.f32 %v6244_v11, %v3836_v40  ;;  %v4598_v62 = vadd.f32 %v7975_v61, %v4559_v58  ;;  %v4849_v5 = vld [vmem:[%s7993_s12 + $0x38] sm:$0xf] (%p6579_p9)  ;;  %v4851_v9 = vld [vmem:[%s7993_s12 + $0x3c] sm:$0xf] (%p6579_p9) }
 0x214   : > { %v4632_v39 = vmax.f32 %v4600_v16, 0.0  ;;  %4848 = vst [vmem:[%s8099_s28 + $0x68] sm:$0xf] (%p6579_p9), %v4847_v22  ;;  %4850 = vst [vmem:[%s8099_s28 + $0x70] sm:$0xf] (%p6579_p9), %v4849_v5 }
 0x215   : > { %5782 = vst [vmem:[%s7993_s12 + $0x60] sm:$0xff] %v5754_v60   ;;  %v4560_v24 = vadd.f32 %v4519_v42, %v3834_v63  ;;  %v4601_v7 = vadd.f32 %v7975_v61, %v4562_v4  ;;  %v4630_v18 = vmax.f32 %v4598_v62, 0.0  ;;  %4852 = vst [vmem:[%s8099_s28 + $0x78] sm:$0xf] (%p6579_p9), %v4851_v9  ;;  %v4853_v12 = vld [vmem:[%s7993_s12 + $0x40] sm:$0xf] (%p6579_p9) }
 0x216   : > { %v4855_v32 = vld [vmem:[%s7993_s12 + $0x44] sm:$0xf] (%p6579_p9)  ;;  %4854 = vst [vmem:[%s8099_s28 + $0x80] sm:$0xf] (%p6579_p9), %v4853_v12  ;;  %4858 = vst [vmem:[%s8099_s28 + $0x90] sm:$0xf] (%p6579_p9), %v4857_v2 }
 0x217   : > { %v4599_v55 = vadd.f32 %v7975_v61, %v4560_v24  ;;  %v4633_v1 = vmax.f32 %v4601_v7, 0.0  ;;  %v4821_v61 = vld [vmem:[%s7993_s12] sm:$0xf] (%p6579_p9)  ;;  %4856 = vst [vmem:[%s8099_s28 + $0x88] sm:$0xf] (%p6579_p9), %v4855_v32 }
 0x218   : > { %4822 = vst [vmem:[%s8099_s28] sm:$0xf] (%p6579_p9), %v4821_v61  ;;  %v4859_v30 = vld [vmem:[%s7993_s12 + $0x4c] sm:$0xf] (%p6579_p9)  ;;  %v4861_v15 = vld [vmem:[%s7993_s12 + $0x50] sm:$0xf] (%p6579_p9) }
 0x219   : > { %v4631_v35 = vmax.f32 %v4599_v55, 0.0  ;;  %v5769_v33 = vpack.c.bf16 %v4633_v1, %v4632_v39  ;;  %4800 = sbr.rel (!%p6579_p9) target bundleno = 550 (0x226), region = 77  ;;  %v4863_v31 = vld [vmem:[%s7993_s12 + $0x54] sm:$0xf] (%p6579_p9)  ;;  %4860 = vst [vmem:[%s8099_s28 + $0x98] sm:$0xf] (%p6579_p9), %v4859_v30 }
 0x21a   : > { %4862 = vst [vmem:[%s8099_s28 + $0xa0] sm:$0xf] (%p6579_p9), %v4861_v15  ;;  %4864 = vst [vmem:[%s8099_s28 + $0xa8] sm:$0xf] (%p6579_p9), %v4863_v31  ;;  %v4865_v53 = vld [vmem:[%s7993_s12 + $0x58] sm:$0xf] (%p6579_p9) }
 0x21b   : > { %v5764_v44 = vpack.c.bf16 %v4631_v35, %v4630_v18  ;;  %5785 = vst [vmem:[%s7993_s12 + $0x78] sm:$0xff] %v5769_v33   ;;  %v4867_v6 = vld [vmem:[%s7993_s12 + $0x5c] sm:$0xf] (%p6579_p9)  ;;  %4866 = vst [vmem:[%s8099_s28 + $0xb0] sm:$0xf] (%p6579_p9), %v4865_v53 }
 0x21c   : > { %v4869_v37 = vld [vmem:[%s7993_s12 + $0x60] sm:$0xf] (%p6579_p9)  ;;  %4868 = vst [vmem:[%s8099_s28 + $0xb8] sm:$0xf] (%p6579_p9), %v4867_v6  ;;  %v4871_v8 = vld [vmem:[%s7993_s12 + $0x64] sm:$0xf] (%p6579_p9) }
 0x21d   : > { %5784 = vst [vmem:[%s7993_s12 + $0x70] sm:$0xff] %v5764_v44   ;;  %4870 = vst [vmem:[%s8099_s28 + $0xc0] sm:$0xf] (%p6579_p9), %v4869_v37  ;;  %v4873_v57 = vld [vmem:[%s7993_s12 + $0x68] sm:$0xf] (%p6579_p9) }
 0x21e   : > { %v4875_v48 = vld [vmem:[%s7993_s12 + $0x6c] sm:$0xf]  ;;  %4872 = vst [vmem:[%s8099_s28 + $0xc8] sm:$0xf] %v4871_v8  ;;  %4874 = vst [vmem:[%s8099_s28 + $0xd0] sm:$0xf] %v4873_v57 }
 0x21f   : > { %4876 = vst [vmem:[%s8099_s28 + $0xd8] sm:$0xf] %v4875_v48 }
 0x222   : > { %v4881_v46 = vld [vmem:[%s7993_s12 + $0x78] sm:$0xf]  ;;  %v4883_v20 = vld [vmem:[%s7993_s12 + $0x7c] sm:$0xf] }
 0x223   : > { %4882 = vst [vmem:[%s8099_s28 + $0xf0] sm:$0xf] %v4881_v46  ;;  %4884 = vst [vmem:[%s8099_s28 + $0xf8] sm:$0xf] %v4883_v20 }
 0x224   : > { %v4877_v38 = vld [vmem:[%s7993_s12 + $0x70] sm:$0xf]  ;;  %v4879_v52 = vld [vmem:[%s7993_s12 + $0x74] sm:$0xf] }
 0x225   : > { %4878 = vst [vmem:[%s8099_s28 + $0xe0] sm:$0xf] %v4877_v38  ;;  %4880 = vst [vmem:[%s8099_s28 + $0xe8] sm:$0xf] %v4879_v52 }
 0x226 PF: > { %s13_s20 = sadd.s32 1, %s6489_s20   ;;  %s8250_s12 = smov %s6461_s13 }
 0x227   : > { %p10_p2 = scmp.ge.s32.totalorder %s13_s20, 6   ;;  %s8251_s13 = smov %s6584_s4 }
 0x228   : > { %s8252_s14 = smov %s6469_s15  ;;  %s8253_s15 = smov %s6573_s27 }
 0x229   : > { %s8254_s16 = smov %s6481_s18  ;;  %s8255_s17 = smov %s6485_s19 }
 0x22a   : > { %s8256_s18 = smov %s8259_s22  ;;  %s8257_s19 = smov %s8263_s23 }
 0x22b   :  { %12 = sbr.rel (!%p10_p2) target bundleno = 5 (0x5), region = 168 }

// kernel: segmentation_forward.11
= control target key start
LH: loop header
LB: loop body
LE: loop exit
PB: predicated region body
PF: predicated region fallthrough
CT: control target
= control target key end

     0   :  { %s1157_s9 = smov 0   ;;  %s1159_s10 = smov 0   ;;  %s1260_s0 = inlined_call_operand.vmem [shape: f32[16,8], index: 0, kind: input, shape index: {}]   ;;  %s1261_s1 = inlined_call_operand.vmem [shape: bf16[2,8,8,256], index: 1, kind: input, shape index: {}]   ;;  %s1262_s2 = inlined_call_operand.vmem [shape: bf16[2,8,16,256], index: 2, kind: output, shape index: {}]  }
   0x1   :  { %s1161_s11 = smov 0  }
   0x2 LB: > { %s24_s12 = sadd.s32 1, %s1135_s10  ;;  %p1035_p0 = scmp.ge.s32.totalorder %s1139_s11, 1  ;;  %s1139_s11 = sphi %s1161_s11, %s12_s11   ;;  %s1135_s10 = sphi %s1159_s10, %s1264_s10   ;;  %s1131_s9 = sphi %s1157_s9, %s1263_s9  }
   0x3   : > { %p26_p1 = scmp.ge.s32.totalorder %s24_s12, 2  ;;  %p133_p2 = scmp.lt.s32.totalorder %s1139_s11, 3 }
   0x5   : > { %s1266_s12 = smov (%p26_p1, %s24_s12), 0  ;;  %p134_p3 = pnand %p1035_p0, %p133_p2 }
   0x6   : > { %p164_p4 = scmp.lt.s32.totalorder (!%p134_p3), %s1131_s9, 1 }
   0x7   : > { %137 = sbr.rel (%p134_p3) target bundleno = 246 (0xf6), region = 28 }
   0xc   : > { %v1141_v0 = vmov 0.0   ;;  %s1268_s9 = smov (!%p164_p4, %s1131_s9), 1  ;;  %v207_v9 = vld [vmem:[%s1260_s0] sm:$0xff]  ;;  %vm209_vm0 = vcmask 64512   ;;  %v208_v16 = vld [vmem:[%s1260_s0 + $0x8] sm:$0xff] }
   0xd   : > { %280 = vmatprep.mubr.f32.mxu0 %v1141_v0  ;;  %357 = vmatprep.mubr.f32.mxu1 %v1141_v0  ;;  %s1074_s13 = sshll.u32 %s1268_s9, 6  ;;  %s1075_s21 = sshll.u32 %s1268_s9, 7 }
   0xe   : > { %s1183_s16 = scalar_lea.vmem %s1261_s1, %s1074_s13  ;;  %s1233_s24 = scalar_lea.vmem %s1262_s2, %s1075_s21 }
   0xf   : > { %v183_v1 = vld [vmem:[%s1183_s16] sm:$0xff]  ;;  %v184_v2 = vld [vmem:[%s1183_s16 + $0x8] sm:$0xff]  ;;  %v185_v3 = vld [vmem:[%s1183_s16 + $0x10] sm:$0xff] }
  0x10   : > { %v192_v4 = vunpack.c.h.bf16 %v183_v1  ;;  %v194_v5 = vunpack.c.h.bf16 %v184_v2  ;;  %v191_v6 = vunpack.c.l.bf16 %v183_v1  ;;  %v193_v7 = vunpack.c.l.bf16 %v184_v2  ;;  %v186_v8 = vld [vmem:[%s1183_s16 + $0x18] sm:$0xff]  ;;  %v187_v14 = vld [vmem:[%s1183_s16 + $0x20] sm:$0xff]  ;;  %v188_v15 = vld [vmem:[%s1183_s16 + $0x28] sm:$0xff] }
  0x11   : > { %v196_v10 = vunpack.c.h.bf16 %v185_v3  ;;  %v198_v11 = vunpack.c.h.bf16 %v186_v8  ;;  %v195_v12 = vunpack.c.l.bf16 %v185_v3  ;;  %v197_v13 = vunpack.c.l.bf16 %v186_v8  ;;  %v189_v19 = vld [vmem:[%s1183_s16 + $0x30] sm:$0xff]  ;;  %v190_v20 = vld [vmem:[%s1183_s16 + $0x38] sm:$0xff] }
  0x12   : > { %246 = vmatprep.subr.mxu0 %v192_v4  ;;  %323 = vmatprep.subr.mxu1 %v194_v5  ;;  %v200_v17 = vunpack.c.h.bf16 %v187_v14  ;;  %v202_v18 = vunpack.c.h.bf16 %v188_v15  ;;  %v199_v21 = vunpack.c.l.bf16 %v187_v14  ;;  %v201_v22 = vunpack.c.l.bf16 %v188_v15 }
  0x13   : > { %247 = vmatpush1.msra.mxu0 %v191_v6  ;;  %324 = vmatpush1.msra.mxu1 %v193_v7  ;;  %v204_v23 = vunpack.c.h.bf16 %v189_v19  ;;  %v206_v24 = vunpack.c.h.bf16 %v190_v20  ;;  %v203_v25 = vunpack.c.l.bf16 %v189_v19  ;;  %v205_v26 = vunpack.c.l.bf16 %v190_v20 }
  0x14   : > { %1040 = vmatmul.mubr.msk.f32.vlgmr.msra.gmra.mxu0 %vm209_vm0, %v207_v9  ;;  %1042 = vmatmul.mubr.msk.f32.vlgmr.msra.gmra.mxu1 %vm209_vm0, %v207_v9 }
  0x15   : > { %400 = vmatprep.subr.mxu0 %v196_v10  ;;  %477 = vmatprep.subr.mxu1 %v198_v11 }
  0x16   : > { %401 = vmatpush1.msra.mxu0 %v195_v12  ;;  %478 = vmatpush1.msra.mxu1 %v197_v13 }
  0x17   : > { %286 = vmatprep.mubr.f32.mxu0 %v1141_v0  ;;  %363 = vmatprep.mubr.f32.mxu1 %v1141_v0 }
  0x18   : > { %1041 = vmatmul.mubr.msk.f32.gmra.mxu0 %vm209_vm0, %v208_v16  ;;  %1043 = vmatmul.mubr.msk.f32.gmra.mxu1 %vm209_vm0, %v208_v16 }
  0x19   : > { %434 = vmatprep.mubr.f32.mxu0 %v1141_v0  ;;  %511 = vmatprep.mubr.f32.mxu1 %v1141_v0 }
  0x1a   : > { %554 = vmatprep.subr.mxu0 %v200_v17  ;;  %631 = vmatprep.subr.mxu1 %v202_v18 }
  0x1c   : > { %1044 = vmatmul.mubr.msk.f32.vlgmr.msra.gmra.mxu0 %vm209_vm0, %v207_v9  ;;  %1046 = vmatmul.mubr.msk.f32.vlgmr.msra.gmra.mxu1 %vm209_vm0, %v207_v9 }
  0x1d   : > { %555 = vmatpush1.msra.mxu0 %v199_v21  ;;  %632 = vmatpush1.msra.mxu1 %v201_v22 }
  0x1e   : > { %440 = vmatprep.mubr.f32.mxu0 %v1141_v0  ;;  %517 = vmatprep.mubr.f32.mxu1 %v1141_v0 }
  0x1f   : > { %708 = vmatprep.subr.mxu0 %v204_v23  ;;  %785 = vmatprep.subr.mxu1 %v206_v24 }
  0x20   : > { %1045 = vmatmul.mubr.msk.f32.gmra.mxu0 %vm209_vm0, %v208_v16  ;;  %1047 = vmatmul.mubr.msk.f32.gmra.mxu1 %vm209_vm0, %v208_v16 }
  0x21   : > { %588 = vmatprep.mubr.f32.mxu0 %v1141_v0  ;;  %665 = vmatprep.mubr.f32.mxu1 %v1141_v0 }
  0x24   : > { %1048 = vmatmul.mubr.msk.f32.vlgmr.msra.gmra.mxu0 %vm209_vm0, %v207_v9  ;;  %1050 = vmatmul.mubr.msk.f32.vlgmr.msra.gmra.mxu1 %vm209_vm0, %v207_v9 }
  0x25   : > { %709 = vmatpush1.msra.mxu0 %v203_v25  ;;  %786 = vmatpush1.msra.mxu1 %v205_v26 }
  0x26   : > { %594 = vmatprep.mubr.f32.mxu0 %v1141_v0  ;;  %671 = vmatprep.mubr.f32.mxu1 %v1141_v0 }
  0x28   : > { %1049 = vmatmul.mubr.msk.f32.gmra.mxu0 %vm209_vm0, %v208_v16  ;;  %1051 = vmatmul.mubr.msk.f32.gmra.mxu1 %vm209_vm0, %v208_v16 }
  0x29   : > { %742 = vmatprep.mubr.f32.mxu0 %v1141_v0  ;;  %819 = vmatprep.mubr.f32.mxu1 %v1141_v0 }
  0x2c   : > { %1052 = vmatmul.mubr.msk.f32.vlgmr.msra.gmra.mxu0 %vm209_vm0, %v207_v9  ;;  %1054 = vmatmul.mubr.msk.f32.vlgmr.msra.gmra.mxu1 %vm209_vm0, %v207_v9 }
  0x2d   : > { %748 = vmatprep.mubr.f32.mxu0 %v1141_v0  ;;  %825 = vmatprep.mubr.f32.mxu1 %v1141_v0 }
  0x30   : > { %1053 = vmatmul.mubr.msk.f32.gmra.mxu0 %vm209_vm0, %v208_v16  ;;  %1055 = vmatmul.mubr.msk.f32.gmra.mxu1 %vm209_vm0, %v208_v16 }
  0xd4   : > { %v282_v27 = vpop.f32.mrf.mxu0  ;;  %v359_v28 = vpop.f32.mrf.mxu1 }
  0xd6   : > { %v284_v29 = vpop.f32.mrf.mxu0  ;;  %v361_v30 = vpop.f32.mrf.mxu1 }
  0xd7   : > { %v1076_v31 = vpack.c.bf16 %v284_v29, %v282_v27  ;;  %v1078_v32 = vpack.c.bf16 %v361_v30, %v359_v28 }
  0xd8   : > { %v288_v33 = vpop.f32.mrf.mxu0  ;;  %v365_v34 = vpop.f32.mrf.mxu1 }
  0xd9   : > { %928 = vst [vmem:[%s1233_s24] sm:$0xff] %v1076_v31  ;;  %930 = vst [vmem:[%s1233_s24 + $0x10] sm:$0xff] %v1078_v32 }
  0xda   : > { %v290_v35 = vpop.f32.mrf.mxu0  ;;  %v367_v36 = vpop.f32.mrf.mxu1 }
  0xdb   : > { %v1077_v37 = vpack.c.bf16 %v290_v35, %v288_v33  ;;  %v1079_v38 = vpack.c.bf16 %v367_v36, %v365_v34 }
  0xdc   : > { %v436_v39 = vpop.f32.mrf.mxu0  ;;  %v513_v40 = vpop.f32.mrf.mxu1 }
  0xdd   : > { %929 = vst [vmem:[%s1233_s24 + $0x8] sm:$0xff] %v1077_v37  ;;  %931 = vst [vmem:[%s1233_s24 + $0x18] sm:$0xff] %v1079_v38 }
  0xde   : > { %v438_v41 = vpop.f32.mrf.mxu0  ;;  %v515_v42 = vpop.f32.mrf.mxu1 }
  0xdf   : > { %v1080_v43 = vpack.c.bf16 %v438_v41, %v436_v39  ;;  %v1082_v44 = vpack.c.bf16 %v515_v42, %v513_v40 }
  0xe0   : > { %v442_v45 = vpop.f32.mrf.mxu0  ;;  %v519_v46 = vpop.f32.mrf.mxu1 }
  0xe1   : > { %932 = vst [vmem:[%s1233_s24 + $0x20] sm:$0xff] %v1080_v43  ;;  %934 = vst [vmem:[%s1233_s24 + $0x30] sm:$0xff] %v1082_v44 }
  0xe2   : > { %v444_v47 = vpop.f32.mrf.mxu0  ;;  %v521_v48 = vpop.f32.mrf.mxu1 }
  0xe3   : > { %v1081_v49 = vpack.c.bf16 %v444_v47, %v442_v45  ;;  %v1083_v50 = vpack.c.bf16 %v521_v48, %v519_v46 }
  0xe4   : > { %v590_v51 = vpop.f32.mrf.mxu0  ;;  %v667_v52 = vpop.f32.mrf.mxu1 }
  0xe5   : > { %933 = vst [vmem:[%s1233_s24 + $0x28] sm:$0xff] %v1081_v49  ;;  %935 = vst [vmem:[%s1233_s24 + $0x38] sm:$0xff] %v1083_v50 }
  0xe6   : > { %v592_v53 = vpop.f32.mrf.mxu0  ;;  %v669_v54 = vpop.f32.mrf.mxu1 }
  0xe7   : > { %v1084_v55 = vpack.c.bf16 %v592_v53, %v590_v51  ;;  %v1086_v56 = vpack.c.bf16 %v669_v54, %v667_v52 }
  0xe8   : > { %v596_v57 = vpop.f32.mrf.mxu0  ;;  %v673_v58 = vpop.f32.mrf.mxu1 }
  0xe9   : > { %936 = vst [vmem:[%s1233_s24 + $0x40] sm:$0xff] %v1084_v55  ;;  %938 = vst [vmem:[%s1233_s24 + $0x50] sm:$0xff] %v1086_v56 }
  0xea   : > { %v598_v59 = vpop.f32.mrf.mxu0  ;;  %v675_v60 = vpop.f32.mrf.mxu1 }
  0xeb   : > { %v1085_v61 = vpack.c.bf16 %v598_v59, %v596_v57  ;;  %v1087_v62 = vpack.c.bf16 %v675_v60, %v673_v58 }
  0xec   : > { %v744_v63 = vpop.f32.mrf.mxu0  ;;  %v821_v0 = vpop.f32.mrf.mxu1 }
  0xed   : > { %937 = vst [vmem:[%s1233_s24 + $0x48] sm:$0xff] %v1085_v61  ;;  %939 = vst [vmem:[%s1233_s24 + $0x58] sm:$0xff] %v1087_v62 }
  0xee   : > { %v746_v1 = vpop.f32.mrf.mxu0  ;;  %v823_v2 = vpop.f32.mrf.mxu1 }
  0xef   : > { %v1088_v3 = vpack.c.bf16 %v746_v1, %v744_v63  ;;  %v1090_v4 = vpack.c.bf16 %v823_v2, %v821_v0 }
  0xf0   : > { %v750_v5 = vpop.f32.mrf.mxu0  ;;  %v827_v6 = vpop.f32.mrf.mxu1 }
  0xf1   : > { %940 = vst [vmem:[%s1233_s24 + $0x60] sm:$0xff] %v1088_v3  ;;  %942 = vst [vmem:[%s1233_s24 + $0x70] sm:$0xff] %v1090_v4 }
  0xf2   : > { %v752_v7 = vpop.f32.mrf.mxu0  ;;  %v829_v8 = vpop.f32.mrf.mxu1 }
  0xf3   : > { %v1089_v9 = vpack.c.bf16 %v752_v7, %v750_v5  ;;  %v1091_v10 = vpack.c.bf16 %v829_v8, %v827_v6 }
  0xf5   : > { %941 = vst [vmem:[%s1233_s24 + $0x68] sm:$0xff] %v1089_v9  ;;  %943 = vst [vmem:[%s1233_s24 + $0x78] sm:$0xff] %v1091_v10 }
  0xf6 PF: > { %s12_s11 = sadd.s32 1, %s1139_s11   ;;  %s1263_s9 = smov %s1135_s10 }
  0xf7   : > { %p9_p5 = scmp.ge.s32.totalorder %s12_s11, 4   ;;  %s1264_s10 = smov %s1266_s12 }
  0xf9   :  { %11 = sbr.rel (!%p9_p5) target bundleno = 2 (0x2), region = 58 }

// kernel: segmentation_forward.12
= control target key start
LH: loop header
LB: loop body
LE: loop exit
PB: predicated region body
PF: predicated region fallthrough
CT: control target
= control target key end

     0   :  { %s1252_s9 = smov 0   ;;  %s1254_s10 = smov 0   ;;  %s1429_s0 = inlined_call_operand.vmem [shape: f32[16,8], index: 0, kind: input, shape index: {}]   ;;  %s1430_s1 = inlined_call_operand.vmem [shape: bf16[2,8,4096], index: 1, kind: input, shape index: {}]   ;;  %s1431_s2 = inlined_call_operand.vmem [shape: bf16[2,16,4096], index: 2, kind: output, shape index: {}]  }
   0x1   :  { %s1256_s11 = smov 0   ;;  %s1258_s12 = smov 0  }
   0x2   :  { %s1260_s13 = smov 0   ;;  %s1262_s14 = smov 0  }
   0x3   :  { %s1264_s15 = smov 0  }
   0x4 LB: > { %s21_s16 = sadd.s32 1, %s1226_s13  ;;  %s24_s17 = sadd.s32 1, %s1230_s14  ;;  %s1234_s15 = sphi %s1264_s15, %s12_s15   ;;  %s1230_s14 = sphi %s1262_s14, %s1438_s14   ;;  %s1226_s13 = sphi %s1260_s13, %s1437_s13   ;;  %s1222_s12 = sphi %s1258_s12, %s1436_s12   ;;  %s1218_s11 = sphi %s1256_s11, %s1435_s11   ;;  %s1214_s10 = sphi %s1254_s10, %s1434_s10   ;;  %s1210_s9 = sphi %s1252_s9, %s1433_s9  }
   0x5   : > { %p22_p0 = scmp.ge.s32.totalorder %s21_s16, 2  ;;  %s1060_s18 = sadd.s32 4294967295, %s1234_s15  }
   0x6   : > { %p92_p1 = scmp.ne.s32.totalorder %s1214_s10, %s1210_s9  ;;  %p93_p2 = scmp.eq.s32.totalorder %s1060_s18, 3 }
   0x7   : > { %s1440_s16 = smov (%p22_p0, %s21_s16), 0  ;;  %s1442_s17 = smov (!%p22_p0, %s24_s17), %s1230_s14 }
   0x8   : > { %s78_s19 = ssub.s32 %s1226_s13, %s1440_s16  ;;  %p26_p3 = scmp.ge.s32.totalorder %s1442_s17, 2 }
   0x9   : > { %p1064_p4 = scmp.ge.s32.totalorder %s1234_s15, 1  ;;  %p1296_p5 = por %p93_p2, %p92_p1 }
   0xa   : > { %p133_p6 = scmp.lt.s32.totalorder %s1234_s15, 5  ;;  %s1444_s17 = smov (%p26_p3, %s1442_s17), 0 }
   0xb   : > { %s77_s21 = ssub.s32 %s1230_s14, %s1444_s17  ;;  %s82_s23 = sadd.s32 1, %s1214_s10 }
   0xc   : > { %p134_p7 = pnand %p1064_p4, %p133_p6  ;;  %s79_s22 = sor.u32 %s78_s19, %s77_s21 }
   0xd   : > { %p80_p8 = scmp.eq.s32.totalorder %s79_s22, 0  ;;  %s1309_s25 = sshll.u32 (!%p134_p7), %s1218_s11, 4 }
   0xe   : > { %137 = sbr.rel (%p134_p7) target bundleno = 264 (0x108), region = 28  ;;  %p159_p9 = scmp.lt.s32.totalorder (!%p134_p7), %s1222_s12, 1 }
   0xf   : > { %s1307_s24 = scalar_select %p80_p8, %s1214_s10, %s82_s23  }
  0x10   : > { %p161_p10 = scmp.lt.s32.totalorder (!%p134_p7), %s1309_s25, 31  ;;  %s155_s18 = sand.u32 (!%p134_p7), 1, %s1210_s9  }
  0x11   : > { %s1065_s19 = sshll.u32 (!%p134_p7), %s155_s18, 7 }
  0x12   : > { %s1367_s21 = scalar_lea.vmem (!%p134_p7), [#allocation2], %s1065_s19 }
  0x13   : > { %v1236_v0 = vmov 0.0   ;;  %s160_s26 = scalar_select %p159_p9, %s1222_s12, 1  ;;  %v193_v9 = vld [vmem:[%s1429_s0] sm:$0xff]  ;;  %vm195_vm0 = vcmask 64512   ;;  %v194_v16 = vld [vmem:[%s1429_s0 + $0x8] sm:$0xff] }
  0x14   : > { %266 = vmatprep.mubr.f32.mxu0 %v1236_v0  ;;  %343 = vmatprep.mubr.f32.mxu1 %v1236_v0  ;;  %s162_s27 = scalar_select %p161_p10, %s1309_s25, 31 }
  0x15   : > { %s1067_s28 = sshll.u32 %s160_s26, 5  ;;  %s1103_s9 = sshll.u32 (%p1296_p5), %s1222_s12, 6 }
  0x16   : > { %s164_s29 = sadd.s32 %s1067_s28, %s162_s27  ;;  %s939_s20 = sadd.s32 (%p1296_p5), %s1103_s9, %s1309_s25 }
  0x17   : > { %s1068_s30 = sshll.u32 %s164_s29, 2  ;;  %s1104_s22 = sshll.u32 (%p1296_p5), %s939_s20, 2 }
  0x18   : > { %s1320_s5 = scalar_lea.vmem %s1430_s1, %s1068_s30  ;;  %s941_s27 = scalar_lea.vmem (%p1296_p5), %s1431_s2, %s1104_s22 }
  0x19   : > { %v169_v1 = vld [vmem:[%s1320_s5] sm:$0xff]  ;;  %v170_v2 = vld [vmem:[%s1320_s5 + $0x8] sm:$0xff]  ;;  %v171_v3 = vld [vmem:[%s1320_s5 + $0x10] sm:$0xff] }
  0x1a   : > { %v178_v4 = vunpack.c.h.bf16 %v169_v1  ;;  %v180_v5 = vunpack.c.h.bf16 %v170_v2  ;;  %v177_v6 = vunpack.c.l.bf16 %v169_v1  ;;  %v179_v7 = vunpack.c.l.bf16 %v170_v2  ;;  %v172_v8 = vld [vmem:[%s1320_s5 + $0x18] sm:$0xff]  ;;  %v173_v14 = vld [vmem:[%s1320_s5 + $0x20] sm:$0xff]  ;;  %v174_v15 = vld [vmem:[%s1320_s5 + $0x28] sm:$0xff] }
  0x1b   : > { %v182_v10 = vunpack.c.h.bf16 %v171_v3  ;;  %v184_v11 = vunpack.c.h.bf16 %v172_v8  ;;  %v181_v12 = vunpack.c.l.bf16 %v171_v3  ;;  %v183_v13 = vunpack.c.l.bf16 %v172_v8  ;;  %v175_v19 = vld [vmem:[%s1320_s5 + $0x30] sm:$0xff]  ;;  %v176_v20 = vld [vmem:[%s1320_s5 + $0x38] sm:$0xff] }
  0x1c   : > { %232 = vmatprep.subr.mxu0 %v178_v4  ;;  %309 = vmatprep.subr.mxu1 %v180_v5  ;;  %v186_v17 = vunpack.c.h.bf16 %v173_v14  ;;  %v188_v18 = vunpack.c.h.bf16 %v174_v15  ;;  %v185_v21 = vunpack.c.l.bf16 %v173_v14  ;;  %v187_v22 = vunpack.c.l.bf16 %v174_v15 }
  0x1d   : > { %233 = vmatpush1.msra.mxu0 %v177_v6  ;;  %310 = vmatpush1.msra.mxu1 %v179_v7  ;;  %v190_v23 = vunpack.c.h.bf16 %v175_v19  ;;  %v192_v24 = vunpack.c.h.bf16 %v176_v20  ;;  %v189_v25 = vunpack.c.l.bf16 %v175_v19  ;;  %v191_v26 = vunpack.c.l.bf16 %v176_v20 }
  0x1e   : > { %1069 = vmatmul.mubr.msk.f32.vlgmr.msra.gmra.mxu0 %vm195_vm0, %v193_v9  ;;  %1071 = vmatmul.mubr.msk.f32.vlgmr.msra.gmra.mxu1 %vm195_vm0, %v193_v9 }
  0x1f   : > { %386 = vmatprep.subr.mxu0 %v182_v10  ;;  %463 = vmatprep.subr.mxu1 %v184_v11 }
  0x20   : > { %387 = vmatpush1.msra.mxu0 %v181_v12  ;;  %464 = vmatpush1.msra.mxu1 %v183_v13 }
  0x21   : > { %272 = vmatprep.mubr.f32.mxu0 %v1236_v0  ;;  %349 = vmatprep.mubr.f32.mxu1 %v1236_v0 }
  0x22   : > { %1070 = vmatmul.mubr.msk.f32.gmra.mxu0 %vm195_vm0, %v194_v16  ;;  %1072 = vmatmul.mubr.msk.f32.gmra.mxu1 %vm195_vm0, %v194_v16 }
  0x23   : > { %420 = vmatprep.mubr.f32.mxu0 %v1236_v0  ;;  %497 = vmatprep.mubr.f32.mxu1 %v1236_v0 }
  0x24   : > { %540 = vmatprep.subr.mxu0 %v186_v17  ;;  %617 = vmatprep.subr.mxu1 %v188_v18 }
  0x26   : > { %1073 = vmatmul.mubr.msk.f32.vlgmr.msra.gmra.mxu0 %vm195_vm0, %v193_v9  ;;  %1075 = vmatmul.mubr.msk.f32.vlgmr.msra.gmra.mxu1 %vm195_vm0, %v193_v9 }
  0x27   : > { %541 = vmatpush1.msra.mxu0 %v185_v21  ;;  %618 = vmatpush1.msra.mxu1 %v187_v22 }
  0x28   : > { %426 = vmatprep.mubr.f32.mxu0 %v1236_v0  ;;  %503 = vmatprep.mubr.f32.mxu1 %v1236_v0 }
  0x29   : > { %694 = vmatprep.subr.mxu0 %v190_v23  ;;  %771 = vmatprep.subr.mxu1 %v192_v24 }
  0x2a   : > { %1074 = vmatmul.mubr.msk.f32.gmra.mxu0 %vm195_vm0, %v194_v16  ;;  %1076 = vmatmul.mubr.msk.f32.gmra.mxu1 %vm195_vm0, %v194_v16 }
  0x2b   : > { %574 = vmatprep.mubr.f32.mxu0 %v1236_v0  ;;  %651 = vmatprep.mubr.f32.mxu1 %v1236_v0 }
  0x2e   : > { %1077 = vmatmul.mubr.msk.f32.vlgmr.msra.gmra.mxu0 %vm195_vm0, %v193_v9  ;;  %1079 = vmatmul.mubr.msk.f32.vlgmr.msra.gmra.mxu1 %vm195_vm0, %v193_v9 }
  0x2f   : > { %695 = vmatpush1.msra.mxu0 %v189_v25  ;;  %772 = vmatpush1.msra.mxu1 %v191_v26 }
  0x30   : > { %580 = vmatprep.mubr.f32.mxu0 %v1236_v0  ;;  %657 = vmatprep.mubr.f32.mxu1 %v1236_v0 }
  0x32   : > { %1078 = vmatmul.mubr.msk.f32.gmra.mxu0 %vm195_vm0, %v194_v16  ;;  %1080 = vmatmul.mubr.msk.f32.gmra.mxu1 %vm195_vm0, %v194_v16 }
  0x33   : > { %728 = vmatprep.mubr.f32.mxu0 %v1236_v0  ;;  %805 = vmatprep.mubr.f32.mxu1 %v1236_v0 }
  0x36   : > { %1081 = vmatmul.mubr.msk.f32.vlgmr.msra.gmra.mxu0 %vm195_vm0, %v193_v9  ;;  %1083 = vmatmul.mubr.msk.f32.vlgmr.msra.gmra.mxu1 %vm195_vm0, %v193_v9 }
  0x37   : > { %734 = vmatprep.mubr.f32.mxu0 %v1236_v0  ;;  %811 = vmatprep.mubr.f32.mxu1 %v1236_v0 }
  0x3a   : > { %1082 = vmatmul.mubr.msk.f32.gmra.mxu0 %vm195_vm0, %v194_v16  ;;  %1084 = vmatmul.mubr.msk.f32.gmra.mxu1 %vm195_vm0, %v194_v16 }
  0xde   : > { %v268_v27 = vpop.f32.mrf.mxu0  ;;  %v345_v28 = vpop.f32.mrf.mxu1 }
  0xe0   : > { %v270_v29 = vpop.f32.mrf.mxu0  ;;  %v347_v30 = vpop.f32.mrf.mxu1 }
  0xe1   : > { %v1107_v31 = vpack.c.bf16 %v270_v29, %v268_v27  ;;  %v1108_v32 = vpack.c.bf16 %v347_v30, %v345_v28 }
  0xe2   : > { %v274_v33 = vpop.f32.mrf.mxu0  ;;  %v351_v34 = vpop.f32.mrf.mxu1 }
  0xe3   : > { %914 = vst [vmem:[%s1367_s21] sm:$0xff] %v1107_v31  ;;  %915 = vst [vmem:[%s1367_s21 + $0x8] sm:$0xff] %v1108_v32 }
  0xe4   : > { %v276_v35 = vpop.f32.mrf.mxu0  ;;  %v353_v36 = vpop.f32.mrf.mxu1 }
  0xe5   : > { %v1115_v37 = vpack.c.bf16 %v276_v35, %v274_v33  ;;  %v1116_v38 = vpack.c.bf16 %v353_v36, %v351_v34 }
  0xe6   : > { %v422_v39 = vpop.f32.mrf.mxu0  ;;  %v499_v40 = vpop.f32.mrf.mxu1 }
  0xe7   : > { %922 = vst [vmem:[%s1367_s21 + $0x40] sm:$0xff] %v1115_v37  ;;  %923 = vst [vmem:[%s1367_s21 + $0x48] sm:$0xff] %v1116_v38 }
  0xe8   : > { %v424_v41 = vpop.f32.mrf.mxu0  ;;  %v501_v42 = vpop.f32.mrf.mxu1 }
  0xe9   : > { %v1109_v43 = vpack.c.bf16 %v424_v41, %v422_v39  ;;  %v1110_v44 = vpack.c.bf16 %v501_v42, %v499_v40 }
  0xea   : > { %v428_v45 = vpop.f32.mrf.mxu0  ;;  %v505_v46 = vpop.f32.mrf.mxu1  ;;  %v954_v11 = vld [vmem:[%s1367_s21] sm:$0xff] (%p1296_p5)  ;;  %v956_v12 = vld [vmem:[%s1367_s21 + $0x8] sm:$0xff] (%p1296_p5) }
  0xeb   : > { %916 = vst [vmem:[%s1367_s21 + $0x10] sm:$0xff] %v1109_v43  ;;  %917 = vst [vmem:[%s1367_s21 + $0x18] sm:$0xff] %v1110_v44 }
  0xec   : > { %v430_v47 = vpop.f32.mrf.mxu0  ;;  %v507_v48 = vpop.f32.mrf.mxu1  ;;  %955 = vst [vmem:[%s941_s27] sm:$0xff] (%p1296_p5), %v954_v11  ;;  %957 = vst [vmem:[%s941_s27 + $0x8] sm:$0xff] (%p1296_p5), %v956_v12 }
  0xed   : > { %v1117_v49 = vpack.c.bf16 %v430_v47, %v428_v45  ;;  %v1118_v50 = vpack.c.bf16 %v507_v48, %v505_v46 }
  0xee   : > { %v576_v51 = vpop.f32.mrf.mxu0  ;;  %v653_v52 = vpop.f32.mrf.mxu1  ;;  %v970_v19 = vld [vmem:[%s1367_s21 + $0x40] sm:$0xff] (%p1296_p5)  ;;  %v972_v20 = vld [vmem:[%s1367_s21 + $0x48] sm:$0xff] (%p1296_p5) }
  0xef   : > { %924 = vst [vmem:[%s1367_s21 + $0x50] sm:$0xff] %v1117_v49  ;;  %925 = vst [vmem:[%s1367_s21 + $0x58] sm:$0xff] %v1118_v50 }
  0xf0   : > { %v578_v53 = vpop.f32.mrf.mxu0  ;;  %v655_v54 = vpop.f32.mrf.mxu1  ;;  %971 = vst [vmem:[%s941_s27 + $0x80] sm:$0xff] (%p1296_p5), %v970_v19  ;;  %973 = vst [vmem:[%s941_s27 + $0x88] sm:$0xff] (%p1296_p5), %v972_v20 }
  0xf1   : > { %v1111_v55 = vpack.c.bf16 %v578_v53, %v576_v51  ;;  %v1112_v56 = vpack.c.bf16 %v655_v54, %v653_v52 }
  0xf2   : > { %v582_v57 = vpop.f32.mrf.mxu0  ;;  %v659_v58 = vpop.f32.mrf.mxu1  ;;  %v958_v13 = vld [vmem:[%s1367_s21 + $0x10] sm:$0xff] (%p1296_p5)  ;;  %v960_v14 = vld [vmem:[%s1367_s21 + $0x18] sm:$0xff] (%p1296_p5) }
  0xf3   : > { %918 = vst [vmem:[%s1367_s21 + $0x20] sm:$0xff] %v1111_v55  ;;  %919 = vst [vmem:[%s1367_s21 + $0x28] sm:$0xff] %v1112_v56 }
  0xf4   : > { %v584_v59 = vpop.f32.mrf.mxu0  ;;  %v661_v60 = vpop.f32.mrf.mxu1  ;;  %959 = vst [vmem:[%s941_s27 + $0x10] sm:$0xff] (%p1296_p5), %v958_v13  ;;  %961 = vst [vmem:[%s941_s27 + $0x18] sm:$0xff] (%p1296_p5), %v960_v14 }
  0xf5   : > { %v1119_v61 = vpack.c.bf16 %v584_v59, %v582_v57  ;;  %v1120_v62 = vpack.c.bf16 %v661_v60, %v659_v58 }
  0xf6   : > { %v730_v63 = vpop.f32.mrf.mxu0  ;;  %v807_v0 = vpop.f32.mrf.mxu1  ;;  %v974_v21 = vld [vmem:[%s1367_s21 + $0x50] sm:$0xff] (%p1296_p5)  ;;  %v976_v22 = vld [vmem:[%s1367_s21 + $0x58] sm:$0xff] (%p1296_p5) }
  0xf7   : > { %926 = vst [vmem:[%s1367_s21 + $0x60] sm:$0xff] %v1119_v61  ;;  %927 = vst [vmem:[%s1367_s21 + $0x68] sm:$0xff] %v1120_v62 }
  0xf8   : > { %v732_v1 = vpop.f32.mrf.mxu0  ;;  %v809_v2 = vpop.f32.mrf.mxu1  ;;  %975 = vst [vmem:[%s941_s27 + $0x90] sm:$0xff] (%p1296_p5), %v974_v21  ;;  %977 = vst [vmem:[%s941_s27 + $0x98] sm:$0xff] (%p1296_p5), %v976_v22 }
  0xf9   : > { %v1113_v3 = vpack.c.bf16 %v732_v1, %v730_v63  ;;  %v1114_v4 = vpack.c.bf16 %v809_v2, %v807_v0 }
  0xfa   : > { %v736_v5 = vpop.f32.mrf.mxu0  ;;  %v813_v6 = vpop.f32.mrf.mxu1  ;;  %v962_v15 = vld [vmem:[%s1367_s21 + $0x20] sm:$0xff] (%p1296_p5)  ;;  %v964_v16 = vld [vmem:[%s1367_s21 + $0x28] sm:$0xff] (%p1296_p5) }
  0xfb   : > { %920 = vst [vmem:[%s1367_s21 + $0x30] sm:$0xff] %v1113_v3  ;;  %921 = vst [vmem:[%s1367_s21 + $0x38] sm:$0xff] %v1114_v4  ;;  %936 = sbr.rel (!%p1296_p5) target bundleno = 264 (0x108), region = 32 }
  0xfc   : > { %v738_v7 = vpop.f32.mrf.mxu0  ;;  %v815_v8 = vpop.f32.mrf.mxu1  ;;  %963 = vst [vmem:[%s941_s27 + $0x20] sm:$0xff] (%p1296_p5), %v962_v15  ;;  %965 = vst [vmem:[%s941_s27 + $0x28] sm:$0xff] (%p1296_p5), %v964_v16 }
  0xfd   : > { %v1121_v9 = vpack.c.bf16 %v738_v7, %v736_v5  ;;  %v1122_v10 = vpack.c.bf16 %v815_v8, %v813_v6 }
  0xfe   : > { %v978_v23 = vld [vmem:[%s1367_s21 + $0x60] sm:$0xff] (%p1296_p5)  ;;  %v980_v24 = vld [vmem:[%s1367_s21 + $0x68] sm:$0xff] (%p1296_p5) }
  0xff   : > { %928 = vst [vmem:[%s1367_s21 + $0x70] sm:$0xff] %v1121_v9  ;;  %929 = vst [vmem:[%s1367_s21 + $0x78] sm:$0xff] %v1122_v10 }
 0x100   : > { %979 = vst [vmem:[%s941_s27 + $0xa0] sm:$0xff] %v978_v23  ;;  %981 = vst [vmem:[%s941_s27 + $0xa8] sm:$0xff] %v980_v24 }
 0x102   : > { %v966_v17 = vld [vmem:[%s1367_s21 + $0x30] sm:$0xff]  ;;  %v968_v18 = vld [vmem:[%s1367_s21 + $0x38] sm:$0xff] }
 0x103   : > { %967 = vst [vmem:[%s941_s27 + $0x30] sm:$0xff] %v966_v17  ;;  %969 = vst [vmem:[%s941_s27 + $0x38] sm:$0xff] %v968_v18 }
 0x106   : > { %v982_v25 = vld [vmem:[%s1367_s21 + $0x70] sm:$0xff]  ;;  %v984_v26 = vld [vmem:[%s1367_s21 + $0x78] sm:$0xff] }
 0x107   : > { %983 = vst [vmem:[%s941_s27 + $0xb0] sm:$0xff] %v982_v25  ;;  %985 = vst [vmem:[%s941_s27 + $0xb8] sm:$0xff] %v984_v26 }
 0x108 PF: > { %s12_s15 = sadd.s32 1, %s1234_s15   ;;  %s1433_s9 = smov %s1214_s10 }
 0x109   : > { %p9_p11 = scmp.ge.s32.totalorder %s12_s15, 6   ;;  %s1434_s10 = smov %s1307_s24 }
 0x10a   : > { %s1435_s11 = smov %s1226_s13  ;;  %s1436_s12 = smov %s1230_s14 }
 0x10b   : > { %s1437_s13 = smov %s1440_s16  ;;  %s1438_s14 = smov %s1444_s17 }
 0x10c   :  { %11 = sbr.rel (!%p9_p11) target bundleno = 4 (0x4), region = 81 }

// kernel: segmentation_forward.10
= control target key start
LH: loop header
LB: loop body
LE: loop exit
PB: predicated region body
PF: predicated region fallthrough
CT: control target
= control target key end

     0   :  { %s1744_s12 = smov 0   ;;  %s1746_s13 = smov 0   ;;  %s1918_s0 = inlined_call_operand.vmem [shape: bf16[512,256], index: 0, kind: input, shape index: {}]   ;;  %s1919_s1 = inlined_call_operand.vmem [shape: bf16[256,128], index: 1, kind: input, shape index: {}]   ;;  %s1920_s2 = inlined_call_operand.vmem [shape: f32[1,128], index: 2, kind: input, shape index: {}]   ;;  %s1921_s3 = inlined_call_operand.vmem [shape: bf16[512,128], index: 3, kind: output, shape index: {}]  }
   0x1   :  { %s1748_s14 = smov 0  }
   0x2 LB: > { %s32_s15 = sadd.s32 1, %s1718_s13  ;;  %p1267_p0 = scmp.ge.s32.totalorder %s1722_s14, 1  ;;  %s1722_s14 = sphi %s1748_s14, %s13_s14   ;;  %s1718_s13 = sphi %s1746_s13, %s1923_s13   ;;  %s1714_s12 = sphi %s1744_s12, %s1922_s12  }
   0x3   : > { %p34_p1 = scmp.ge.s32.totalorder %s32_s15, 2  ;;  %p191_p2 = scmp.lt.s32.totalorder %s1722_s14, 3 }
   0x5   : > { %s1925_s15 = smov (%p34_p1, %s32_s15), 0  ;;  %p192_p3 = pnand %p1267_p0, %p191_p2 }
   0x6   : > { %s1268_s18 = sshll.u32 (!%p192_p3), %s1714_s12, 5 }
   0x7   : > { %195 = sbr.rel (%p192_p3) target bundleno = 309 (0x135), region = 32  ;;  %p236_p4 = scmp.lt.s32.totalorder (!%p192_p3), %s1268_s18, 63 }
   0xc   : > { %v1636_v0 = vld [vmem:[%s1919_s1 + $0x78] sm:$0xff]   ;;  %v1638_v2 = vld [vmem:[%s1919_s1 + $0x70] sm:$0xff]   ;;  %v1640_v4 = vld [vmem:[%s1919_s1 + $0x68] sm:$0xff]   ;;  %s1927_s18 = smov (!%p236_p4, %s1268_s18), 63 }
   0xd   : > { %v1637_v1 = vld [vmem:[%s1919_s1 + $0x38] sm:$0xff]   ;;  %1484 = vmatprep.subr.bf16.mxu0 %v1636_v0  ;;  %1596 = vmatprep.subr.bf16.mxu1 %v1636_v0  ;;  %v1639_v3 = vld [vmem:[%s1919_s1 + $0x30] sm:$0xff]   ;;  %v1641_v5 = vld [vmem:[%s1919_s1 + $0x28] sm:$0xff]   ;;  %s1356_s6 = sshll.u32 %s1927_s18, 3  ;;  %s1272_s5 = sshll.u32 %s1927_s18, 2 }
   0xe   : > { %1485 = vmatpush3.bf16.msra.mxu0 %v1637_v1  ;;  %1604 = vmatpush3.bf16.msra.mxu1 %v1637_v1  ;;  %v1642_v6 = vld [vmem:[%s1919_s1 + $0x60] sm:$0xff]   ;;  %v1644_v8 = vld [vmem:[%s1919_s1 + $0x58] sm:$0xff]   ;;  %s1795_s11 = scalar_lea.vmem %s1918_s0, %s1356_s6  ;;  %v1646_v10 = vld [vmem:[%s1919_s1 + $0x50] sm:$0xff]   ;;  %s1863_s8 = scalar_lea.vmem %s1921_s3, %s1272_s5 }
   0xf   : > { %1486 = vmatprep.subr.bf16.mxu0 %v1638_v2  ;;  %1597 = vmatprep.subr.bf16.mxu1 %v1638_v2  ;;  %v1643_v7 = vld [vmem:[%s1919_s1 + $0x20] sm:$0xff]   ;;  %v1645_v9 = vld [vmem:[%s1919_s1 + $0x18] sm:$0xff]   ;;  %v1647_v13 = vld [vmem:[%s1919_s1 + $0x10] sm:$0xff]  }
  0x10   : > { %v1654_v11 = vld [vmem:[%s1795_s11 + $0x4] ss:$8 sps:$4 sm:$0xff]   ;;  %v1652_v18 = vld [vmem:[%s1795_s11] ss:$8 sps:$4 sm:$0xff]   ;;  %v1658_v20 = vld [vmem:[%s1795_s11 + $0x14] ss:$8 sps:$4 sm:$0xff]  }
  0x11   : > { %v1657_v12 = vld [vmem:[%s1795_s11 + $0x84] ss:$8 sps:$4 sm:$0xff]   ;;  %688 = vmatprep.mubr.bf16.mxu0 %v1654_v11  ;;  %v1655_v19 = vld [vmem:[%s1795_s11 + $0x80] ss:$8 sps:$4 sm:$0xff]   ;;  %v1660_v21 = vld [vmem:[%s1795_s11 + $0x94] ss:$8 sps:$4 sm:$0xff]  }
  0x12   : > { %1487 = vmatpush3.bf16.msra.mxu0 %v1639_v3  ;;  %1605 = vmatpush3.bf16.msra.mxu1 %v1639_v3  ;;  %v1648_v14 = vld [vmem:[%s1919_s1 + $0x48] sm:$0xff]   ;;  %v1650_v16 = vld [vmem:[%s1919_s1 + $0x40] sm:$0xff]   ;;  %v1662_v22 = vld [vmem:[%s1795_s11 + $0x10] ss:$8 sps:$4 sm:$0xff]  }
  0x13   : > { %1488 = vmatprep.subr.bf16.mxu0 %v1640_v4  ;;  %1598 = vmatprep.subr.bf16.mxu1 %v1640_v4  ;;  %v1649_v15 = vld [vmem:[%s1919_s1 + $0x8] sm:$0xff]   ;;  %v1651_v17 = vld [vmem:[%s1919_s1] sm:$0xff]   ;;  %v1663_v23 = vld [vmem:[%s1795_s11 + $0x90] ss:$8 sps:$4 sm:$0xff]  }
  0x14   : > { %752 = vmatprep.mubr.bf16.mxu1 %v1657_v12  ;;  %v1664_v24 = vld [vmem:[%s1795_s11 + $0x24] ss:$8 sps:$4 sm:$0xff]   ;;  %v1668_v26 = vld [vmem:[%s1795_s11 + $0x20] ss:$8 sps:$4 sm:$0xff]   ;;  %v1670_v28 = vld [vmem:[%s1795_s11 + $0x34] ss:$8 sps:$4 sm:$0xff]  }
  0x15   : > { %v1666_v25 = vld [vmem:[%s1795_s11 + $0xa4] ss:$8 sps:$4 sm:$0xff]   ;;  %v1669_v27 = vld [vmem:[%s1795_s11 + $0xa0] ss:$8 sps:$4 sm:$0xff]   ;;  %v1672_v29 = vld [vmem:[%s1795_s11 + $0xb4] ss:$8 sps:$4 sm:$0xff]  }
  0x16   : > { %1489 = vmatpush3.bf16.msra.mxu0 %v1641_v5  ;;  %1606 = vmatpush3.bf16.msra.mxu1 %v1641_v5  ;;  %v1674_v30 = vld [vmem:[%s1795_s11 + $0x30] ss:$8 sps:$4 sm:$0xff]   ;;  %v1676_v32 = vld [vmem:[%s1795_s11 + $0x44] ss:$8 sps:$4 sm:$0xff]   ;;  %v1680_v34 = vld [vmem:[%s1795_s11 + $0x40] ss:$8 sps:$4 sm:$0xff]  }
  0x17   : > { %1490 = vmatprep.subr.bf16.mxu0 %v1642_v6  ;;  %1599 = vmatprep.subr.bf16.mxu1 %v1642_v6  ;;  %v1675_v31 = vld [vmem:[%s1795_s11 + $0xb0] ss:$8 sps:$4 sm:$0xff]   ;;  %v1678_v33 = vld [vmem:[%s1795_s11 + $0xc4] ss:$8 sps:$4 sm:$0xff]   ;;  %v1681_v35 = vld [vmem:[%s1795_s11 + $0xc0] ss:$8 sps:$4 sm:$0xff]  }
  0x18   : > { %v1682_v36 = vld [vmem:[%s1795_s11 + $0x54] ss:$8 sps:$4 sm:$0xff]   ;;  %v1686_v38 = vld [vmem:[%s1795_s11 + $0x50] ss:$8 sps:$4 sm:$0xff]   ;;  %v1688_v40 = vld [vmem:[%s1795_s11 + $0x64] ss:$8 sps:$4 sm:$0xff]  }
  0x19   : > { %v1684_v37 = vld [vmem:[%s1795_s11 + $0xd4] ss:$8 sps:$4 sm:$0xff]   ;;  %v1687_v39 = vld [vmem:[%s1795_s11 + $0xd0] ss:$8 sps:$4 sm:$0xff]   ;;  %v1690_v41 = vld [vmem:[%s1795_s11 + $0xe4] ss:$8 sps:$4 sm:$0xff]  }
  0x1a   : > { %1491 = vmatpush3.bf16.msra.mxu0 %v1643_v7  ;;  %1607 = vmatpush3.bf16.msra.mxu1 %v1643_v7  ;;  %v1692_v42 = vld [vmem:[%s1795_s11 + $0x60] ss:$8 sps:$4 sm:$0xff]   ;;  %v1694_v44 = vld [vmem:[%s1795_s11 + $0x74] ss:$8 sps:$4 sm:$0xff]   ;;  %v1698_v46 = vld [vmem:[%s1795_s11 + $0x70] ss:$8 sps:$4 sm:$0xff]  }
  0x1b   : > { %1492 = vmatprep.subr.bf16.mxu0 %v1644_v8  ;;  %1600 = vmatprep.subr.bf16.mxu1 %v1644_v8  ;;  %v1693_v43 = vld [vmem:[%s1795_s11 + $0xe0] ss:$8 sps:$4 sm:$0xff]   ;;  %v1696_v45 = vld [vmem:[%s1795_s11 + $0xf4] ss:$8 sps:$4 sm:$0xff]   ;;  %v1699_v47 = vld [vmem:[%s1795_s11 + $0xf0] ss:$8 sps:$4 sm:$0xff]  }
  0x1c   : > { %v1853_v53 = vld [vmem:[%s1920_s2] ss:$0 sm:$0xff] }
  0x1e   : > { %1493 = vmatpush3.bf16.msra.mxu0 %v1645_v9  ;;  %1608 = vmatpush3.bf16.msra.mxu1 %v1645_v9 }
  0x1f   : > { %1494 = vmatprep.subr.bf16.mxu0 %v1646_v10  ;;  %1601 = vmatprep.subr.bf16.mxu1 %v1646_v10 }
  0x22   : > { %1495 = vmatpush3.bf16.msra.mxu0 %v1647_v13  ;;  %1609 = vmatpush3.bf16.msra.mxu1 %v1647_v13 }
  0x23   : > { %1496 = vmatprep.subr.bf16.mxu0 %v1648_v14  ;;  %1602 = vmatprep.subr.bf16.mxu1 %v1648_v14 }
  0x26   : > { %1497 = vmatpush3.bf16.msra.mxu0 %v1649_v15  ;;  %1610 = vmatpush3.bf16.msra.mxu1 %v1649_v15 }
  0x27   : > { %1498 = vmatprep.subr.bf16.mxu0 %v1650_v16  ;;  %1603 = vmatprep.subr.bf16.mxu1 %v1650_v16 }
  0x2a   : > { %1499 = vmatpush3.bf16.msra.mxu0 %v1651_v17  ;;  %1611 = vmatpush3.bf16.msra.mxu1 %v1651_v17 }
  0x2d   : > { %689 = vmatmul.mubr.bf16.vlgmr.msra.gmra.mxu0 %v1652_v18  ;;  %753 = vmatmul.mubr.bf16.vlgmr.msra.gmra.mxu1 %v1655_v19 }
  0x2e   : > { %696 = vmatprep.mubr.bf16.mxu0 %v1658_v20  ;;  %760 = vmatprep.mubr.bf16.mxu1 %v1660_v21 }
  0x35   : > { %697 = vmatmul.mubr.bf16.gmra.mxu0 %v1662_v22  ;;  %761 = vmatmul.mubr.bf16.gmra.mxu1 %v1663_v23 }
  0x36   : > { %704 = vmatprep.mubr.bf16.mxu0 %v1664_v24  ;;  %768 = vmatprep.mubr.bf16.mxu1 %v1666_v25 }
  0x3d   : > { %705 = vmatmul.mubr.bf16.gmra.mxu0 %v1668_v26  ;;  %769 = vmatmul.mubr.bf16.gmra.mxu1 %v1669_v27 }
  0x3e   : > { %712 = vmatprep.mubr.bf16.mxu0 %v1670_v28  ;;  %776 = vmatprep.mubr.bf16.mxu1 %v1672_v29 }
  0x45   : > { %713 = vmatmul.mubr.bf16.gmra.mxu0 %v1674_v30  ;;  %777 = vmatmul.mubr.bf16.gmra.mxu1 %v1675_v31 }
  0x46   : > { %720 = vmatprep.mubr.bf16.mxu0 %v1676_v32  ;;  %784 = vmatprep.mubr.bf16.mxu1 %v1678_v33 }
  0x4d   : > { %721 = vmatmul.mubr.bf16.gmra.mxu0 %v1680_v34  ;;  %785 = vmatmul.mubr.bf16.gmra.mxu1 %v1681_v35 }
  0x4e   : > { %728 = vmatprep.mubr.bf16.mxu0 %v1682_v36  ;;  %792 = vmatprep.mubr.bf16.mxu1 %v1684_v37 }
  0x55   : > { %729 = vmatmul.mubr.bf16.gmra.mxu0 %v1686_v38  ;;  %793 = vmatmul.mubr.bf16.gmra.mxu1 %v1687_v39 }
  0x56   : > { %736 = vmatprep.mubr.bf16.mxu0 %v1688_v40  ;;  %800 = vmatprep.mubr.bf16.mxu1 %v1690_v41 }
  0x5d   : > { %737 = vmatmul.mubr.bf16.gmra.mxu0 %v1692_v42  ;;  %801 = vmatmul.mubr.bf16.gmra.mxu1 %v1693_v43 }
  0x5e   : > { %744 = vmatprep.mubr.bf16.mxu0 %v1694_v44  ;;  %808 = vmatprep.mubr.bf16.mxu1 %v1696_v45 }
  0x65   : > { %745 = vmatmul.mubr.bf16.gmra.mxu0 %v1698_v46  ;;  %809 = vmatmul.mubr.bf16.gmra.mxu1 %v1699_v47 }
  0xed   : > { %v1500_v48 = vpop.f32.mrf.mxu0  ;;  %v1548_v49 = vpop.f32.mrf.mxu1 }
  0xef   : > { %v1501_v50 = vpop.f32.mrf.mxu0  ;;  %v1549_v51 = vpop.f32.mrf.mxu1 }
  0xf0   : > { %v1502_v52 = vadd.f32 %v1501_v50, %v1500_v48  ;;  %v1550_v54 = vadd.f32 %v1549_v51, %v1548_v49 }
  0xf1   : > { %v1503_v55 = vpop.f32.mrf.mxu0  ;;  %v1551_v56 = vpop.f32.mrf.mxu1 }
  0xf2   : > { %v923_v57 = vadd.f32 %v1502_v52, %v1853_v53  ;;  %v939_v58 = vadd.f32 %v1550_v54, %v1853_v53 }
  0xf3   : > { %v1504_v59 = vpop.f32.mrf.mxu0  ;;  %v1552_v60 = vpop.f32.mrf.mxu1 }
  0xf4   : > { %v1505_v61 = vadd.f32 %v1504_v59, %v1503_v55  ;;  %v1553_v62 = vadd.f32 %v1552_v60, %v1551_v56  ;;  %v955_v3 = vmax.f32 %v923_v57, 0.0  ;;  %v971_v4 = vmax.f32 %v939_v58, 0.0 }
  0xf5   : > { %v1506_v63 = vpop.f32.mrf.mxu0  ;;  %v1554_v0 = vpop.f32.mrf.mxu1 }
  0xf6   : > { %v924_v1 = vadd.f32 %v1505_v61, %v1853_v53  ;;  %v940_v2 = vadd.f32 %v1553_v62, %v1853_v53 }
  0xf7   : > { %v1507_v5 = vpop.f32.mrf.mxu0  ;;  %v1555_v6 = vpop.f32.mrf.mxu1 }
  0xf8   : > { %v956_v7 = vmax.f32 %v924_v1, 0.0  ;;  %v972_v8 = vmax.f32 %v940_v2, 0.0  ;;  %v1508_v9 = vadd.f32 %v1507_v5, %v1506_v63  ;;  %v1556_v10 = vadd.f32 %v1555_v6, %v1554_v0 }
  0xf9   : > { %v1509_v11 = vpop.f32.mrf.mxu0  ;;  %v1557_v12 = vpop.f32.mrf.mxu1 }
  0xfa   : > { %v1392_v13 = vpack.c.bf16 %v956_v7, %v955_v3  ;;  %v1432_v14 = vpack.c.bf16 %v972_v8, %v971_v4  ;;  %v925_v15 = vadd.f32 %v1508_v9, %v1853_v53  ;;  %v941_v16 = vadd.f32 %v1556_v10, %v1853_v53 }
  0xfb   : > { %v1510_v17 = vpop.f32.mrf.mxu0  ;;  %v1558_v18 = vpop.f32.mrf.mxu1 }
  0xfc   : > { %1393 = vst [vmem:[%s1863_s8] sm:$0xff] %v1392_v13   ;;  %1476 = vst [vmem:[%s1863_s8 + $0x40] sm:$0xff] %v1432_v14   ;;  %v1511_v19 = vadd.f32 %v1510_v17, %v1509_v11  ;;  %v1559_v20 = vadd.f32 %v1558_v18, %v1557_v12  ;;  %v957_v25 = vmax.f32 %v925_v15, 0.0  ;;  %v973_v26 = vmax.f32 %v941_v16, 0.0 }
  0xfd   : > { %v1512_v21 = vpop.f32.mrf.mxu0  ;;  %v1560_v22 = vpop.f32.mrf.mxu1 }
  0xfe   : > { %v926_v23 = vadd.f32 %v1511_v19, %v1853_v53  ;;  %v942_v24 = vadd.f32 %v1559_v20, %v1853_v53 }
  0xff   : > { %v1513_v27 = vpop.f32.mrf.mxu0  ;;  %v1561_v28 = vpop.f32.mrf.mxu1 }
 0x100   : > { %v958_v29 = vmax.f32 %v926_v23, 0.0  ;;  %v974_v30 = vmax.f32 %v942_v24, 0.0  ;;  %v1514_v31 = vadd.f32 %v1513_v27, %v1512_v21  ;;  %v1562_v32 = vadd.f32 %v1561_v28, %v1560_v22 }
 0x101   : > { %v1515_v33 = vpop.f32.mrf.mxu0  ;;  %v1563_v34 = vpop.f32.mrf.mxu1 }
 0x102   : > { %v1397_v35 = vpack.c.bf16 %v958_v29, %v957_v25  ;;  %v1437_v36 = vpack.c.bf16 %v974_v30, %v973_v26  ;;  %v927_v37 = vadd.f32 %v1514_v31, %v1853_v53  ;;  %v943_v38 = vadd.f32 %v1562_v32, %v1853_v53 }
 0x103   : > { %v1516_v39 = vpop.f32.mrf.mxu0  ;;  %v1564_v40 = vpop.f32.mrf.mxu1 }
 0x104   : > { %1469 = vst [vmem:[%s1863_s8 + $0x8] sm:$0xff] %v1397_v35   ;;  %1477 = vst [vmem:[%s1863_s8 + $0x48] sm:$0xff] %v1437_v36   ;;  %v1517_v41 = vadd.f32 %v1516_v39, %v1515_v33  ;;  %v1565_v42 = vadd.f32 %v1564_v40, %v1563_v34  ;;  %v959_v47 = vmax.f32 %v927_v37, 0.0  ;;  %v975_v48 = vmax.f32 %v943_v38, 0.0 }
 0x105   : > { %v1518_v43 = vpop.f32.mrf.mxu0  ;;  %v1566_v44 = vpop.f32.mrf.mxu1 }
 0x106   : > { %v928_v45 = vadd.f32 %v1517_v41, %v1853_v53  ;;  %v944_v46 = vadd.f32 %v1565_v42, %v1853_v53 }
 0x107   : > { %v1519_v49 = vpop.f32.mrf.mxu0  ;;  %v1567_v50 = vpop.f32.mrf.mxu1 }
 0x108   : > { %v960_v51 = vmax.f32 %v928_v45, 0.0  ;;  %v976_v52 = vmax.f32 %v944_v46, 0.0  ;;  %v1520_v54 = vadd.f32 %v1519_v49, %v1518_v43  ;;  %v1568_v55 = vadd.f32 %v1567_v50, %v1566_v44 }
 0x109   : > { %v1521_v56 = vpop.f32.mrf.mxu0  ;;  %v1569_v57 = vpop.f32.mrf.mxu1 }
 0x10a   : > { %v1402_v58 = vpack.c.bf16 %v960_v51, %v959_v47  ;;  %v1442_v59 = vpack.c.bf16 %v976_v52, %v975_v48  ;;  %v929_v60 = vadd.f32 %v1520_v54, %v1853_v53  ;;  %v945_v61 = vadd.f32 %v1568_v55, %v1853_v53 }
 0x10b   : > { %v1522_v62 = vpop.f32.mrf.mxu0  ;;  %v1570_v63 = vpop.f32.mrf.mxu1 }
 0x10c   : > { %1470 = vst [vmem:[%s1863_s8 + $0x10] sm:$0xff] %v1402_v58   ;;  %1478 = vst [vmem:[%s1863_s8 + $0x50] sm:$0xff] %v1442_v59   ;;  %v1523_v0 = vadd.f32 %v1522_v62, %v1521_v56  ;;  %v1571_v1 = vadd.f32 %v1570_v63, %v1569_v57  ;;  %v961_v6 = vmax.f32 %v929_v60, 0.0  ;;  %v977_v7 = vmax.f32 %v945_v61, 0.0 }
 0x10d   : > { %v1524_v2 = vpop.f32.mrf.mxu0  ;;  %v1572_v3 = vpop.f32.mrf.mxu1 }
 0x10e   : > { %v930_v4 = vadd.f32 %v1523_v0, %v1853_v53  ;;  %v946_v5 = vadd.f32 %v1571_v1, %v1853_v53 }
 0x10f   : > { %v1525_v8 = vpop.f32.mrf.mxu0  ;;  %v1573_v9 = vpop.f32.mrf.mxu1 }
 0x110   : > { %v962_v10 = vmax.f32 %v930_v4, 0.0  ;;  %v978_v11 = vmax.f32 %v946_v5, 0.0  ;;  %v1526_v12 = vadd.f32 %v1525_v8, %v1524_v2  ;;  %v1574_v13 = vadd.f32 %v1573_v9, %v1572_v3 }
 0x111   : > { %v1527_v14 = vpop.f32.mrf.mxu0  ;;  %v1575_v15 = vpop.f32.mrf.mxu1 }
 0x112   : > { %v1407_v16 = vpack.c.bf16 %v962_v10, %v961_v6  ;;  %v1447_v17 = vpack.c.bf16 %v978_v11, %v977_v7  ;;  %v931_v18 = vadd.f32 %v1526_v12, %v1853_v53  ;;  %v947_v19 = vadd.f32 %v1574_v13, %v1853_v53 }
 0x113   : > { %v1528_v20 = vpop.f32.mrf.mxu0  ;;  %v1576_v21 = vpop.f32.mrf.mxu1 }
 0x114   : > { %1471 = vst [vmem:[%s1863_s8 + $0x18] sm:$0xff] %v1407_v16   ;;  %1479 = vst [vmem:[%s1863_s8 + $0x58] sm:$0xff] %v1447_v17   ;;  %v1529_v22 = vadd.f32 %v1528_v20, %v1527_v14  ;;  %v1577_v23 = vadd.f32 %v1576_v21, %v1575_v15  ;;  %v963_v28 = vmax.f32 %v931_v18, 0.0  ;;  %v979_v29 = vmax.f32 %v947_v19, 0.0 }
 0x115   : > { %v1530_v24 = vpop.f32.mrf.mxu0  ;;  %v1578_v25 = vpop.f32.mrf.mxu1 }
 0x116   : > { %v932_v26 = vadd.f32 %v1529_v22, %v1853_v53  ;;  %v948_v27 = vadd.f32 %v1577_v23, %v1853_v53 }
 0x117   : > { %v1531_v30 = vpop.f32.mrf.mxu0  ;;  %v1579_v31 = vpop.f32.mrf.mxu1 }
 0x118   : > { %v964_v32 = vmax.f32 %v932_v26, 0.0  ;;  %v980_v33 = vmax.f32 %v948_v27, 0.0  ;;  %v1532_v34 = vadd.f32 %v1531_v30, %v1530_v24  ;;  %v1580_v35 = vadd.f32 %v1579_v31, %v1578_v25 }
 0x119   : > { %v1533_v36 = vpop.f32.mrf.mxu0  ;;  %v1581_v37 = vpop.f32.mrf.mxu1 }
 0x11a   : > { %v1412_v38 = vpack.c.bf16 %v964_v32, %v963_v28  ;;  %v1452_v39 = vpack.c.bf16 %v980_v33, %v979_v29  ;;  %v933_v40 = vadd.f32 %v1532_v34, %v1853_v53  ;;  %v949_v41 = vadd.f32 %v1580_v35, %v1853_v53 }
 0x11b   : > { %v1534_v42 = vpop.f32.mrf.mxu0  ;;  %v1582_v43 = vpop.f32.mrf.mxu1 }
 0x11c   : > { %1472 = vst [vmem:[%s1863_s8 + $0x20] sm:$0xff] %v1412_v38   ;;  %1480 = vst [vmem:[%s1863_s8 + $0x60] sm:$0xff] %v1452_v39   ;;  %v1535_v44 = vadd.f32 %v1534_v42, %v1533_v36  ;;  %v1583_v45 = vadd.f32 %v1582_v43, %v1581_v37  ;;  %v965_v50 = vmax.f32 %v933_v40, 0.0  ;;  %v981_v51 = vmax.f32 %v949_v41, 0.0 }
 0x11d   : > { %v1536_v46 = vpop.f32.mrf.mxu0  ;;  %v1584_v47 = vpop.f32.mrf.mxu1 }
 0x11e   : > { %v934_v48 = vadd.f32 %v1535_v44, %v1853_v53  ;;  %v950_v49 = vadd.f32 %v1583_v45, %v1853_v53 }
 0x11f   : > { %v1537_v52 = vpop.f32.mrf.mxu0  ;;  %v1585_v54 = vpop.f32.mrf.mxu1 }
 0x120   : > { %v966_v55 = vmax.f32 %v934_v48, 0.0  ;;  %v982_v56 = vmax.f32 %v950_v49, 0.0  ;;  %v1538_v57 = vadd.f32 %v1537_v52, %v1536_v46  ;;  %v1586_v58 = vadd.f32 %v1585_v54, %v1584_v47 }
 0x121   : > { %v1539_v59 = vpop.f32.mrf.mxu0  ;;  %v1587_v60 = vpop.f32.mrf.mxu1 }
 0x122   : > { %v1417_v61 = vpack.c.bf16 %v966_v55, %v965_v50  ;;  %v1457_v62 = vpack.c.bf16 %v982_v56, %v981_v51  ;;  %v935_v63 = vadd.f32 %v1538_v57, %v1853_v53  ;;  %v951_v0 = vadd.f32 %v1586_v58, %v1853_v53 }
 0x123   : > { %v1540_v1 = vpop.f32.mrf.mxu0  ;;  %v1588_v2 = vpop.f32.mrf.mxu1 }
 0x124   : > { %1473 = vst [vmem:[%s1863_s8 + $0x28] sm:$0xff] %v1417_v61   ;;  %1481 = vst [vmem:[%s1863_s8 + $0x68] sm:$0xff] %v1457_v62   ;;  %v1541_v3 = vadd.f32 %v1540_v1, %v1539_v59  ;;  %v1589_v4 = vadd.f32 %v1588_v2, %v1587_v60  ;;  %v967_v9 = vmax.f32 %v935_v63, 0.0  ;;  %v983_v10 = vmax.f32 %v951_v0, 0.0 }
 0x125   : > { %v1542_v5 = vpop.f32.mrf.mxu0  ;;  %v1590_v6 = vpop.f32.mrf.mxu1 }
 0x126   : > { %v936_v7 = vadd.f32 %v1541_v3, %v1853_v53  ;;  %v952_v8 = vadd.f32 %v1589_v4, %v1853_v53 }
 0x127   : > { %v1543_v11 = vpop.f32.mrf.mxu0  ;;  %v1591_v12 = vpop.f32.mrf.mxu1 }
 0x128   : > { %v968_v13 = vmax.f32 %v936_v7, 0.0  ;;  %v984_v14 = vmax.f32 %v952_v8, 0.0  ;;  %v1544_v15 = vadd.f32 %v1543_v11, %v1542_v5  ;;  %v1592_v16 = vadd.f32 %v1591_v12, %v1590_v6 }
 0x129   : > { %v1545_v17 = vpop.f32.mrf.mxu0  ;;  %v1593_v18 = vpop.f32.mrf.mxu1 }
 0x12a   : > { %v1422_v19 = vpack.c.bf16 %v968_v13, %v967_v9  ;;  %v1462_v20 = vpack.c.bf16 %v984_v14, %v983_v10  ;;  %v937_v23 = vadd.f32 %v1544_v15, %v1853_v53  ;;  %v953_v24 = vadd.f32 %v1592_v16, %v1853_v53 }
 0x12b   : > { %v1546_v21 = vpop.f32.mrf.mxu0  ;;  %v1594_v22 = vpop.f32.mrf.mxu1 }
 0x12c   : > { %1474 = vst [vmem:[%s1863_s8 + $0x30] sm:$0xff] %v1422_v19   ;;  %1482 = vst [vmem:[%s1863_s8 + $0x70] sm:$0xff] %v1462_v20   ;;  %v1547_v25 = vadd.f32 %v1546_v21, %v1545_v17  ;;  %v1595_v26 = vadd.f32 %v1594_v22, %v1593_v18  ;;  %v969_v29 = vmax.f32 %v937_v23, 0.0  ;;  %v985_v30 = vmax.f32 %v953_v24, 0.0 }
 0x12e   : > { %v938_v27 = vadd.f32 %v1547_v25, %v1853_v53  ;;  %v954_v28 = vadd.f32 %v1595_v26, %v1853_v53 }
 0x130   : > { %v970_v31 = vmax.f32 %v938_v27, 0.0  ;;  %v986_v32 = vmax.f32 %v954_v28, 0.0 }
 0x132   : > { %v1427_v33 = vpack.c.bf16 %v970_v31, %v969_v29  ;;  %v1467_v34 = vpack.c.bf16 %v986_v32, %v985_v30 }
 0x134   : > { %1475 = vst [vmem:[%s1863_s8 + $0x38] sm:$0xff] %v1427_v33   ;;  %1483 = vst [vmem:[%s1863_s8 + $0x78] sm:$0xff] %v1467_v34  }
 0x135 PF: > { %s13_s14 = sadd.s32 1, %s1722_s14   ;;  %s1922_s12 = smov %s1718_s13 }
 0x136   : > { %p10_p5 = scmp.ge.s32.totalorder %s13_s14, 4   ;;  %s1923_s13 = smov %s1925_s15 }
 0x138   :  { %12 = sbr.rel (!%p10_p5) target bundleno = 2 (0x2), region = 76 }

// kernel: segmentation_forward.13
= control target key start
LH: loop header
LB: loop body
LE: loop exit
PB: predicated region body
PF: predicated region fallthrough
CT: control target
= control target key end

     0   :  { %s2100_s18 = smov 0   ;;  %s2102_s19 = smov 0   ;;  %s2420_s0 = inlined_call_operand.vmem [shape: bf16[512,256], index: 0, kind: input, shape index: {}]   ;;  %s2421_s1 = inlined_call_operand.vmem [shape: bf16[512,128], index: 1, kind: input, shape index: {}]   ;;  %s2422_s2 = inlined_call_operand.vmem [shape: bf16[256,128], index: 2, kind: input, shape index: {}]   ;;  %s2423_s3 = inlined_call_operand.vmem [shape: bf16[128,128], index: 3, kind: input, shape index: {}]   ;;  %s2424_s4 = inlined_call_operand.vmem [shape: f32[1,128], index: 4, kind: input, shape index: {}]   ;;  %s2425_s5 = inlined_call_operand.vmem [shape: bf16[512,128], index: 5, kind: output, shape index: {}]  }
   0x1   :  { %s2104_s20 = smov 0  }
   0x2 LB: > { %s27_s21 = sadd.s32 1, %s2064_s19  ;;  %p1491_p0 = scmp.ge.s32.totalorder %s2068_s20, 1  ;;  %s2068_s20 = sphi %s2104_s20, %s15_s20   ;;  %s2064_s19 = sphi %s2102_s19, %s2427_s19   ;;  %s2060_s18 = sphi %s2100_s18, %s2426_s18  }
   0x3   : > { %p29_p1 = scmp.ge.s32.totalorder %s27_s21, 2  ;;  %p240_p2 = scmp.lt.s32.totalorder %s2068_s20, 3 }
   0x5   : > { %s2429_s21 = smov (%p29_p1, %s27_s21), 0  ;;  %p241_p3 = pnand %p1491_p0, %p240_p2 }
   0x6   : > { %s1492_s13 = sshll.u32 (!%p241_p3), %s2060_s18, 5 }
   0x7   : > { %244 = sbr.rel (%p241_p3) target bundleno = 342 (0x156), region = 40  ;;  %p289_p4 = scmp.lt.s32.totalorder (!%p241_p3), %s1492_s13, 63 }
   0xc   : > { %v1958_v0 = vld [vmem:[%s2423_s3 + $0x38] sm:$0xff]   ;;  %v1961_v3 = vld [vmem:[%s2423_s3 + $0x30] sm:$0xff]   ;;  %v1964_v6 = vld [vmem:[%s2423_s3 + $0x28] sm:$0xff]   ;;  %s2431_s13 = smov (!%p289_p4, %s1492_s13), 63 }
   0xd   : > { %v2126_v1 = vld [vmem:[%s2422_s2 + $0x78] sm:$0xff]   ;;  %1870 = vmatprep.subr.bf16.mxu0 %v1958_v0  ;;  %v2141_v4 = vld [vmem:[%s2422_s2 + $0x70] sm:$0xff]   ;;  %v2155_v7 = vld [vmem:[%s2422_s2 + $0x68] sm:$0xff]   ;;  %s1496_s10 = sshll.u32 %s2431_s13, 2  ;;  %s1606_s16 = sshll.u32 %s2431_s13, 3 }
   0xe   : > { %v2131_v2 = vld [vmem:[%s2422_s2 + $0x38] sm:$0xff]   ;;  %1918 = vmatprep.subr.bf16.mxu1 %v2126_v1  ;;  %1871 = vmatpush3.bf16.msra.mxu0 %v1958_v0  ;;  %v2146_v5 = vld [vmem:[%s2422_s2 + $0x30] sm:$0xff]   ;;  %v2162_v8 = vld [vmem:[%s2422_s2 + $0x28] sm:$0xff]   ;;  %s2225_s24 = scalar_lea.vmem %s2421_s1, %s1496_s10  ;;  %s2238_s6 = scalar_lea.vmem %s2420_s0, %s1606_s16 }
   0xf   : > { %1926 = vmatpush3.bf16.msra.mxu1 %v2131_v2  ;;  %1872 = vmatprep.subr.bf16.mxu0 %v1961_v3  ;;  %v1967_v9 = vld [vmem:[%s2423_s3 + $0x20] sm:$0xff]   ;;  %v1970_v12 = vld [vmem:[%s2423_s3 + $0x18] sm:$0xff]   ;;  %v1973_v15 = vld [vmem:[%s2423_s3 + $0x10] sm:$0xff]   ;;  %s2337_s17 = scalar_lea.vmem %s2425_s5, %s1496_s10 }
  0x10   : > { %1919 = vmatprep.subr.bf16.mxu1 %v2141_v4  ;;  %v2171_v10 = vld [vmem:[%s2422_s2 + $0x60] sm:$0xff]   ;;  %v2186_v13 = vld [vmem:[%s2422_s2 + $0x58] sm:$0xff]   ;;  %v2203_v16 = vld [vmem:[%s2422_s2 + $0x50] sm:$0xff]  }
  0x11   : > { %v2176_v11 = vld [vmem:[%s2422_s2 + $0x20] sm:$0xff]   ;;  %v2193_v14 = vld [vmem:[%s2422_s2 + $0x18] sm:$0xff]   ;;  %v2209_v17 = vld [vmem:[%s2422_s2 + $0x10] sm:$0xff]  }
  0x12   : > { %1873 = vmatpush3.bf16.msra.mxu0 %v1961_v3  ;;  %v1976_v18 = vld [vmem:[%s2423_s3 + $0x8] sm:$0xff]   ;;  %v1979_v21 = vld [vmem:[%s2423_s3] sm:$0xff]   ;;  %v1987_v28 = vld [vmem:[%s2225_s24 + $0x10] sm:$0xff]  }
  0x13   : > { %1927 = vmatpush3.bf16.msra.mxu1 %v2146_v5  ;;  %1874 = vmatprep.subr.bf16.mxu0 %v1964_v6  ;;  %v1977_v19 = vld [vmem:[%s2422_s2 + $0x48] sm:$0xff]   ;;  %v1982_v22 = vld [vmem:[%s2225_s24] sm:$0xff]   ;;  %v1988_v29 = vld [vmem:[%s2238_s6 + $0x54] ss:$8 sps:$4 sm:$0xff]  }
  0x14   : > { %1920 = vmatprep.subr.bf16.mxu1 %v2155_v7  ;;  %v2230_v20 = vld [vmem:[%s2422_s2 + $0x8] sm:$0xff]   ;;  %v1980_v23 = vld [vmem:[%s2422_s2 + $0x40] sm:$0xff]   ;;  %1886 = vmatprep.mubr.bf16.mxu0 %v1982_v22  ;;  %v1990_v30 = vld [vmem:[%s2225_s24 + $0x18] sm:$0xff]  }
  0x15   : > { %v1985_v24 = vld [vmem:[%s2238_s6 + $0x44] ss:$8 sps:$4 sm:$0xff]   ;;  %v1983_v26 = vld [vmem:[%s2238_s6 + $0x40] ss:$8 sps:$4 sm:$0xff]   ;;  %v1991_v31 = vld [vmem:[%s2238_s6 + $0x50] ss:$8 sps:$4 sm:$0xff]  }
  0x16   : > { %1875 = vmatpush3.bf16.msra.mxu0 %v1964_v6  ;;  %v1981_v25 = vld [vmem:[%s2422_s2] sm:$0xff]   ;;  %1059 = vmatprep.mubr.bf16.mxu1 %v1985_v24  ;;  %v1986_v27 = vld [vmem:[%s2225_s24 + $0x8] sm:$0xff]   ;;  %v1997_v36 = vld [vmem:[%s2225_s24 + $0x30] sm:$0xff]  }
  0x17   : > { %1928 = vmatpush3.bf16.msra.mxu1 %v2162_v8  ;;  %1876 = vmatprep.subr.bf16.mxu0 %v1967_v9  ;;  %v1992_v32 = vld [vmem:[%s2225_s24 + $0x20] sm:$0xff]   ;;  %v1995_v34 = vld [vmem:[%s2225_s24 + $0x28] sm:$0xff]   ;;  %v1998_v37 = vld [vmem:[%s2238_s6 + $0x74] ss:$8 sps:$4 sm:$0xff]  }
  0x18   : > { %1921 = vmatprep.subr.bf16.mxu1 %v2171_v10  ;;  %v1993_v33 = vld [vmem:[%s2238_s6 + $0x64] ss:$8 sps:$4 sm:$0xff]   ;;  %v1996_v35 = vld [vmem:[%s2238_s6 + $0x60] ss:$8 sps:$4 sm:$0xff]   ;;  %v2000_v38 = vld [vmem:[%s2225_s24 + $0x38] sm:$0xff]  }
  0x19   : > { %v2001_v39 = vld [vmem:[%s2238_s6 + $0x70] ss:$8 sps:$4 sm:$0xff]   ;;  %v2002_v40 = vld [vmem:[%s2225_s24 + $0x40] sm:$0xff]   ;;  %v2005_v42 = vld [vmem:[%s2225_s24 + $0x48] sm:$0xff]  }
  0x1a   : > { %1877 = vmatpush3.bf16.msra.mxu0 %v1967_v9  ;;  %v2003_v41 = vld [vmem:[%s2238_s6 + $0x84] ss:$8 sps:$4 sm:$0xff]   ;;  %v2006_v43 = vld [vmem:[%s2238_s6 + $0x80] ss:$8 sps:$4 sm:$0xff]   ;;  %v2007_v44 = vld [vmem:[%s2225_s24 + $0x50] sm:$0xff]  }
  0x1b   : > { %1929 = vmatpush3.bf16.msra.mxu1 %v2176_v11  ;;  %1878 = vmatprep.subr.bf16.mxu0 %v1970_v12  ;;  %v2008_v45 = vld [vmem:[%s2238_s6 + $0x94] ss:$8 sps:$4 sm:$0xff]   ;;  %v2011_v47 = vld [vmem:[%s2238_s6 + $0x90] ss:$8 sps:$4 sm:$0xff]   ;;  %v2012_v48 = vld [vmem:[%s2225_s24 + $0x60] sm:$0xff]  }
  0x1c   : > { %1922 = vmatprep.subr.bf16.mxu1 %v2186_v13  ;;  %v2010_v46 = vld [vmem:[%s2225_s24 + $0x58] sm:$0xff]   ;;  %v2013_v49 = vld [vmem:[%s2238_s6 + $0xa4] ss:$8 sps:$4 sm:$0xff]   ;;  %v2016_v51 = vld [vmem:[%s2238_s6 + $0xa0] ss:$8 sps:$4 sm:$0xff]  }
  0x1d   : > { %v2015_v50 = vld [vmem:[%s2225_s24 + $0x68] sm:$0xff]   ;;  %v2017_v52 = vld [vmem:[%s2225_s24 + $0x70] sm:$0xff]   ;;  %v2020_v54 = vld [vmem:[%s2225_s24 + $0x78] sm:$0xff]  }
  0x1e   : > { %1879 = vmatpush3.bf16.msra.mxu0 %v1970_v12  ;;  %v2018_v53 = vld [vmem:[%s2238_s6 + $0xb4] ss:$8 sps:$4 sm:$0xff]   ;;  %v2021_v55 = vld [vmem:[%s2238_s6 + $0xb0] ss:$8 sps:$4 sm:$0xff]   ;;  %v2024_v56 = vld [vmem:[%s2238_s6 + $0x4] ss:$8 sps:$4 sm:$0xff]  }
  0x1f   : > { %1930 = vmatpush3.bf16.msra.mxu1 %v2193_v14  ;;  %1880 = vmatprep.subr.bf16.mxu0 %v1973_v15  ;;  %v2025_v57 = vld [vmem:[%s2238_s6 + $0xc4] ss:$8 sps:$4 sm:$0xff]   ;;  %v2022_v58 = vld [vmem:[%s2238_s6] ss:$8 sps:$4 sm:$0xff]   ;;  %v2028_v60 = vld [vmem:[%s2238_s6 + $0x14] ss:$8 sps:$4 sm:$0xff]  }
  0x20   : > { %1923 = vmatprep.subr.bf16.mxu1 %v2203_v16  ;;  %v2027_v59 = vld [vmem:[%s2238_s6 + $0xc0] ss:$8 sps:$4 sm:$0xff]   ;;  %v2030_v61 = vld [vmem:[%s2238_s6 + $0xd4] ss:$8 sps:$4 sm:$0xff]   ;;  %v2032_v62 = vld [vmem:[%s2238_s6 + $0x10] ss:$8 sps:$4 sm:$0xff]  }
  0x21   : > { %v2033_v63 = vld [vmem:[%s2238_s6 + $0xd0] ss:$8 sps:$4 sm:$0xff]   ;;  %v2034_v0 = vld [vmem:[%s2238_s6 + $0x24] ss:$8 sps:$4 sm:$0xff]   ;;  %v2039_v3 = vld [vmem:[%s2238_s6 + $0xe0] ss:$8 sps:$4 sm:$0xff]  }
  0x22   : > { %1881 = vmatpush3.bf16.msra.mxu0 %v1973_v15  ;;  %v2044_v6 = vld [vmem:[%s2238_s6 + $0x30] ss:$8 sps:$4 sm:$0xff]  }
  0x23   : > { %1931 = vmatpush3.bf16.msra.mxu1 %v2209_v17  ;;  %1882 = vmatprep.subr.bf16.mxu0 %v1976_v18 }
  0x24   : > { %1924 = vmatprep.subr.bf16.mxu1 %v1977_v19 }
  0x26   : > { %1883 = vmatpush3.bf16.msra.mxu0 %v1976_v18 }
  0x27   : > { %1932 = vmatpush3.bf16.msra.mxu1 %v2230_v20  ;;  %1884 = vmatprep.subr.bf16.mxu0 %v1979_v21 }
  0x28   : > { %1925 = vmatprep.subr.bf16.mxu1 %v1980_v23 }
  0x2a   : > { %1885 = vmatpush3.bf16.msra.mxu0 %v1979_v21 }
  0x2b   : > { %1933 = vmatpush3.bf16.msra.mxu1 %v1981_v25  ;;  %1758 = vmatprep.subr.bf16.mxu0 %v2126_v1  ;;  %v2036_v1 = vld [vmem:[%s2238_s6 + $0xe4] ss:$8 sps:$4 sm:$0xff]  }
  0x2d   : > { %1887 = vmatmul.mubr.bf16.vlgmr.msra.gmra.mxu0 %v1986_v27 }
  0x2e   : > { %1060 = vmatmul.mubr.bf16.vlgmr.msra.gmra.mxu1 %v1983_v26  ;;  %1759 = vmatpush3.bf16.msra.mxu0 %v2131_v2  ;;  %v2038_v2 = vld [vmem:[%s2238_s6 + $0x20] ss:$8 sps:$4 sm:$0xff]  }
  0x2f   : > { %1890 = vmatprep.mubr.bf16.mxu0 %v1987_v28  ;;  %1067 = vmatprep.mubr.bf16.mxu1 %v1988_v29 }
  0x30   : > { %1760 = vmatprep.subr.bf16.mxu0 %v2141_v4  ;;  %v2040_v4 = vld [vmem:[%s2238_s6 + $0x34] ss:$8 sps:$4 sm:$0xff]  }
  0x32   : > { %1761 = vmatpush3.bf16.msra.mxu0 %v2146_v5  ;;  %v2042_v5 = vld [vmem:[%s2238_s6 + $0xf4] ss:$8 sps:$4 sm:$0xff]  }
  0x33   : > { %1762 = vmatprep.subr.bf16.mxu0 %v2155_v7  ;;  %v2045_v7 = vld [vmem:[%s2238_s6 + $0xf0] ss:$8 sps:$4 sm:$0xff]  }
  0x35   : > { %1891 = vmatmul.mubr.bf16.gmra.mxu0 %v1990_v30 }
  0x36   : > { %1068 = vmatmul.mubr.bf16.gmra.mxu1 %v1991_v31  ;;  %1894 = vmatprep.mubr.bf16.mxu0 %v1992_v32  ;;  %v2328_v32 = vld [vmem:[%s2424_s4] ss:$0 sm:$0xff] }
  0x37   : > { %1075 = vmatprep.mubr.bf16.mxu1 %v1993_v33  ;;  %1763 = vmatpush3.bf16.msra.mxu0 %v2162_v8 }
  0x38   : > { %1764 = vmatprep.subr.bf16.mxu0 %v2171_v10 }
  0x3b   : > { %1765 = vmatpush3.bf16.msra.mxu0 %v2176_v11 }
  0x3c   : > { %1766 = vmatprep.subr.bf16.mxu0 %v2186_v13 }
  0x3d   : > { %1895 = vmatmul.mubr.bf16.gmra.mxu0 %v1995_v34 }
  0x3e   : > { %1076 = vmatmul.mubr.bf16.gmra.mxu1 %v1996_v35  ;;  %1898 = vmatprep.mubr.bf16.mxu0 %v1997_v36 }
  0x3f   : > { %1083 = vmatprep.mubr.bf16.mxu1 %v1998_v37  ;;  %1767 = vmatpush3.bf16.msra.mxu0 %v2193_v14 }
  0x40   : > { %1768 = vmatprep.subr.bf16.mxu0 %v2203_v16 }
  0x43   : > { %1769 = vmatpush3.bf16.msra.mxu0 %v2209_v17 }
  0x44   : > { %1770 = vmatprep.subr.bf16.mxu0 %v1977_v19 }
  0x45   : > { %1899 = vmatmul.mubr.bf16.gmra.mxu0 %v2000_v38 }
  0x46   : > { %1084 = vmatmul.mubr.bf16.gmra.mxu1 %v2001_v39  ;;  %1902 = vmatprep.mubr.bf16.mxu0 %v2002_v40 }
  0x47   : > { %1091 = vmatprep.mubr.bf16.mxu1 %v2003_v41  ;;  %1771 = vmatpush3.bf16.msra.mxu0 %v2230_v20 }
  0x48   : > { %1772 = vmatprep.subr.bf16.mxu0 %v1980_v23 }
  0x4b   : > { %1773 = vmatpush3.bf16.msra.mxu0 %v1981_v25 }
  0x4d   : > { %1903 = vmatmul.mubr.bf16.gmra.mxu0 %v2005_v42 }
  0x4e   : > { %1092 = vmatmul.mubr.bf16.gmra.mxu1 %v2006_v43  ;;  %1906 = vmatprep.mubr.bf16.mxu0 %v2007_v44 }
  0x4f   : > { %1099 = vmatprep.mubr.bf16.mxu1 %v2008_v45 }
  0x55   : > { %1907 = vmatmul.mubr.bf16.gmra.mxu0 %v2010_v46 }
  0x56   : > { %1100 = vmatmul.mubr.bf16.gmra.mxu1 %v2011_v47  ;;  %1910 = vmatprep.mubr.bf16.mxu0 %v2012_v48 }
  0x57   : > { %1107 = vmatprep.mubr.bf16.mxu1 %v2013_v49 }
  0x5d   : > { %1911 = vmatmul.mubr.bf16.gmra.mxu0 %v2015_v50 }
  0x5e   : > { %1108 = vmatmul.mubr.bf16.gmra.mxu1 %v2016_v51  ;;  %1914 = vmatprep.mubr.bf16.mxu0 %v2017_v52 }
  0x5f   : > { %1115 = vmatprep.mubr.bf16.mxu1 %v2018_v53 }
  0x65   : > { %1915 = vmatmul.mubr.bf16.gmra.mxu0 %v2020_v54 }
  0x66   : > { %1116 = vmatmul.mubr.bf16.gmra.mxu1 %v2021_v55  ;;  %1027 = vmatprep.mubr.bf16.mxu0 %v2024_v56 }
  0x67   : > { %1123 = vmatprep.mubr.bf16.mxu1 %v2025_v57 }
  0x6d   : > { %1028 = vmatmul.mubr.bf16.vlgmr.msra.gmra.mxu0 %v2022_v58 }
  0x6e   : > { %1124 = vmatmul.mubr.bf16.gmra.mxu1 %v2027_v59  ;;  %1035 = vmatprep.mubr.bf16.mxu0 %v2028_v60 }
  0x6f   : > { %1131 = vmatprep.mubr.bf16.mxu1 %v2030_v61 }
  0x75   : > { %1036 = vmatmul.mubr.bf16.gmra.mxu0 %v2032_v62 }
  0x76   : > { %1132 = vmatmul.mubr.bf16.gmra.mxu1 %v2033_v63  ;;  %1043 = vmatprep.mubr.bf16.mxu0 %v2034_v0 }
  0x77   : > { %1139 = vmatprep.mubr.bf16.mxu1 %v2036_v1 }
  0x7d   : > { %1044 = vmatmul.mubr.bf16.gmra.mxu0 %v2038_v2 }
  0x7e   : > { %1140 = vmatmul.mubr.bf16.gmra.mxu1 %v2039_v3  ;;  %1051 = vmatprep.mubr.bf16.mxu0 %v2040_v4 }
  0x7f   : > { %1147 = vmatprep.mubr.bf16.mxu1 %v2042_v5 }
  0x85   : > { %1052 = vmatmul.mubr.bf16.gmra.mxu0 %v2044_v6 }
  0x86   : > { %1148 = vmatmul.mubr.bf16.gmra.mxu1 %v2045_v7 }
  0xed   : > { %v2309_v8 = vpop.f32.mrf.mxu0 }
  0xee   : > { %v1798_v9 = vpop.f32.mrf.mxu1 }
  0xef   : > { %v2311_v10 = vpop.f32.mrf.mxu0 }
  0xf0   : > { %v1799_v11 = vpop.f32.mrf.mxu1 }
  0xf1   : > { %v2313_v12 = vpop.f32.mrf.mxu0  ;;  %v1800_v28 = vadd.f32 %v1799_v11, %v1798_v9 }
  0xf2   : > { %v1801_v13 = vpop.f32.mrf.mxu1 }
  0xf3   : > { %v2315_v14 = vpop.f32.mrf.mxu0 }
  0xf4   : > { %v1802_v15 = vpop.f32.mrf.mxu1 }
  0xf5   : > { %v2317_v16 = vpop.f32.mrf.mxu0  ;;  %v1803_v34 = vadd.f32 %v1802_v15, %v1801_v13 }
  0xf6   : > { %v1804_v17 = vpop.f32.mrf.mxu1 }
  0xf7   : > { %v2319_v18 = vpop.f32.mrf.mxu0 }
  0xf8   : > { %v1805_v19 = vpop.f32.mrf.mxu1 }
  0xf9   : > { %v2321_v20 = vpop.f32.mrf.mxu0  ;;  %v1806_v25 = vadd.f32 %v1805_v19, %v1804_v17 }
  0xfa   : > { %v1807_v21 = vpop.f32.mrf.mxu1 }
  0xfb   : > { %v2323_v22 = vpop.f32.mrf.mxu0 }
  0xfc   : > { %v1808_v23 = vpop.f32.mrf.mxu1 }
  0xfd   : > { %v1896_v24 = vpop.f32.mrf.mxu0  ;;  %v1809_v29 = vadd.f32 %v1808_v23, %v1807_v21 }
  0xfe   : > { %v1810_v26 = vpop.f32.mrf.mxu1  ;;  %v1070_v30 = vadd.f32 %v1896_v24, %v1806_v25 }
  0xff   : > { %v644_v27 = vpop.f32.mrf.mxu0 }
 0x100   : > { %v1811_v31 = vpop.f32.mrf.mxu1  ;;  %v1062_v35 = vadd.f32 %v1800_v28, %v644_v27  ;;  %v1173_v39 = vadd.f32 %v2328_v32, %v1070_v30 }
 0x101   : > { %v1897_v33 = vpop.f32.mrf.mxu0  ;;  %v1812_v49 = vadd.f32 %v1811_v31, %v1810_v26 }
 0x102   : > { %v1073_v36 = vadd.f32 %v1897_v33, %v1809_v29  ;;  %v1813_v37 = vpop.f32.mrf.mxu1  ;;  %v1171_v44 = vadd.f32 %v2328_v32, %v1062_v35 }
 0x103   : > { %v647_v38 = vpop.f32.mrf.mxu0 }
 0x104   : > { %v1174_v40 = vadd.f32 %v2328_v32, %v1073_v36  ;;  %v1065_v41 = vadd.f32 %v1803_v34, %v647_v38  ;;  %v1814_v42 = vpop.f32.mrf.mxu1 }
 0x105   : > { %v1900_v43 = vpop.f32.mrf.mxu0  ;;  %v1815_v54 = vadd.f32 %v1814_v42, %v1813_v37 }
 0x106   : > { %v1667_v45 = vpack.c.bf16 %v1174_v40, %v1173_v39  ;;  %v1172_v46 = vadd.f32 %v2328_v32, %v1065_v41  ;;  %v1816_v47 = vpop.f32.mrf.mxu1 }
 0x107   : > { %v660_v48 = vpop.f32.mrf.mxu0 }
 0x108   : > { %1723 = vst [vmem:[%s2337_s17 + $0x28] sm:$0xff] %v1667_v45   ;;  %v1662_v50 = vpack.c.bf16 %v1172_v46, %v1171_v44  ;;  %v1817_v51 = vpop.f32.mrf.mxu1  ;;  %v1078_v55 = vadd.f32 %v1812_v49, %v660_v48 }
 0x109   : > { %v1818_v52 = vadd.f32 %v1817_v51, %v1816_v47  ;;  %v1901_v53 = vpop.f32.mrf.mxu0 }
 0x10a   : > { %1722 = vst [vmem:[%s2337_s17 + $0x20] sm:$0xff] %v1662_v50   ;;  %v1819_v56 = vpop.f32.mrf.mxu1  ;;  %v1175_v63 = vadd.f32 %v2328_v32, %v1078_v55 }
 0x10b   : > { %v663_v57 = vpop.f32.mrf.mxu0  ;;  %v1086_v60 = vadd.f32 %v1900_v43, %v1818_v52 }
 0x10c   : > { %v1081_v58 = vadd.f32 %v1815_v54, %v663_v57  ;;  %v1820_v59 = vpop.f32.mrf.mxu1 }
 0x10d   : > { %v1821_v61 = vadd.f32 %v1820_v59, %v1819_v56  ;;  %v1904_v62 = vpop.f32.mrf.mxu0  ;;  %v1177_v6 = vadd.f32 %v2328_v32, %v1086_v60 }
 0x10e   : > { %v1176_v0 = vadd.f32 %v2328_v32, %v1081_v58  ;;  %v1822_v1 = vpop.f32.mrf.mxu1 }
 0x10f   : > { %v1089_v2 = vadd.f32 %v1901_v53, %v1821_v61  ;;  %v676_v3 = vpop.f32.mrf.mxu0 }
 0x110   : > { %v1672_v4 = vpack.c.bf16 %v1176_v0, %v1175_v63  ;;  %v1823_v5 = vpop.f32.mrf.mxu1 }
 0x111   : > { %v1178_v7 = vadd.f32 %v2328_v32, %v1089_v2  ;;  %v1824_v9 = vadd.f32 %v1823_v5, %v1822_v1  ;;  %v1905_v11 = vpop.f32.mrf.mxu0 }
 0x112   : > { %1724 = vst [vmem:[%s2337_s17 + $0x30] sm:$0xff] %v1672_v4   ;;  %v1825_v13 = vpop.f32.mrf.mxu1 }
 0x113   : > { %v1677_v15 = vpack.c.bf16 %v1178_v7, %v1177_v6  ;;  %v679_v17 = vpop.f32.mrf.mxu0  ;;  %v1094_v21 = vadd.f32 %v1824_v9, %v676_v3 }
 0x114   : > { %v1826_v19 = vpop.f32.mrf.mxu1 }
 0x115   : > { %1725 = vst [vmem:[%s2337_s17 + $0x38] sm:$0xff] %v1677_v15   ;;  %v1827_v23 = vadd.f32 %v1826_v19, %v1825_v13  ;;  %v1908_v24 = vpop.f32.mrf.mxu0  ;;  %v1179_v29 = vadd.f32 %v2328_v32, %v1094_v21 }
 0x116   : > { %v1828_v25 = vpop.f32.mrf.mxu1 }
 0x117   : > { %v1097_v26 = vadd.f32 %v1827_v23, %v679_v17  ;;  %v692_v27 = vpop.f32.mrf.mxu0 }
 0x118   : > { %v1829_v28 = vpop.f32.mrf.mxu1 }
 0x119   : > { %v1180_v30 = vadd.f32 %v2328_v32, %v1097_v26  ;;  %v1830_v31 = vadd.f32 %v1829_v28, %v1828_v25  ;;  %v1909_v33 = vpop.f32.mrf.mxu0 }
 0x11a   : > { %v1831_v34 = vpop.f32.mrf.mxu1 }
 0x11b   : > { %v1682_v35 = vpack.c.bf16 %v1180_v30, %v1179_v29  ;;  %v695_v36 = vpop.f32.mrf.mxu0  ;;  %v1102_v38 = vadd.f32 %v1904_v62, %v1830_v31 }
 0x11c   : > { %v1832_v37 = vpop.f32.mrf.mxu1 }
 0x11d   : > { %1726 = vst [vmem:[%s2337_s17 + $0x40] sm:$0xff] %v1682_v35   ;;  %v1833_v39 = vadd.f32 %v1832_v37, %v1831_v34  ;;  %v2352_v40 = vpop.f32.mrf.mxu0  ;;  %v1181_v45 = vadd.f32 %v2328_v32, %v1102_v38 }
 0x11e   : > { %v1834_v41 = vpop.f32.mrf.mxu1 }
 0x11f   : > { %v1105_v42 = vadd.f32 %v1905_v11, %v1833_v39  ;;  %v708_v43 = vpop.f32.mrf.mxu0 }
 0x120   : > { %v1835_v44 = vpop.f32.mrf.mxu1 }
 0x121   : > { %v1182_v46 = vadd.f32 %v2328_v32, %v1105_v42  ;;  %v1836_v47 = vadd.f32 %v1835_v44, %v1834_v41  ;;  %v2356_v48 = vpop.f32.mrf.mxu0 }
 0x122   : > { %v1837_v49 = vpop.f32.mrf.mxu1 }
 0x123   : > { %v1687_v50 = vpack.c.bf16 %v1182_v46, %v1181_v45  ;;  %v711_v51 = vpop.f32.mrf.mxu0  ;;  %v1110_v53 = vadd.f32 %v1836_v47, %v692_v27 }
 0x124   : > { %v1838_v52 = vpop.f32.mrf.mxu1 }
 0x125   : > { %1727 = vst [vmem:[%s2337_s17 + $0x48] sm:$0xff] %v1687_v50   ;;  %v1839_v54 = vadd.f32 %v1838_v52, %v1837_v49  ;;  %v2359_v55 = vpop.f32.mrf.mxu0  ;;  %v1183_v60 = vadd.f32 %v2328_v32, %v1110_v53 }
 0x126   : > { %v1840_v56 = vpop.f32.mrf.mxu1 }
 0x127   : > { %v1113_v57 = vadd.f32 %v1839_v54, %v695_v36  ;;  %v2361_v58 = vpop.f32.mrf.mxu0 }
 0x128   : > { %v1841_v59 = vpop.f32.mrf.mxu1 }
 0x129   : > { %v1184_v61 = vadd.f32 %v2328_v32, %v1113_v57  ;;  %v1842_v62 = vadd.f32 %v1841_v59, %v1840_v56  ;;  %v2365_v63 = vpop.f32.mrf.mxu0 }
 0x12a   : > { %v1843_v0 = vpop.f32.mrf.mxu1 }
 0x12b   : > { %v1692_v1 = vpack.c.bf16 %v1184_v61, %v1183_v60  ;;  %v2367_v2 = vpop.f32.mrf.mxu0  ;;  %v1118_v4 = vadd.f32 %v1908_v24, %v1842_v62 }
 0x12c   : > { %v1844_v3 = vpop.f32.mrf.mxu1 }
 0x12d   : > { %1728 = vst [vmem:[%s2337_s17 + $0x50] sm:$0xff] %v1692_v1   ;;  %v1845_v5 = vadd.f32 %v1844_v3, %v1843_v0  ;;  %v1774_v6 = vpop.f32.mrf.mxu0  ;;  %v1185_v17 = vadd.f32 %v2328_v32, %v1118_v4 }
 0x12e   : > { %v1846_v7 = vpop.f32.mrf.mxu1 }
 0x12f   : > { %v1121_v9 = vadd.f32 %v1909_v33, %v1845_v5  ;;  %v1775_v11 = vpop.f32.mrf.mxu0 }
 0x130   : > { %v1776_v13 = vadd.f32 %v1775_v11, %v1774_v6  ;;  %v1847_v15 = vpop.f32.mrf.mxu1 }
 0x131   : > { %v1186_v19 = vadd.f32 %v2328_v32, %v1121_v9  ;;  %v1848_v21 = vadd.f32 %v1847_v15, %v1846_v7  ;;  %v1777_v23 = vpop.f32.mrf.mxu0 }
 0x132   : > { %v1849_v25 = vpop.f32.mrf.mxu1  ;;  %v1030_v28 = vadd.f32 %v1776_v13, %v2311_v10 }
 0x133   : > { %v1697_v26 = vpack.c.bf16 %v1186_v19, %v1185_v17  ;;  %v1778_v27 = vpop.f32.mrf.mxu0  ;;  %v1126_v30 = vadd.f32 %v1848_v21, %v708_v43 }
 0x134   : > { %v1779_v24 = vadd.f32 %v1778_v27, %v1777_v23  ;;  %v1850_v29 = vpop.f32.mrf.mxu1  ;;  %v1163_v38 = vadd.f32 %v2328_v32, %v1030_v28 }
 0x135   : > { %1729 = vst [vmem:[%s2337_s17 + $0x58] sm:$0xff] %v1697_v26   ;;  %v1851_v31 = vadd.f32 %v1850_v29, %v1849_v25  ;;  %v1780_v33 = vpop.f32.mrf.mxu0  ;;  %v1187_v10 = vadd.f32 %v2328_v32, %v1126_v30 }
 0x136   : > { %v1033_v34 = vadd.f32 %v1779_v24, %v2315_v14  ;;  %v1852_v35 = vpop.f32.mrf.mxu1 }
 0x137   : > { %v1129_v36 = vadd.f32 %v1851_v31, %v711_v51  ;;  %v1781_v37 = vpop.f32.mrf.mxu0 }
 0x138   : > { %v1164_v39 = vadd.f32 %v2328_v32, %v1033_v34  ;;  %v1782_v41 = vadd.f32 %v1781_v37, %v1780_v33  ;;  %v1853_v42 = vpop.f32.mrf.mxu1 }
 0x139   : > { %v1188_v44 = vadd.f32 %v2328_v32, %v1129_v36  ;;  %v1854_v43 = vadd.f32 %v1853_v42, %v1852_v35  ;;  %v1783_v45 = vpop.f32.mrf.mxu0 }
 0x13a   : > { %v1642_v46 = vpack.c.bf16 %v1164_v39, %v1163_v38  ;;  %v1855_v47 = vpop.f32.mrf.mxu1  ;;  %v1038_v50 = vadd.f32 %v2309_v8, %v1782_v41 }
 0x13b   : > { %v1702_v14 = vpack.c.bf16 %v1188_v44, %v1187_v10  ;;  %v1784_v49 = vpop.f32.mrf.mxu0  ;;  %v1134_v53 = vadd.f32 %v2352_v40, %v1854_v43 }
 0x13c   : > { %1643 = vst [vmem:[%s2337_s17] sm:$0xff] %v1642_v46   ;;  %v1785_v51 = vadd.f32 %v1784_v49, %v1783_v45  ;;  %v1856_v52 = vpop.f32.mrf.mxu1  ;;  %v1165_v62 = vadd.f32 %v2328_v32, %v1038_v50 }
 0x13d   : > { %1730 = vst [vmem:[%s2337_s17 + $0x60] sm:$0xff] %v1702_v14   ;;  %v1857_v54 = vadd.f32 %v1856_v52, %v1855_v47  ;;  %v1786_v56 = vpop.f32.mrf.mxu0  ;;  %v1189_v3 = vadd.f32 %v2328_v32, %v1134_v53 }
 0x13e   : > { %v1041_v57 = vadd.f32 %v2313_v12, %v1785_v51  ;;  %v1858_v59 = vpop.f32.mrf.mxu1 }
 0x13f   : > { %v1137_v60 = vadd.f32 %v2356_v48, %v1857_v54  ;;  %v1787_v61 = vpop.f32.mrf.mxu0 }
 0x140   : > { %v1166_v0 = vadd.f32 %v2328_v32, %v1041_v57  ;;  %v1788_v8 = vadd.f32 %v1787_v61, %v1786_v56  ;;  %v1859_v1 = vpop.f32.mrf.mxu1 }
 0x141   : > { %v1190_v40 = vadd.f32 %v2328_v32, %v1137_v60  ;;  %v1860_v4 = vadd.f32 %v1859_v1, %v1858_v59  ;;  %v1789_v5 = vpop.f32.mrf.mxu0 }
 0x142   : > { %v1647_v6 = vpack.c.bf16 %v1166_v0, %v1165_v62  ;;  %v1861_v12 = vpop.f32.mrf.mxu1  ;;  %v1046_v48 = vadd.f32 %v1788_v8, %v2319_v18 }
 0x143   : > { %v1707_v7 = vpack.c.bf16 %v1190_v40, %v1189_v3  ;;  %v1790_v9 = vpop.f32.mrf.mxu0  ;;  %v1142_v15 = vadd.f32 %v1860_v4, %v2361_v58 }
 0x144   : > { %1719 = vst [vmem:[%s2337_s17 + $0x8] sm:$0xff] %v1647_v6   ;;  %v1791_v11 = vadd.f32 %v1790_v9, %v1789_v5  ;;  %v1862_v13 = vpop.f32.mrf.mxu1  ;;  %v1167_v27 = vadd.f32 %v2328_v32, %v1046_v48 }
 0x145   : > { %1731 = vst [vmem:[%s2337_s17 + $0x68] sm:$0xff] %v1707_v7   ;;  %v1863_v17 = vadd.f32 %v1862_v13, %v1861_v12  ;;  %v1792_v19 = vpop.f32.mrf.mxu0  ;;  %v1191_v29 = vadd.f32 %v2328_v32, %v1142_v15 }
 0x146   : > { %v1049_v21 = vadd.f32 %v1791_v11, %v2323_v22  ;;  %v1864_v23 = vpop.f32.mrf.mxu1 }
 0x147   : > { %v1145_v25 = vadd.f32 %v1863_v17, %v2367_v2  ;;  %v1793_v26 = vpop.f32.mrf.mxu0 }
 0x148   : > { %v1168_v28 = vadd.f32 %v2328_v32, %v1049_v21  ;;  %v1794_v18 = vadd.f32 %v1793_v26, %v1792_v19  ;;  %v1865_v24 = vpop.f32.mrf.mxu1 }
 0x149   : > { %v1192_v58 = vadd.f32 %v2328_v32, %v1145_v25  ;;  %v1866_v30 = vadd.f32 %v1865_v24, %v1864_v23  ;;  %v1795_v31 = vpop.f32.mrf.mxu0 }
 0x14a   : > { %v1652_v33 = vpack.c.bf16 %v1168_v28, %v1167_v27  ;;  %v1867_v22 = vpop.f32.mrf.mxu1  ;;  %v1054_v2 = vadd.f32 %v2317_v16, %v1794_v18 }
 0x14b   : > { %v1712_v34 = vpack.c.bf16 %v1192_v58, %v1191_v29  ;;  %v1796_v35 = vpop.f32.mrf.mxu0  ;;  %v1150_v38 = vadd.f32 %v2359_v55, %v1866_v30 }
 0x14c   : > { %1720 = vst [vmem:[%s2337_s17 + $0x10] sm:$0xff] %v1652_v33   ;;  %v1797_v36 = vadd.f32 %v1796_v35, %v1795_v31  ;;  %v1868_v37 = vpop.f32.mrf.mxu1  ;;  %v1169_v10 = vadd.f32 %v2328_v32, %v1054_v2 }
 0x14d   : > { %1732 = vst [vmem:[%s2337_s17 + $0x70] sm:$0xff] %v1712_v34   ;;  %v1869_v39 = vadd.f32 %v1868_v37, %v1867_v22  ;;  %v1193_v43 = vadd.f32 %v2328_v32, %v1150_v38 }
 0x14e   : > { %v1057_v41 = vadd.f32 %v2321_v20, %v1797_v36 }
 0x14f   : > { %v1153_v42 = vadd.f32 %v2365_v63, %v1869_v39 }
 0x150   : > { %v1170_v44 = vadd.f32 %v2328_v32, %v1057_v41 }
 0x151   : > { %v1194_v45 = vadd.f32 %v2328_v32, %v1153_v42 }
 0x152   : > { %v1657_v46 = vpack.c.bf16 %v1170_v44, %v1169_v10 }
 0x153   : > { %v1717_v16 = vpack.c.bf16 %v1194_v45, %v1193_v43 }
 0x154   : > { %1721 = vst [vmem:[%s2337_s17 + $0x18] sm:$0xff] %v1657_v46  }
 0x155   : > { %1733 = vst [vmem:[%s2337_s17 + $0x78] sm:$0xff] %v1717_v16  }
 0x156 PF: > { %s15_s20 = sadd.s32 1, %s2068_s20   ;;  %s2426_s18 = smov %s2064_s19 }
 0x157   : > { %p12_p5 = scmp.ge.s32.totalorder %s15_s20, 4   ;;  %s2427_s19 = smov %s2429_s21 }
 0x159   :  { %14 = sbr.rel (!%p12_p5) target bundleno = 2 (0x2), region = 82 }

// kernel: segmentation_forward.9
= control target key start
LH: loop header
LB: loop body
LE: loop exit
PB: predicated region body
PF: predicated region fallthrough
CT: control target
= control target key end

     0   :  { %s5520_s12 = smov 0   ;;  %s5522_s13 = smov 0   ;;  %s6780_s0 = inlined_call_operand.vmem [shape: bf16[2,4,9,9,256], index: 0, kind: input, shape index: {}]   ;;  %s6781_s1 = inlined_call_operand.vmem [shape: bf16[3,3,256,256], index: 1, kind: input, shape index: {}]   ;;  %s6782_s2 = inlined_call_operand.vmem [shape: f32[1,256], index: 2, kind: input, shape index: {}]   ;;  %s6783_s3 = inlined_call_operand.vmem [shape: bf16[2,8,8,256], index: 3, kind: output, shape index: {}]  }
   0x1   :  { %s5524_s14 = smov 0   ;;  %s5526_s15 = smov 0  }
   0x2   :  { %s5528_s16 = smov 0   ;;  %s5530_s17 = smov 0  }
   0x3   :  { %s5532_s18 = smov 0   ;;  %s5534_s19 = smov 0  }
   0x4   :  { %s5536_s20 = smov 0  }
   0x5 LB: > { %s4192_s21 = sadd.s32 4294967295, %s5498_s20   ;;  %s22_s22 = sadd.s32 1, %s5490_s18  ;;  %s5498_s20 = sphi %s5536_s20, %s13_s20   ;;  %s5494_s19 = sphi %s5534_s19, %s6818_s19   ;;  %s5490_s18 = sphi %s5532_s18, %s6817_s18   ;;  %s5486_s17 = sphi %s5530_s17, %s6816_s17   ;;  %s5482_s16 = sphi %s5528_s16, %s6815_s16   ;;  %s5478_s15 = sphi %s5526_s15, %s6814_s15   ;;  %s5474_s14 = sphi %s5524_s14, %s6813_s14   ;;  %s5470_s13 = sphi %s5522_s13, %s6812_s13   ;;  %s5466_s12 = sphi %s5520_s12, %s6811_s12  }
   0x6   : > { %p23_p0 = scmp.ge.s32.totalorder %s22_s22, 2  ;;  %s25_s23 = sadd.s32 1, %s5494_s19 }
   0x7   : > { %s58_s24 = sadd.s32 1, %s5478_s15  ;;  %p65_p1 = scmp.ne.s32.totalorder %s5478_s15, %s5474_s14 }
   0x8   : > { %s6820_s22 = smov (%p23_p0, %s22_s22), 0  ;;  %s6822_s23 = smov (!%p23_p0, %s25_s23), %s5494_s19 }
   0x9   : > { %s55_s25 = ssub.s32 %s5490_s18, %s6820_s22  ;;  %p66_p2 = scmp.eq.s32.totalorder %s5498_s20, 0 }
   0xa   : > { %p27_p3 = scmp.ge.s32.totalorder %s6822_s23, 2  ;;  %p56_p4 = scmp.eq.s32.totalorder %s55_s25, 0 }
   0xb   : > { %p67_p5 = por %p66_p2, %p65_p1  ;;  %s112_s26 = sadd.s32 1, %s5470_s13 }
   0xc   : > { %s6824_s23 = smov (%p27_p3, %s6822_s23), 0  ;;  %p122_p6 = scmp.ne.s32.totalorder %s5470_s13, %s5466_s12 }
   0xd   : > { %s5581_s27 = scalar_select %p56_p4, %s5478_s15, %s58_s24  }
   0xe   : > { %s107_s28 = ssub.s32 %s5494_s19, %s6824_s23  ;;  %p123_p7 = scmp.eq.s32.totalorder %s4192_s21, 3 }
   0xf   : > { %s109_s29 = sor.u32 %s107_s28, %s55_s25  ;;  %p4195_p10 = scmp.ge.s32.totalorder %s5498_s20, 4 }
  0x10   : > { %p110_p8 = scmp.eq.s32.totalorder %s109_s29, 0  ;;  %p5587_p9 = por %p123_p7, %p122_p6 }
  0x11   : > { %145 = sbr.rel (%p4195_p10) target bundleno = 218 (0xda), region = 16 }
  0x12   : > { %s5592_s4 = scalar_select %p110_p8, %s5470_s13, %s112_s26  }
  0x16   : > { %156 = sbr.rel (!%p67_p5) target bundleno = 218 (0xda), region = 24  ;;  %s158_s5 = sand.u32 (%p67_p5), 1, %s5478_s15  }
  0x17   : > { %s4196_s6 = sshll.u32 (%p67_p5), %s5490_s18, 2  ;;  %s5149_s7 = smul.u32 (%p67_p5), 1152, %s158_s5 }
  0x18   : > { %s5600_s10 = scalar_lea.vmem (%p67_p5), %s6781_s1, %s4196_s6 }
  0x19   : > { %v179_v0 = vld [vmem:[%s5600_s10] sm:$0xf] (%p67_p5)  ;;  %v181_v1 = vld [vmem:[%s5600_s10 + $0x8] sm:$0xf] (%p67_p5)  ;;  %v183_v2 = vld [vmem:[%s5600_s10 + $0x10] sm:$0xf] (%p67_p5) }
  0x1a   : > { %v185_v3 = vld [vmem:[%s5600_s10 + $0x18] sm:$0xf] (%p67_p5)  ;;  %v187_v4 = vld [vmem:[%s5600_s10 + $0x20] sm:$0xf] (%p67_p5)  ;;  %s5607_s11 = scalar_lea.vmem (%p67_p5), [#allocation2], %s5149_s7 }
  0x1b   : > { %180 = vst [vmem:[%s5607_s11] sm:$0xf] %v179_v0  ;;  %182 = vst [vmem:[%s5607_s11 + $0x4] sm:$0xf] %v181_v1  ;;  %v189_v5 = vld [vmem:[%s5600_s10 + $0x28] sm:$0xf] }
  0x1c   : > { %184 = vst [vmem:[%s5607_s11 + $0x8] sm:$0xf] %v183_v2  ;;  %186 = vst [vmem:[%s5607_s11 + $0xc] sm:$0xf] %v185_v3  ;;  %v191_v6 = vld [vmem:[%s5600_s10 + $0x30] sm:$0xf] }
  0x1d   : > { %188 = vst [vmem:[%s5607_s11 + $0x10] sm:$0xf] %v187_v4  ;;  %v193_v7 = vld [vmem:[%s5600_s10 + $0x38] sm:$0xf]  ;;  %190 = vst [vmem:[%s5607_s11 + $0x14] sm:$0xf] %v189_v5 }
  0x1e   : > { %192 = vst [vmem:[%s5607_s11 + $0x18] sm:$0xf] %v191_v6  ;;  %194 = vst [vmem:[%s5607_s11 + $0x1c] sm:$0xf] %v193_v7  ;;  %v195_v8 = vld [vmem:[%s5600_s10 + $0x40] sm:$0xf] }
  0x1f   : > { %v197_v9 = vld [vmem:[%s5600_s10 + $0x48] sm:$0xf]  ;;  %v199_v10 = vld [vmem:[%s5600_s10 + $0x50] sm:$0xf]  ;;  %196 = vst [vmem:[%s5607_s11 + $0x20] sm:$0xf] %v195_v8 }
  0x20   : > { %198 = vst [vmem:[%s5607_s11 + $0x24] sm:$0xf] %v197_v9  ;;  %200 = vst [vmem:[%s5607_s11 + $0x28] sm:$0xf] %v199_v10  ;;  %v201_v11 = vld [vmem:[%s5600_s10 + $0x58] sm:$0xf] }
  0x21   : > { %v203_v12 = vld [vmem:[%s5600_s10 + $0x60] sm:$0xf]  ;;  %v205_v13 = vld [vmem:[%s5600_s10 + $0x68] sm:$0xf]  ;;  %202 = vst [vmem:[%s5607_s11 + $0x2c] sm:$0xf] %v201_v11 }
  0x22   : > { %204 = vst [vmem:[%s5607_s11 + $0x30] sm:$0xf] %v203_v12  ;;  %206 = vst [vmem:[%s5607_s11 + $0x34] sm:$0xf] %v205_v13  ;;  %v207_v14 = vld [vmem:[%s5600_s10 + $0x70] sm:$0xf] }
  0x23   : > { %v209_v15 = vld [vmem:[%s5600_s10 + $0x78] sm:$0xf]  ;;  %v211_v16 = vld [vmem:[%s5600_s10 + $0x80] sm:$0xf]  ;;  %208 = vst [vmem:[%s5607_s11 + $0x38] sm:$0xf] %v207_v14 }
  0x24   : > { %210 = vst [vmem:[%s5607_s11 + $0x3c] sm:$0xf] %v209_v15  ;;  %212 = vst [vmem:[%s5607_s11 + $0x40] sm:$0xf] %v211_v16  ;;  %v213_v17 = vld [vmem:[%s5600_s10 + $0x88] sm:$0xf] }
  0x25   : > { %v215_v18 = vld [vmem:[%s5600_s10 + $0x90] sm:$0xf]  ;;  %v217_v19 = vld [vmem:[%s5600_s10 + $0x98] sm:$0xf]  ;;  %214 = vst [vmem:[%s5607_s11 + $0x44] sm:$0xf] %v213_v17 }
  0x26   : > { %216 = vst [vmem:[%s5607_s11 + $0x48] sm:$0xf] %v215_v18  ;;  %218 = vst [vmem:[%s5607_s11 + $0x4c] sm:$0xf] %v217_v19  ;;  %v219_v20 = vld [vmem:[%s5600_s10 + $0xa0] sm:$0xf] }
  0x27   : > { %v221_v21 = vld [vmem:[%s5600_s10 + $0xa8] sm:$0xf]  ;;  %v223_v22 = vld [vmem:[%s5600_s10 + $0xb0] sm:$0xf]  ;;  %220 = vst [vmem:[%s5607_s11 + $0x50] sm:$0xf] %v219_v20 }
  0x28   : > { %222 = vst [vmem:[%s5607_s11 + $0x54] sm:$0xf] %v221_v21  ;;  %224 = vst [vmem:[%s5607_s11 + $0x58] sm:$0xf] %v223_v22  ;;  %v225_v23 = vld [vmem:[%s5600_s10 + $0xb8] sm:$0xf] }
  0x29   : > { %v227_v24 = vld [vmem:[%s5600_s10 + $0xc0] sm:$0xf]  ;;  %v229_v25 = vld [vmem:[%s5600_s10 + $0xc8] sm:$0xf]  ;;  %226 = vst [vmem:[%s5607_s11 + $0x5c] sm:$0xf] %v225_v23 }
  0x2a   : > { %228 = vst [vmem:[%s5607_s11 + $0x60] sm:$0xf] %v227_v24  ;;  %230 = vst [vmem:[%s5607_s11 + $0x64] sm:$0xf] %v229_v25  ;;  %v231_v26 = vld [vmem:[%s5600_s10 + $0xd0] sm:$0xf] }
  0x2b   : > { %v233_v27 = vld [vmem:[%s5600_s10 + $0xd8] sm:$0xf]  ;;  %v235_v28 = vld [vmem:[%s5600_s10 + $0xe0] sm:$0xf]  ;;  %232 = vst [vmem:[%s5607_s11 + $0x68] sm:$0xf] %v231_v26 }
  0x2c   : > { %234 = vst [vmem:[%s5607_s11 + $0x6c] sm:$0xf] %v233_v27  ;;  %236 = vst [vmem:[%s5607_s11 + $0x70] sm:$0xf] %v235_v28  ;;  %v237_v29 = vld [vmem:[%s5600_s10 + $0xe8] sm:$0xf] }
  0x2d   : > { %v239_v30 = vld [vmem:[%s5600_s10 + $0xf0] sm:$0xf]  ;;  %v241_v31 = vld [vmem:[%s5600_s10 + $0xf8] sm:$0xf]  ;;  %238 = vst [vmem:[%s5607_s11 + $0x74] sm:$0xf] %v237_v29 }
  0x2e   : > { %240 = vst [vmem:[%s5607_s11 + $0x78] sm:$0xf] %v239_v30  ;;  %242 = vst [vmem:[%s5607_s11 + $0x7c] sm:$0xf] %v241_v31  ;;  %v243_v32 = vld [vmem:[%s5600_s10 + $0x100] sm:$0xf] }
  0x2f   : > { %v245_v33 = vld [vmem:[%s5600_s10 + $0x108] sm:$0xf]  ;;  %v247_v34 = vld [vmem:[%s5600_s10 + $0x110] sm:$0xf]  ;;  %244 = vst [vmem:[%s5607_s11 + $0x80] sm:$0xf] %v243_v32 }
  0x30   : > { %246 = vst [vmem:[%s5607_s11 + $0x84] sm:$0xf] %v245_v33  ;;  %248 = vst [vmem:[%s5607_s11 + $0x88] sm:$0xf] %v247_v34  ;;  %v249_v35 = vld [vmem:[%s5600_s10 + $0x118] sm:$0xf] }
  0x31   : > { %v251_v36 = vld [vmem:[%s5600_s10 + $0x120] sm:$0xf]  ;;  %v253_v37 = vld [vmem:[%s5600_s10 + $0x128] sm:$0xf]  ;;  %250 = vst [vmem:[%s5607_s11 + $0x8c] sm:$0xf] %v249_v35 }
  0x32   : > { %252 = vst [vmem:[%s5607_s11 + $0x90] sm:$0xf] %v251_v36  ;;  %254 = vst [vmem:[%s5607_s11 + $0x94] sm:$0xf] %v253_v37  ;;  %v255_v38 = vld [vmem:[%s5600_s10 + $0x130] sm:$0xf] }
  0x33   : > { %v257_v39 = vld [vmem:[%s5600_s10 + $0x138] sm:$0xf]  ;;  %v259_v40 = vld [vmem:[%s5600_s10 + $0x140] sm:$0xf]  ;;  %256 = vst [vmem:[%s5607_s11 + $0x98] sm:$0xf] %v255_v38 }
  0x34   : > { %258 = vst [vmem:[%s5607_s11 + $0x9c] sm:$0xf] %v257_v39  ;;  %260 = vst [vmem:[%s5607_s11 + $0xa0] sm:$0xf] %v259_v40  ;;  %v261_v41 = vld [vmem:[%s5600_s10 + $0x148] sm:$0xf] }
  0x35   : > { %v263_v42 = vld [vmem:[%s5600_s10 + $0x150] sm:$0xf]  ;;  %v265_v43 = vld [vmem:[%s5600_s10 + $0x158] sm:$0xf]  ;;  %262 = vst [vmem:[%s5607_s11 + $0xa4] sm:$0xf] %v261_v41 }
  0x36   : > { %264 = vst [vmem:[%s5607_s11 + $0xa8] sm:$0xf] %v263_v42  ;;  %266 = vst [vmem:[%s5607_s11 + $0xac] sm:$0xf] %v265_v43  ;;  %v267_v44 = vld [vmem:[%s5600_s10 + $0x160] sm:$0xf] }
  0x37   : > { %v269_v45 = vld [vmem:[%s5600_s10 + $0x168] sm:$0xf]  ;;  %v271_v46 = vld [vmem:[%s5600_s10 + $0x170] sm:$0xf]  ;;  %268 = vst [vmem:[%s5607_s11 + $0xb0] sm:$0xf] %v267_v44 }
  0x38   : > { %270 = vst [vmem:[%s5607_s11 + $0xb4] sm:$0xf] %v269_v45  ;;  %272 = vst [vmem:[%s5607_s11 + $0xb8] sm:$0xf] %v271_v46  ;;  %v273_v47 = vld [vmem:[%s5600_s10 + $0x178] sm:$0xf] }
  0x39   : > { %v275_v48 = vld [vmem:[%s5600_s10 + $0x180] sm:$0xf]  ;;  %v277_v49 = vld [vmem:[%s5600_s10 + $0x188] sm:$0xf]  ;;  %274 = vst [vmem:[%s5607_s11 + $0xbc] sm:$0xf] %v273_v47 }
  0x3a   : > { %276 = vst [vmem:[%s5607_s11 + $0xc0] sm:$0xf] %v275_v48  ;;  %278 = vst [vmem:[%s5607_s11 + $0xc4] sm:$0xf] %v277_v49  ;;  %v279_v50 = vld [vmem:[%s5600_s10 + $0x190] sm:$0xf] }
  0x3b   : > { %v281_v51 = vld [vmem:[%s5600_s10 + $0x198] sm:$0xf]  ;;  %v283_v52 = vld [vmem:[%s5600_s10 + $0x1a0] sm:$0xf]  ;;  %280 = vst [vmem:[%s5607_s11 + $0xc8] sm:$0xf] %v279_v50 }
  0x3c   : > { %282 = vst [vmem:[%s5607_s11 + $0xcc] sm:$0xf] %v281_v51  ;;  %284 = vst [vmem:[%s5607_s11 + $0xd0] sm:$0xf] %v283_v52  ;;  %v285_v53 = vld [vmem:[%s5600_s10 + $0x1a8] sm:$0xf] }
  0x3d   : > { %v287_v54 = vld [vmem:[%s5600_s10 + $0x1b0] sm:$0xf]  ;;  %v289_v55 = vld [vmem:[%s5600_s10 + $0x1b8] sm:$0xf]  ;;  %286 = vst [vmem:[%s5607_s11 + $0xd4] sm:$0xf] %v285_v53 }
  0x3e   : > { %288 = vst [vmem:[%s5607_s11 + $0xd8] sm:$0xf] %v287_v54  ;;  %290 = vst [vmem:[%s5607_s11 + $0xdc] sm:$0xf] %v289_v55  ;;  %v291_v56 = vld [vmem:[%s5600_s10 + $0x1c0] sm:$0xf] }
  0x3f   : > { %v293_v57 = vld [vmem:[%s5600_s10 + $0x1c8] sm:$0xf]  ;;  %v295_v58 = vld [vmem:[%s5600_s10 + $0x1d0] sm:$0xf]  ;;  %292 = vst [vmem:[%s5607_s11 + $0xe0] sm:$0xf] %v291_v56 }
  0x40   : > { %294 = vst [vmem:[%s5607_s11 + $0xe4] sm:$0xf] %v293_v57  ;;  %296 = vst [vmem:[%s5607_s11 + $0xe8] sm:$0xf] %v295_v58  ;;  %v297_v59 = vld [vmem:[%s5600_s10 + $0x1d8] sm:$0xf] }
  0x41   : > { %v299_v60 = vld [vmem:[%s5600_s10 + $0x1e0] sm:$0xf]  ;;  %v301_v61 = vld [vmem:[%s5600_s10 + $0x1e8] sm:$0xf]  ;;  %298 = vst [vmem:[%s5607_s11 + $0xec] sm:$0xf] %v297_v59 }
  0x42   : > { %300 = vst [vmem:[%s5607_s11 + $0xf0] sm:$0xf] %v299_v60  ;;  %302 = vst [vmem:[%s5607_s11 + $0xf4] sm:$0xf] %v301_v61  ;;  %v303_v62 = vld [vmem:[%s5600_s10 + $0x1f0] sm:$0xf] }
  0x43   : > { %v305_v63 = vld [vmem:[%s5600_s10 + $0x1f8] sm:$0xf]  ;;  %v307_v0 = vld [vmem:[%s5600_s10 + $0x200] sm:$0xf]  ;;  %304 = vst [vmem:[%s5607_s11 + $0xf8] sm:$0xf] %v303_v62 }
  0x44   : > { %306 = vst [vmem:[%s5607_s11 + $0xfc] sm:$0xf] %v305_v63  ;;  %308 = vst [vmem:[%s5607_s11 + $0x100] sm:$0xf] %v307_v0  ;;  %v309_v1 = vld [vmem:[%s5600_s10 + $0x208] sm:$0xf] }
  0x45   : > { %v311_v2 = vld [vmem:[%s5600_s10 + $0x210] sm:$0xf]  ;;  %v313_v3 = vld [vmem:[%s5600_s10 + $0x218] sm:$0xf]  ;;  %310 = vst [vmem:[%s5607_s11 + $0x104] sm:$0xf] %v309_v1 }
  0x46   : > { %312 = vst [vmem:[%s5607_s11 + $0x108] sm:$0xf] %v311_v2  ;;  %314 = vst [vmem:[%s5607_s11 + $0x10c] sm:$0xf] %v313_v3  ;;  %v315_v4 = vld [vmem:[%s5600_s10 + $0x220] sm:$0xf] }
  0x47   : > { %v317_v5 = vld [vmem:[%s5600_s10 + $0x228] sm:$0xf]  ;;  %v319_v6 = vld [vmem:[%s5600_s10 + $0x230] sm:$0xf]  ;;  %316 = vst [vmem:[%s5607_s11 + $0x110] sm:$0xf] %v315_v4 }
  0x48   : > { %318 = vst [vmem:[%s5607_s11 + $0x114] sm:$0xf] %v317_v5  ;;  %320 = vst [vmem:[%s5607_s11 + $0x118] sm:$0xf] %v319_v6  ;;  %v321_v7 = vld [vmem:[%s5600_s10 + $0x238] sm:$0xf] }
  0x49   : > { %v323_v8 = vld [vmem:[%s5600_s10 + $0x240] sm:$0xf]  ;;  %v325_v9 = vld [vmem:[%s5600_s10 + $0x248] sm:$0xf]  ;;  %322 = vst [vmem:[%s5607_s11 + $0x11c] sm:$0xf] %v321_v7 }
  0x4a   : > { %324 = vst [vmem:[%s5607_s11 + $0x120] sm:$0xf] %v323_v8  ;;  %326 = vst [vmem:[%s5607_s11 + $0x124] sm:$0xf] %v325_v9  ;;  %v327_v10 = vld [vmem:[%s5600_s10 + $0x250] sm:$0xf] }
  0x4b   : > { %v329_v11 = vld [vmem:[%s5600_s10 + $0x258] sm:$0xf]  ;;  %v331_v12 = vld [vmem:[%s5600_s10 + $0x260] sm:$0xf]  ;;  %328 = vst [vmem:[%s5607_s11 + $0x128] sm:$0xf] %v327_v10 }
  0x4c   : > { %330 = vst [vmem:[%s5607_s11 + $0x12c] sm:$0xf] %v329_v11  ;;  %332 = vst [vmem:[%s5607_s11 + $0x130] sm:$0xf] %v331_v12  ;;  %v333_v13 = vld [vmem:[%s5600_s10 + $0x268] sm:$0xf] }
  0x4d   : > { %v335_v14 = vld [vmem:[%s5600_s10 + $0x270] sm:$0xf]  ;;  %v337_v15 = vld [vmem:[%s5600_s10 + $0x278] sm:$0xf]  ;;  %334 = vst [vmem:[%s5607_s11 + $0x134] sm:$0xf] %v333_v13 }
  0x4e   : > { %336 = vst [vmem:[%s5607_s11 + $0x138] sm:$0xf] %v335_v14  ;;  %338 = vst [vmem:[%s5607_s11 + $0x13c] sm:$0xf] %v337_v15  ;;  %v339_v16 = vld [vmem:[%s5600_s10 + $0x280] sm:$0xf] }
  0x4f   : > { %v341_v17 = vld [vmem:[%s5600_s10 + $0x288] sm:$0xf]  ;;  %v343_v18 = vld [vmem:[%s5600_s10 + $0x290] sm:$0xf]  ;;  %340 = vst [vmem:[%s5607_s11 + $0x140] sm:$0xf] %v339_v16 }
  0x50   : > { %342 = vst [vmem:[%s5607_s11 + $0x144] sm:$0xf] %v341_v17  ;;  %344 = vst [vmem:[%s5607_s11 + $0x148] sm:$0xf] %v343_v18  ;;  %v345_v19 = vld [vmem:[%s5600_s10 + $0x298] sm:$0xf] }
  0x51   : > { %v347_v20 = vld [vmem:[%s5600_s10 + $0x2a0] sm:$0xf]  ;;  %v349_v21 = vld [vmem:[%s5600_s10 + $0x2a8] sm:$0xf]  ;;  %346 = vst [vmem:[%s5607_s11 + $0x14c] sm:$0xf] %v345_v19 }
  0x52   : > { %348 = vst [vmem:[%s5607_s11 + $0x150] sm:$0xf] %v347_v20  ;;  %350 = vst [vmem:[%s5607_s11 + $0x154] sm:$0xf] %v349_v21  ;;  %v351_v22 = vld [vmem:[%s5600_s10 + $0x2b0] sm:$0xf] }
  0x53   : > { %v353_v23 = vld [vmem:[%s5600_s10 + $0x2b8] sm:$0xf]  ;;  %v355_v24 = vld [vmem:[%s5600_s10 + $0x2c0] sm:$0xf]  ;;  %352 = vst [vmem:[%s5607_s11 + $0x158] sm:$0xf] %v351_v22 }
  0x54   : > { %354 = vst [vmem:[%s5607_s11 + $0x15c] sm:$0xf] %v353_v23  ;;  %356 = vst [vmem:[%s5607_s11 + $0x160] sm:$0xf] %v355_v24  ;;  %v357_v25 = vld [vmem:[%s5600_s10 + $0x2c8] sm:$0xf] }
  0x55   : > { %v359_v26 = vld [vmem:[%s5600_s10 + $0x2d0] sm:$0xf]  ;;  %v361_v27 = vld [vmem:[%s5600_s10 + $0x2d8] sm:$0xf]  ;;  %358 = vst [vmem:[%s5607_s11 + $0x164] sm:$0xf] %v357_v25 }
  0x56   : > { %360 = vst [vmem:[%s5607_s11 + $0x168] sm:$0xf] %v359_v26  ;;  %362 = vst [vmem:[%s5607_s11 + $0x16c] sm:$0xf] %v361_v27  ;;  %v363_v28 = vld [vmem:[%s5600_s10 + $0x2e0] sm:$0xf] }
  0x57   : > { %v365_v29 = vld [vmem:[%s5600_s10 + $0x2e8] sm:$0xf]  ;;  %v367_v30 = vld [vmem:[%s5600_s10 + $0x2f0] sm:$0xf]  ;;  %364 = vst [vmem:[%s5607_s11 + $0x170] sm:$0xf] %v363_v28 }
  0x58   : > { %366 = vst [vmem:[%s5607_s11 + $0x174] sm:$0xf] %v365_v29  ;;  %368 = vst [vmem:[%s5607_s11 + $0x178] sm:$0xf] %v367_v30  ;;  %v369_v31 = vld [vmem:[%s5600_s10 + $0x2f8] sm:$0xf] }
  0x59   : > { %v371_v32 = vld [vmem:[%s5600_s10 + $0x300] sm:$0xf]  ;;  %v373_v33 = vld [vmem:[%s5600_s10 + $0x308] sm:$0xf]  ;;  %370 = vst [vmem:[%s5607_s11 + $0x17c] sm:$0xf] %v369_v31 }
  0x5a   : > { %372 = vst [vmem:[%s5607_s11 + $0x180] sm:$0xf] %v371_v32  ;;  %374 = vst [vmem:[%s5607_s11 + $0x184] sm:$0xf] %v373_v33  ;;  %v375_v34 = vld [vmem:[%s5600_s10 + $0x310] sm:$0xf] }
  0x5b   : > { %v377_v35 = vld [vmem:[%s5600_s10 + $0x318] sm:$0xf]  ;;  %v379_v36 = vld [vmem:[%s5600_s10 + $0x320] sm:$0xf]  ;;  %376 = vst [vmem:[%s5607_s11 + $0x188] sm:$0xf] %v375_v34 }
  0x5c   : > { %378 = vst [vmem:[%s5607_s11 + $0x18c] sm:$0xf] %v377_v35  ;;  %380 = vst [vmem:[%s5607_s11 + $0x190] sm:$0xf] %v379_v36  ;;  %v381_v37 = vld [vmem:[%s5600_s10 + $0x328] sm:$0xf] }
  0x5d   : > { %v383_v38 = vld [vmem:[%s5600_s10 + $0x330] sm:$0xf]  ;;  %v385_v39 = vld [vmem:[%s5600_s10 + $0x338] sm:$0xf]  ;;  %382 = vst [vmem:[%s5607_s11 + $0x194] sm:$0xf] %v381_v37 }
  0x5e   : > { %384 = vst [vmem:[%s5607_s11 + $0x198] sm:$0xf] %v383_v38  ;;  %386 = vst [vmem:[%s5607_s11 + $0x19c] sm:$0xf] %v385_v39  ;;  %v387_v40 = vld [vmem:[%s5600_s10 + $0x340] sm:$0xf] }
  0x5f   : > { %v389_v41 = vld [vmem:[%s5600_s10 + $0x348] sm:$0xf]  ;;  %v391_v42 = vld [vmem:[%s5600_s10 + $0x350] sm:$0xf]  ;;  %388 = vst [vmem:[%s5607_s11 + $0x1a0] sm:$0xf] %v387_v40 }
  0x60   : > { %390 = vst [vmem:[%s5607_s11 + $0x1a4] sm:$0xf] %v389_v41  ;;  %392 = vst [vmem:[%s5607_s11 + $0x1a8] sm:$0xf] %v391_v42  ;;  %v393_v43 = vld [vmem:[%s5600_s10 + $0x358] sm:$0xf] }
  0x61   : > { %v395_v44 = vld [vmem:[%s5600_s10 + $0x360] sm:$0xf]  ;;  %v397_v45 = vld [vmem:[%s5600_s10 + $0x368] sm:$0xf]  ;;  %394 = vst [vmem:[%s5607_s11 + $0x1ac] sm:$0xf] %v393_v43 }
  0x62   : > { %396 = vst [vmem:[%s5607_s11 + $0x1b0] sm:$0xf] %v395_v44  ;;  %398 = vst [vmem:[%s5607_s11 + $0x1b4] sm:$0xf] %v397_v45  ;;  %v399_v46 = vld [vmem:[%s5600_s10 + $0x370] sm:$0xf] }
  0x63   : > { %v401_v47 = vld [vmem:[%s5600_s10 + $0x378] sm:$0xf]  ;;  %v403_v48 = vld [vmem:[%s5600_s10 + $0x380] sm:$0xf]  ;;  %400 = vst [vmem:[%s5607_s11 + $0x1b8] sm:$0xf] %v399_v46 }
  0x64   : > { %402 = vst [vmem:[%s5607_s11 + $0x1bc] sm:$0xf] %v401_v47  ;;  %404 = vst [vmem:[%s5607_s11 + $0x1c0] sm:$0xf] %v403_v48  ;;  %v405_v49 = vld [vmem:[%s5600_s10 + $0x388] sm:$0xf] }
  0x65   : > { %v407_v50 = vld [vmem:[%s5600_s10 + $0x390] sm:$0xf]  ;;  %v409_v51 = vld [vmem:[%s5600_s10 + $0x398] sm:$0xf]  ;;  %406 = vst [vmem:[%s5607_s11 + $0x1c4] sm:$0xf] %v405_v49 }
  0x66   : > { %408 = vst [vmem:[%s5607_s11 + $0x1c8] sm:$0xf] %v407_v50  ;;  %410 = vst [vmem:[%s5607_s11 + $0x1cc] sm:$0xf] %v409_v51  ;;  %v411_v52 = vld [vmem:[%s5600_s10 + $0x3a0] sm:$0xf] }
  0x67   : > { %v413_v53 = vld [vmem:[%s5600_s10 + $0x3a8] sm:$0xf]  ;;  %v415_v54 = vld [vmem:[%s5600_s10 + $0x3b0] sm:$0xf]  ;;  %412 = vst [vmem:[%s5607_s11 + $0x1d0] sm:$0xf] %v411_v52 }
  0x68   : > { %414 = vst [vmem:[%s5607_s11 + $0x1d4] sm:$0xf] %v413_v53  ;;  %416 = vst [vmem:[%s5607_s11 + $0x1d8] sm:$0xf] %v415_v54  ;;  %v417_v55 = vld [vmem:[%s5600_s10 + $0x3b8] sm:$0xf] }
  0x69   : > { %v419_v56 = vld [vmem:[%s5600_s10 + $0x3c0] sm:$0xf]  ;;  %v421_v57 = vld [vmem:[%s5600_s10 + $0x3c8] sm:$0xf]  ;;  %418 = vst [vmem:[%s5607_s11 + $0x1dc] sm:$0xf] %v417_v55 }
  0x6a   : > { %420 = vst [vmem:[%s5607_s11 + $0x1e0] sm:$0xf] %v419_v56  ;;  %422 = vst [vmem:[%s5607_s11 + $0x1e4] sm:$0xf] %v421_v57  ;;  %v423_v58 = vld [vmem:[%s5600_s10 + $0x3d0] sm:$0xf] }
  0x6b   : > { %v425_v59 = vld [vmem:[%s5600_s10 + $0x3d8] sm:$0xf]  ;;  %v427_v60 = vld [vmem:[%s5600_s10 + $0x3e0] sm:$0xf]  ;;  %424 = vst [vmem:[%s5607_s11 + $0x1e8] sm:$0xf] %v423_v58 }
  0x6c   : > { %426 = vst [vmem:[%s5607_s11 + $0x1ec] sm:$0xf] %v425_v59  ;;  %428 = vst [vmem:[%s5607_s11 + $0x1f0] sm:$0xf] %v427_v60  ;;  %v429_v61 = vld [vmem:[%s5600_s10 + $0x3e8] sm:$0xf] }
  0x6d   : > { %v431_v62 = vld [vmem:[%s5600_s10 + $0x3f0] sm:$0xf]  ;;  %v433_v63 = vld [vmem:[%s5600_s10 + $0x3f8] sm:$0xf]  ;;  %430 = vst [vmem:[%s5607_s11 + $0x1f4] sm:$0xf] %v429_v61 }
  0x6e   : > { %432 = vst [vmem:[%s5607_s11 + $0x1f8] sm:$0xf] %v431_v62  ;;  %434 = vst [vmem:[%s5607_s11 + $0x1fc] sm:$0xf] %v433_v63  ;;  %v435_v0 = vld [vmem:[%s5600_s10 + $0x400] sm:$0xf] }
  0x6f   : > { %v437_v1 = vld [vmem:[%s5600_s10 + $0x408] sm:$0xf]  ;;  %v439_v2 = vld [vmem:[%s5600_s10 + $0x410] sm:$0xf]  ;;  %436 = vst [vmem:[%s5607_s11 + $0x200] sm:$0xf] %v435_v0 }
  0x70   : > { %438 = vst [vmem:[%s5607_s11 + $0x204] sm:$0xf] %v437_v1  ;;  %440 = vst [vmem:[%s5607_s11 + $0x208] sm:$0xf] %v439_v2  ;;  %v441_v3 = vld [vmem:[%s5600_s10 + $0x418] sm:$0xf] }
  0x71   : > { %v443_v4 = vld [vmem:[%s5600_s10 + $0x420] sm:$0xf]  ;;  %v445_v5 = vld [vmem:[%s5600_s10 + $0x428] sm:$0xf]  ;;  %442 = vst [vmem:[%s5607_s11 + $0x20c] sm:$0xf] %v441_v3 }
  0x72   : > { %444 = vst [vmem:[%s5607_s11 + $0x210] sm:$0xf] %v443_v4  ;;  %446 = vst [vmem:[%s5607_s11 + $0x214] sm:$0xf] %v445_v5  ;;  %v447_v6 = vld [vmem:[%s5600_s10 + $0x430] sm:$0xf] }
  0x73   : > { %v449_v7 = vld [vmem:[%s5600_s10 + $0x438] sm:$0xf]  ;;  %v451_v8 = vld [vmem:[%s5600_s10 + $0x440] sm:$0xf]  ;;  %448 = vst [vmem:[%s5607_s11 + $0x218] sm:$0xf] %v447_v6 }
  0x74   : > { %450 = vst [vmem:[%s5607_s11 + $0x21c] sm:$0xf] %v449_v7  ;;  %452 = vst [vmem:[%s5607_s11 + $0x220] sm:$0xf] %v451_v8  ;;  %v453_v9 = vld [vmem:[%s5600_s10 + $0x448] sm:$0xf] }
  0x75   : > { %v455_v10 = vld [vmem:[%s5600_s10 + $0x450] sm:$0xf]  ;;  %v457_v11 = vld [vmem:[%s5600_s10 + $0x458] sm:$0xf]  ;;  %454 = vst [vmem:[%s5607_s11 + $0x224] sm:$0xf] %v453_v9 }
  0x76   : > { %456 = vst [vmem:[%s5607_s11 + $0x228] sm:$0xf] %v455_v10  ;;  %458 = vst [vmem:[%s5607_s11 + $0x22c] sm:$0xf] %v457_v11  ;;  %v459_v12 = vld [vmem:[%s5600_s10 + $0x460] sm:$0xf] }
  0x77   : > { %v461_v13 = vld [vmem:[%s5600_s10 + $0x468] sm:$0xf]  ;;  %v463_v14 = vld [vmem:[%s5600_s10 + $0x470] sm:$0xf]  ;;  %460 = vst [vmem:[%s5607_s11 + $0x230] sm:$0xf] %v459_v12 }
  0x78   : > { %462 = vst [vmem:[%s5607_s11 + $0x234] sm:$0xf] %v461_v13  ;;  %464 = vst [vmem:[%s5607_s11 + $0x238] sm:$0xf] %v463_v14  ;;  %v465_v15 = vld [vmem:[%s5600_s10 + $0x478] sm:$0xf] }
  0x79   : > { %v467_v16 = vld [vmem:[%s5600_s10 + $0x480] sm:$0xf]  ;;  %v469_v17 = vld [vmem:[%s5600_s10 + $0x488] sm:$0xf]  ;;  %466 = vst [vmem:[%s5607_s11 + $0x23c] sm:$0xf] %v465_v15 }
  0x7a   : > { %468 = vst [vmem:[%s5607_s11 + $0x240] sm:$0xf] %v467_v16  ;;  %470 = vst [vmem:[%s5607_s11 + $0x244] sm:$0xf] %v469_v17  ;;  %v471_v18 = vld [vmem:[%s5600_s10 + $0x490] sm:$0xf] }
  0x7b   : > { %v473_v19 = vld [vmem:[%s5600_s10 + $0x498] sm:$0xf]  ;;  %v475_v20 = vld [vmem:[%s5600_s10 + $0x4a0] sm:$0xf]  ;;  %472 = vst [vmem:[%s5607_s11 + $0x248] sm:$0xf] %v471_v18 }
  0x7c   : > { %474 = vst [vmem:[%s5607_s11 + $0x24c] sm:$0xf] %v473_v19  ;;  %476 = vst [vmem:[%s5607_s11 + $0x250] sm:$0xf] %v475_v20  ;;  %v477_v21 = vld [vmem:[%s5600_s10 + $0x4a8] sm:$0xf] }
  0x7d   : > { %v479_v22 = vld [vmem:[%s5600_s10 + $0x4b0] sm:$0xf]  ;;  %v481_v23 = vld [vmem:[%s5600_s10 + $0x4b8] sm:$0xf]  ;;  %478 = vst [vmem:[%s5607_s11 + $0x254] sm:$0xf] %v477_v21 }
  0x7e   : > { %480 = vst [vmem:[%s5607_s11 + $0x258] sm:$0xf] %v479_v22  ;;  %482 = vst [vmem:[%s5607_s11 + $0x25c] sm:$0xf] %v481_v23  ;;  %v483_v24 = vld [vmem:[%s5600_s10 + $0x4c0] sm:$0xf] }
  0x7f   : > { %v485_v25 = vld [vmem:[%s5600_s10 + $0x4c8] sm:$0xf]  ;;  %v487_v26 = vld [vmem:[%s5600_s10 + $0x4d0] sm:$0xf]  ;;  %484 = vst [vmem:[%s5607_s11 + $0x260] sm:$0xf] %v483_v24 }
  0x80   : > { %486 = vst [vmem:[%s5607_s11 + $0x264] sm:$0xf] %v485_v25  ;;  %488 = vst [vmem:[%s5607_s11 + $0x268] sm:$0xf] %v487_v26  ;;  %v489_v27 = vld [vmem:[%s5600_s10 + $0x4d8] sm:$0xf] }
  0x81   : > { %v491_v28 = vld [vmem:[%s5600_s10 + $0x4e0] sm:$0xf]  ;;  %v493_v29 = vld [vmem:[%s5600_s10 + $0x4e8] sm:$0xf]  ;;  %490 = vst [vmem:[%s5607_s11 + $0x26c] sm:$0xf] %v489_v27 }
  0x82   : > { %492 = vst [vmem:[%s5607_s11 + $0x270] sm:$0xf] %v491_v28  ;;  %494 = vst [vmem:[%s5607_s11 + $0x274] sm:$0xf] %v493_v29  ;;  %v495_v30 = vld [vmem:[%s5600_s10 + $0x4f0] sm:$0xf] }
  0x83   : > { %v497_v31 = vld [vmem:[%s5600_s10 + $0x4f8] sm:$0xf]  ;;  %v499_v32 = vld [vmem:[%s5600_s10 + $0x500] sm:$0xf]  ;;  %496 = vst [vmem:[%s5607_s11 + $0x278] sm:$0xf] %v495_v30 }
  0x84   : > { %498 = vst [vmem:[%s5607_s11 + $0x27c] sm:$0xf] %v497_v31  ;;  %500 = vst [vmem:[%s5607_s11 + $0x280] sm:$0xf] %v499_v32  ;;  %v501_v33 = vld [vmem:[%s5600_s10 + $0x508] sm:$0xf] }
  0x85   : > { %v503_v34 = vld [vmem:[%s5600_s10 + $0x510] sm:$0xf]  ;;  %v505_v35 = vld [vmem:[%s5600_s10 + $0x518] sm:$0xf]  ;;  %502 = vst [vmem:[%s5607_s11 + $0x284] sm:$0xf] %v501_v33 }
  0x86   : > { %504 = vst [vmem:[%s5607_s11 + $0x288] sm:$0xf] %v503_v34  ;;  %506 = vst [vmem:[%s5607_s11 + $0x28c] sm:$0xf] %v505_v35  ;;  %v507_v36 = vld [vmem:[%s5600_s10 + $0x520] sm:$0xf] }
  0x87   : > { %v509_v37 = vld [vmem:[%s5600_s10 + $0x528] sm:$0xf]  ;;  %v511_v38 = vld [vmem:[%s5600_s10 + $0x530] sm:$0xf]  ;;  %508 = vst [vmem:[%s5607_s11 + $0x290] sm:$0xf] %v507_v36 }
  0x88   : > { %510 = vst [vmem:[%s5607_s11 + $0x294] sm:$0xf] %v509_v37  ;;  %512 = vst [vmem:[%s5607_s11 + $0x298] sm:$0xf] %v511_v38  ;;  %v513_v39 = vld [vmem:[%s5600_s10 + $0x538] sm:$0xf] }
  0x89   : > { %v515_v40 = vld [vmem:[%s5600_s10 + $0x540] sm:$0xf]  ;;  %v517_v41 = vld [vmem:[%s5600_s10 + $0x548] sm:$0xf]  ;;  %514 = vst [vmem:[%s5607_s11 + $0x29c] sm:$0xf] %v513_v39 }
  0x8a   : > { %516 = vst [vmem:[%s5607_s11 + $0x2a0] sm:$0xf] %v515_v40  ;;  %518 = vst [vmem:[%s5607_s11 + $0x2a4] sm:$0xf] %v517_v41  ;;  %v519_v42 = vld [vmem:[%s5600_s10 + $0x550] sm:$0xf] }
  0x8b   : > { %v521_v43 = vld [vmem:[%s5600_s10 + $0x558] sm:$0xf]  ;;  %v523_v44 = vld [vmem:[%s5600_s10 + $0x560] sm:$0xf]  ;;  %520 = vst [vmem:[%s5607_s11 + $0x2a8] sm:$0xf] %v519_v42 }
  0x8c   : > { %522 = vst [vmem:[%s5607_s11 + $0x2ac] sm:$0xf] %v521_v43  ;;  %524 = vst [vmem:[%s5607_s11 + $0x2b0] sm:$0xf] %v523_v44  ;;  %v525_v45 = vld [vmem:[%s5600_s10 + $0x568] sm:$0xf] }
  0x8d   : > { %v527_v46 = vld [vmem:[%s5600_s10 + $0x570] sm:$0xf]  ;;  %v529_v47 = vld [vmem:[%s5600_s10 + $0x578] sm:$0xf]  ;;  %526 = vst [vmem:[%s5607_s11 + $0x2b4] sm:$0xf] %v525_v45 }
  0x8e   : > { %528 = vst [vmem:[%s5607_s11 + $0x2b8] sm:$0xf] %v527_v46  ;;  %530 = vst [vmem:[%s5607_s11 + $0x2bc] sm:$0xf] %v529_v47  ;;  %v531_v48 = vld [vmem:[%s5600_s10 + $0x580] sm:$0xf] }
  0x8f   : > { %v533_v49 = vld [vmem:[%s5600_s10 + $0x588] sm:$0xf]  ;;  %v535_v50 = vld [vmem:[%s5600_s10 + $0x590] sm:$0xf]  ;;  %532 = vst [vmem:[%s5607_s11 + $0x2c0] sm:$0xf] %v531_v48 }
  0x90   : > { %534 = vst [vmem:[%s5607_s11 + $0x2c4] sm:$0xf] %v533_v49  ;;  %536 = vst [vmem:[%s5607_s11 + $0x2c8] sm:$0xf] %v535_v50  ;;  %v537_v51 = vld [vmem:[%s5600_s10 + $0x598] sm:$0xf] }
  0x91   : > { %v539_v52 = vld [vmem:[%s5600_s10 + $0x5a0] sm:$0xf]  ;;  %v541_v53 = vld [vmem:[%s5600_s10 + $0x5a8] sm:$0xf]  ;;  %538 = vst [vmem:[%s5607_s11 + $0x2cc] sm:$0xf] %v537_v51 }
  0x92   : > { %540 = vst [vmem:[%s5607_s11 + $0x2d0] sm:$0xf] %v539_v52  ;;  %542 = vst [vmem:[%s5607_s11 + $0x2d4] sm:$0xf] %v541_v53  ;;  %v543_v54 = vld [vmem:[%s5600_s10 + $0x5b0] sm:$0xf] }
  0x93   : > { %v545_v55 = vld [vmem:[%s5600_s10 + $0x5b8] sm:$0xf]  ;;  %v547_v56 = vld [vmem:[%s5600_s10 + $0x5c0] sm:$0xf]  ;;  %544 = vst [vmem:[%s5607_s11 + $0x2d8] sm:$0xf] %v543_v54 }
  0x94   : > { %546 = vst [vmem:[%s5607_s11 + $0x2dc] sm:$0xf] %v545_v55  ;;  %548 = vst [vmem:[%s5607_s11 + $0x2e0] sm:$0xf] %v547_v56  ;;  %v549_v57 = vld [vmem:[%s5600_s10 + $0x5c8] sm:$0xf] }
  0x95   : > { %v551_v58 = vld [vmem:[%s5600_s10 + $0x5d0] sm:$0xf]  ;;  %v553_v59 = vld [vmem:[%s5600_s10 + $0x5d8] sm:$0xf]  ;;  %550 = vst [vmem:[%s5607_s11 + $0x2e4] sm:$0xf] %v549_v57 }
  0x96   : > { %552 = vst [vmem:[%s5607_s11 + $0x2e8] sm:$0xf] %v551_v58  ;;  %554 = vst [vmem:[%s5607_s11 + $0x2ec] sm:$0xf] %v553_v59  ;;  %v555_v60 = vld [vmem:[%s5600_s10 + $0x5e0] sm:$0xf] }
  0x97   : > { %v557_v61 = vld [vmem:[%s5600_s10 + $0x5e8] sm:$0xf]  ;;  %v559_v62 = vld [vmem:[%s5600_s10 + $0x5f0] sm:$0xf]  ;;  %556 = vst [vmem:[%s5607_s11 + $0x2f0] sm:$0xf] %v555_v60 }
  0x98   : > { %558 = vst [vmem:[%s5607_s11 + $0x2f4] sm:$0xf] %v557_v61  ;;  %560 = vst [vmem:[%s5607_s11 + $0x2f8] sm:$0xf] %v559_v62  ;;  %v561_v63 = vld [vmem:[%s5600_s10 + $0x5f8] sm:$0xf] }
  0x99   : > { %v563_v0 = vld [vmem:[%s5600_s10 + $0x600] sm:$0xf]  ;;  %v565_v1 = vld [vmem:[%s5600_s10 + $0x608] sm:$0xf]  ;;  %562 = vst [vmem:[%s5607_s11 + $0x2fc] sm:$0xf] %v561_v63 }
  0x9a   : > { %564 = vst [vmem:[%s5607_s11 + $0x300] sm:$0xf] %v563_v0  ;;  %566 = vst [vmem:[%s5607_s11 + $0x304] sm:$0xf] %v565_v1  ;;  %v567_v2 = vld [vmem:[%s5600_s10 + $0x610] sm:$0xf] }
  0x9b   : > { %v569_v3 = vld [vmem:[%s5600_s10 + $0x618] sm:$0xf]  ;;  %v571_v4 = vld [vmem:[%s5600_s10 + $0x620] sm:$0xf]  ;;  %568 = vst [vmem:[%s5607_s11 + $0x308] sm:$0xf] %v567_v2 }
  0x9c   : > { %570 = vst [vmem:[%s5607_s11 + $0x30c] sm:$0xf] %v569_v3  ;;  %572 = vst [vmem:[%s5607_s11 + $0x310] sm:$0xf] %v571_v4  ;;  %v573_v5 = vld [vmem:[%s5600_s10 + $0x628] sm:$0xf] }
  0x9d   : > { %v575_v6 = vld [vmem:[%s5600_s10 + $0x630] sm:$0xf]  ;;  %v577_v7 = vld [vmem:[%s5600_s10 + $0x638] sm:$0xf]  ;;  %574 = vst [vmem:[%s5607_s11 + $0x314] sm:$0xf] %v573_v5 }
  0x9e   : > { %576 = vst [vmem:[%s5607_s11 + $0x318] sm:$0xf] %v575_v6  ;;  %578 = vst [vmem:[%s5607_s11 + $0x31c] sm:$0xf] %v577_v7  ;;  %v579_v8 = vld [vmem:[%s5600_s10 + $0x640] sm:$0xf] }
  0x9f   : > { %v581_v9 = vld [vmem:[%s5600_s10 + $0x648] sm:$0xf]  ;;  %v583_v10 = vld [vmem:[%s5600_s10 + $0x650] sm:$0xf]  ;;  %580 = vst [vmem:[%s5607_s11 + $0x320] sm:$0xf] %v579_v8 }
  0xa0   : > { %582 = vst [vmem:[%s5607_s11 + $0x324] sm:$0xf] %v581_v9  ;;  %584 = vst [vmem:[%s5607_s11 + $0x328] sm:$0xf] %v583_v10  ;;  %v585_v11 = vld [vmem:[%s5600_s10 + $0x658] sm:$0xf] }
  0xa1   : > { %v587_v12 = vld [vmem:[%s5600_s10 + $0x660] sm:$0xf]  ;;  %v589_v13 = vld [vmem:[%s5600_s10 + $0x668] sm:$0xf]  ;;  %586 = vst [vmem:[%s5607_s11 + $0x32c] sm:$0xf] %v585_v11 }
  0xa2   : > { %588 = vst [vmem:[%s5607_s11 + $0x330] sm:$0xf] %v587_v12  ;;  %590 = vst [vmem:[%s5607_s11 + $0x334] sm:$0xf] %v589_v13  ;;  %v591_v14 = vld [vmem:[%s5600_s10 + $0x670] sm:$0xf] }
  0xa3   : > { %v593_v15 = vld [vmem:[%s5600_s10 + $0x678] sm:$0xf]  ;;  %v595_v16 = vld [vmem:[%s5600_s10 + $0x680] sm:$0xf]  ;;  %592 = vst [vmem:[%s5607_s11 + $0x338] sm:$0xf] %v591_v14 }
  0xa4   : > { %594 = vst [vmem:[%s5607_s11 + $0x33c] sm:$0xf] %v593_v15  ;;  %596 = vst [vmem:[%s5607_s11 + $0x340] sm:$0xf] %v595_v16  ;;  %v597_v17 = vld [vmem:[%s5600_s10 + $0x688] sm:$0xf] }
  0xa5   : > { %v599_v18 = vld [vmem:[%s5600_s10 + $0x690] sm:$0xf]  ;;  %v601_v19 = vld [vmem:[%s5600_s10 + $0x698] sm:$0xf]  ;;  %598 = vst [vmem:[%s5607_s11 + $0x344] sm:$0xf] %v597_v17 }
  0xa6   : > { %600 = vst [vmem:[%s5607_s11 + $0x348] sm:$0xf] %v599_v18  ;;  %602 = vst [vmem:[%s5607_s11 + $0x34c] sm:$0xf] %v601_v19  ;;  %v603_v20 = vld [vmem:[%s5600_s10 + $0x6a0] sm:$0xf] }
  0xa7   : > { %v605_v21 = vld [vmem:[%s5600_s10 + $0x6a8] sm:$0xf]  ;;  %v607_v22 = vld [vmem:[%s5600_s10 + $0x6b0] sm:$0xf]  ;;  %604 = vst [vmem:[%s5607_s11 + $0x350] sm:$0xf] %v603_v20 }
  0xa8   : > { %606 = vst [vmem:[%s5607_s11 + $0x354] sm:$0xf] %v605_v21  ;;  %608 = vst [vmem:[%s5607_s11 + $0x358] sm:$0xf] %v607_v22  ;;  %v609_v23 = vld [vmem:[%s5600_s10 + $0x6b8] sm:$0xf] }
  0xa9   : > { %v611_v24 = vld [vmem:[%s5600_s10 + $0x6c0] sm:$0xf]  ;;  %v613_v25 = vld [vmem:[%s5600_s10 + $0x6c8] sm:$0xf]  ;;  %610 = vst [vmem:[%s5607_s11 + $0x35c] sm:$0xf] %v609_v23 }
  0xaa   : > { %612 = vst [vmem:[%s5607_s11 + $0x360] sm:$0xf] %v611_v24  ;;  %614 = vst [vmem:[%s5607_s11 + $0x364] sm:$0xf] %v613_v25  ;;  %v615_v26 = vld [vmem:[%s5600_s10 + $0x6d0] sm:$0xf] }
  0xab   : > { %v617_v27 = vld [vmem:[%s5600_s10 + $0x6d8] sm:$0xf]  ;;  %v619_v28 = vld [vmem:[%s5600_s10 + $0x6e0] sm:$0xf]  ;;  %616 = vst [vmem:[%s5607_s11 + $0x368] sm:$0xf] %v615_v26 }
  0xac   : > { %618 = vst [vmem:[%s5607_s11 + $0x36c] sm:$0xf] %v617_v27  ;;  %620 = vst [vmem:[%s5607_s11 + $0x370] sm:$0xf] %v619_v28  ;;  %v621_v29 = vld [vmem:[%s5600_s10 + $0x6e8] sm:$0xf] }
  0xad   : > { %v623_v30 = vld [vmem:[%s5600_s10 + $0x6f0] sm:$0xf]  ;;  %v625_v31 = vld [vmem:[%s5600_s10 + $0x6f8] sm:$0xf]  ;;  %622 = vst [vmem:[%s5607_s11 + $0x374] sm:$0xf] %v621_v29 }
  0xae   : > { %624 = vst [vmem:[%s5607_s11 + $0x378] sm:$0xf] %v623_v30  ;;  %626 = vst [vmem:[%s5607_s11 + $0x37c] sm:$0xf] %v625_v31  ;;  %v627_v32 = vld [vmem:[%s5600_s10 + $0x700] sm:$0xf] }
  0xaf   : > { %v629_v33 = vld [vmem:[%s5600_s10 + $0x708] sm:$0xf]  ;;  %v631_v34 = vld [vmem:[%s5600_s10 + $0x710] sm:$0xf]  ;;  %628 = vst [vmem:[%s5607_s11 + $0x380] sm:$0xf] %v627_v32 }
  0xb0   : > { %630 = vst [vmem:[%s5607_s11 + $0x384] sm:$0xf] %v629_v33  ;;  %632 = vst [vmem:[%s5607_s11 + $0x388] sm:$0xf] %v631_v34  ;;  %v633_v35 = vld [vmem:[%s5600_s10 + $0x718] sm:$0xf] }
  0xb1   : > { %v635_v36 = vld [vmem:[%s5600_s10 + $0x720] sm:$0xf]  ;;  %v637_v37 = vld [vmem:[%s5600_s10 + $0x728] sm:$0xf]  ;;  %634 = vst [vmem:[%s5607_s11 + $0x38c] sm:$0xf] %v633_v35 }
  0xb2   : > { %636 = vst [vmem:[%s5607_s11 + $0x390] sm:$0xf] %v635_v36  ;;  %638 = vst [vmem:[%s5607_s11 + $0x394] sm:$0xf] %v637_v37  ;;  %v639_v38 = vld [vmem:[%s5600_s10 + $0x730] sm:$0xf] }
  0xb3   : > { %v641_v39 = vld [vmem:[%s5600_s10 + $0x738] sm:$0xf]  ;;  %v643_v40 = vld [vmem:[%s5600_s10 + $0x740] sm:$0xf]  ;;  %640 = vst [vmem:[%s5607_s11 + $0x398] sm:$0xf] %v639_v38 }
  0xb4   : > { %642 = vst [vmem:[%s5607_s11 + $0x39c] sm:$0xf] %v641_v39  ;;  %644 = vst [vmem:[%s5607_s11 + $0x3a0] sm:$0xf] %v643_v40  ;;  %v645_v41 = vld [vmem:[%s5600_s10 + $0x748] sm:$0xf] }
  0xb5   : > { %v647_v42 = vld [vmem:[%s5600_s10 + $0x750] sm:$0xf]  ;;  %v649_v43 = vld [vmem:[%s5600_s10 + $0x758] sm:$0xf]  ;;  %646 = vst [vmem:[%s5607_s11 + $0x3a4] sm:$0xf] %v645_v41 }
  0xb6   : > { %648 = vst [vmem:[%s5607_s11 + $0x3a8] sm:$0xf] %v647_v42  ;;  %650 = vst [vmem:[%s5607_s11 + $0x3ac] sm:$0xf] %v649_v43  ;;  %v651_v44 = vld [vmem:[%s5600_s10 + $0x760] sm:$0xf] }
  0xb7   : > { %v653_v45 = vld [vmem:[%s5600_s10 + $0x768] sm:$0xf]  ;;  %v655_v46 = vld [vmem:[%s5600_s10 + $0x770] sm:$0xf]  ;;  %652 = vst [vmem:[%s5607_s11 + $0x3b0] sm:$0xf] %v651_v44 }
  0xb8   : > { %654 = vst [vmem:[%s5607_s11 + $0x3b4] sm:$0xf] %v653_v45  ;;  %656 = vst [vmem:[%s5607_s11 + $0x3b8] sm:$0xf] %v655_v46  ;;  %v657_v47 = vld [vmem:[%s5600_s10 + $0x778] sm:$0xf] }
  0xb9   : > { %v659_v48 = vld [vmem:[%s5600_s10 + $0x780] sm:$0xf]  ;;  %v661_v49 = vld [vmem:[%s5600_s10 + $0x788] sm:$0xf]  ;;  %658 = vst [vmem:[%s5607_s11 + $0x3bc] sm:$0xf] %v657_v47 }
  0xba   : > { %660 = vst [vmem:[%s5607_s11 + $0x3c0] sm:$0xf] %v659_v48  ;;  %662 = vst [vmem:[%s5607_s11 + $0x3c4] sm:$0xf] %v661_v49  ;;  %v663_v50 = vld [vmem:[%s5600_s10 + $0x790] sm:$0xf] }
  0xbb   : > { %v665_v51 = vld [vmem:[%s5600_s10 + $0x798] sm:$0xf]  ;;  %v667_v52 = vld [vmem:[%s5600_s10 + $0x7a0] sm:$0xf]  ;;  %664 = vst [vmem:[%s5607_s11 + $0x3c8] sm:$0xf] %v663_v50 }
  0xbc   : > { %666 = vst [vmem:[%s5607_s11 + $0x3cc] sm:$0xf] %v665_v51  ;;  %668 = vst [vmem:[%s5607_s11 + $0x3d0] sm:$0xf] %v667_v52  ;;  %v669_v53 = vld [vmem:[%s5600_s10 + $0x7a8] sm:$0xf] }
  0xbd   : > { %v671_v54 = vld [vmem:[%s5600_s10 + $0x7b0] sm:$0xf]  ;;  %v673_v55 = vld [vmem:[%s5600_s10 + $0x7b8] sm:$0xf]  ;;  %670 = vst [vmem:[%s5607_s11 + $0x3d4] sm:$0xf] %v669_v53 }
  0xbe   : > { %672 = vst [vmem:[%s5607_s11 + $0x3d8] sm:$0xf] %v671_v54  ;;  %674 = vst [vmem:[%s5607_s11 + $0x3dc] sm:$0xf] %v673_v55  ;;  %v675_v56 = vld [vmem:[%s5600_s10 + $0x7c0] sm:$0xf] }
  0xbf   : > { %v677_v57 = vld [vmem:[%s5600_s10 + $0x7c8] sm:$0xf]  ;;  %v679_v58 = vld [vmem:[%s5600_s10 + $0x7d0] sm:$0xf]  ;;  %676 = vst [vmem:[%s5607_s11 + $0x3e0] sm:$0xf] %v675_v56 }
  0xc0   : > { %678 = vst [vmem:[%s5607_s11 + $0x3e4] sm:$0xf] %v677_v57  ;;  %680 = vst [vmem:[%s5607_s11 + $0x3e8] sm:$0xf] %v679_v58  ;;  %v681_v59 = vld [vmem:[%s5600_s10 + $0x7d8] sm:$0xf] }
  0xc1   : > { %v683_v60 = vld [vmem:[%s5600_s10 + $0x7e0] sm:$0xf]  ;;  %v685_v61 = vld [vmem:[%s5600_s10 + $0x7e8] sm:$0xf]  ;;  %682 = vst [vmem:[%s5607_s11 + $0x3ec] sm:$0xf] %v681_v59 }
  0xc2   : > { %684 = vst [vmem:[%s5607_s11 + $0x3f0] sm:$0xf] %v683_v60  ;;  %686 = vst [vmem:[%s5607_s11 + $0x3f4] sm:$0xf] %v685_v61  ;;  %v687_v62 = vld [vmem:[%s5600_s10 + $0x7f0] sm:$0xf] }
  0xc3   : > { %v689_v63 = vld [vmem:[%s5600_s10 + $0x7f8] sm:$0xf]  ;;  %v691_v0 = vld [vmem:[%s5600_s10 + $0x800] sm:$0xf]  ;;  %688 = vst [vmem:[%s5607_s11 + $0x3f8] sm:$0xf] %v687_v62 }
  0xc4   : > { %690 = vst [vmem:[%s5607_s11 + $0x3fc] sm:$0xf] %v689_v63  ;;  %692 = vst [vmem:[%s5607_s11 + $0x400] sm:$0xf] %v691_v0  ;;  %v693_v1 = vld [vmem:[%s5600_s10 + $0x808] sm:$0xf] }
  0xc5   : > { %v695_v2 = vld [vmem:[%s5600_s10 + $0x810] sm:$0xf]  ;;  %v697_v3 = vld [vmem:[%s5600_s10 + $0x818] sm:$0xf]  ;;  %694 = vst [vmem:[%s5607_s11 + $0x404] sm:$0xf] %v693_v1 }
  0xc6   : > { %696 = vst [vmem:[%s5607_s11 + $0x408] sm:$0xf] %v695_v2  ;;  %698 = vst [vmem:[%s5607_s11 + $0x40c] sm:$0xf] %v697_v3  ;;  %v699_v4 = vld [vmem:[%s5600_s10 + $0x820] sm:$0xf] }
  0xc7   : > { %v701_v5 = vld [vmem:[%s5600_s10 + $0x828] sm:$0xf]  ;;  %v703_v6 = vld [vmem:[%s5600_s10 + $0x830] sm:$0xf]  ;;  %700 = vst [vmem:[%s5607_s11 + $0x410] sm:$0xf] %v699_v4 }
  0xc8   : > { %702 = vst [vmem:[%s5607_s11 + $0x414] sm:$0xf] %v701_v5  ;;  %704 = vst [vmem:[%s5607_s11 + $0x418] sm:$0xf] %v703_v6  ;;  %v705_v7 = vld [vmem:[%s5600_s10 + $0x838] sm:$0xf] }
  0xc9   : > { %v707_v8 = vld [vmem:[%s5600_s10 + $0x840] sm:$0xf]  ;;  %v709_v9 = vld [vmem:[%s5600_s10 + $0x848] sm:$0xf]  ;;  %706 = vst [vmem:[%s5607_s11 + $0x41c] sm:$0xf] %v705_v7 }
  0xca   : > { %708 = vst [vmem:[%s5607_s11 + $0x420] sm:$0xf] %v707_v8  ;;  %710 = vst [vmem:[%s5607_s11 + $0x424] sm:$0xf] %v709_v9  ;;  %v711_v10 = vld [vmem:[%s5600_s10 + $0x850] sm:$0xf] }
  0xcb   : > { %v713_v11 = vld [vmem:[%s5600_s10 + $0x858] sm:$0xf]  ;;  %v715_v12 = vld [vmem:[%s5600_s10 + $0x860] sm:$0xf]  ;;  %712 = vst [vmem:[%s5607_s11 + $0x428] sm:$0xf] %v711_v10 }
  0xcc   : > { %714 = vst [vmem:[%s5607_s11 + $0x42c] sm:$0xf] %v713_v11  ;;  %716 = vst [vmem:[%s5607_s11 + $0x430] sm:$0xf] %v715_v12  ;;  %v717_v13 = vld [vmem:[%s5600_s10 + $0x868] sm:$0xf] }
  0xcd   : > { %v719_v14 = vld [vmem:[%s5600_s10 + $0x870] sm:$0xf]  ;;  %v721_v15 = vld [vmem:[%s5600_s10 + $0x878] sm:$0xf]  ;;  %718 = vst [vmem:[%s5607_s11 + $0x434] sm:$0xf] %v717_v13 }
  0xce   : > { %720 = vst [vmem:[%s5607_s11 + $0x438] sm:$0xf] %v719_v14  ;;  %722 = vst [vmem:[%s5607_s11 + $0x43c] sm:$0xf] %v721_v15  ;;  %v723_v16 = vld [vmem:[%s5600_s10 + $0x880] sm:$0xf] }
  0xcf   : > { %v725_v17 = vld [vmem:[%s5600_s10 + $0x888] sm:$0xf]  ;;  %v727_v18 = vld [vmem:[%s5600_s10 + $0x890] sm:$0xf]  ;;  %724 = vst [vmem:[%s5607_s11 + $0x440] sm:$0xf] %v723_v16 }
  0xd0   : > { %726 = vst [vmem:[%s5607_s11 + $0x444] sm:$0xf] %v725_v17  ;;  %728 = vst [vmem:[%s5607_s11 + $0x448] sm:$0xf] %v727_v18  ;;  %v729_v19 = vld [vmem:[%s5600_s10 + $0x898] sm:$0xf] }
  0xd1   : > { %v731_v20 = vld [vmem:[%s5600_s10 + $0x8a0] sm:$0xf]  ;;  %v733_v21 = vld [vmem:[%s5600_s10 + $0x8a8] sm:$0xf]  ;;  %730 = vst [vmem:[%s5607_s11 + $0x44c] sm:$0xf] %v729_v19 }
  0xd2   : > { %732 = vst [vmem:[%s5607_s11 + $0x450] sm:$0xf] %v731_v20  ;;  %734 = vst [vmem:[%s5607_s11 + $0x454] sm:$0xf] %v733_v21  ;;  %v735_v22 = vld [vmem:[%s5600_s10 + $0x8b0] sm:$0xf] }
  0xd3   : > { %v737_v23 = vld [vmem:[%s5600_s10 + $0x8b8] sm:$0xf]  ;;  %v739_v24 = vld [vmem:[%s5600_s10 + $0x8c0] sm:$0xf]  ;;  %736 = vst [vmem:[%s5607_s11 + $0x458] sm:$0xf] %v735_v22 }
  0xd4   : > { %738 = vst [vmem:[%s5607_s11 + $0x45c] sm:$0xf] %v737_v23  ;;  %740 = vst [vmem:[%s5607_s11 + $0x460] sm:$0xf] %v739_v24  ;;  %v741_v25 = vld [vmem:[%s5600_s10 + $0x8c8] sm:$0xf] }
  0xd5   : > { %v743_v26 = vld [vmem:[%s5600_s10 + $0x8d0] sm:$0xf]  ;;  %v745_v27 = vld [vmem:[%s5600_s10 + $0x8d8] sm:$0xf]  ;;  %742 = vst [vmem:[%s5607_s11 + $0x464] sm:$0xf] %v741_v25 }
  0xd6   : > { %744 = vst [vmem:[%s5607_s11 + $0x468] sm:$0xf] %v743_v26  ;;  %746 = vst [vmem:[%s5607_s11 + $0x46c] sm:$0xf] %v745_v27  ;;  %v747_v28 = vld [vmem:[%s5600_s10 + $0x8e0] sm:$0xf] }
  0xd7   : > { %v749_v29 = vld [vmem:[%s5600_s10 + $0x8e8] sm:$0xf]  ;;  %v751_v30 = vld [vmem:[%s5600_s10 + $0x8f0] sm:$0xf]  ;;  %748 = vst [vmem:[%s5607_s11 + $0x470] sm:$0xf] %v747_v28 }
  0xd8   : > { %750 = vst [vmem:[%s5607_s11 + $0x474] sm:$0xf] %v749_v29  ;;  %752 = vst [vmem:[%s5607_s11 + $0x478] sm:$0xf] %v751_v30  ;;  %v753_v31 = vld [vmem:[%s5600_s10 + $0x8f8] sm:$0xf] }
  0xd9   : > { %754 = vst [vmem:[%s5607_s11 + $0x47c] sm:$0xf] %v753_v31 }
  0xda PF: > { %p4197_p11 = scmp.ge.s32.totalorder %s5498_s20, 1  ;;  %p1359_p12 = scmp.lt.s32.totalorder %s5498_s20, 5 }
  0xdc   : > { %p1360_p13 = pnand %p4197_p11, %p1359_p12 }
  0xde   : > { %1363 = sbr.rel (%p1360_p13) target bundleno = 621 (0x26d), region = 69 }
  0xe3   : > { %s1366_s21 = sand.u32 1, %s5474_s14   ;;  %p1396_p0 = scmp.lt.s32.totalorder %s5486_s17, 1  ;;  %vm1905_vm0 = vsmask.f32 3328  ;;  %vm1906_vm1 = vsmask.f32 7440 }
  0xe4   : > { %s5150_s24 = smul.u32 1152, %s1366_s21  ;;  %vm6290_vm2 = vmor %vm1905_vm0, %vm1906_vm1  ;;  %p1401_p1 = scmp.lt.s32.totalorder %s5482_s16, 1 }
  0xe5   : > { %s1397_s14 = scalar_select %p1396_p0, %s5486_s17, 1 }
  0xe6   : > { %s6183_s25 = scalar_lea.vmem [#allocation2], %s5150_s24  ;;  %s1393_s10 = sand.u32 1, %s5466_s12  }
  0xe7   : > { %v5224_v32 = vld [vmem:[%s6183_s25 + $0xf8] sm:$0xff]   ;;  %v5228_v36 = vld [vmem:[%s6183_s25 + $0xf0] sm:$0xff]   ;;  %v5232_v40 = vld [vmem:[%s6183_s25 + $0xe8] sm:$0xff]   ;;  %s5151_s26 = smul.u32 576, %s1397_s14  ;;  %s4198_s12 = sshll.u32 %s1393_s10, 5 }
  0xe8   : > { %v5225_v33 = vld [vmem:[%s6183_s25 + $0x78] sm:$0xff]   ;;  %4773 = vmatprep.subr.bf16.mxu0 %v5224_v32  ;;  %v5229_v37 = vld [vmem:[%s6183_s25 + $0x70] sm:$0xff]   ;;  %v5233_v41 = vld [vmem:[%s6183_s25 + $0x68] sm:$0xff]   ;;  %s6675_s6 = scalar_select %p1401_p1, %s5482_s16, 1 }
  0xe9   : > { %v5226_v34 = vld [vmem:[%s6183_s25 + $0xb8] sm:$0xff]   ;;  %4813 = vmatprep.subr.bf16.mxu1 %v5225_v33  ;;  %v5230_v38 = vld [vmem:[%s6183_s25 + $0xb0] sm:$0xff]   ;;  %v5234_v42 = vld [vmem:[%s6183_s25 + $0xa8] sm:$0xff]   ;;  %s6221_s5 = scalar_lea.vmem %s6780_s0, %s5151_s26  ;;  %s6728_s11 = scalar_lea.vmem [#allocation3], %s4198_s12 }
  0xea   : > { %v5227_v35 = vld [vmem:[%s6183_s25 + $0x38] sm:$0xff]   ;;  %4774 = vmatpush3.bf16.msra.mxu0 %v5226_v34  ;;  %v5231_v39 = vld [vmem:[%s6183_s25 + $0x30] sm:$0xff]   ;;  %v5235_v43 = vld [vmem:[%s6183_s25 + $0x28] sm:$0xff]   ;;  %s1403_s9 = scalar_lea.vmem %s6782_s2, %s6675_s6  ;;  %s4746_s21 = sshll.u32 (%p5587_p9), %s5486_s17, 4 }
  0xeb   : > { %4814 = vmatpush3.bf16.msra.mxu1 %v5227_v35  ;;  %4775 = vmatprep.subr.bf16.mxu0 %v5228_v36  ;;  %v5236_v44 = vld [vmem:[%s6183_s25 + $0xe0] sm:$0xff]   ;;  %v5240_v48 = vld [vmem:[%s6183_s25 + $0xd8] sm:$0xff]   ;;  %v5244_v52 = vld [vmem:[%s6183_s25 + $0xd0] sm:$0xff]   ;;  %s4029_s24 = sadd.s32 (%p5587_p9), %s5482_s16, %s4746_s21 }
  0xec   : > { %4815 = vmatprep.subr.bf16.mxu1 %v5229_v37  ;;  %v5237_v45 = vld [vmem:[%s6183_s25 + $0x60] sm:$0xff]   ;;  %v5241_v49 = vld [vmem:[%s6183_s25 + $0x58] sm:$0xff]   ;;  %v5245_v53 = vld [vmem:[%s6183_s25 + $0x50] sm:$0xff]  }
  0xed   : > { %v5238_v46 = vld [vmem:[%s6183_s25 + $0xa0] sm:$0xff]   ;;  %v5242_v50 = vld [vmem:[%s6183_s25 + $0x98] sm:$0xff]   ;;  %v5246_v54 = vld [vmem:[%s6183_s25 + $0x90] sm:$0xff]  }
  0xee   : > { %4776 = vmatpush3.bf16.msra.mxu0 %v5230_v38  ;;  %v5239_v47 = vld [vmem:[%s6183_s25 + $0x20] sm:$0xff]   ;;  %v5243_v51 = vld [vmem:[%s6183_s25 + $0x18] sm:$0xff]   ;;  %v5247_v55 = vld [vmem:[%s6183_s25 + $0x10] sm:$0xff]  }
  0xef   : > { %4816 = vmatpush3.bf16.msra.mxu1 %v5231_v39  ;;  %4777 = vmatprep.subr.bf16.mxu0 %v5232_v40  ;;  %v5248_v56 = vld [vmem:[%s6183_s25 + $0xc8] sm:$0xff]   ;;  %v5252_v60 = vld [vmem:[%s6183_s25 + $0xc0] sm:$0xff]   ;;  %v1406_v3 = vld [vmem:[%s6221_s5 + $0x10] sm:$0xff] }
  0xf0   : > { %4817 = vmatprep.subr.bf16.mxu1 %v5233_v41  ;;  %v5249_v57 = vld [vmem:[%s6183_s25 + $0x48] sm:$0xff]   ;;  %v5253_v61 = vld [vmem:[%s6183_s25 + $0x40] sm:$0xff]   ;;  %v5261_v6 = vld [vmem:[%s6183_s25 + $0x178] sm:$0xff]   ;;  %v1923_v26 = vshrl.u32 %v1406_v3, 16  ;;  %v1926_v28 = vshll.u32 %v1406_v3, 16 }
  0xf1   : > { %v5250_v58 = vld [vmem:[%s6183_s25 + $0x88] sm:$0xff]   ;;  %v5254_v62 = vld [vmem:[%s6183_s25 + $0x80] sm:$0xff]   ;;  %v5262_v7 = vld [vmem:[%s6183_s25 + $0x1f8] sm:$0xff]  }
  0xf2   : > { %4778 = vmatpush3.bf16.msra.mxu0 %v5234_v42  ;;  %v5251_v59 = vld [vmem:[%s6183_s25 + $0x8] sm:$0xff]   ;;  %v5255_v63 = vld [vmem:[%s6183_s25] sm:$0xff]   ;;  %v5263_v8 = vld [vmem:[%s6183_s25 + $0x138] sm:$0xff]   ;;  %v1925_v38 = vrot.slane %v1923_v26, 4  ;;  %v1928_v40 = vrot.slane %v1926_v28, 5 }
  0xf3   : > { %4818 = vmatpush3.bf16.msra.mxu1 %v5235_v43  ;;  %4779 = vmatprep.subr.bf16.mxu0 %v5236_v44  ;;  %v5256_v0 = vld [vmem:[%s6221_s5 + $0x90] ss:$16 sps:$4 sm:$0xff]   ;;  %v5258_v1 = vld [vmem:[%s6221_s5 + $0x94] ss:$16 sps:$4 sm:$0xff]   ;;  %v5264_v9 = vld [vmem:[%s6183_s25 + $0x1b8] sm:$0xff]  }
  0xf4   : > { %4819 = vmatprep.subr.bf16.mxu1 %v5237_v45  ;;  %v1405_v2 = vld [vmem:[%s6221_s5] sm:$0xff]  ;;  %1655 = vmatprep.mubr.bf16.mxu0 %v5258_v1  ;;  %v5265_v10 = vld [vmem:[%s6183_s25 + $0x170] sm:$0xff]   ;;  %v5274_v23 = vld [vmem:[%s6183_s25 + $0x168] sm:$0xff]  }
  0xf5   : > { %v4264_v4 = vcombine.low %v1405_v2, %v1406_v3  ;;  %v4265_v5 = vcombine.high %v1405_v2, %v1406_v3  ;;  %v5266_v11 = vld [vmem:[%s6183_s25 + $0x1f0] sm:$0xff]   ;;  %v1909_v12 = vshrl.u32 %v1405_v2, 16  ;;  %v1912_v14 = vshll.u32 %v1405_v2, 16  ;;  %v1407_v17 = vld [vmem:[%s6221_s5 + $0x20] sm:$0xff]  ;;  %v5275_v25 = vld [vmem:[%s6183_s25 + $0x1e8] sm:$0xff]  }
  0xf6   : > { %4780 = vmatpush3.bf16.msra.mxu0 %v5238_v46  ;;  %v5267_v13 = vld [vmem:[%s6183_s25 + $0x130] sm:$0xff]   ;;  %v5276_v27 = vld [vmem:[%s6183_s25 + $0x128] sm:$0xff]   ;;  %v1937_v30 = vshrl.u32 %v1407_v17, 16  ;;  %v5278_v31 = vld [vmem:[%s6183_s25 + $0x160] sm:$0xff]   ;;  %v1940_v32 = vshll.u32 %v1407_v17, 16 }
  0xf7   : > { %4820 = vmatpush3.bf16.msra.mxu1 %v5239_v47  ;;  %4781 = vmatprep.subr.bf16.mxu0 %v5240_v48  ;;  %v5268_v15 = vld [vmem:[%s6183_s25 + $0x1b0] sm:$0xff]   ;;  %v6240_v20 = vrot.slane %v1909_v12, 4  ;;  %v1914_v24 = vrot.slane %v1912_v14, 5  ;;  %v5277_v29 = vld [vmem:[%s6183_s25 + $0x1a8] sm:$0xff]   ;;  %v5279_v33 = vld [vmem:[%s6183_s25 + $0x1e0] sm:$0xff]  }
  0xf8   : > { %4821 = vmatprep.subr.bf16.mxu1 %v5241_v49  ;;  %1856 = vmatprep.mubr.bf16.mxu1 %v4265_v5  ;;  %v5269_v16 = vld [vmem:[%s6221_s5 + $0xb4] ss:$16 sps:$4 sm:$0xff]   ;;  %v5272_v19 = vld [vmem:[%s6221_s5 + $0xb0] ss:$16 sps:$4 sm:$0xff]   ;;  %v1939_v41 = vrot.slane %v1937_v30, 4  ;;  %v1942_v45 = vrot.slane %v1940_v32, 5 }
  0xf9   : > { %v1408_v18 = vld [vmem:[%s6221_s5 + $0x30] sm:$0xff]  ;;  %v5280_v35 = vld [vmem:[%s6183_s25 + $0x120] sm:$0xff]   ;;  %v5287_v49 = vld [vmem:[%s6183_s25 + $0x158] sm:$0xff]  }
  0xfa   : > { %4782 = vmatpush3.bf16.msra.mxu0 %v5242_v50  ;;  %v4267_v21 = vcombine.high %v1407_v17, %v1408_v18  ;;  %v4266_v22 = vcombine.low %v1407_v17, %v1408_v18  ;;  %v1951_v34 = vshrl.u32 %v1408_v18, 16  ;;  %v1954_v36 = vshll.u32 %v1408_v18, 16  ;;  %v5281_v37 = vld [vmem:[%s6183_s25 + $0x1a0] sm:$0xff]   ;;  %v6253_v43 = vld [vmem:[%s6221_s5 + $0x50] sm:$0xff]  ;;  %v5300_v12 = vld [vmem:[%s6183_s25 + $0x148] sm:$0xff]  }
  0xfb   : > { %4822 = vmatpush3.bf16.msra.mxu1 %v5243_v51  ;;  %4783 = vmatprep.subr.bf16.mxu0 %v5244_v52  ;;  %v5282_v39 = vld [vmem:[%s6221_s5 + $0xd4] ss:$16 sps:$4 sm:$0xff]   ;;  %v5285_v44 = vld [vmem:[%s6221_s5 + $0xd0] ss:$16 sps:$4 sm:$0xff]   ;;  %v5288_v51 = vld [vmem:[%s6183_s25 + $0x1d8] sm:$0xff]  }
  0xfc   : > { %4823 = vmatprep.subr.bf16.mxu1 %v5245_v53  ;;  %v1409_v42 = vld [vmem:[%s6221_s5 + $0x40] sm:$0xff]  ;;  %v1953_v46 = vrot.slane %v1951_v34, 4  ;;  %v1956_v50 = vrot.slane %v1954_v36, 5  ;;  %v5289_v52 = vld [vmem:[%s6183_s25 + $0x118] sm:$0xff]   ;;  %v1915_v53 = vor.u32 %v1914_v24, %v6240_v20  ;;  %v5301_v14 = vld [vmem:[%s6183_s25 + $0x1c8] sm:$0xff]  }
  0xfd   : > { %v4269_v47 = vcombine.high %v1409_v42, %v6253_v43  ;;  %v4268_v48 = vcombine.low %v1409_v42, %v6253_v43  ;;  %v5295_v2 = vld [vmem:[%s6221_s5 + $0xf4] ss:$16 sps:$4 sm:$0xff]   ;;  %v1892_v30 = vld [vmem:[%s6221_s5 + $0x18] sm:$0x11] }
  0xfe   : > { %4784 = vmatpush3.bf16.msra.mxu0 %v5246_v54  ;;  %v5290_v54 = vld [vmem:[%s6183_s25 + $0x198] sm:$0xff]   ;;  %v1411_v5 = vld [vmem:[%s6221_s5 + $0x60] sm:$0xff]  ;;  %v1932_v34 = vshll.u32 %v1892_v30, 16 }
  0xff   : > { %4824 = vmatpush3.bf16.msra.mxu1 %v5247_v55  ;;  %4785 = vmatprep.subr.bf16.mxu0 %v5248_v56  ;;  %v1929_v55 = vor.u32 %v1928_v40, %v1925_v38  ;;  %v5291_v56 = vld [vmem:[%s6183_s25 + $0x150] sm:$0xff]   ;;  %v1993_v18 = vshrl.u32 %v1411_v5, 16  ;;  %v1996_v20 = vshll.u32 %v1411_v5, 16  ;;  %v5310_v36 = vld [vmem:[%s6183_s25 + $0x278] sm:$0xff]  }
 0x100   : > { %4825 = vmatprep.subr.bf16.mxu1 %v5249_v57  ;;  %v1943_v57 = vor.u32 %v1942_v45, %v1939_v41  ;;  %v1934_v41 = vrot.slane %v1932_v34, 5 }
 0x101   : > { %v6269_v1 = vrot.slane %v1929_v55, 4  ;;  %v1995_v26 = vrot.slane %v1993_v18, 4  ;;  %v1998_v28 = vrot.slane %v1996_v20, 5  ;;  %v5323_v18 = vld [vmem:[%s6183_s25 + $0x2a8] sm:$0xff]  }
 0x102   : > { %4786 = vmatpush3.bf16.msra.mxu0 %v5250_v58  ;;  %v1957_v58 = vor.u32 %v1956_v50, %v1953_v46  ;;  %v6272_v3 = vrot.slane %v1943_v57, 4  ;;  %v5316_v57 = vld [vmem:[%s6183_s25 + $0x230] sm:$0xff]  }
 0x103   : > { %4826 = vmatpush3.bf16.msra.mxu1 %v5251_v59  ;;  %4787 = vmatprep.subr.bf16.mxu0 %v5252_v60  ;;  %v1965_v59 = vshrl.u32 %v1409_v42, 16  ;;  %v5292_v60 = vld [vmem:[%s6183_s25 + $0x1d0] sm:$0xff]   ;;  %v1999_v55 = vor.u32 %v1998_v28, %v1995_v26  ;;  %v5327_v26 = vld [vmem:[%s6183_s25 + $0x2a0] sm:$0xff]  }
 0x104   : > { %4827 = vmatprep.subr.bf16.mxu1 %v5253_v61  ;;  %v1968_v61 = vshll.u32 %v1409_v42, 16  ;;  %v5311_v42 = vld [vmem:[%s6183_s25 + $0x2f8] sm:$0xff]  }
 0x106   : > { %4788 = vmatpush3.bf16.msra.mxu0 %v5254_v62  ;;  %v5293_v62 = vld [vmem:[%s6183_s25 + $0x110] sm:$0xff]  }
 0x107   : > { %4828 = vmatpush3.bf16.msra.mxu1 %v5255_v63  ;;  %4853 = vmatprep.subr.bf16.mxu0 %v5261_v6  ;;  %v6266_v63 = vrot.slane %v1915_v53, 4  ;;  %v6278_v6 = vld [vmem:[%s6221_s5 + $0x70] sm:$0xff] }
 0x108   : > { %4893 = vmatprep.subr.bf16.mxu1 %v5262_v7  ;;  %v5298_v7 = vld [vmem:[%s6221_s5 + $0xf0] ss:$16 sps:$4 sm:$0xff]   ;;  %v2007_v32 = vshrl.u32 %v6278_v6, 16 }
 0x109   : > { %1656 = vmatmul.mubr.bf16.vlgmr.msra.gmra.mxu0 %v5256_v0  ;;  %v5294_v0 = vld [vmem:[%s6183_s25 + $0x190] sm:$0xff]  }
 0x10a   : > { %1857 = vmatmul.mubr.bf16.vlgmr.msra.gmra.mxu1 %v4264_v4  ;;  %4854 = vmatpush3.bf16.msra.mxu0 %v5263_v8  ;;  %v6274_v4 = vrot.slane %v1957_v58, 4  ;;  %v1967_v8 = vrot.slane %v1965_v59, 4  ;;  %v2009_v53 = vrot.slane %v2007_v32, 4  ;;  %v5317_v59 = vld [vmem:[%s6183_s25 + $0x2b0] sm:$0xff]  }
 0x10b   : > { %4894 = vmatpush3.bf16.msra.mxu1 %v5264_v9  ;;  %4855 = vmatprep.subr.bf16.mxu0 %v5265_v10  ;;  %v1970_v9 = vrot.slane %v1968_v61, 5  ;;  %v4271_v10 = vcombine.high %v1411_v5, %v6278_v6  ;;  %v1896_v61 = vld [vmem:[%s6221_s5 + $0x38] sm:$0x11]  ;;  %v6375_v32 = vld [vmem:[%s6221_s5 + $0x170] sm:$0xff] }
 0x10c   : > { %4895 = vmatprep.subr.bf16.mxu1 %v5266_v11  ;;  %1663 = vmatprep.mubr.bf16.mxu0 %v5269_v16  ;;  %v4270_v11 = vcombine.low %v1411_v5, %v6278_v6  ;;  %v5302_v16 = vld [vmem:[%s6183_s25 + $0x108] sm:$0xff]  }
 0x10d   : > { %1864 = vmatprep.mubr.bf16.mxu1 %v4267_v21  ;;  %v5304_v21 = vld [vmem:[%s6183_s25 + $0x140] sm:$0xff]  }
 0x10e   : > { %4856 = vmatpush3.bf16.msra.mxu0 %v5267_v13  ;;  %v1979_v13 = vshrl.u32 %v6253_v43, 16 }
 0x10f   : > { %4896 = vmatpush3.bf16.msra.mxu1 %v5268_v15  ;;  %4857 = vmatprep.subr.bf16.mxu0 %v5274_v23  ;;  %v1982_v15 = vshll.u32 %v6253_v43, 16  ;;  %v5305_v23 = vld [vmem:[%s6183_s25 + $0x1c0] sm:$0xff]   ;;  %v2010_v43 = vshll.u32 %v6278_v6, 16 }
 0x110   : > { %4897 = vmatprep.subr.bf16.mxu1 %v5275_v25  ;;  %v5306_v25 = vld [vmem:[%s6183_s25 + $0x100] sm:$0xff]  }
 0x111   : > { %1664 = vmatmul.mubr.bf16.gmra.mxu0 %v5272_v19  ;;  %v5303_v19 = vld [vmem:[%s6183_s25 + $0x188] sm:$0xff]   ;;  %v1984_v24 = vrot.slane %v1982_v15, 5 }
 0x112   : > { %1865 = vmatmul.mubr.bf16.gmra.mxu1 %v4266_v22  ;;  %4858 = vmatpush3.bf16.msra.mxu0 %v5276_v27  ;;  %v1981_v22 = vrot.slane %v1979_v13, 4  ;;  %v5307_v27 = vld [vmem:[%s6183_s25 + $0x180] sm:$0xff]  }
 0x113   : > { %4898 = vmatpush3.bf16.msra.mxu1 %v5277_v29  ;;  %4859 = vmatprep.subr.bf16.mxu0 %v5278_v31  ;;  %v1890_v29 = vld [vmem:[%s6221_s5 + $0x8] sm:$0x11]  ;;  %v6302_v31 = vld [vmem:[%s6221_s5 + $0x120] sm:$0xff] }
 0x114   : > { %4899 = vmatprep.subr.bf16.mxu1 %v5279_v33  ;;  %1671 = vmatprep.mubr.bf16.mxu0 %v5282_v39  ;;  %v1918_v33 = vshll.u32 %v1890_v29, 16  ;;  %v1985_v45 = vor.u32 %v1984_v24, %v1981_v22  ;;  %v2776_v13 = vshll.u32 %v6302_v31, 16  ;;  %v5324_v22 = vld [vmem:[%s6183_s25 + $0x260] sm:$0xff]   ;;  %v1900_v29 = vld [vmem:[%s6221_s5 + $0x58] sm:$0x11] }
 0x115   : > { %1872 = vmatprep.mubr.bf16.mxu1 %v4269_v47  ;;  %v1935_v47 = vsel %vm6290_vm2, %v6269_v1, %v1934_v41  ;;  %v6335_v1 = vld [vmem:[%s6221_s5 + $0x140] sm:$0xff]  ;;  %v1988_v34 = vshll.u32 %v1900_v29, 16  ;;  %v5332_v41 = vld [vmem:[%s6183_s25 + $0x218] sm:$0xff]  }
 0x116   : > { %4860 = vmatpush3.bf16.msra.mxu0 %v5280_v35  ;;  %v6306_v35 = vld [vmem:[%s6221_s5 + $0x130] sm:$0xff]  ;;  %v1920_v40 = vrot.slane %v1918_v33, 5  ;;  %v6328_v58 = vrot.slane %v1985_v45, 4  ;;  %v6363_v24 = vrot.slane %v2776_v13, 5  ;;  %v2801_v33 = vshrl.u32 %v6335_v1, 16 }
 0x117   : > { %4900 = vmatpush3.bf16.msra.mxu1 %v5281_v37  ;;  %4861 = vmatprep.subr.bf16.mxu0 %v5287_v49  ;;  %v1971_v37 = vor.u32 %v1970_v9, %v1967_v8  ;;  %v4384_v38 = vcombine.low %v6302_v31, %v6306_v35  ;;  %v4385_v39 = vcombine.high %v6302_v31, %v6306_v35  ;;  %v6345_v8 = vrot.slane %v1999_v55, 4 }
 0x118   : > { %4901 = vmatprep.subr.bf16.mxu1 %v5288_v51  ;;  %v1921_v46 = vsel %vm6290_vm2, %v6266_v63, %v1920_v40  ;;  %v2790_v28 = vshll.u32 %v6306_v35, 16  ;;  %v1990_v40 = vrot.slane %v1988_v34, 5 }
 0x119   : > { %1672 = vmatmul.mubr.bf16.gmra.mxu0 %v5285_v44  ;;  %v5312_v44 = vld [vmem:[%s6183_s25 + $0x238] sm:$0xff]   ;;  %v6323_v49 = vrot.slane %v1971_v37, 4  ;;  %v4320_v50 = vcombine.low %v1921_v46, %v1935_v47  ;;  %v4321_v51 = vcombine.high %v1921_v46, %v1935_v47  ;;  %v5334_v46 = vld [vmem:[%s6183_s25 + $0x250] sm:$0xff]  }
 0x11a   : > { %1873 = vmatmul.mubr.bf16.gmra.mxu1 %v4268_v48  ;;  %4862 = vmatpush3.bf16.msra.mxu0 %v5289_v52  ;;  %v5313_v48 = vld [vmem:[%s6183_s25 + $0x2b8] sm:$0xff]   ;;  %v5314_v52 = vld [vmem:[%s6183_s25 + $0x270] sm:$0xff]   ;;  %v1991_v45 = vsel %vm6290_vm2, %v6328_v58, %v1990_v40  ;;  %v2792_v47 = vrot.slane %v2790_v28, 5  ;;  %v6403_v58 = vld [vmem:[%s6221_s5 + $0x180] sm:$0xff]  ;;  %v2843_v40 = vshrl.u32 %v6375_v32, 16 }
 0x11b   : > { %4902 = vmatpush3.bf16.msra.mxu1 %v5290_v54  ;;  %4863 = vmatprep.subr.bf16.mxu0 %v5291_v56  ;;  %v5315_v54 = vld [vmem:[%s6183_s25 + $0x2f0] sm:$0xff]   ;;  %v2012_v56 = vrot.slane %v2010_v43, 5  ;;  %v5330_v37 = vld [vmem:[%s6183_s25 + $0x258] sm:$0xff]  }
 0x11c   : > { %4903 = vmatprep.subr.bf16.mxu1 %v5292_v60  ;;  %1679 = vmatprep.mubr.bf16.mxu0 %v5295_v2  ;;  %v1894_v60 = vld [vmem:[%s6221_s5 + $0x28] sm:$0x11]  ;;  %v6338_v2 = vld [vmem:[%s6221_s5 + $0x150] sm:$0xff]  ;;  %v5333_v43 = vld [vmem:[%s6183_s25 + $0x298] sm:$0xff]  }
 0x11d   : > { %1880 = vmatprep.mubr.bf16.mxu1 %v4271_v10  ;;  %v1946_v63 = vshll.u32 %v1894_v60, 16  ;;  %v4387_v5 = vcombine.high %v6335_v1, %v6338_v2  ;;  %v4386_v6 = vcombine.low %v6335_v1, %v6338_v2  ;;  %v2013_v9 = vor.u32 %v2012_v56, %v2009_v53  ;;  %v1902_v56 = vld [vmem:[%s6221_s5 + $0x68] sm:$0x11] }
 0x11e   : > { %4864 = vmatpush3.bf16.msra.mxu0 %v5293_v62  ;;  %v2773_v62 = vshrl.u32 %v6302_v31, 16  ;;  %v6372_v31 = vld [vmem:[%s6221_s5 + $0x160] sm:$0xff]  ;;  %v2803_v53 = vrot.slane %v2801_v33, 4  ;;  %v2815_v55 = vshrl.u32 %v6338_v2, 16  ;;  %v2002_v60 = vshll.u32 %v1902_v56, 16 }
 0x11f   : > { %4904 = vmatpush3.bf16.msra.mxu1 %v5294_v0  ;;  %4865 = vmatprep.subr.bf16.mxu0 %v5300_v12  ;;  %v1960_v0 = vshll.u32 %v1896_v61, 16  ;;  %v1948_v10 = vrot.slane %v1946_v63, 5  ;;  %v5321_v12 = vld [vmem:[%s6183_s25 + $0x2e8] sm:$0xff]   ;;  %v2832_v29 = vshll.u32 %v6372_v31, 16  ;;  %v4475_v33 = vld [vmem:[%s6221_s5 + $0x138] sm:$0x11] }
 0x120   : > { %4905 = vmatprep.subr.bf16.mxu1 %v5301_v14  ;;  %v5322_v14 = vld [vmem:[%s6183_s25 + $0x228] sm:$0xff]   ;;  %v2857_v56 = vshrl.u32 %v6403_v58, 16 }
 0x121   : > { %1680 = vmatmul.mubr.bf16.gmra.mxu0 %v5298_v7  ;;  %v5320_v7 = vld [vmem:[%s6183_s25 + $0x268] sm:$0xff]   ;;  %v1949_v15 = vsel %vm6290_vm2, %v6272_v3, %v1948_v10  ;;  %v5325_v3 = vld [vmem:[%s6183_s25 + $0x2e0] sm:$0xff]  }
 0x122   : > { %1881 = vmatmul.mubr.bf16.gmra.mxu1 %v4270_v11  ;;  %4866 = vmatpush3.bf16.msra.mxu0 %v5302_v16  ;;  %v1962_v11 = vrot.slane %v1960_v0, 5  ;;  %v5340_v63 = vld [vmem:[%s6183_s25 + $0x248] sm:$0xff]  }
 0x123   : > { %4906 = vmatpush3.bf16.msra.mxu1 %v5303_v19  ;;  %4867 = vmatprep.subr.bf16.mxu0 %v5304_v21  ;;  %v6357_v19 = vrot.slane %v2773_v62, 4  ;;  %v6406_v62 = vld [vmem:[%s6221_s5 + $0x190] sm:$0xff] }
 0x124   : > { %4907 = vmatprep.subr.bf16.mxu1 %v5305_v23  ;;  %2464 = vmatprep.mubr.bf16.mxu1 %v4385_v39  ;;  %v1963_v16 = vsel %vm6290_vm2, %v6274_v4, %v1962_v11  ;;  %v6360_v23 = vrot.slane %v2013_v9, 4  ;;  %v5326_v4 = vld [vmem:[%s6183_s25 + $0x220] sm:$0xff]   ;;  %v5331_v39 = vld [vmem:[%s6183_s25 + $0x2d8] sm:$0xff]   ;;  %v4391_v0 = vcombine.high %v6403_v58, %v6406_v62  ;;  %v5342_v9 = vld [vmem:[%s6183_s25 + $0x208] sm:$0xff]  }
 0x125   : > { %2213 = vmatprep.mubr.bf16.mxu0 %v4321_v51  ;;  %v4323_v20 = vcombine.high %v1949_v15, %v1963_v16  ;;  %v4322_v21 = vcombine.low %v1949_v15, %v1963_v16  ;;  %v2804_v51 = vshll.u32 %v6335_v1, 16  ;;  %v4390_v1 = vcombine.low %v6403_v58, %v6406_v62 }
 0x126   : > { %4868 = vmatpush3.bf16.msra.mxu0 %v5306_v25  ;;  %v2787_v25 = vshrl.u32 %v6306_v35, 16  ;;  %v4388_v35 = vcombine.low %v6372_v31, %v6375_v32  ;;  %v2779_v10 = vor.u32 %v6363_v24, %v6357_v19  ;;  %v2817_v16 = vrot.slane %v2815_v55, 4  ;;  %v5344_v19 = vld [vmem:[%s6183_s25 + $0x240] sm:$0xff]  }
 0x127   : > { %4908 = vmatpush3.bf16.msra.mxu1 %v5307_v27  ;;  %4933 = vmatprep.subr.bf16.mxu0 %v5310_v36  ;;  %v1898_v27 = vld [vmem:[%s6221_s5 + $0x48] sm:$0x11]  ;;  %v4389_v36 = vcombine.high %v6372_v31, %v6375_v32  ;;  %v5347_v24 = vld [vmem:[%s6183_s25 + $0x280] sm:$0xff]   ;;  %v2846_v55 = vshll.u32 %v6375_v32, 16 }
 0x128   : > { %4973 = vmatprep.subr.bf16.mxu1 %v5311_v42  ;;  %v1974_v30 = vshll.u32 %v1898_v27, 16  ;;  %v4473_v27 = vld [vmem:[%s6221_s5 + $0x128] sm:$0x11] }
 0x129   : > { %2214 = vmatmul.mubr.bf16.vlgmr.msra.gmra.mxu0 %v4320_v50  ;;  %v2782_v34 = vshll.u32 %v4473_v27, 16 }
 0x12a   : > { %2465 = vmatmul.mubr.bf16.vlgmr.msra.gmra.mxu1 %v4384_v38  ;;  %4934 = vmatpush3.bf16.msra.mxu0 %v5312_v44  ;;  %v1976_v38 = vrot.slane %v1974_v30, 5  ;;  %v6389_v44 = vrot.slane %v2787_v25, 4  ;;  %v5348_v30 = vld [vmem:[%s6221_s5 + $0x1b0] ss:$16 sps:$4 sm:$0xff]  }
 0x12b   : > { %4974 = vmatpush3.bf16.msra.mxu1 %v5313_v48  ;;  %4935 = vmatprep.subr.bf16.mxu0 %v5314_v52  ;;  %v5336_v52 = vld [vmem:[%s6183_s25 + $0x210] sm:$0xff]  }
 0x12c   : > { %4975 = vmatprep.subr.bf16.mxu1 %v5315_v54  ;;  %2472 = vmatprep.mubr.bf16.mxu1 %v4387_v5  ;;  %v1977_v42 = vsel %vm6290_vm2, %v6323_v49, %v1976_v38  ;;  %v5335_v49 = vld [vmem:[%s6183_s25 + $0x2d0] sm:$0xff]   ;;  %v2004_v5 = vrot.slane %v2002_v60, 5  ;;  %v2793_v11 = vor.u32 %v2792_v47, %v6389_v44  ;;  %v4477_v60 = vld [vmem:[%s6221_s5 + $0x148] sm:$0x11] }
 0x12d   : > { %2221 = vmatprep.mubr.bf16.mxu0 %v4323_v20  ;;  %v4325_v48 = vcombine.high %v1977_v42, %v1991_v45  ;;  %v4324_v50 = vcombine.low %v1977_v42, %v1991_v45  ;;  %v5337_v54 = vld [vmem:[%s6183_s25 + $0x290] sm:$0xff]  }
 0x12e   : > { %4936 = vmatpush3.bf16.msra.mxu0 %v5316_v57  ;;  %v1904_v57 = vld [vmem:[%s6221_s5 + $0x78] sm:$0x11]  ;;  %v2794_v25 = vrot.slane %v2793_v11, 4  ;;  %v5355_v45 = vld [vmem:[%s6183_s25 + $0x370] sm:$0xff]  }
 0x12f   : > { %4976 = vmatpush3.bf16.msra.mxu1 %v5317_v59  ;;  %4937 = vmatprep.subr.bf16.mxu0 %v5320_v7  ;;  %v2806_v59 = vrot.slane %v2804_v51, 5  ;;  %v2016_v61 = vshll.u32 %v1904_v57, 16  ;;  %v5341_v7 = vld [vmem:[%s6183_s25 + $0x2c8] sm:$0xff]   ;;  %v5357_v51 = vld [vmem:[%s6183_s25 + $0x330] sm:$0xff]   ;;  %v2860_v57 = vshll.u32 %v6403_v58, 16 }
 0x130   : > { %4977 = vmatprep.subr.bf16.mxu1 %v5321_v12  ;;  %v2005_v12 = vsel %vm6290_vm2, %v6345_v8, %v2004_v5  ;;  %v5345_v8 = vld [vmem:[%s6183_s25 + $0x2c0] sm:$0xff]   ;;  %v5362_v5 = vld [vmem:[%s6183_s25 + $0x368] sm:$0xff]  }
 0x131   : > { %2222 = vmatmul.mubr.bf16.gmra.mxu0 %v4322_v21  ;;  %v2807_v15 = vor.u32 %v2806_v59, %v2803_v53  ;;  %v2818_v21 = vshll.u32 %v6338_v2, 16  ;;  %v5358_v53 = vld [vmem:[%s6183_s25 + $0x3b0] sm:$0xff]   ;;  %v5363_v58 = vld [vmem:[%s6183_s25 + $0x3e8] sm:$0xff]  }
 0x132   : > { %2473 = vmatmul.mubr.bf16.gmra.mxu1 %v4386_v6  ;;  %4938 = vmatpush3.bf16.msra.mxu0 %v5322_v14  ;;  %v2018_v6 = vrot.slane %v2016_v61, 5  ;;  %v5343_v14 = vld [vmem:[%s6183_s25 + $0x288] sm:$0xff]   ;;  %v5359_v59 = vld [vmem:[%s6221_s5 + $0x1d4] ss:$16 sps:$4 sm:$0xff]   ;;  %v4479_v61 = vld [vmem:[%s6221_s5 + $0x158] sm:$0x11] }
 0x133   : > { %4978 = vmatpush3.bf16.msra.mxu1 %v5323_v18  ;;  %4939 = vmatprep.subr.bf16.mxu0 %v5324_v22  ;;  %v2829_v22 = vshrl.u32 %v6372_v31, 16  ;;  %v2808_v2 = vrot.slane %v2807_v15, 4 }
 0x134   : > { %4979 = vmatprep.subr.bf16.mxu1 %v5325_v3  ;;  %2480 = vmatprep.mubr.bf16.mxu1 %v4389_v36  ;;  %v2019_v13 = vsel %vm6290_vm2, %v6360_v23, %v2018_v6  ;;  %v5346_v23 = vld [vmem:[%s6183_s25 + $0x200] sm:$0xff]   ;;  %v2820_v3 = vrot.slane %v2818_v21, 5  ;;  %v5351_v36 = vld [vmem:[%s6183_s25 + $0x378] sm:$0xff]   ;;  %v2862_v21 = vrot.slane %v2860_v57, 5  ;;  %v5385_v57 = vld [vmem:[%s6183_s25 + $0x3c8] sm:$0xff]  }
 0x135   : > { %2229 = vmatprep.mubr.bf16.mxu0 %v4325_v48  ;;  %v4327_v18 = vcombine.high %v2005_v12, %v2019_v13  ;;  %v4326_v20 = vcombine.low %v2005_v12, %v2019_v13  ;;  %v2831_v28 = vrot.slane %v2829_v22, 4  ;;  %v5365_v12 = vld [vmem:[%s6183_s25 + $0x3a8] sm:$0xff]   ;;  %v2848_v13 = vrot.slane %v2846_v55, 5 }
 0x136   : > { %4940 = vmatpush3.bf16.msra.mxu0 %v5326_v4  ;;  %v2780_v4 = vrot.slane %v2779_v10, 4  ;;  %v2821_v38 = vor.u32 %v2820_v3, %v2817_v16  ;;  %v5366_v16 = vld [vmem:[%s6183_s25 + $0x360] sm:$0xff]   ;;  %v2871_v22 = vshrl.u32 %v6406_v62, 16  ;;  %v5384_v55 = vld [vmem:[%s6183_s25 + $0x348] sm:$0xff]  }
 0x137   : > { %4980 = vmatpush3.bf16.msra.mxu1 %v5327_v26  ;;  %4941 = vmatprep.subr.bf16.mxu0 %v5330_v37  ;;  %v5350_v26 = vld [vmem:[%s6221_s5 + $0x1b4] ss:$16 sps:$4 sm:$0xff]   ;;  %v5352_v37 = vld [vmem:[%s6183_s25 + $0x3f8] sm:$0xff]  }
 0x138   : > { %4981 = vmatprep.subr.bf16.mxu1 %v5331_v39  ;;  %v2784_v39 = vrot.slane %v2782_v34, 5 }
 0x139   : > { %2230 = vmatmul.mubr.bf16.gmra.mxu0 %v4324_v50  ;;  %v5356_v50 = vld [vmem:[%s6183_s25 + $0x3f0] sm:$0xff]  }
 0x13a   : > { %2481 = vmatmul.mubr.bf16.gmra.mxu1 %v4388_v35  ;;  %4942 = vmatpush3.bf16.msra.mxu0 %v5332_v41  ;;  %v2796_v35 = vshll.u32 %v4475_v33, 16  ;;  %v5353_v41 = vld [vmem:[%s6183_s25 + $0x338] sm:$0xff]   ;;  %v2785_v42 = vsel %vm6290_vm2, %v2780_v4, %v2784_v39  ;;  %v5370_v4 = vld [vmem:[%s6221_s5 + $0x1f4] ss:$16 sps:$4 sm:$0xff]  }
 0x13b   : > { %4982 = vmatpush3.bf16.msra.mxu1 %v5333_v43  ;;  %4943 = vmatprep.subr.bf16.mxu0 %v5334_v46  ;;  %v5354_v43 = vld [vmem:[%s6183_s25 + $0x3b8] sm:$0xff]   ;;  %v2822_v46 = vrot.slane %v2821_v38, 4  ;;  %v5377_v39 = vld [vmem:[%s6183_s25 + $0x350] sm:$0xff]  }
 0x13c   : > { %4983 = vmatprep.subr.bf16.mxu1 %v5335_v49  ;;  %2488 = vmatprep.mubr.bf16.mxu1 %v4391_v0  ;;  %v2798_v31 = vrot.slane %v2796_v35, 5  ;;  %v2834_v49 = vrot.slane %v2832_v29, 5  ;;  %v2824_v0 = vshll.u32 %v4479_v61, 16  ;;  %v5373_v29 = vld [vmem:[%s6183_s25 + $0x358] sm:$0xff]  }
 0x13d   : > { %2237 = vmatprep.mubr.bf16.mxu0 %v4327_v18  ;;  %v2859_v18 = vrot.slane %v2857_v56, 4  ;;  %v5374_v33 = vld [vmem:[%s6183_s25 + $0x3d8] sm:$0xff]  }
 0x13e   : > { %4944 = vmatpush3.bf16.msra.mxu0 %v5336_v52  ;;  %v2799_v44 = vsel %vm6290_vm2, %v2794_v25, %v2798_v31  ;;  %v2845_v52 = vrot.slane %v2843_v40, 4  ;;  %v4481_v25 = vld [vmem:[%s6221_s5 + $0x168] sm:$0x11]  ;;  %v5376_v35 = vld [vmem:[%s6183_s25 + $0x398] sm:$0xff]  }
 0x13f   : > { %4984 = vmatpush3.bf16.msra.mxu1 %v5337_v54  ;;  %4945 = vmatprep.subr.bf16.mxu0 %v5340_v63  ;;  %v4520_v47 = vcombine.low %v2785_v42, %v2799_v44  ;;  %v4521_v48 = vcombine.high %v2785_v42, %v2799_v44  ;;  %v2835_v54 = vor.u32 %v2834_v49, %v2831_v28  ;;  %v2810_v63 = vshll.u32 %v4477_v60, 16  ;;  %v5372_v28 = vld [vmem:[%s6221_s5 + $0x1f0] ss:$16 sps:$4 sm:$0xff]   ;;  %v4487_v49 = vld [vmem:[%s6221_s5 + $0x198] sm:$0x11]  ;;  %v5386_v60 = vld [vmem:[%s6183_s25 + $0x308] sm:$0xff]  }
 0x140   : > { %4985 = vmatprep.subr.bf16.mxu1 %v5341_v7  ;;  %v2826_v7 = vrot.slane %v2824_v0, 5  ;;  %v2838_v27 = vshll.u32 %v4481_v25, 16  ;;  %v2863_v40 = vor.u32 %v2862_v21, %v2859_v18  ;;  %v5378_v42 = vld [vmem:[%s6183_s25 + $0x3d0] sm:$0xff]  }
 0x141   : > { %2238 = vmatmul.mubr.bf16.gmra.mxu0 %v4326_v20  ;;  %v2836_v6 = vrot.slane %v2835_v54, 4  ;;  %v2812_v32 = vrot.slane %v2810_v63, 5  ;;  %v5367_v20 = vld [vmem:[%s6183_s25 + $0x3e0] sm:$0xff]   ;;  %v5379_v44 = vld [vmem:[%s6183_s25 + $0x310] sm:$0xff]   ;;  %v2880_v54 = vshll.u32 %v4487_v49, 16  ;;  %v5387_v63 = vld [vmem:[%s6183_s25 + $0x388] sm:$0xff]  }
 0x142   : > { %2489 = vmatmul.mubr.bf16.gmra.mxu1 %v4390_v1  ;;  %4946 = vmatpush3.bf16.msra.mxu0 %v5342_v9  ;;  %v5361_v1 = vld [vmem:[%s6221_s5 + $0x1d0] ss:$16 sps:$4 sm:$0xff]   ;;  %v5364_v9 = vld [vmem:[%s6183_s25 + $0x328] sm:$0xff]   ;;  %v2827_v11 = vsel %vm6290_vm2, %v2822_v46, %v2826_v7  ;;  %v2840_v34 = vrot.slane %v2838_v27, 5 }
 0x143   : > { %4986 = vmatpush3.bf16.msra.mxu1 %v5343_v14  ;;  %4947 = vmatprep.subr.bf16.mxu0 %v5344_v19  ;;  %v2813_v10 = vsel %vm6290_vm2, %v2808_v2, %v2812_v32  ;;  %v2849_v19 = vor.u32 %v2848_v13, %v2845_v52  ;;  %v2873_v2 = vrot.slane %v2871_v22, 4  ;;  %v5389_v32 = vld [vmem:[%s6183_s25 + $0x3c0] sm:$0xff]   ;;  %v5407_v27 = vld [vmem:[%s6183_s25 + $0x428] sm:$0xff]   ;;  %v5417_v49 = vld [vmem:[%s6183_s25 + $0x450] sm:$0xff]  }
 0x144   : > { %4987 = vmatprep.subr.bf16.mxu1 %v5345_v8  ;;  %2715 = vmatprep.mubr.bf16.mxu0 %v5350_v26  ;;  %v4523_v14 = vcombine.high %v2813_v10, %v2827_v11  ;;  %v4522_v15 = vcombine.low %v2813_v10, %v2827_v11  ;;  %v5368_v8 = vld [vmem:[%s6183_s25 + $0x320] sm:$0xff]   ;;  %v4483_v26 = vld [vmem:[%s6221_s5 + $0x178] sm:$0x11] }
 0x145   : > { %3077 = vmatprep.mubr.bf16.mxu1 %v4521_v48  ;;  %v2850_v3 = vrot.slane %v2849_v19, 4  ;;  %v4485_v48 = vld [vmem:[%s6221_s5 + $0x188] sm:$0x11]  ;;  %v5390_v7 = vld [vmem:[%s6183_s25 + $0x300] sm:$0xff]   ;;  %v5400_v19 = vld [vmem:[%s6183_s25 + $0x430] sm:$0xff]  }
 0x146   : > { %4948 = vmatpush3.bf16.msra.mxu0 %v5346_v23  ;;  %v5369_v23 = vld [vmem:[%s6183_s25 + $0x3a0] sm:$0xff]  }
 0x147   : > { %4988 = vmatpush3.bf16.msra.mxu1 %v5347_v24  ;;  %5013 = vmatprep.subr.bf16.mxu0 %v5351_v36  ;;  %v2874_v24 = vshll.u32 %v6406_v62, 16  ;;  %v5375_v62 = vld [vmem:[%s6183_s25 + $0x318] sm:$0xff]   ;;  %v4545_v10 = vld [vmem:[%s6221_s5 + $0x20] sm:$0xff] }
 0x148   : > { %5053 = vmatprep.subr.bf16.mxu1 %v5352_v37  ;;  %v2841_v37 = vsel %vm6290_vm2, %v2836_v6, %v2840_v34  ;;  %v5396_v13 = vld [vmem:[%s6221_s5 + $0xa4] ss:$16 sps:$4 sm:$0xff]  }
 0x149   : > { %2716 = vmatmul.mubr.bf16.vlgmr.msra.gmra.mxu0 %v5348_v30  ;;  %v2852_v30 = vshll.u32 %v4483_v26, 16  ;;  %v6512_v22 = vld [vmem:[%s6221_s5 + $0x40] sm:$0xff]  ;;  %v3654_v26 = vshll.u32 %v4545_v10, 16  ;;  %v4548_v34 = vld [vmem:[%s6221_s5 + $0x50] sm:$0xff] }
 0x14a   : > { %5014 = vmatpush3.bf16.msra.mxu0 %v5353_v41  ;;  %3078 = vmatmul.mubr.bf16.vlgmr.msra.gmra.mxu1 %v4520_v47  ;;  %v5381_v47 = vld [vmem:[%s6221_s5 + $0x214] ss:$16 sps:$4 sm:$0xff]  }
 0x14b   : > { %5015 = vmatprep.subr.bf16.mxu0 %v5355_v45  ;;  %5054 = vmatpush3.bf16.msra.mxu1 %v5354_v43  ;;  %v2854_v36 = vrot.slane %v2852_v30, 5  ;;  %v2876_v43 = vrot.slane %v2874_v24, 5  ;;  %v5380_v45 = vld [vmem:[%s6183_s25 + $0x390] sm:$0xff]  }
 0x14c   : > { %5055 = vmatprep.subr.bf16.mxu1 %v5356_v50  ;;  %2723 = vmatprep.mubr.bf16.mxu0 %v5359_v59  ;;  %v2864_v50 = vrot.slane %v2863_v40, 4  ;;  %v2882_v59 = vrot.slane %v2880_v54, 5 }
 0x14d   : > { %3085 = vmatprep.mubr.bf16.mxu1 %v4523_v14  ;;  %v2855_v38 = vsel %vm6290_vm2, %v2850_v3, %v2854_v36  ;;  %v2877_v46 = vor.u32 %v2876_v43, %v2873_v2  ;;  %v5394_v14 = vld [vmem:[%s6221_s5 + $0xa0] ss:$16 sps:$4 sm:$0xff]   ;;  %v5402_v3 = vld [vmem:[%s6221_s5 + $0xc4] ss:$16 sps:$4 sm:$0xff]   ;;  %v5406_v2 = vld [vmem:[%s6183_s25 + $0x468] sm:$0xff]  }
 0x14e   : > { %5016 = vmatpush3.bf16.msra.mxu0 %v5357_v51  ;;  %v4525_v31 = vcombine.high %v2841_v37, %v2855_v38  ;;  %v4524_v41 = vcombine.low %v2841_v37, %v2855_v38  ;;  %v2866_v51 = vshll.u32 %v4485_v48, 16  ;;  %v5409_v37 = vld [vmem:[%s6183_s25 + $0x420] sm:$0xff]   ;;  %v5415_v43 = vld [vmem:[%s6183_s25 + $0x458] sm:$0xff]  }
 0x14f   : > { %5017 = vmatprep.subr.bf16.mxu0 %v5362_v5  ;;  %5056 = vmatpush3.bf16.msra.mxu1 %v5358_v53  ;;  %v2878_v52 = vrot.slane %v2877_v46, 4  ;;  %v5383_v53 = vld [vmem:[%s6221_s5 + $0x210] ss:$16 sps:$4 sm:$0xff]  }
 0x150   : > { %5057 = vmatprep.subr.bf16.mxu1 %v5363_v58  ;;  %v2868_v56 = vrot.slane %v2866_v51, 5  ;;  %v5391_v58 = vld [vmem:[%s6183_s25 + $0x380] sm:$0xff]  }
 0x151   : > { %2724 = vmatmul.mubr.bf16.gmra.mxu0 %v5361_v1  ;;  %v2883_v0 = vsel %vm6290_vm2, %v2878_v52, %v2882_v59  ;;  %v5388_v1 = vld [vmem:[%s6183_s25 + $0x340] sm:$0xff]   ;;  %v6530_v52 = vld [vmem:[%s6221_s5 + $0x70] sm:$0xff] }
 0x152   : > { %5018 = vmatpush3.bf16.msra.mxu0 %v5364_v9  ;;  %3086 = vmatmul.mubr.bf16.gmra.mxu1 %v4522_v15  ;;  %v2869_v61 = vsel %vm6290_vm2, %v2864_v50, %v2868_v56  ;;  %v4544_v9 = vld [vmem:[%s6221_s5 + $0x10] sm:$0xff]  ;;  %v5397_v15 = vld [vmem:[%s6183_s25 + $0x478] sm:$0xff]  }
 0x153   : > { %5019 = vmatprep.subr.bf16.mxu0 %v5366_v16  ;;  %5058 = vmatpush3.bf16.msra.mxu1 %v5365_v12  ;;  %v4527_v5 = vcombine.high %v2869_v61, %v2883_v0  ;;  %v4526_v6 = vcombine.low %v2869_v61, %v2883_v0  ;;  %v4584_v11 = vcombine.low %v4544_v9, %v4545_v10  ;;  %v5398_v16 = vld [vmem:[%s6183_s25 + $0x438] sm:$0xff]   ;;  %v3637_v18 = vshrl.u32 %v4544_v9, 16  ;;  %v5420_v0 = vld [vmem:[%s6221_s5 + $0x104] ss:$16 sps:$4 sm:$0xff]  }
 0x154   : > { %5059 = vmatprep.subr.bf16.mxu1 %v5367_v20  ;;  %2731 = vmatprep.mubr.bf16.mxu0 %v5370_v4  ;;  %v4585_v12 = vcombine.high %v4544_v9, %v4545_v10  ;;  %v5399_v20 = vld [vmem:[%s6183_s25 + $0x470] sm:$0xff]   ;;  %v3640_v21 = vshll.u32 %v4544_v9, 16  ;;  %v3651_v4 = vshrl.u32 %v4545_v10, 16  ;;  %v5425_v10 = vld [vmem:[%s6183_s25 + $0x408] sm:$0xff]  }
 0x155   : > { %3093 = vmatprep.mubr.bf16.mxu1 %v4525_v31  ;;  %v3639_v24 = vrot.slane %v3637_v18, 4  ;;  %v4681_v18 = vld [vmem:[%s6221_s5 + $0x58] sm:$0x11] }
 0x156   : > { %5020 = vmatpush3.bf16.msra.mxu0 %v5368_v8  ;;  %v4546_v8 = vld [vmem:[%s6221_s5 + $0x30] sm:$0xff]  ;;  %v3653_v36 = vrot.slane %v3651_v4, 4  ;;  %v4677_v4 = vld [vmem:[%s6221_s5 + $0x38] sm:$0x11] }
 0x157   : > { %5021 = vmatprep.subr.bf16.mxu0 %v5373_v29  ;;  %5060 = vmatpush3.bf16.msra.mxu1 %v5369_v23  ;;  %v4587_v23 = vcombine.high %v4546_v8, %v6512_v22  ;;  %v4586_v25 = vcombine.low %v4546_v8, %v6512_v22  ;;  %v5408_v29 = vld [vmem:[%s6183_s25 + $0x460] sm:$0xff]   ;;  %v3665_v30 = vshrl.u32 %v4546_v8, 16  ;;  %v3668_v31 = vshll.u32 %v4546_v8, 16  ;;  %v4683_v8 = vld [vmem:[%s6221_s5 + $0x68] sm:$0x11] }
 0x158   : > { %5061 = vmatprep.subr.bf16.mxu1 %v5374_v33  ;;  %v5405_v33 = vld [vmem:[%s6221_s5 + $0xc0] ss:$16 sps:$4 sm:$0xff]  }
 0x159   : > { %2732 = vmatmul.mubr.bf16.gmra.mxu0 %v5372_v28  ;;  %v3642_v28 = vrot.slane %v3640_v21, 5  ;;  %v3667_v40 = vrot.slane %v3665_v30, 4  ;;  %v3670_v56 = vrot.slane %v3668_v31, 5 }
 0x15a   : > { %5022 = vmatpush3.bf16.msra.mxu0 %v5375_v62  ;;  %3094 = vmatmul.mubr.bf16.gmra.mxu1 %v4524_v41  ;;  %v4549_v62 = vld [vmem:[%s6221_s5 + $0x60] sm:$0xff]  ;;  %v3693_v41 = vshrl.u32 %v4548_v34, 16 }
 0x15b   : > { %5062 = vmatpush3.bf16.msra.mxu1 %v5376_v35  ;;  %5023 = vmatprep.subr.bf16.mxu0 %v5377_v39  ;;  %v3656_v35 = vrot.slane %v3654_v26, 5  ;;  %v4589_v38 = vcombine.high %v4548_v34, %v4549_v62  ;;  %v5411_v39 = vld [vmem:[%s6221_s5 + $0xe4] ss:$16 sps:$4 sm:$0xff]   ;;  %v4588_v46 = vcombine.low %v4548_v34, %v4549_v62  ;;  %v3707_v54 = vshrl.u32 %v4549_v62, 16 }
 0x15c   : > { %5063 = vmatprep.subr.bf16.mxu1 %v5378_v42  ;;  %2739 = vmatprep.mubr.bf16.mxu0 %v5381_v47  ;;  %v3679_v42 = vshrl.u32 %v6512_v22, 16  ;;  %v5416_v47 = vld [vmem:[%s6183_s25 + $0x418] sm:$0xff]   ;;  %v3695_v50 = vrot.slane %v3693_v41, 4 }
 0x15d   : > { %3101 = vmatprep.mubr.bf16.mxu1 %v4527_v5  ;;  %v3657_v48 = vor.u32 %v3656_v35, %v3653_v36  ;;  %v3709_v5 = vrot.slane %v3707_v54, 4  ;;  %v5427_v36 = vld [vmem:[%s6183_s25 + $0x400] sm:$0xff]  }
 0x15e   : > { %5024 = vmatpush3.bf16.msra.mxu0 %v5379_v44  ;;  %v3643_v44 = vor.u32 %v3642_v28, %v3639_v24  ;;  %v3716_v24 = vshll.u32 %v4683_v8, 16  ;;  %v3674_v28 = vshll.u32 %v4677_v4, 16 }
 0x15f   : > { %5064 = vmatpush3.bf16.msra.mxu1 %v5380_v45  ;;  %5025 = vmatprep.subr.bf16.mxu0 %v5384_v55  ;;  %v3696_v45 = vshll.u32 %v4548_v34, 16  ;;  %v3710_v55 = vshll.u32 %v4549_v62, 16  ;;  %v3721_v62 = vshrl.u32 %v6530_v52, 16 }
 0x160   : > { %5065 = vmatprep.subr.bf16.mxu1 %v5385_v57  ;;  %v5414_v57 = vld [vmem:[%s6221_s5 + $0xe0] ss:$16 sps:$4 sm:$0xff]   ;;  %v3718_v30 = vrot.slane %v3716_v24, 5 }
 0x161   : > { %2740 = vmatmul.mubr.bf16.gmra.mxu0 %v5383_v53  ;;  %v3698_v51 = vrot.slane %v3696_v45, 5  ;;  %v6533_v53 = vld [vmem:[%s6221_s5 + $0x80] sm:$0xff]  ;;  %v3712_v9 = vrot.slane %v3710_v55, 5 }
 0x162   : > { %5026 = vmatpush3.bf16.msra.mxu0 %v5386_v60  ;;  %3102 = vmatmul.mubr.bf16.gmra.mxu1 %v4526_v6  ;;  %v4591_v59 = vcombine.high %v6530_v52, %v6533_v53  ;;  %v3644_v60 = vrot.slane %v3643_v44, 4  ;;  %v3671_v6 = vor.u32 %v3670_v56, %v3667_v40  ;;  %v4685_v40 = vld [vmem:[%s6221_s5 + $0x78] sm:$0x11]  ;;  %v3738_v55 = vshll.u32 %v6533_v53, 16 }
 0x163   : > { %5066 = vmatpush3.bf16.msra.mxu1 %v5387_v63  ;;  %5027 = vmatprep.subr.bf16.mxu0 %v5388_v1  ;;  %v3699_v61 = vor.u32 %v3698_v51, %v3695_v50  ;;  %v3682_v63 = vshll.u32 %v6512_v22, 16  ;;  %v3658_v1 = vrot.slane %v3657_v48, 4  ;;  %v3702_v22 = vshll.u32 %v4681_v18, 16 }
 0x164   : > { %5067 = vmatprep.subr.bf16.mxu1 %v5389_v32  ;;  %3328 = vmatprep.mubr.bf16.mxu0 %v4585_v12  ;;  %v5418_v32 = vld [vmem:[%s6183_s25 + $0x410] sm:$0xff]   ;;  %v3672_v12 = vrot.slane %v3671_v6, 4  ;;  %v3723_v48 = vrot.slane %v3721_v62, 4  ;;  %v3724_v50 = vshll.u32 %v6530_v52, 16  ;;  %v3735_v51 = vshrl.u32 %v6533_v53, 16 }
 0x165   : > { %3579 = vmatprep.mubr.bf16.mxu1 %v5396_v13  ;;  %v4590_v13 = vcombine.low %v6530_v52, %v6533_v53 }
 0x166   : > { %5028 = vmatpush3.bf16.msra.mxu0 %v5390_v7  ;;  %v3681_v7 = vrot.slane %v3679_v42, 4 }
 0x167   : > { %5068 = vmatpush3.bf16.msra.mxu1 %v5391_v58  ;;  %5093 = vmatprep.subr.bf16.mxu0 %v5397_v15  ;;  %v5424_v58 = vld [vmem:[%s6183_s25 + $0x448] sm:$0xff]  }
 0x168   : > { %5133 = vmatprep.subr.bf16.mxu1 %v5397_v15  ;;  %v4673_v15 = vld [vmem:[%s6221_s5 + $0x18] sm:$0x11] }
 0x169   : > { %3329 = vmatmul.mubr.bf16.vlgmr.msra.gmra.mxu0 %v4584_v11  ;;  %v3700_v11 = vrot.slane %v3699_v61, 4  ;;  %v3740_v61 = vrot.slane %v3738_v55, 5 }
 0x16a   : > { %5094 = vmatpush3.bf16.msra.mxu0 %v5398_v16  ;;  %3580 = vmatmul.mubr.bf16.vlgmr.msra.gmra.mxu1 %v5394_v14  ;;  %v5426_v14 = vld [vmem:[%s6183_s25 + $0x440] sm:$0xff]   ;;  %s4747_s25 = sshll.u32 (%p5587_p9), %s4029_s24, 2 }
 0x16b   : > { %5095 = vmatprep.subr.bf16.mxu0 %v5399_v20  ;;  %5141 = vmatpush3.bf16.msra.mxu1 %v5398_v16  ;;  %v4675_v16 = vld [vmem:[%s6221_s5 + $0x28] sm:$0x11]  ;;  %s4031_s26 = scalar_lea.vmem (%p5587_p9), %s6783_s3, %s4747_s25 }
 0x16c   : > { %5134 = vmatprep.subr.bf16.mxu1 %v5399_v20  ;;  %3336 = vmatprep.mubr.bf16.mxu0 %v4587_v23  ;;  %v3713_v20 = vor.u32 %v3712_v9, %v3709_v5  ;;  %v3660_v21 = vshll.u32 %v4675_v16, 16  ;;  %v3684_v23 = vrot.slane %v3682_v63, 5 }
 0x16d   : > { %3587 = vmatprep.mubr.bf16.mxu1 %v5402_v3 }
 0x16e   : > { %5096 = vmatpush3.bf16.msra.mxu0 %v5400_v19  ;;  %v3714_v3 = vrot.slane %v3713_v20, 4  ;;  %v3662_v26 = vrot.slane %v3660_v21, 5 }
 0x16f   : > { %5097 = vmatprep.subr.bf16.mxu0 %v5406_v2  ;;  %5142 = vmatpush3.bf16.msra.mxu1 %v5400_v19  ;;  %v3646_v19 = vshll.u32 %v4673_v15, 16 }
 0x170   : > { %5135 = vmatprep.subr.bf16.mxu1 %v5406_v2  ;;  %v3719_v41 = vsel %vm6290_vm2, %v3714_v3, %v3718_v30 }
 0x171   : > { %3337 = vmatmul.mubr.bf16.gmra.mxu0 %v4586_v25  ;;  %v4679_v25 = vld [vmem:[%s6221_s5 + $0x48] sm:$0x11]  ;;  %v3648_v2 = vrot.slane %v3646_v19, 5 }
 0x172   : > { %5098 = vmatpush3.bf16.msra.mxu0 %v5407_v27  ;;  %3344 = vmatprep.mubr.bf16.mxu0 %v4589_v38  ;;  %v3688_v34 = vshll.u32 %v4679_v25, 16 }
 0x173   : > { %5099 = vmatprep.subr.bf16.mxu0 %v5408_v29  ;;  %3588 = vmatmul.mubr.bf16.gmra.mxu1 %v5405_v33  ;;  %v3685_v33 = vor.u32 %v3684_v23, %v3681_v7  ;;  %v3649_v35 = vsel %vm6290_vm2, %v3644_v60, %v3648_v2  ;;  %v3737_v60 = vrot.slane %v3735_v51, 4 }
 0x174   : > { %5143 = vmatpush3.bf16.msra.mxu1 %v5407_v27  ;;  %3595 = vmatprep.mubr.bf16.mxu1 %v5411_v39  ;;  %v3704_v27 = vrot.slane %v3702_v22, 5  ;;  %v3676_v39 = vrot.slane %v3674_v28, 5 }
 0x175   : > { %5136 = vmatprep.subr.bf16.mxu1 %v5408_v29  ;;  %v5423_v29 = vld [vmem:[%s6221_s5 + $0x100] ss:$16 sps:$4 sm:$0xff]   ;;  %v3686_v42 = vrot.slane %v3685_v33, 4 }
 0x176   : > { %5100 = vmatpush3.bf16.msra.mxu0 %v5409_v37  ;;  %v3705_v38 = vsel %vm6290_vm2, %v3700_v11, %v3704_v27 }
 0x177   : > { %5101 = vmatprep.subr.bf16.mxu0 %v5415_v43  ;;  %v4725_v45 = vcombine.high %v3705_v38, %v3719_v41  ;;  %v4724_v63 = vcombine.low %v3705_v38, %v3719_v41 }
 0x178   : > { %5144 = vmatpush3.bf16.msra.mxu1 %v5409_v37  ;;  %v3663_v37 = vsel %vm6290_vm2, %v3658_v1, %v3662_v26  ;;  %v3741_v1 = vor.u32 %v3740_v61, %v3737_v60 }
 0x179   : > { %3345 = vmatmul.mubr.bf16.gmra.mxu0 %v4588_v46  ;;  %5137 = vmatprep.subr.bf16.mxu1 %v5415_v43  ;;  %v4721_v31 = vcombine.high %v3649_v35, %v3663_v37  ;;  %v4687_v43 = vld [vmem:[%s6221_s5 + $0x88] sm:$0x11]  ;;  %v4720_v44 = vcombine.low %v3649_v35, %v3663_v37  ;;  %v3677_v46 = vsel %vm6290_vm2, %v3672_v12, %v3676_v39 }
 0x17a   : > { %5102 = vmatpush3.bf16.msra.mxu0 %v5416_v47  ;;  %3352 = vmatprep.mubr.bf16.mxu0 %v4591_v59  ;;  %v3744_v56 = vshll.u32 %v4687_v43, 16  ;;  %v3726_v59 = vrot.slane %v3724_v50, 5 }
 0x17b   : > { %5103 = vmatprep.subr.bf16.mxu0 %v5417_v49  ;;  %3596 = vmatmul.mubr.bf16.gmra.mxu1 %v5414_v57 }
 0x17c   : > { %5145 = vmatpush3.bf16.msra.mxu1 %v5416_v47  ;;  %3603 = vmatprep.mubr.bf16.mxu1 %v5420_v0  ;;  %v3690_v47 = vrot.slane %v3688_v34, 5  ;;  %v3727_v52 = vor.u32 %v3726_v59, %v3723_v48  ;;  %v3746_v5 = vrot.slane %v3744_v56, 5 }
 0x17d   : > { %5138 = vmatprep.subr.bf16.mxu1 %v5417_v49  ;;  %v3730_v49 = vshll.u32 %v4685_v40, 16 }
 0x17e   : > { %5104 = vmatpush3.bf16.msra.mxu0 %v5418_v32  ;;  %v3691_v54 = vsel %vm6290_vm2, %v3686_v42, %v3690_v47  ;;  %v3728_v6 = vrot.slane %v3727_v52, 4 }
 0x17f   : > { %5105 = vmatprep.subr.bf16.mxu0 %v5424_v58  ;;  %v4723_v57 = vcombine.high %v3677_v46, %v3691_v54  ;;  %v3732_v0 = vrot.slane %v3730_v49, 5  ;;  %v4722_v7 = vcombine.low %v3677_v46, %v3691_v54 }
 0x180   : > { %5146 = vmatpush3.bf16.msra.mxu1 %v5418_v32  ;;  %v3742_v32 = vrot.slane %v3741_v1, 4 }
 0x181   : > { %3353 = vmatmul.mubr.bf16.gmra.mxu0 %v4590_v13  ;;  %5139 = vmatprep.subr.bf16.mxu1 %v5424_v58  ;;  %v3733_v53 = vsel %vm6290_vm2, %v3728_v6, %v3732_v0 }
 0x182   : > { %5106 = vmatpush3.bf16.msra.mxu0 %v5425_v10  ;;  %3941 = vmatprep.mubr.bf16.mxu0 %v4721_v31  ;;  %v3747_v58 = vsel %vm6290_vm2, %v3742_v32, %v3746_v5 }
 0x183   : > { %5107 = vmatprep.subr.bf16.mxu0 %v5426_v14  ;;  %3604 = vmatmul.mubr.bf16.gmra.mxu1 %v5423_v29  ;;  %v4727_v9 = vcombine.high %v3733_v53, %v3747_v58 }
 0x184   : > { %5147 = vmatpush3.bf16.msra.mxu1 %v5425_v10  ;;  %3957 = vmatprep.mubr.bf16.mxu1 %v4725_v45  ;;  %v4726_v10 = vcombine.low %v3733_v53, %v3747_v58 }
 0x185   : > { %5140 = vmatprep.subr.bf16.mxu1 %v5426_v14 }
 0x186   : > { %5108 = vmatpush3.bf16.msra.mxu0 %v5427_v36 }
 0x188   : > { %5148 = vmatpush3.bf16.msra.mxu1 %v5427_v36 }
 0x189   : > { %3942 = vmatmul.mubr.bf16.vlgmr.msra.gmra.mxu0 %v4720_v44 }
 0x18a   : > { %3949 = vmatprep.mubr.bf16.mxu0 %v4723_v57 }
 0x18b   : > { %3958 = vmatmul.mubr.bf16.vlgmr.msra.gmra.mxu1 %v4724_v63 }
 0x18c   : > { %3965 = vmatprep.mubr.bf16.mxu1 %v4727_v9 }
 0x191   : > { %3950 = vmatmul.mubr.bf16.gmra.mxu0 %v4722_v7 }
 0x193   : > { %3966 = vmatmul.mubr.bf16.gmra.mxu1 %v4726_v10 }
 0x1c9   : > { %v4789_v11 = vpop.f32.mrf.mxu0 }
 0x1ca   : > { %v4829_v12 = vpop.f32.mrf.mxu1 }
 0x1cb   : > { %v4790_v13 = vpop.f32.mrf.mxu0 }
 0x1cc   : > { %v4791_v14 = vadd.f32 %v4790_v13, %v4789_v11  ;;  %v4830_v15 = vpop.f32.mrf.mxu1 }
 0x1cd   : > { %v4831_v16 = vadd.f32 %v4830_v15, %v4829_v12  ;;  %v4792_v18 = vpop.f32.mrf.mxu0 }
 0x1ce   : > { %v4832_v20 = vpop.f32.mrf.mxu1 }
 0x1cf   : > { %v1859_v19 = vadd.f32 %v4831_v16, %v4791_v14  ;;  %v4793_v21 = vpop.f32.mrf.mxu0 }
 0x1d0   : > { %v4794_v8 = vadd.f32 %v4793_v21, %v4792_v18  ;;  %v4833_v22 = vpop.f32.mrf.mxu1 }
 0x1d1   : > { %v4834_v23 = vadd.f32 %v4833_v22, %v4832_v20  ;;  %v4795_v17 = vpop.f32.mrf.mxu0 }
 0x1d2   : > { %v4835_v24 = vpop.f32.mrf.mxu1 }
 0x1d3   : > { %v1862_v3 = vadd.f32 %v4834_v23, %v4794_v8  ;;  %v4796_v4 = vpop.f32.mrf.mxu0 }
 0x1d4   : > { %v4797_v25 = vadd.f32 %v4796_v4, %v4795_v17  ;;  %v4836_v2 = vpop.f32.mrf.mxu1 }
 0x1d5   : > { %v4798_v26 = vpop.f32.mrf.mxu0  ;;  %v4837_v27 = vadd.f32 %v4836_v2, %v4835_v24 }
 0x1d6   : > { %v4838_v28 = vpop.f32.mrf.mxu1 }
 0x1d7   : > { %v4799_v29 = vpop.f32.mrf.mxu0  ;;  %v1867_v30 = vadd.f32 %v4837_v27, %v4797_v25 }
 0x1d8   : > { %v4800_v33 = vadd.f32 %v4799_v29, %v4798_v26  ;;  %v4839_v34 = vpop.f32.mrf.mxu1 }
 0x1d9   : > { %v4840_v62 = vadd.f32 %v4839_v34, %v4838_v28  ;;  %v4801_v36 = vpop.f32.mrf.mxu0 }
 0x1da   : > { %v4841_v37 = vpop.f32.mrf.mxu1 }
 0x1db   : > { %v1870_v35 = vadd.f32 %v4840_v62, %v4800_v33  ;;  %v4802_v38 = vpop.f32.mrf.mxu0 }
 0x1dc   : > { %v4803_v39 = vadd.f32 %v4802_v38, %v4801_v36  ;;  %v4842_v40 = vpop.f32.mrf.mxu1 }
 0x1dd   : > { %v4804_v31 = vpop.f32.mrf.mxu0  ;;  %v4843_v41 = vadd.f32 %v4842_v40, %v4841_v37 }
 0x1de   : > { %v4844_v42 = vpop.f32.mrf.mxu1 }
 0x1df   : > { %v4805_v43 = vpop.f32.mrf.mxu0  ;;  %v1875_v44 = vadd.f32 %v4843_v41, %v4803_v39 }
 0x1e0   : > { %v4806_v45 = vadd.f32 %v4805_v43, %v4804_v31  ;;  %v4845_v46 = vpop.f32.mrf.mxu1 }
 0x1e1   : > { %v4846_v47 = vadd.f32 %v4845_v46, %v4844_v42  ;;  %v4807_v48 = vpop.f32.mrf.mxu0 }
 0x1e2   : > { %v4847_v49 = vpop.f32.mrf.mxu1 }
 0x1e3   : > { %v6576_v50 = vadd.f32 %v4846_v47, %v4806_v45  ;;  %v4808_v51 = vpop.f32.mrf.mxu0 }
 0x1e4   : > { %v4809_v54 = vadd.f32 %v4808_v51, %v4807_v48  ;;  %v4848_v55 = vpop.f32.mrf.mxu1 }
 0x1e5   : > { %v4810_v56 = vpop.f32.mrf.mxu0  ;;  %v4849_v57 = vadd.f32 %v4848_v55, %v4847_v49 }
 0x1e6   : > { %v4850_v59 = vpop.f32.mrf.mxu1 }
 0x1e7   : > { %v4811_v60 = vpop.f32.mrf.mxu0  ;;  %v6578_v61 = vadd.f32 %v4849_v57, %v4809_v54 }
 0x1e8   : > { %v4812_v63 = vadd.f32 %v4811_v60, %v4810_v56  ;;  %v4851_v52 = vpop.f32.mrf.mxu1 }
 0x1e9   : > { %v4852_v0 = vadd.f32 %v4851_v52, %v4850_v59  ;;  %v4869_v53 = vpop.f32.mrf.mxu0 }
 0x1ea   : > { %v4909_v5 = vpop.f32.mrf.mxu1 }
 0x1eb   : > { %v6580_v1 = vadd.f32 %v4852_v0, %v4812_v63  ;;  %v4870_v58 = vpop.f32.mrf.mxu0 }
 0x1ec   : > { %v4910_v6 = vpop.f32.mrf.mxu1  ;;  %v4871_v10 = vadd.f32 %v4870_v58, %v4869_v53 }
 0x1ed   : > { %v4911_v32 = vadd.f32 %v4910_v6, %v4909_v5  ;;  %v4872_v12 = vpop.f32.mrf.mxu0 }
 0x1ee   : > { %v4912_v7 = vpop.f32.mrf.mxu1  ;;  %v2246_v13 = vadd.f32 %v4871_v10, %v1859_v19 }
 0x1ef   : > { %v4873_v15 = vpop.f32.mrf.mxu0 }
 0x1f0   : > { %v4913_v9 = vpop.f32.mrf.mxu1  ;;  %v6582_v16 = vadd.f32 %v4911_v32, %v2246_v13  ;;  %v4874_v18 = vadd.f32 %v4873_v15, %v4872_v12 }
 0x1f1   : > { %v4914_v11 = vadd.f32 %v4913_v9, %v4912_v7  ;;  %v4875_v22 = vpop.f32.mrf.mxu0 }
 0x1f2   : > { %v4915_v14 = vpop.f32.mrf.mxu1  ;;  %v2247_v8 = vadd.f32 %v4874_v18, %v1862_v3 }
 0x1f3   : > { %v4876_v24 = vpop.f32.mrf.mxu0 }
 0x1f4   : > { %v4916_v20 = vpop.f32.mrf.mxu1  ;;  %v6584_v17 = vadd.f32 %v4914_v11, %v2247_v8  ;;  %v4877_v25 = vadd.f32 %v4876_v24, %v4875_v22 }
 0x1f5   : > { %v4917_v21 = vadd.f32 %v4916_v20, %v4915_v14  ;;  %v4878_v26 = vpop.f32.mrf.mxu0 }
 0x1f6   : > { %v4918_v23 = vpop.f32.mrf.mxu1  ;;  %v2248_v27 = vadd.f32 %v4877_v25, %v1867_v30 }
 0x1f7   : > { %v4879_v19 = vpop.f32.mrf.mxu0 }
 0x1f8   : > { %v4919_v4 = vpop.f32.mrf.mxu1  ;;  %v6586_v29 = vadd.f32 %v4917_v21, %v2248_v27  ;;  %v4880_v33 = vadd.f32 %v4879_v19, %v4878_v26 }
 0x1f9   : > { %v4920_v2 = vadd.f32 %v4919_v4, %v4918_v23  ;;  %v4881_v3 = vpop.f32.mrf.mxu0 }
 0x1fa   : > { %v4921_v28 = vpop.f32.mrf.mxu1  ;;  %v2249_v36 = vadd.f32 %v4880_v33, %v1870_v35 }
 0x1fb   : > { %v4882_v40 = vpop.f32.mrf.mxu0 }
 0x1fc   : > { %v4922_v34 = vpop.f32.mrf.mxu1  ;;  %v6588_v38 = vadd.f32 %v4920_v2, %v2249_v36  ;;  %v4883_v41 = vadd.f32 %v4882_v40, %v4881_v3 }
 0x1fd   : > { %v4923_v62 = vadd.f32 %v4922_v34, %v4921_v28  ;;  %v4884_v42 = vpop.f32.mrf.mxu0 }
 0x1fe   : > { %v4924_v37 = vpop.f32.mrf.mxu1  ;;  %v2250_v43 = vadd.f32 %v4883_v41, %v1875_v44 }
 0x1ff   : > { %v4885_v30 = vpop.f32.mrf.mxu0 }
 0x200   : > { %v4925_v39 = vpop.f32.mrf.mxu1  ;;  %v6590_v46 = vadd.f32 %v4923_v62, %v2250_v43  ;;  %v4886_v47 = vadd.f32 %v4885_v30, %v4884_v42 }
 0x201   : > { %v4926_v31 = vadd.f32 %v4925_v39, %v4924_v37  ;;  %v4887_v35 = vpop.f32.mrf.mxu0 }
 0x202   : > { %v4927_v45 = vpop.f32.mrf.mxu1  ;;  %v2251_v51 = vadd.f32 %v4886_v47, %v6576_v50 }
 0x203   : > { %v4888_v56 = vpop.f32.mrf.mxu0 }
 0x204   : > { %v4928_v48 = vpop.f32.mrf.mxu1  ;;  %v6593_v55 = vadd.f32 %v4926_v31, %v2251_v51  ;;  %v4889_v59 = vadd.f32 %v4888_v56, %v4887_v35 }
 0x205   : > { %v4929_v49 = vadd.f32 %v4928_v48, %v4927_v45  ;;  %v4890_v63 = vpop.f32.mrf.mxu0 }
 0x206   : > { %v4930_v54 = vpop.f32.mrf.mxu1  ;;  %v2252_v44 = vadd.f32 %v4889_v59, %v6578_v61 }
 0x207   : > { %v4891_v52 = vpop.f32.mrf.mxu0 }
 0x208   : > { %v4931_v57 = vpop.f32.mrf.mxu1  ;;  %v6596_v0 = vadd.f32 %v4929_v49, %v2252_v44  ;;  %v4892_v5 = vadd.f32 %v4891_v52, %v4890_v63 }
 0x209   : > { %v4932_v60 = vadd.f32 %v4931_v57, %v4930_v54  ;;  %v4949_v6 = vpop.f32.mrf.mxu0 }
 0x20a   : > { %v2253_v32 = vadd.f32 %v4892_v5, %v6580_v1  ;;  %v4989_v7 = vpop.f32.mrf.mxu1 }
 0x20b   : > { %v4950_v53 = vpop.f32.mrf.mxu0 }
 0x20c   : > { %v6599_v50 = vadd.f32 %v4932_v60, %v2253_v32  ;;  %v4990_v9 = vpop.f32.mrf.mxu1  ;;  %v4951_v44 = vadd.f32 %v4950_v53, %v4949_v6 }
 0x20d   : > { %v4952_v58 = vpop.f32.mrf.mxu0 }
 0x20e   : > { %6787 = vst [vmem:[#allocation4_spill] sm:$0xff] %v6599_v50  ;;  %v6601_v11 = vpop.f32.mrf.mxu1  ;;  %v4991_v50 = vadd.f32 %v4990_v9, %v4989_v7 }
 0x20f   : > { %v4953_v10 = vpop.f32.mrf.mxu0 }
 0x210   : > { %v6603_v13 = vpop.f32.mrf.mxu1 }
 0x211   : > { %v4955_v12 = vpop.f32.mrf.mxu0 }
 0x212   : > { %v6605_v14 = vpop.f32.mrf.mxu1 }
 0x213   : > { %v4956_v61 = vpop.f32.mrf.mxu0 }
 0x214   : > { %v6609_v18 = vpop.f32.mrf.mxu1 }
 0x215   : > { %v6607_v15 = vpop.f32.mrf.mxu0 }
 0x216   : > { %v6613_v20 = vpop.f32.mrf.mxu1 }
 0x217   : > { %v6611_v1 = vpop.f32.mrf.mxu0 }
 0x218   : > { %v6615_v22 = vpop.f32.mrf.mxu1 }
 0x219   : > { %v4961_v21 = vpop.f32.mrf.mxu0 }
 0x21a   : > { %v5001_v4 = vpop.f32.mrf.mxu1 }
 0x21b   : > { %v4962_v8 = vpop.f32.mrf.mxu0 }
 0x21c   : > { %v5002_v25 = vpop.f32.mrf.mxu1 }
 0x21d   : > { %v4964_v23 = vpop.f32.mrf.mxu0 }
 0x21e   : > { %v6617_v26 = vpop.f32.mrf.mxu1 }
 0x21f   : > { %v4965_v24 = vpop.f32.mrf.mxu0 }
 0x220   : > { %v6619_v28 = vpop.f32.mrf.mxu1 }
 0x221   : > { %v4967_v2 = vpop.f32.mrf.mxu0 }
 0x222   : > { %v6623_v33 = vpop.f32.mrf.mxu1 }
 0x223   : > { %v4968_v27 = vpop.f32.mrf.mxu0  ;;  %6788 = vst [vmem:[#allocation5_spill] sm:$0xff] %v6623_v33 }
 0x224   : > { %v6627_v62 = vpop.f32.mrf.mxu1 }
 0x225   : > { %v6621_v19 = vpop.f32.mrf.mxu0  ;;  %6789 = vst [vmem:[#allocation6_spill] sm:$0xff] %v6627_v62  ;;  %v4966_v62 = vadd.f32 %v4965_v24, %v4964_v23 }
 0x226   : > { %v6629_v36 = vpop.f32.mrf.mxu1 }
 0x227   : > { %v6625_v34 = vpop.f32.mrf.mxu0  ;;  %6790 = vst [vmem:[#allocation7_spill] sm:$0xff] %v6629_v36  ;;  %v4963_v36 = vadd.f32 %v4962_v8, %v4961_v21 }
 0x228   : > { %v6631_v3 = vpop.f32.mrf.mxu1 }
 0x229   : > { %v5029_v37 = vpop.f32.mrf.mxu0  ;;  %6791 = vst [vmem:[#allocation8_spill] sm:$0xff] %v6631_v3  ;;  %v2748_v3 = vadd.f32 %v4951_v44, %v6582_v16  ;;  %v2752_v16 = vadd.f32 %v4963_v36, %v6590_v46  ;;  %v4960_v46 = vadd.f32 %v6611_v1, %v6607_v15  ;;  %v5006_v36 = vadd.f32 %v6619_v28, %v6617_v26 }
 0x22a   : > { %v5069_v40 = vpop.f32.mrf.mxu1 }
 0x22b   : > { %v5030_v39 = vpop.f32.mrf.mxu0 }
 0x22c   : > { %v5070_v41 = vpop.f32.mrf.mxu1 }
 0x22d   : > { %v5032_v31 = vpop.f32.mrf.mxu0 }
 0x22e   : > { %v6633_v43 = vpop.f32.mrf.mxu1 }
 0x22f   : > { %v5033_v42 = vpop.f32.mrf.mxu0 }
 0x230   : > { %v6637_v30 = vpop.f32.mrf.mxu1  ;;  %v5034_v21 = vadd.f32 %v5033_v42, %v5032_v31  ;;  %v6800_v42 = vld [vmem:[#allocation6_spill] sm:$0xff] }
 0x231   : > { %v6635_v45 = vpop.f32.mrf.mxu0 }
 0x233   : > { %v6639_v47 = vpop.f32.mrf.mxu0  ;;  %v6641_v48 = vpop.f32.mrf.mxu1 }
 0x234   : > { %6792 = vst [vmem:[#allocation9_spill] sm:$0xff] %v6641_v48  ;;  %v5037_v28 = vadd.f32 %v6639_v47, %v6635_v45 }
 0x235   : > { %v6643_v49 = vpop.f32.mrf.mxu0  ;;  %v6645_v51 = vpop.f32.mrf.mxu1 }
 0x236   : > { %6793 = vst [vmem:[#allocation10_spill] sm:$0xff] %v6643_v49  ;;  %6794 = vst [vmem:[#allocation11_spill] sm:$0xff] %v6645_v51  ;;  %v4954_v51 = vadd.f32 %v4953_v10, %v4952_v58  ;;  %v4994_v58 = vadd.f32 %v6603_v13, %v6601_v11 }
 0x237   : > { %v6647_v35 = vpop.f32.mrf.mxu0  ;;  %v6649_v54 = vpop.f32.mrf.mxu1 }
 0x238   : > { %6795 = vst [vmem:[#allocation12_spill] sm:$0xff] %v6647_v35  ;;  %6796 = vst [vmem:[#allocation13_spill] sm:$0xff] %v6649_v54  ;;  %v4957_v35 = vadd.f32 %v4956_v61, %v4955_v12  ;;  %v2749_v33 = vadd.f32 %v4954_v51, %v6584_v17  ;;  %v5003_v12 = vadd.f32 %v5002_v25, %v5001_v4 }
 0x239   : > { %v5041_v56 = vpop.f32.mrf.mxu0  ;;  %v6651_v57 = vpop.f32.mrf.mxu1  ;;  %v4997_v17 = vadd.f32 %v6609_v18, %v6605_v14  ;;  %v5071_v4 = vadd.f32 %v5070_v41, %v5069_v40  ;;  %v4972_v14 = vadd.f32 %v6625_v34, %v6621_v19  ;;  %v6799_v41 = vld [vmem:[#allocation5_spill] sm:$0xff] }
 0x23a   : > { %6797 = vst [vmem:[#allocation14_spill] sm:$0xff] %v6651_v57  ;;  %v5031_v57 = vadd.f32 %v5030_v39, %v5029_v37  ;;  %v2750_v10 = vadd.f32 %v4957_v35, %v6586_v29  ;;  %v4969_v29 = vadd.f32 %v4968_v27, %v4967_v2  ;;  %v3111_v23 = vadd.f32 %v4994_v58, %v2749_v33 }
 0x23b   : > { %v5042_v59 = vpop.f32.mrf.mxu0  ;;  %v5081_v60 = vpop.f32.mrf.mxu1  ;;  %v3114_v24 = vadd.f32 %v5003_v12, %v2752_v16  ;;  %v2751_v33 = vadd.f32 %v4960_v46, %v6588_v38  ;;  %v5074_v39 = vadd.f32 %v6637_v30, %v6633_v43  ;;  %v5009_v51 = vadd.f32 %v6800_v42, %v6799_v41  ;;  %v6801_v38 = vld [vmem:[#allocation4_spill] sm:$0xff] }
 0x23c   : > { %v5043_v8 = vadd.f32 %v5042_v59, %v5041_v56  ;;  %v3112_v25 = vadd.f32 %v4997_v17, %v2750_v10  ;;  %v3362_v1 = vadd.f32 %v5034_v21, %v3111_v23  ;;  %v2754_v26 = vadd.f32 %v4969_v29, %v6596_v0  ;;  %v6806_v21 = vld [vmem:[#allocation8_spill] sm:$0xff]  ;;  %v6807_v17 = vld [vmem:[#allocation9_spill] sm:$0xff] }
 0x23d   : > { %v5044_v63 = vpop.f32.mrf.mxu0  ;;  %v5082_v52 = vpop.f32.mrf.mxu1  ;;  %v2755_v35 = vadd.f32 %v4972_v14, %v6801_v38  ;;  %v6802_v30 = vld [vmem:[#allocation10_spill] sm:$0xff]  ;;  %v6808_v46 = vld [vmem:[#allocation11_spill] sm:$0xff] }
 0x23e   : > { %v3365_v2 = vadd.f32 %v5043_v8, %v3114_v24  ;;  %v5083_v40 = vadd.f32 %v5082_v52, %v5081_v60  ;;  %v3613_v59 = vadd.f32 %v5074_v39, %v3362_v1  ;;  %v3116_v44 = vadd.f32 %v5009_v51, %v2754_v26 }
 0x23f   : > { %v5045_v5 = vpop.f32.mrf.mxu0  ;;  %v6653_v32 = vpop.f32.mrf.mxu1  ;;  %v3363_v43 = vadd.f32 %v5037_v28, %v3112_v25  ;;  %v6803_v60 = vld [vmem:[#allocation12_spill] sm:$0xff]  ;;  %v6809_v28 = vld [vmem:[#allocation13_spill] sm:$0xff] }
 0x240   : > { %6798 = vst [vmem:[#allocation15_spill] sm:$0xff] %v6653_v32  ;;  %v3110_v32 = vadd.f32 %v4991_v50, %v2748_v3  ;;  %v2753_v50 = vadd.f32 %v4966_v62, %v6593_v55  ;;  %v5046_v18 = vadd.f32 %v5045_v5, %v5044_v63  ;;  %v5000_v3 = vadd.f32 %v6615_v22, %v6613_v20 }
 0x241   : > { %v5047_v48 = vpop.f32.mrf.mxu0  ;;  %v6656_v49 = vpop.f32.mrf.mxu1  ;;  %v3616_v63 = vadd.f32 %v5083_v40, %v3365_v2  ;;  %v5040_v52 = vadd.f32 %v6803_v60, %v6802_v30 }
 0x242   : > { %v3361_v61 = vadd.f32 %v5031_v57, %v3110_v32  ;;  %v3115_v62 = vadd.f32 %v5006_v36, %v2753_v50  ;;  %v6705_v57 = vld [vmem:[%s1403_s9] ss:$0 sm:$0xff]  ;;  %v5077_v50 = vadd.f32 %v6808_v46, %v6807_v17 }
 0x243   : > { %v5048_v54 = vpop.f32.mrf.mxu0  ;;  %v6659_v6 = vpop.f32.mrf.mxu1 }
 0x244   : > { %v3612_v55 = vadd.f32 %v5071_v4, %v3361_v61  ;;  %v3366_v0 = vadd.f32 %v5046_v18, %v3115_v62  ;;  %v5049_v56 = vadd.f32 %v5048_v54, %v5047_v48  ;;  %v3113_v48 = vadd.f32 %v5000_v3, %v2751_v33  ;;  %v6805_v61 = vld [vmem:[#allocation7_spill] sm:$0xff] }
 0x245   : > { %v6661_v53 = vpop.f32.mrf.mxu0  ;;  %v6668_v7 = vpop.f32.mrf.mxu1  ;;  %v5012_v8 = vadd.f32 %v6806_v21, %v6805_v61  ;;  %v3614_v18 = vadd.f32 %v5077_v50, %v3363_v43 }
 0x247   : > { %v6670_v9 = vpop.f32.mrf.mxu0  ;;  %v6682_v11 = vpop.f32.mrf.mxu1  ;;  %v6804_v5 = vld [vmem:[#allocation15_spill] sm:$0xff]  ;;  %v3117_v14 = vadd.f32 %v5012_v8, %v2755_v35 }
 0x248   : > { %v5086_v32 = vadd.f32 %v6656_v49, %v6804_v5  ;;  %v5052_v49 = vadd.f32 %v6670_v9, %v6661_v53  ;;  %v6810_v53 = vld [vmem:[#allocation14_spill] sm:$0xff] }
 0x249   : > { %v5109_v13 = vpop.f32.mrf.mxu0  ;;  %v6688_v37 = vpop.f32.mrf.mxu1  ;;  %v5080_v9 = vadd.f32 %v6810_v53, %v6809_v28 }
 0x24a   : > { %v3617_v29 = vadd.f32 %v5086_v32, %v3366_v0  ;;  %v3368_v40 = vadd.f32 %v5052_v49, %v3117_v14  ;;  %v5092_v38 = vadd.f32 %v6688_v37, %v6682_v11 }
 0x24b   : > { %v5110_v15 = vpop.f32.mrf.mxu0  ;;  %v5121_v19 = vpop.f32.mrf.mxu1 }
 0x24c   : > { %v5111_v27 = vadd.f32 %v5110_v15, %v5109_v13  ;;  %v3367_v13 = vadd.f32 %v5049_v56, %v3116_v44  ;;  %v3364_v15 = vadd.f32 %v5040_v52, %v3113_v48 }
 0x24d   : > { %v5112_v34 = vpop.f32.mrf.mxu0  ;;  %v5122_v45 = vpop.f32.mrf.mxu1 }
 0x24e   : > { %v3974_v31 = vadd.f32 %v5111_v27, %v3612_v55  ;;  %v5123_v20 = vadd.f32 %v5122_v45, %v5121_v19  ;;  %v5089_v55 = vadd.f32 %v6668_v7, %v6659_v6  ;;  %v3615_v6 = vadd.f32 %v5080_v9, %v3364_v15 }
 0x24f   : > { %v5113_v47 = vpop.f32.mrf.mxu0  ;;  %v5124_v16 = vpop.f32.mrf.mxu1 }
 0x250   : > { %v5114_v22 = vadd.f32 %v5113_v47, %v5112_v34  ;;  %v3989_v54 = vadd.f32 %v6705_v57, %v3974_v31  ;;  %v3978_v10 = vadd.f32 %v5123_v20, %v3616_v63  ;;  %v3618_v19 = vadd.f32 %v5089_v55, %v3367_v13 }
 0x251   : > { %v5115_v58 = vpop.f32.mrf.mxu0  ;;  %v5125_v23 = vpop.f32.mrf.mxu1  ;;  %v3619_v63 = vadd.f32 %v5092_v38, %v3368_v40 }
 0x252   : > { %v3975_v12 = vadd.f32 %v5114_v22, %v3613_v59  ;;  %v5126_v25 = vadd.f32 %v5125_v23, %v5124_v16  ;;  %v3997_v27 = vmax.f32 %v3989_v54, 0.0  ;;  %v3993_v33 = vadd.f32 %v6705_v57, %v3978_v10 }
 0x253   : > { %v5116_v24 = vpop.f32.mrf.mxu0  ;;  %v5127_v1 = vpop.f32.mrf.mxu1 }
 0x254   : > { %v3990_v4 = vadd.f32 %v6705_v57, %v3975_v12  ;;  %v5117_v36 = vadd.f32 %v5116_v24, %v5115_v58  ;;  %v3979_v26 = vadd.f32 %v5126_v25, %v3617_v29  ;;  %v4001_v35 = vmax.f32 %v3993_v33, 0.0 }
 0x255   : > { %v5118_v2 = vpop.f32.mrf.mxu0  ;;  %v5128_v3 = vpop.f32.mrf.mxu1 }
 0x256   : > { %v3998_v62 = vmax.f32 %v3990_v4, 0.0  ;;  %v3976_v34 = vadd.f32 %v5117_v36, %v3614_v18  ;;  %v3994_v41 = vadd.f32 %v6705_v57, %v3979_v26  ;;  %v5129_v42 = vadd.f32 %v5128_v3, %v5127_v1 }
 0x257   : > { %v5119_v39 = vpop.f32.mrf.mxu0  ;;  %v5130_v7 = vpop.f32.mrf.mxu1 }
 0x258   : > { %v4753_v31 = vpack.c.bf16 %v3998_v62, %v3997_v27  ;;  %v5120_v51 = vadd.f32 %v5119_v39, %v5118_v2  ;;  %v4002_v0 = vmax.f32 %v3994_v41, 0.0  ;;  %v3980_v56 = vadd.f32 %v5129_v42, %v3618_v19 }
 0x259   : > { %v3991_v45 = vadd.f32 %v6705_v57, %v3976_v34  ;;  %v5131_v59 = vpop.f32.mrf.mxu1 }
 0x25a   : > { %4754 = vst [vmem:[%s6728_s11] sm:$0xff] %v4753_v31   ;;  %v3977_v47 = vadd.f32 %v5120_v51, %v3615_v6  ;;  %v4763_v20 = vpack.c.bf16 %v4002_v0, %v4001_v35  ;;  %v5132_v22 = vadd.f32 %v5131_v59, %v5130_v7  ;;  %v3995_v11 = vadd.f32 %v6705_v57, %v3980_v56 }
 0x25b   : > { %v3999_v43 = vmax.f32 %v3991_v45, 0.0 }
 0x25c   : > { %v3992_v44 = vadd.f32 %v6705_v57, %v3977_v47  ;;  %4771 = vst [vmem:[%s6728_s11 + $0x10] sm:$0xff] %v4763_v20   ;;  %v3981_v37 = vadd.f32 %v5132_v22, %v3619_v63  ;;  %v4003_v5 = vmax.f32 %v3995_v11, 0.0 }
 0x25e   : > { %v4000_v30 = vmax.f32 %v3992_v44, 0.0  ;;  %v3996_v60 = vadd.f32 %v6705_v57, %v3981_v37 }
 0x260   : > { %v4758_v52 = vpack.c.bf16 %v4000_v30, %v3999_v43  ;;  %v4004_v32 = vmax.f32 %v3996_v60, 0.0  ;;  %4027 = sbr.rel (!%p5587_p9) target bundleno = 621 (0x26d), region = 77 }
 0x261   : > { %v4048_v57 = vld [vmem:[%s6728_s11] sm:$0xf] (%p5587_p9)  ;;  %v4050_v58 = vld [vmem:[%s6728_s11 + $0x4] sm:$0xf] (%p5587_p9) }
 0x262   : > { %4770 = vst [vmem:[%s6728_s11 + $0x8] sm:$0xff] %v4758_v52   ;;  %v4768_v16 = vpack.c.bf16 %v4004_v32, %v4003_v5  ;;  %4049 = vst [vmem:[%s4031_s26] sm:$0xf] (%p5587_p9), %v4048_v57 }
 0x263   : > { %v4056_v10 = vld [vmem:[%s6728_s11 + $0x10] sm:$0xf] (%p5587_p9)  ;;  %v4058_v12 = vld [vmem:[%s6728_s11 + $0x14] sm:$0xf] (%p5587_p9)  ;;  %4051 = vst [vmem:[%s4031_s26 + $0x8] sm:$0xf] (%p5587_p9), %v4050_v58 }
 0x264   : > { %4772 = vst [vmem:[%s6728_s11 + $0x18] sm:$0xff] %v4768_v16   ;;  %4057 = vst [vmem:[%s4031_s26 + $0x20] sm:$0xf] (%p5587_p9), %v4056_v10 }
 0x265   : > { %4059 = vst [vmem:[%s4031_s26 + $0x28] sm:$0xf] %v4058_v12 }
 0x269   : > { %v4052_v48 = vld [vmem:[%s6728_s11 + $0x8] sm:$0xf]  ;;  %v4054_v54 = vld [vmem:[%s6728_s11 + $0xc] sm:$0xf] }
 0x26a   : > { %4053 = vst [vmem:[%s4031_s26 + $0x10] sm:$0xf] %v4052_v48  ;;  %4055 = vst [vmem:[%s4031_s26 + $0x18] sm:$0xf] %v4054_v54 }
 0x26b   : > { %v4060_v61 = vld [vmem:[%s6728_s11 + $0x18] sm:$0xf]  ;;  %v4062_v21 = vld [vmem:[%s6728_s11 + $0x1c] sm:$0xf] }
 0x26c   : > { %4061 = vst [vmem:[%s4031_s26 + $0x30] sm:$0xf] %v4060_v61  ;;  %4063 = vst [vmem:[%s4031_s26 + $0x38] sm:$0xf] %v4062_v21 }
 0x26d PF: > { %s13_s20 = sadd.s32 1, %s5498_s20   ;;  %s6811_s12 = smov %s5470_s13 }
 0x26e   : > { %p10_p2 = scmp.ge.s32.totalorder %s13_s20, 6   ;;  %s6812_s13 = smov %s5592_s4 }
 0x26f   : > { %s6813_s14 = smov %s5478_s15  ;;  %s6814_s15 = smov %s5581_s27 }
 0x270   : > { %s6815_s16 = smov %s5490_s18  ;;  %s6816_s17 = smov %s5494_s19 }
 0x271   : > { %s6817_s18 = smov %s6820_s22  ;;  %s6818_s19 = smov %s6824_s23 }
 0x272   :  { %12 = sbr.rel (!%p10_p2) target bundleno = 5 (0x5), region = 168 }

// kernel: segmentation_forward.15
= control target key start
LH: loop header
LB: loop body
LE: loop exit
PB: predicated region body
PF: predicated region fallthrough
CT: control target
= control target key end

     0   :  { %s1616_s9 = smov 0   ;;  %s1618_s10 = smov 0   ;;  %s1968_s0 = inlined_call_operand.vmem [shape: f32[32,16], index: 0, kind: input, shape index: {}]   ;;  %s1969_s1 = inlined_call_operand.vmem [shape: bf16[2,16,4096], index: 1, kind: input, shape index: {}]   ;;  %s1970_s2 = inlined_call_operand.vmem [shape: bf16[2,32,4096], index: 2, kind: output, shape index: {}]  }
   0x1   :  { %s1620_s11 = smov 0   ;;  %s1622_s12 = smov 0  }
   0x2   :  { %s1624_s13 = smov 0   ;;  %s1626_s14 = smov 0  }
   0x3   :  { %s1628_s15 = smov 0  }
   0x4 LB: > { %s21_s16 = sadd.s32 1, %s1590_s13  ;;  %s24_s17 = sadd.s32 1, %s1594_s14  ;;  %s1598_s15 = sphi %s1628_s15, %s12_s15   ;;  %s1594_s14 = sphi %s1626_s14, %s1977_s14   ;;  %s1590_s13 = sphi %s1624_s13, %s1976_s13   ;;  %s1586_s12 = sphi %s1622_s12, %s1975_s12   ;;  %s1582_s11 = sphi %s1620_s11, %s1974_s11   ;;  %s1578_s10 = sphi %s1618_s10, %s1973_s10   ;;  %s1574_s9 = sphi %s1616_s9, %s1972_s9  }
   0x5   : > { %p22_p0 = scmp.ge.s32.totalorder %s21_s16, 2  ;;  %s1374_s18 = sadd.s32 4294967295, %s1598_s15  }
   0x6   : > { %p61_p1 = scmp.ne.s32.totalorder %s1578_s10, %s1574_s9  ;;  %p62_p2 = scmp.eq.s32.totalorder %s1598_s15, 0 }
   0x7   : > { %s1979_s16 = smov (%p22_p0, %s21_s16), 0  ;;  %s1981_s17 = smov (!%p22_p0, %s24_s17), %s1594_s14 }
   0x8   : > { %p26_p3 = scmp.ge.s32.totalorder %s1981_s17, 2  ;;  %p93_p4 = scmp.eq.s32.totalorder %s1374_s18, 3 }
   0x9   : > { %s50_s19 = ssub.s32 %s1590_s13, %s1979_s16  ;;  %p63_p5 = por %p62_p2, %p61_p1 }
   0xa   : > { %s1983_s17 = smov (%p26_p3, %s1981_s17), 0  ;;  %p1664_p6 = por %p93_p4, %p61_p1 }
   0xb   : > { %s49_s21 = ssub.s32 %s1594_s14, %s1983_s17  ;;  %s54_s23 = sadd.s32 1, %s1578_s10 }
   0xc   : > { %s51_s22 = sor.u32 %s50_s19, %s49_s21  ;;  %p1377_p8 = scmp.ge.s32.totalorder %s1598_s15, 4 }
   0xd   : > { %p52_p7 = scmp.eq.s32.totalorder %s51_s22, 0 }
   0xe   : > { %118 = sbr.rel (%p1377_p8) target bundleno = 34 (0x22), region = 20 }
   0xf   : > { %s1672_s24 = scalar_select %p52_p7, %s1578_s10, %s54_s23  }
  0x13   : > { %121 = sbr.rel (!%p63_p5) target bundleno = 34 (0x22), region = 24  ;;  %s123_s25 = sand.u32 (%p63_p5), 1, %s1578_s10  }
  0x14   : > { %s1379_s26 = sshll.u32 (%p63_p5), %s1590_s13, 4  ;;  %s1378_s27 = sshll.u32 (%p63_p5), %s123_s25, 7 }
  0x15   : > { %s1380_s28 = sshll.u32 (%p63_p5), %s1594_s14, 6  ;;  %s125_s6 = scalar_lea.vmem (%p63_p5), [#allocation2], %s1378_s27 }
  0x16   : > { %s128_s29 = sadd.s32 (%p63_p5), %s1380_s28, %s1379_s26 }
  0x17   : > { %s1381_s30 = sshll.u32 (%p63_p5), %s128_s29, 2 }
  0x18   : > { %s1681_s5 = scalar_lea.vmem %s1969_s1, %s1381_s30 }
  0x19   : > { %v143_v0 = vld [vmem:[%s1681_s5] sm:$0xff]  ;;  %v145_v1 = vld [vmem:[%s1681_s5 + $0x8] sm:$0xff]  ;;  %v147_v2 = vld [vmem:[%s1681_s5 + $0x10] sm:$0xff] }
  0x1a   : > { %144 = vst [vmem:[%s125_s6] sm:$0xff] %v143_v0  ;;  %146 = vst [vmem:[%s125_s6 + $0x8] sm:$0xff] %v145_v1  ;;  %v149_v3 = vld [vmem:[%s1681_s5 + $0x18] sm:$0xff]  ;;  %v151_v4 = vld [vmem:[%s1681_s5 + $0x20] sm:$0xff] }
  0x1b   : > { %148 = vst [vmem:[%s125_s6 + $0x10] sm:$0xff] %v147_v2  ;;  %v153_v5 = vld [vmem:[%s1681_s5 + $0x28] sm:$0xff]  ;;  %150 = vst [vmem:[%s125_s6 + $0x18] sm:$0xff] %v149_v3  ;;  %v155_v6 = vld [vmem:[%s1681_s5 + $0x30] sm:$0xff] }
  0x1c   : > { %152 = vst [vmem:[%s125_s6 + $0x20] sm:$0xff] %v151_v4  ;;  %154 = vst [vmem:[%s125_s6 + $0x28] sm:$0xff] %v153_v5  ;;  %v157_v7 = vld [vmem:[%s1681_s5 + $0x38] sm:$0xff]  ;;  %v159_v8 = vld [vmem:[%s1681_s5 + $0x80] sm:$0xff] }
  0x1d   : > { %156 = vst [vmem:[%s125_s6 + $0x30] sm:$0xff] %v155_v6  ;;  %158 = vst [vmem:[%s125_s6 + $0x38] sm:$0xff] %v157_v7  ;;  %v161_v9 = vld [vmem:[%s1681_s5 + $0x88] sm:$0xff]  ;;  %v163_v10 = vld [vmem:[%s1681_s5 + $0x90] sm:$0xff] }
  0x1e   : > { %160 = vst [vmem:[%s125_s6 + $0x40] sm:$0xff] %v159_v8  ;;  %v165_v11 = vld [vmem:[%s1681_s5 + $0x98] sm:$0xff]  ;;  %162 = vst [vmem:[%s125_s6 + $0x48] sm:$0xff] %v161_v9  ;;  %v167_v12 = vld [vmem:[%s1681_s5 + $0xa0] sm:$0xff] }
  0x1f   : > { %164 = vst [vmem:[%s125_s6 + $0x50] sm:$0xff] %v163_v10  ;;  %166 = vst [vmem:[%s125_s6 + $0x58] sm:$0xff] %v165_v11  ;;  %v169_v13 = vld [vmem:[%s1681_s5 + $0xa8] sm:$0xff]  ;;  %v171_v14 = vld [vmem:[%s1681_s5 + $0xb0] sm:$0xff] }
  0x20   : > { %168 = vst [vmem:[%s125_s6 + $0x60] sm:$0xff] %v167_v12  ;;  %170 = vst [vmem:[%s125_s6 + $0x68] sm:$0xff] %v169_v13  ;;  %v173_v15 = vld [vmem:[%s1681_s5 + $0xb8] sm:$0xff] }
  0x21   : > { %172 = vst [vmem:[%s125_s6 + $0x70] sm:$0xff] %v171_v14  ;;  %174 = vst [vmem:[%s125_s6 + $0x78] sm:$0xff] %v173_v15 }
  0x22 PF: > { %p1382_p9 = scmp.ge.s32.totalorder %s1598_s15, 1  ;;  %p179_p10 = scmp.lt.s32.totalorder %s1598_s15, 5 }
  0x24   : > { %p180_p11 = pnand %p1382_p9, %p179_p10 }
  0x25   : > { %s186_s7 = sand.u32 (!%p180_p11), 1, %s1574_s9  }
  0x26   : > { %183 = sbr.rel (%p180_p11) target bundleno = 316 (0x13c), region = 47  ;;  %s1383_s8 = sshll.u32 (!%p180_p11), %s186_s7, 7 }
  0x27   : > { %s1706_s18 = scalar_lea.vmem (!%p180_p11), [#allocation2], %s1383_s8  ;;  %s1384_s29 = sshll.u32 (!%p180_p11), %s186_s7, 8 }
  0x28   : > { %s1840_s30 = scalar_lea.vmem (!%p180_p11), [#allocation3], %s1384_s29 }
  0x2b   : > { %v1600_v16 = vmov 0.0   ;;  %v216_v17 = vld [vmem:[%s1706_s18 + $0x40] sm:$0xff]  ;;  %v217_v18 = vld [vmem:[%s1706_s18 + $0x48] sm:$0xff]  ;;  %v218_v25 = vld [vmem:[%s1706_s18 + $0x50] sm:$0xff]  ;;  %vm260_vm0 = vcmask 130048   ;;  %s1450_s9 = sshll.u32 (%p1664_p6), %s1582_s11, 4 }
  0x2c   : > { %337 = vmatprep.mubr.f32.mxu0 %v1600_v16  ;;  %426 = vmatprep.mubr.f32.mxu1 %v1600_v16  ;;  %v208_v19 = vld [vmem:[%s1706_s18] sm:$0xff]  ;;  %v241_v20 = vunpack.c.h.bf16 %v216_v17  ;;  %v243_v21 = vunpack.c.h.bf16 %v217_v18  ;;  %v240_v22 = vunpack.c.l.bf16 %v216_v17  ;;  %v242_v23 = vunpack.c.l.bf16 %v217_v18  ;;  %v209_v24 = vld [vmem:[%s1706_s18 + $0x8] sm:$0xff]  ;;  %v219_v26 = vld [vmem:[%s1706_s18 + $0x58] sm:$0xff]  ;;  %s1451_s3 = sshll.u32 (%p1664_p6), %s1586_s12, 7 }
  0x2d   : > { %v225_v27 = vunpack.c.h.bf16 %v208_v19  ;;  %v227_v28 = vunpack.c.h.bf16 %v209_v24  ;;  %v224_v29 = vunpack.c.l.bf16 %v208_v19  ;;  %v226_v30 = vunpack.c.l.bf16 %v209_v24  ;;  %v1717_v31 = vld [vmem:[%s1968_s0] sm:$0xff]  ;;  %v210_v36 = vld [vmem:[%s1706_s18 + $0x10] sm:$0xff]  ;;  %v211_v37 = vld [vmem:[%s1706_s18 + $0x18] sm:$0xff]  ;;  %s1218_s20 = sadd.s32 (%p1664_p6), %s1451_s3, %s1450_s9 }
  0x2e   : > { %301 = vmatprep.subr.mxu0 %v241_v20  ;;  %390 = vmatprep.subr.mxu1 %v243_v21  ;;  %v245_v32 = vunpack.c.h.bf16 %v218_v25  ;;  %v247_v33 = vunpack.c.h.bf16 %v219_v26  ;;  %v244_v34 = vunpack.c.l.bf16 %v218_v25  ;;  %v246_v35 = vunpack.c.l.bf16 %v219_v26  ;;  %v1728_v38 = vld [vmem:[%s1968_s0 + $0x8] sm:$0xff]  ;;  %v220_v43 = vld [vmem:[%s1706_s18 + $0x60] sm:$0xff]  ;;  %v1743_v45 = vld [vmem:[%s1968_s0 + $0x10] sm:$0xff]  ;;  %s1452_s4 = sshll.u32 (%p1664_p6), %s1218_s20, 2 }
  0x2f   : > { %302 = vmatpush1.msra.mxu0 %v240_v22  ;;  %391 = vmatpush1.msra.mxu1 %v242_v23  ;;  %v229_v39 = vunpack.c.h.bf16 %v210_v36  ;;  %v231_v40 = vunpack.c.h.bf16 %v211_v37  ;;  %v228_v41 = vunpack.c.l.bf16 %v210_v36  ;;  %v230_v42 = vunpack.c.l.bf16 %v211_v37  ;;  %v221_v44 = vld [vmem:[%s1706_s18 + $0x68] sm:$0xff]  ;;  %v1754_v48 = vld [vmem:[%s1968_s0 + $0x18] sm:$0xff]  ;;  %v212_v49 = vld [vmem:[%s1706_s18 + $0x20] sm:$0xff]  ;;  %s1890_s7 = scalar_lea.vmem (%p1664_p6), %s1970_s2, %s1452_s4 }
  0x30   : > { %303 = vmatprep.subr.mxu0 %v225_v27  ;;  %392 = vmatprep.subr.mxu1 %v227_v28  ;;  %v249_v46 = vunpack.c.h.bf16 %v220_v43  ;;  %v251_v47 = vunpack.c.h.bf16 %v221_v44  ;;  %v213_v50 = vld [vmem:[%s1706_s18 + $0x28] sm:$0xff]  ;;  %v248_v51 = vunpack.c.l.bf16 %v220_v43  ;;  %v250_v52 = vunpack.c.l.bf16 %v221_v44  ;;  %v222_v55 = vld [vmem:[%s1706_s18 + $0x70] sm:$0xff]  ;;  %v223_v56 = vld [vmem:[%s1706_s18 + $0x78] sm:$0xff] }
  0x31   : > { %304 = vmatpush1.msra.mxu0 %v224_v29  ;;  %393 = vmatpush1.msra.mxu1 %v226_v30  ;;  %v233_v53 = vunpack.c.h.bf16 %v212_v49  ;;  %v235_v54 = vunpack.c.h.bf16 %v213_v50  ;;  %v232_v57 = vunpack.c.l.bf16 %v212_v49  ;;  %v234_v58 = vunpack.c.l.bf16 %v213_v50  ;;  %v214_v61 = vld [vmem:[%s1706_s18 + $0x30] sm:$0xff]  ;;  %v215_v62 = vld [vmem:[%s1706_s18 + $0x38] sm:$0xff] }
  0x32   : > { %1385 = vmatmul.mubr.msk.f32.vlgmr.msra.gmra.mxu0 %vm260_vm0, %v1717_v31  ;;  %1389 = vmatmul.mubr.msk.f32.vlgmr.msra.gmra.mxu1 %vm260_vm0, %v1717_v31  ;;  %v253_v59 = vunpack.c.h.bf16 %v222_v55  ;;  %v255_v60 = vunpack.c.h.bf16 %v223_v56  ;;  %v252_v63 = vunpack.c.l.bf16 %v222_v55  ;;  %v254_v0 = vunpack.c.l.bf16 %v223_v56 }
  0x33   : > { %479 = vmatprep.subr.mxu0 %v245_v32  ;;  %568 = vmatprep.subr.mxu1 %v247_v33  ;;  %v237_v1 = vunpack.c.h.bf16 %v214_v61  ;;  %v239_v2 = vunpack.c.h.bf16 %v215_v62  ;;  %v236_v3 = vunpack.c.l.bf16 %v214_v61  ;;  %v238_v4 = vunpack.c.l.bf16 %v215_v62 }
  0x34   : > { %480 = vmatpush1.msra.mxu0 %v244_v34  ;;  %569 = vmatpush1.msra.mxu1 %v246_v35 }
  0x35   : > { %343 = vmatprep.mubr.f32.mxu0 %v1600_v16  ;;  %432 = vmatprep.mubr.f32.mxu1 %v1600_v16 }
  0x36   : > { %1386 = vmatmul.mubr.msk.f32.gmra.mxu0 %vm260_vm0, %v1728_v38  ;;  %1390 = vmatmul.mubr.msk.f32.gmra.mxu1 %vm260_vm0, %v1728_v38 }
  0x37   : > { %349 = vmatprep.mubr.f32.mxu0 %v1600_v16  ;;  %438 = vmatprep.mubr.f32.mxu1 %v1600_v16 }
  0x38   : > { %481 = vmatprep.subr.mxu0 %v229_v39  ;;  %570 = vmatprep.subr.mxu1 %v231_v40 }
  0x39   : > { %482 = vmatpush1.msra.mxu0 %v228_v41  ;;  %571 = vmatpush1.msra.mxu1 %v230_v42 }
  0x3a   : > { %1387 = vmatmul.mubr.msk.f32.gmra.mxu0 %vm260_vm0, %v1743_v45  ;;  %1391 = vmatmul.mubr.msk.f32.gmra.mxu1 %vm260_vm0, %v1743_v45 }
  0x3b   : > { %355 = vmatprep.mubr.f32.mxu0 %v1600_v16  ;;  %444 = vmatprep.mubr.f32.mxu1 %v1600_v16 }
  0x3c   : > { %657 = vmatprep.subr.mxu0 %v249_v46  ;;  %746 = vmatprep.subr.mxu1 %v251_v47 }
  0x3e   : > { %1388 = vmatmul.mubr.msk.f32.gmra.mxu0 %vm260_vm0, %v1754_v48  ;;  %1392 = vmatmul.mubr.msk.f32.gmra.mxu1 %vm260_vm0, %v1754_v48 }
  0x3f   : > { %515 = vmatprep.mubr.f32.mxu0 %v1600_v16  ;;  %604 = vmatprep.mubr.f32.mxu1 %v1600_v16 }
  0x42   : > { %1393 = vmatmul.mubr.msk.f32.vlgmr.msra.gmra.mxu0 %vm260_vm0, %v1717_v31  ;;  %1397 = vmatmul.mubr.msk.f32.vlgmr.msra.gmra.mxu1 %vm260_vm0, %v1717_v31 }
  0x43   : > { %658 = vmatpush1.msra.mxu0 %v248_v51  ;;  %747 = vmatpush1.msra.mxu1 %v250_v52 }
  0x44   : > { %521 = vmatprep.mubr.f32.mxu0 %v1600_v16  ;;  %610 = vmatprep.mubr.f32.mxu1 %v1600_v16 }
  0x45   : > { %659 = vmatprep.subr.mxu0 %v233_v53  ;;  %748 = vmatprep.subr.mxu1 %v235_v54 }
  0x46   : > { %1394 = vmatmul.mubr.msk.f32.gmra.mxu0 %vm260_vm0, %v1728_v38  ;;  %1398 = vmatmul.mubr.msk.f32.gmra.mxu1 %vm260_vm0, %v1728_v38 }
  0x47   : > { %527 = vmatprep.mubr.f32.mxu0 %v1600_v16  ;;  %616 = vmatprep.mubr.f32.mxu1 %v1600_v16 }
  0x48   : > { %660 = vmatpush1.msra.mxu0 %v232_v57  ;;  %749 = vmatpush1.msra.mxu1 %v234_v58 }
  0x49   : > { %835 = vmatprep.subr.mxu0 %v253_v59  ;;  %924 = vmatprep.subr.mxu1 %v255_v60 }
  0x4a   : > { %1395 = vmatmul.mubr.msk.f32.gmra.mxu0 %vm260_vm0, %v1743_v45  ;;  %1399 = vmatmul.mubr.msk.f32.gmra.mxu1 %vm260_vm0, %v1743_v45 }
  0x4b   : > { %533 = vmatprep.mubr.f32.mxu0 %v1600_v16  ;;  %622 = vmatprep.mubr.f32.mxu1 %v1600_v16 }
  0x4e   : > { %1396 = vmatmul.mubr.msk.f32.gmra.mxu0 %vm260_vm0, %v1754_v48  ;;  %1400 = vmatmul.mubr.msk.f32.gmra.mxu1 %vm260_vm0, %v1754_v48 }
  0x4f   : > { %693 = vmatprep.mubr.f32.mxu0 %v1600_v16  ;;  %782 = vmatprep.mubr.f32.mxu1 %v1600_v16 }
  0x52   : > { %1401 = vmatmul.mubr.msk.f32.vlgmr.msra.gmra.mxu0 %vm260_vm0, %v1717_v31  ;;  %1405 = vmatmul.mubr.msk.f32.vlgmr.msra.gmra.mxu1 %vm260_vm0, %v1717_v31 }
  0x53   : > { %836 = vmatpush1.msra.mxu0 %v252_v63  ;;  %925 = vmatpush1.msra.mxu1 %v254_v0 }
  0x54   : > { %699 = vmatprep.mubr.f32.mxu0 %v1600_v16  ;;  %788 = vmatprep.mubr.f32.mxu1 %v1600_v16 }
  0x55   : > { %837 = vmatprep.subr.mxu0 %v237_v1  ;;  %926 = vmatprep.subr.mxu1 %v239_v2 }
  0x56   : > { %1402 = vmatmul.mubr.msk.f32.gmra.mxu0 %vm260_vm0, %v1728_v38  ;;  %1406 = vmatmul.mubr.msk.f32.gmra.mxu1 %vm260_vm0, %v1728_v38 }
  0x57   : > { %705 = vmatprep.mubr.f32.mxu0 %v1600_v16  ;;  %794 = vmatprep.mubr.f32.mxu1 %v1600_v16 }
  0x58   : > { %838 = vmatpush1.msra.mxu0 %v236_v3  ;;  %927 = vmatpush1.msra.mxu1 %v238_v4 }
  0x5a   : > { %1403 = vmatmul.mubr.msk.f32.gmra.mxu0 %vm260_vm0, %v1743_v45  ;;  %1407 = vmatmul.mubr.msk.f32.gmra.mxu1 %vm260_vm0, %v1743_v45 }
  0x5b   : > { %711 = vmatprep.mubr.f32.mxu0 %v1600_v16  ;;  %800 = vmatprep.mubr.f32.mxu1 %v1600_v16 }
  0x5e   : > { %1404 = vmatmul.mubr.msk.f32.gmra.mxu0 %vm260_vm0, %v1754_v48  ;;  %1408 = vmatmul.mubr.msk.f32.gmra.mxu1 %vm260_vm0, %v1754_v48 }
  0x5f   : > { %871 = vmatprep.mubr.f32.mxu0 %v1600_v16  ;;  %960 = vmatprep.mubr.f32.mxu1 %v1600_v16 }
  0x62   : > { %1409 = vmatmul.mubr.msk.f32.vlgmr.msra.gmra.mxu0 %vm260_vm0, %v1717_v31  ;;  %1413 = vmatmul.mubr.msk.f32.vlgmr.msra.gmra.mxu1 %vm260_vm0, %v1717_v31 }
  0x63   : > { %877 = vmatprep.mubr.f32.mxu0 %v1600_v16  ;;  %966 = vmatprep.mubr.f32.mxu1 %v1600_v16 }
  0x66   : > { %1410 = vmatmul.mubr.msk.f32.gmra.mxu0 %vm260_vm0, %v1728_v38  ;;  %1414 = vmatmul.mubr.msk.f32.gmra.mxu1 %vm260_vm0, %v1728_v38 }
  0x67   : > { %883 = vmatprep.mubr.f32.mxu0 %v1600_v16  ;;  %972 = vmatprep.mubr.f32.mxu1 %v1600_v16 }
  0x6a   : > { %1411 = vmatmul.mubr.msk.f32.gmra.mxu0 %vm260_vm0, %v1743_v45  ;;  %1415 = vmatmul.mubr.msk.f32.gmra.mxu1 %vm260_vm0, %v1743_v45 }
  0x6b   : > { %889 = vmatprep.mubr.f32.mxu0 %v1600_v16  ;;  %978 = vmatprep.mubr.f32.mxu1 %v1600_v16 }
  0x6e   : > { %1412 = vmatmul.mubr.msk.f32.gmra.mxu0 %vm260_vm0, %v1754_v48  ;;  %1416 = vmatmul.mubr.msk.f32.gmra.mxu1 %vm260_vm0, %v1754_v48 }
  0xf2   : > { %v339_v5 = vpop.f32.mrf.mxu0  ;;  %v428_v6 = vpop.f32.mrf.mxu1 }
  0xf4   : > { %v341_v7 = vpop.f32.mrf.mxu0  ;;  %v430_v8 = vpop.f32.mrf.mxu1 }
  0xf5   : > { %v1455_v9 = vpack.c.bf16 %v341_v7, %v339_v5  ;;  %v1456_v10 = vpack.c.bf16 %v430_v8, %v428_v6 }
  0xf6   : > { %v345_v11 = vpop.f32.mrf.mxu0  ;;  %v434_v12 = vpop.f32.mrf.mxu1 }
  0xf7   : > { %1177 = vst [vmem:[%s1840_s30] sm:$0xff] %v1455_v9  ;;  %1178 = vst [vmem:[%s1840_s30 + $0x8] sm:$0xff] %v1456_v10 }
  0xf8   : > { %v347_v13 = vpop.f32.mrf.mxu0  ;;  %v436_v14 = vpop.f32.mrf.mxu1 }
  0xf9   : > { %v1463_v15 = vpack.c.bf16 %v347_v13, %v345_v11  ;;  %v1464_v16 = vpack.c.bf16 %v436_v14, %v434_v12 }
  0xfa   : > { %v351_v17 = vpop.f32.mrf.mxu0  ;;  %v440_v18 = vpop.f32.mrf.mxu1 }
  0xfb   : > { %1185 = vst [vmem:[%s1840_s30 + $0x40] sm:$0xff] %v1463_v15  ;;  %1186 = vst [vmem:[%s1840_s30 + $0x48] sm:$0xff] %v1464_v16 }
  0xfc   : > { %v353_v19 = vpop.f32.mrf.mxu0  ;;  %v442_v20 = vpop.f32.mrf.mxu1 }
  0xfd   : > { %v1471_v21 = vpack.c.bf16 %v353_v19, %v351_v17  ;;  %v1472_v22 = vpack.c.bf16 %v442_v20, %v440_v18 }
  0xfe   : > { %v357_v23 = vpop.f32.mrf.mxu0  ;;  %v446_v24 = vpop.f32.mrf.mxu1 }
  0xff   : > { %1193 = vst [vmem:[%s1840_s30 + $0x80] sm:$0xff] %v1471_v21  ;;  %1194 = vst [vmem:[%s1840_s30 + $0x88] sm:$0xff] %v1472_v22 }
 0x100   : > { %v359_v25 = vpop.f32.mrf.mxu0  ;;  %v448_v26 = vpop.f32.mrf.mxu1 }
 0x101   : > { %v1479_v27 = vpack.c.bf16 %v359_v25, %v357_v23  ;;  %v1480_v28 = vpack.c.bf16 %v448_v26, %v446_v24 }
 0x102   : > { %v517_v29 = vpop.f32.mrf.mxu0  ;;  %v606_v30 = vpop.f32.mrf.mxu1 }
 0x103   : > { %1201 = vst [vmem:[%s1840_s30 + $0xc0] sm:$0xff] %v1479_v27  ;;  %1202 = vst [vmem:[%s1840_s30 + $0xc8] sm:$0xff] %v1480_v28 }
 0x104   : > { %v519_v31 = vpop.f32.mrf.mxu0  ;;  %v608_v32 = vpop.f32.mrf.mxu1 }
 0x105   : > { %v1457_v33 = vpack.c.bf16 %v519_v31, %v517_v29  ;;  %v1458_v34 = vpack.c.bf16 %v608_v32, %v606_v30 }
 0x106   : > { %v523_v35 = vpop.f32.mrf.mxu0  ;;  %v612_v36 = vpop.f32.mrf.mxu1 }
 0x107   : > { %1179 = vst [vmem:[%s1840_s30 + $0x10] sm:$0xff] %v1457_v33  ;;  %1180 = vst [vmem:[%s1840_s30 + $0x18] sm:$0xff] %v1458_v34 }
 0x108   : > { %v525_v37 = vpop.f32.mrf.mxu0  ;;  %v614_v38 = vpop.f32.mrf.mxu1 }
 0x109   : > { %v1465_v39 = vpack.c.bf16 %v525_v37, %v523_v35  ;;  %v1466_v40 = vpack.c.bf16 %v614_v38, %v612_v36  ;;  %v1233_v37 = vld [vmem:[%s1840_s30] sm:$0xff] (%p1664_p6)  ;;  %v1235_v38 = vld [vmem:[%s1840_s30 + $0x8] sm:$0xff] (%p1664_p6) }
 0x10a   : > { %v529_v41 = vpop.f32.mrf.mxu0  ;;  %v618_v42 = vpop.f32.mrf.mxu1  ;;  %1234 = vst [vmem:[%s1890_s7] sm:$0xff] (%p1664_p6), %v1233_v37  ;;  %1236 = vst [vmem:[%s1890_s7 + $0x8] sm:$0xff] (%p1664_p6), %v1235_v38 }
 0x10b   : > { %1187 = vst [vmem:[%s1840_s30 + $0x50] sm:$0xff] %v1465_v39  ;;  %1188 = vst [vmem:[%s1840_s30 + $0x58] sm:$0xff] %v1466_v40 }
 0x10c   : > { %v531_v43 = vpop.f32.mrf.mxu0  ;;  %v620_v44 = vpop.f32.mrf.mxu1 }
 0x10d   : > { %v1473_v45 = vpack.c.bf16 %v531_v43, %v529_v41  ;;  %v1474_v46 = vpack.c.bf16 %v620_v44, %v618_v42 }
 0x10e   : > { %v535_v47 = vpop.f32.mrf.mxu0  ;;  %v624_v48 = vpop.f32.mrf.mxu1  ;;  %v1237_v39 = vld [vmem:[%s1840_s30 + $0x10] sm:$0xff] (%p1664_p6)  ;;  %v1239_v40 = vld [vmem:[%s1840_s30 + $0x18] sm:$0xff] (%p1664_p6) }
 0x10f   : > { %1195 = vst [vmem:[%s1840_s30 + $0x90] sm:$0xff] %v1473_v45  ;;  %1196 = vst [vmem:[%s1840_s30 + $0x98] sm:$0xff] %v1474_v46  ;;  %v1249_v45 = vld [vmem:[%s1840_s30 + $0x40] sm:$0xff] (%p1664_p6)  ;;  %v1251_v46 = vld [vmem:[%s1840_s30 + $0x48] sm:$0xff] (%p1664_p6) }
 0x110   : > { %v537_v49 = vpop.f32.mrf.mxu0  ;;  %v626_v50 = vpop.f32.mrf.mxu1  ;;  %1238 = vst [vmem:[%s1890_s7 + $0x10] sm:$0xff] (%p1664_p6), %v1237_v39  ;;  %1240 = vst [vmem:[%s1890_s7 + $0x18] sm:$0xff] (%p1664_p6), %v1239_v40 }
 0x111   : > { %v1481_v51 = vpack.c.bf16 %v537_v49, %v535_v47  ;;  %v1482_v52 = vpack.c.bf16 %v626_v50, %v624_v48  ;;  %1250 = vst [vmem:[%s1890_s7 + $0x80] sm:$0xff] (%p1664_p6), %v1249_v45  ;;  %1252 = vst [vmem:[%s1890_s7 + $0x88] sm:$0xff] (%p1664_p6), %v1251_v46 }
 0x112   : > { %v695_v53 = vpop.f32.mrf.mxu0  ;;  %v784_v54 = vpop.f32.mrf.mxu1  ;;  %v1253_v47 = vld [vmem:[%s1840_s30 + $0x50] sm:$0xff] (%p1664_p6)  ;;  %v1255_v48 = vld [vmem:[%s1840_s30 + $0x58] sm:$0xff] (%p1664_p6) }
 0x113   : > { %1203 = vst [vmem:[%s1840_s30 + $0xd0] sm:$0xff] %v1481_v51  ;;  %1204 = vst [vmem:[%s1840_s30 + $0xd8] sm:$0xff] %v1482_v52 }
 0x114   : > { %v697_v55 = vpop.f32.mrf.mxu0  ;;  %v786_v56 = vpop.f32.mrf.mxu1  ;;  %1254 = vst [vmem:[%s1890_s7 + $0x90] sm:$0xff] (%p1664_p6), %v1253_v47  ;;  %1256 = vst [vmem:[%s1890_s7 + $0x98] sm:$0xff] (%p1664_p6), %v1255_v48 }
 0x115   : > { %v1459_v57 = vpack.c.bf16 %v697_v55, %v695_v53  ;;  %v1460_v58 = vpack.c.bf16 %v786_v56, %v784_v54  ;;  %v1265_v53 = vld [vmem:[%s1840_s30 + $0x80] sm:$0xff] (%p1664_p6)  ;;  %v1267_v54 = vld [vmem:[%s1840_s30 + $0x88] sm:$0xff] (%p1664_p6) }
 0x116   : > { %v701_v59 = vpop.f32.mrf.mxu0  ;;  %v790_v60 = vpop.f32.mrf.mxu1  ;;  %1266 = vst [vmem:[%s1890_s7 + $0x100] sm:$0xff] (%p1664_p6), %v1265_v53  ;;  %1268 = vst [vmem:[%s1890_s7 + $0x108] sm:$0xff] (%p1664_p6), %v1267_v54  ;;  %v1269_v55 = vld [vmem:[%s1840_s30 + $0x90] sm:$0xff] (%p1664_p6)  ;;  %v1271_v56 = vld [vmem:[%s1840_s30 + $0x98] sm:$0xff] (%p1664_p6) }
 0x117   : > { %1181 = vst [vmem:[%s1840_s30 + $0x20] sm:$0xff] %v1459_v57  ;;  %1182 = vst [vmem:[%s1840_s30 + $0x28] sm:$0xff] %v1460_v58 }
 0x118   : > { %v703_v61 = vpop.f32.mrf.mxu0  ;;  %v792_v62 = vpop.f32.mrf.mxu1  ;;  %1270 = vst [vmem:[%s1890_s7 + $0x110] sm:$0xff] (%p1664_p6), %v1269_v55  ;;  %1272 = vst [vmem:[%s1890_s7 + $0x118] sm:$0xff] (%p1664_p6), %v1271_v56 }
 0x119   : > { %v1467_v63 = vpack.c.bf16 %v703_v61, %v701_v59  ;;  %v1468_v0 = vpack.c.bf16 %v792_v62, %v790_v60  ;;  %v1281_v61 = vld [vmem:[%s1840_s30 + $0xc0] sm:$0xff] (%p1664_p6)  ;;  %v1283_v62 = vld [vmem:[%s1840_s30 + $0xc8] sm:$0xff] (%p1664_p6) }
 0x11a   : > { %v707_v1 = vpop.f32.mrf.mxu0  ;;  %v796_v2 = vpop.f32.mrf.mxu1  ;;  %1282 = vst [vmem:[%s1890_s7 + $0x180] sm:$0xff] (%p1664_p6), %v1281_v61  ;;  %1284 = vst [vmem:[%s1890_s7 + $0x188] sm:$0xff] (%p1664_p6), %v1283_v62 }
 0x11b   : > { %1189 = vst [vmem:[%s1840_s30 + $0x60] sm:$0xff] %v1467_v63  ;;  %1190 = vst [vmem:[%s1840_s30 + $0x68] sm:$0xff] %v1468_v0  ;;  %v1285_v63 = vld [vmem:[%s1840_s30 + $0xd0] sm:$0xff] (%p1664_p6)  ;;  %v1287_v0 = vld [vmem:[%s1840_s30 + $0xd8] sm:$0xff] (%p1664_p6) }
 0x11c   : > { %v709_v3 = vpop.f32.mrf.mxu0  ;;  %v798_v4 = vpop.f32.mrf.mxu1  ;;  %1286 = vst [vmem:[%s1890_s7 + $0x190] sm:$0xff] (%p1664_p6), %v1285_v63  ;;  %1288 = vst [vmem:[%s1890_s7 + $0x198] sm:$0xff] (%p1664_p6), %v1287_v0 }
 0x11d   : > { %v1475_v5 = vpack.c.bf16 %v709_v3, %v707_v1  ;;  %v1476_v6 = vpack.c.bf16 %v798_v4, %v796_v2 }
 0x11e   : > { %v713_v7 = vpop.f32.mrf.mxu0  ;;  %v802_v8 = vpop.f32.mrf.mxu1  ;;  %v1241_v41 = vld [vmem:[%s1840_s30 + $0x20] sm:$0xff] (%p1664_p6)  ;;  %v1243_v42 = vld [vmem:[%s1840_s30 + $0x28] sm:$0xff] (%p1664_p6) }
 0x11f   : > { %1197 = vst [vmem:[%s1840_s30 + $0xa0] sm:$0xff] %v1475_v5  ;;  %1198 = vst [vmem:[%s1840_s30 + $0xa8] sm:$0xff] %v1476_v6 }
 0x120   : > { %v715_v9 = vpop.f32.mrf.mxu0  ;;  %v804_v10 = vpop.f32.mrf.mxu1  ;;  %1242 = vst [vmem:[%s1890_s7 + $0x20] sm:$0xff] (%p1664_p6), %v1241_v41  ;;  %1244 = vst [vmem:[%s1890_s7 + $0x28] sm:$0xff] (%p1664_p6), %v1243_v42 }
 0x121   : > { %v1483_v11 = vpack.c.bf16 %v715_v9, %v713_v7  ;;  %v1484_v12 = vpack.c.bf16 %v804_v10, %v802_v8 }
 0x122   : > { %v873_v13 = vpop.f32.mrf.mxu0  ;;  %v962_v14 = vpop.f32.mrf.mxu1  ;;  %v1257_v49 = vld [vmem:[%s1840_s30 + $0x60] sm:$0xff] (%p1664_p6)  ;;  %v1259_v50 = vld [vmem:[%s1840_s30 + $0x68] sm:$0xff] (%p1664_p6) }
 0x123   : > { %1205 = vst [vmem:[%s1840_s30 + $0xe0] sm:$0xff] %v1483_v11  ;;  %1206 = vst [vmem:[%s1840_s30 + $0xe8] sm:$0xff] %v1484_v12 }
 0x124   : > { %v875_v15 = vpop.f32.mrf.mxu0  ;;  %v964_v16 = vpop.f32.mrf.mxu1  ;;  %1258 = vst [vmem:[%s1890_s7 + $0xa0] sm:$0xff] (%p1664_p6), %v1257_v49  ;;  %1260 = vst [vmem:[%s1890_s7 + $0xa8] sm:$0xff] (%p1664_p6), %v1259_v50 }
 0x125   : > { %v1461_v17 = vpack.c.bf16 %v875_v15, %v873_v13  ;;  %v1462_v18 = vpack.c.bf16 %v964_v16, %v962_v14 }
 0x126   : > { %v879_v19 = vpop.f32.mrf.mxu0  ;;  %v968_v20 = vpop.f32.mrf.mxu1  ;;  %v1273_v57 = vld [vmem:[%s1840_s30 + $0xa0] sm:$0xff] (%p1664_p6)  ;;  %v1275_v58 = vld [vmem:[%s1840_s30 + $0xa8] sm:$0xff] (%p1664_p6) }
 0x127   : > { %1183 = vst [vmem:[%s1840_s30 + $0x30] sm:$0xff] %v1461_v17  ;;  %1184 = vst [vmem:[%s1840_s30 + $0x38] sm:$0xff] %v1462_v18 }
 0x128   : > { %v881_v21 = vpop.f32.mrf.mxu0  ;;  %v970_v22 = vpop.f32.mrf.mxu1  ;;  %1274 = vst [vmem:[%s1890_s7 + $0x120] sm:$0xff] (%p1664_p6), %v1273_v57  ;;  %1276 = vst [vmem:[%s1890_s7 + $0x128] sm:$0xff] (%p1664_p6), %v1275_v58 }
 0x129   : > { %v1469_v23 = vpack.c.bf16 %v881_v21, %v879_v19  ;;  %v1470_v24 = vpack.c.bf16 %v970_v22, %v968_v20 }
 0x12a   : > { %v885_v25 = vpop.f32.mrf.mxu0  ;;  %v974_v26 = vpop.f32.mrf.mxu1  ;;  %v1289_v1 = vld [vmem:[%s1840_s30 + $0xe0] sm:$0xff] (%p1664_p6)  ;;  %v1291_v2 = vld [vmem:[%s1840_s30 + $0xe8] sm:$0xff] (%p1664_p6) }
 0x12b   : > { %1191 = vst [vmem:[%s1840_s30 + $0x70] sm:$0xff] %v1469_v23  ;;  %1192 = vst [vmem:[%s1840_s30 + $0x78] sm:$0xff] %v1470_v24 }
 0x12c   : > { %v887_v27 = vpop.f32.mrf.mxu0  ;;  %v976_v28 = vpop.f32.mrf.mxu1  ;;  %1290 = vst [vmem:[%s1890_s7 + $0x1a0] sm:$0xff] (%p1664_p6), %v1289_v1  ;;  %1292 = vst [vmem:[%s1890_s7 + $0x1a8] sm:$0xff] (%p1664_p6), %v1291_v2 }
 0x12d   : > { %v1477_v29 = vpack.c.bf16 %v887_v27, %v885_v25  ;;  %v1478_v30 = vpack.c.bf16 %v976_v28, %v974_v26 }
 0x12e   : > { %v891_v31 = vpop.f32.mrf.mxu0  ;;  %v980_v32 = vpop.f32.mrf.mxu1  ;;  %v1245_v43 = vld [vmem:[%s1840_s30 + $0x30] sm:$0xff] (%p1664_p6)  ;;  %v1247_v44 = vld [vmem:[%s1840_s30 + $0x38] sm:$0xff] (%p1664_p6) }
 0x12f   : > { %1199 = vst [vmem:[%s1840_s30 + $0xb0] sm:$0xff] %v1477_v29  ;;  %1200 = vst [vmem:[%s1840_s30 + $0xb8] sm:$0xff] %v1478_v30  ;;  %1215 = sbr.rel (!%p1664_p6) target bundleno = 316 (0x13c), region = 55 }
 0x130   : > { %v893_v33 = vpop.f32.mrf.mxu0  ;;  %v982_v34 = vpop.f32.mrf.mxu1  ;;  %1246 = vst [vmem:[%s1890_s7 + $0x30] sm:$0xff] (%p1664_p6), %v1245_v43  ;;  %1248 = vst [vmem:[%s1890_s7 + $0x38] sm:$0xff] (%p1664_p6), %v1247_v44 }
 0x131   : > { %v1485_v35 = vpack.c.bf16 %v893_v33, %v891_v31  ;;  %v1486_v36 = vpack.c.bf16 %v982_v34, %v980_v32 }
 0x132   : > { %v1261_v51 = vld [vmem:[%s1840_s30 + $0x70] sm:$0xff] (%p1664_p6)  ;;  %v1263_v52 = vld [vmem:[%s1840_s30 + $0x78] sm:$0xff] (%p1664_p6) }
 0x133   : > { %1207 = vst [vmem:[%s1840_s30 + $0xf0] sm:$0xff] %v1485_v35  ;;  %1208 = vst [vmem:[%s1840_s30 + $0xf8] sm:$0xff] %v1486_v36 }
 0x134   : > { %1262 = vst [vmem:[%s1890_s7 + $0xb0] sm:$0xff] %v1261_v51  ;;  %1264 = vst [vmem:[%s1890_s7 + $0xb8] sm:$0xff] %v1263_v52 }
 0x136   : > { %v1277_v59 = vld [vmem:[%s1840_s30 + $0xb0] sm:$0xff]  ;;  %v1279_v60 = vld [vmem:[%s1840_s30 + $0xb8] sm:$0xff] }
 0x137   : > { %1278 = vst [vmem:[%s1890_s7 + $0x130] sm:$0xff] %v1277_v59  ;;  %1280 = vst [vmem:[%s1890_s7 + $0x138] sm:$0xff] %v1279_v60 }
 0x13a   : > { %v1293_v3 = vld [vmem:[%s1840_s30 + $0xf0] sm:$0xff]  ;;  %v1295_v4 = vld [vmem:[%s1840_s30 + $0xf8] sm:$0xff] }
 0x13b   : > { %1294 = vst [vmem:[%s1890_s7 + $0x1b0] sm:$0xff] %v1293_v3  ;;  %1296 = vst [vmem:[%s1890_s7 + $0x1b8] sm:$0xff] %v1295_v4 }
 0x13c PF: > { %s12_s15 = sadd.s32 1, %s1598_s15   ;;  %s1972_s9 = smov %s1578_s10 }
 0x13d   : > { %p9_p12 = scmp.ge.s32.totalorder %s12_s15, 6   ;;  %s1973_s10 = smov %s1672_s24 }
 0x13e   : > { %s1974_s11 = smov %s1590_s13  ;;  %s1975_s12 = smov %s1594_s14 }
 0x13f   : > { %s1976_s13 = smov %s1979_s16  ;;  %s1977_s14 = smov %s1983_s17 }
 0x140   :  { %11 = sbr.rel (!%p9_p12) target bundleno = 4 (0x4), region = 109 }

// kernel: segmentation_forward.14
= control target key start
LH: loop header
LB: loop body
LE: loop exit
PB: predicated region body
PF: predicated region fallthrough
CT: control target
= control target key end

     0   :  { %s2813_s9 = smov 0   ;;  %s2815_s10 = smov 0   ;;  %s3050_s0 = inlined_call_operand.vmem [shape: f32[32,16], index: 0, kind: input, shape index: {}]   ;;  %s3051_s1 = inlined_call_operand.vmem [shape: bf16[2,16,16,128], index: 1, kind: input, shape index: {}]   ;;  %s3052_s2 = inlined_call_operand.vmem [shape: bf16[2,16,32,128], index: 2, kind: output, shape index: {}]  }
   0x1   :  { %s2817_s11 = smov 0  }
   0x2 LB: > { %s24_s12 = sadd.s32 1, %s2792_s10  ;;  %p2023_p0 = scmp.ge.s32.totalorder %s2796_s11, 1  ;;  %s2796_s11 = sphi %s2817_s11, %s12_s11   ;;  %s2792_s10 = sphi %s2815_s10, %s3054_s10   ;;  %s2788_s9 = sphi %s2813_s9, %s3053_s9  }
   0x3   : > { %p26_p1 = scmp.ge.s32.totalorder %s24_s12, 2  ;;  %p131_p2 = scmp.lt.s32.totalorder %s2796_s11, 3 }
   0x5   : > { %s3056_s12 = smov (%p26_p1, %s24_s12), 0  ;;  %p132_p3 = pnand %p2023_p0, %p131_p2 }
   0x6   : > { %p159_p4 = scmp.lt.s32.totalorder (!%p132_p3), %s2788_s9, 1 }
   0x7   : > { %135 = sbr.rel (%p132_p3) target bundleno = 280 (0x118), region = 28 }
   0xc   : > { %v2834_v0 = vld [vmem:[%s3050_s0] sm:$0xff]  ;;  %vm243_vm0 = vcmask 130048   ;;  %s3058_s9 = smov (!%p159_p4, %s2788_s9), 1  ;;  %v2855_v9 = vld [vmem:[%s3050_s0 + $0x8] sm:$0xff]  ;;  %v2864_v12 = vld [vmem:[%s3050_s0 + $0x10] sm:$0xff] }
   0xd   : > { %2594 = vmatprep.mubr.msk.f32.mxu0 %vm243_vm0, %v2834_v0  ;;  %2604 = vmatprep.mubr.msk.f32.mxu1 %vm243_vm0, %v2834_v0  ;;  %s2158_s15 = sshll.u32 %s3058_s9, 7  ;;  %v2869_v13 = vld [vmem:[%s3050_s0 + $0x18] sm:$0xff]  ;;  %s2159_s25 = sshll.u32 %s3058_s9, 8 }
   0xe   : > { %s2846_s18 = scalar_lea.vmem %s3051_s1, %s2158_s15  ;;  %s3007_s28 = scalar_lea.vmem %s3052_s2, %s2159_s25 }
   0xf   : > { %v2225_v1 = vld [vmem:[%s2846_s18] sm:$0xff]   ;;  %v2448_v2 = vld [vmem:[%s2846_s18 + $0x8] sm:$0xff]   ;;  %v2449_v7 = vld [vmem:[%s2846_s18 + $0x10] sm:$0xff]  }
  0x10   : > { %v2226_v3 = vunpack.c.l.bf16 %v2225_v1  ;;  %v2227_v4 = vunpack.c.h.bf16 %v2225_v1  ;;  %v2230_v5 = vunpack.c.l.bf16 %v2448_v2  ;;  %v2231_v6 = vunpack.c.h.bf16 %v2448_v2  ;;  %v2450_v8 = vld [vmem:[%s2846_s18 + $0x18] sm:$0xff]   ;;  %v2451_v16 = vld [vmem:[%s2846_s18 + $0x20] sm:$0xff]   ;;  %v2452_v17 = vld [vmem:[%s2846_s18 + $0x28] sm:$0xff]  }
  0x11   : > { %v2235_v10 = vunpack.c.h.bf16 %v2449_v7  ;;  %v2239_v11 = vunpack.c.h.bf16 %v2450_v8  ;;  %v2234_v14 = vunpack.c.l.bf16 %v2449_v7  ;;  %v2238_v15 = vunpack.c.l.bf16 %v2450_v8  ;;  %v2453_v22 = vld [vmem:[%s2846_s18 + $0x30] sm:$0xff]   ;;  %v2454_v23 = vld [vmem:[%s2846_s18 + $0x38] sm:$0xff]   ;;  %v2455_v28 = vld [vmem:[%s2846_s18 + $0x40] sm:$0xff]  }
  0x12   : > { %2590 = vmatprep.subr.mxu0 %v2227_v4  ;;  %2600 = vmatprep.subr.mxu1 %v2231_v6  ;;  %v2243_v18 = vunpack.c.h.bf16 %v2451_v16  ;;  %v2247_v19 = vunpack.c.h.bf16 %v2452_v17  ;;  %v2242_v20 = vunpack.c.l.bf16 %v2451_v16  ;;  %v2246_v21 = vunpack.c.l.bf16 %v2452_v17  ;;  %v2456_v29 = vld [vmem:[%s2846_s18 + $0x48] sm:$0xff]   ;;  %v2457_v34 = vld [vmem:[%s2846_s18 + $0x50] sm:$0xff]   ;;  %v2458_v35 = vld [vmem:[%s2846_s18 + $0x58] sm:$0xff]  }
  0x13   : > { %2591 = vmatpush3.msra.mxu0 %v2227_v4  ;;  %2601 = vmatpush3.msra.mxu1 %v2231_v6  ;;  %v2251_v24 = vunpack.c.h.bf16 %v2453_v22  ;;  %v2255_v25 = vunpack.c.h.bf16 %v2454_v23  ;;  %v2250_v26 = vunpack.c.l.bf16 %v2453_v22  ;;  %v2254_v27 = vunpack.c.l.bf16 %v2454_v23  ;;  %v2459_v40 = vld [vmem:[%s2846_s18 + $0x60] sm:$0xff]   ;;  %v2460_v41 = vld [vmem:[%s2846_s18 + $0x68] sm:$0xff]   ;;  %v2461_v46 = vld [vmem:[%s2846_s18 + $0x70] sm:$0xff]  }
  0x14   : > { %2592 = vmatprep.subr.mxu0 %v2226_v3  ;;  %2602 = vmatprep.subr.mxu1 %v2230_v5  ;;  %v2259_v30 = vunpack.c.h.bf16 %v2455_v28  ;;  %v2263_v31 = vunpack.c.h.bf16 %v2456_v29  ;;  %v2258_v32 = vunpack.c.l.bf16 %v2455_v28  ;;  %v2262_v33 = vunpack.c.l.bf16 %v2456_v29  ;;  %v2462_v47 = vld [vmem:[%s2846_s18 + $0x78] sm:$0xff]  }
  0x15   : > { %2593 = vmatpush3.msra.mxu0 %v2226_v3  ;;  %2603 = vmatpush3.msra.mxu1 %v2230_v5  ;;  %v2267_v36 = vunpack.c.h.bf16 %v2457_v34  ;;  %v2271_v37 = vunpack.c.h.bf16 %v2458_v35  ;;  %v2266_v38 = vunpack.c.l.bf16 %v2457_v34  ;;  %v2270_v39 = vunpack.c.l.bf16 %v2458_v35 }
  0x16   : > { %2595 = vmatmul.mubr.msk.f32.vlgmr.msra.gmra.mxu0 %vm243_vm0, %v2855_v9  ;;  %2605 = vmatmul.mubr.msk.f32.vlgmr.msra.gmra.mxu1 %vm243_vm0, %v2855_v9  ;;  %v2275_v42 = vunpack.c.h.bf16 %v2459_v40  ;;  %v2279_v43 = vunpack.c.h.bf16 %v2460_v41  ;;  %v2274_v44 = vunpack.c.l.bf16 %v2459_v40  ;;  %v2278_v45 = vunpack.c.l.bf16 %v2460_v41 }
  0x17   : > { %2610 = vmatprep.subr.mxu0 %v2235_v10  ;;  %2620 = vmatprep.subr.mxu1 %v2239_v11  ;;  %v2283_v48 = vunpack.c.h.bf16 %v2461_v46  ;;  %v2287_v49 = vunpack.c.h.bf16 %v2462_v47  ;;  %v2282_v50 = vunpack.c.l.bf16 %v2461_v46  ;;  %v2286_v51 = vunpack.c.l.bf16 %v2462_v47 }
  0x18   : > { %2611 = vmatpush3.msra.mxu0 %v2235_v10  ;;  %2621 = vmatpush3.msra.mxu1 %v2239_v11 }
  0x19   : > { %2597 = vmatprep.mubr.msk.f32.mxu0 %vm243_vm0, %v2864_v12  ;;  %2607 = vmatprep.mubr.msk.f32.mxu1 %vm243_vm0, %v2864_v12 }
  0x1a   : > { %2598 = vmatmul.mubr.msk.f32.gmra.mxu0 %vm243_vm0, %v2869_v13  ;;  %2608 = vmatmul.mubr.msk.f32.gmra.mxu1 %vm243_vm0, %v2869_v13 }
  0x1b   : > { %2612 = vmatprep.subr.mxu0 %v2234_v14  ;;  %2622 = vmatprep.subr.mxu1 %v2238_v15 }
  0x1c   : > { %2613 = vmatpush3.msra.mxu0 %v2234_v14  ;;  %2623 = vmatpush3.msra.mxu1 %v2238_v15 }
  0x1d   : > { %2614 = vmatprep.mubr.msk.f32.mxu0 %vm243_vm0, %v2834_v0  ;;  %2624 = vmatprep.mubr.msk.f32.mxu1 %vm243_vm0, %v2834_v0 }
  0x1e   : > { %2615 = vmatmul.mubr.msk.f32.vlgmr.msra.gmra.mxu0 %vm243_vm0, %v2855_v9  ;;  %2625 = vmatmul.mubr.msk.f32.vlgmr.msra.gmra.mxu1 %vm243_vm0, %v2855_v9 }
  0x1f   : > { %2630 = vmatprep.subr.mxu0 %v2243_v18  ;;  %2640 = vmatprep.subr.mxu1 %v2247_v19 }
  0x20   : > { %2631 = vmatpush3.msra.mxu0 %v2243_v18  ;;  %2641 = vmatpush3.msra.mxu1 %v2247_v19 }
  0x21   : > { %2617 = vmatprep.mubr.msk.f32.mxu0 %vm243_vm0, %v2864_v12  ;;  %2627 = vmatprep.mubr.msk.f32.mxu1 %vm243_vm0, %v2864_v12 }
  0x22   : > { %2618 = vmatmul.mubr.msk.f32.gmra.mxu0 %vm243_vm0, %v2869_v13  ;;  %2628 = vmatmul.mubr.msk.f32.gmra.mxu1 %vm243_vm0, %v2869_v13 }
  0x23   : > { %2632 = vmatprep.subr.mxu0 %v2242_v20  ;;  %2642 = vmatprep.subr.mxu1 %v2246_v21 }
  0x24   : > { %2633 = vmatpush3.msra.mxu0 %v2242_v20  ;;  %2643 = vmatpush3.msra.mxu1 %v2246_v21 }
  0x25   : > { %2634 = vmatprep.mubr.msk.f32.mxu0 %vm243_vm0, %v2834_v0  ;;  %2644 = vmatprep.mubr.msk.f32.mxu1 %vm243_vm0, %v2834_v0 }
  0x26   : > { %2635 = vmatmul.mubr.msk.f32.vlgmr.msra.gmra.mxu0 %vm243_vm0, %v2855_v9  ;;  %2645 = vmatmul.mubr.msk.f32.vlgmr.msra.gmra.mxu1 %vm243_vm0, %v2855_v9 }
  0x27   : > { %2650 = vmatprep.subr.mxu0 %v2251_v24  ;;  %2660 = vmatprep.subr.mxu1 %v2255_v25 }
  0x28   : > { %2651 = vmatpush3.msra.mxu0 %v2251_v24  ;;  %2661 = vmatpush3.msra.mxu1 %v2255_v25 }
  0x29   : > { %2637 = vmatprep.mubr.msk.f32.mxu0 %vm243_vm0, %v2864_v12  ;;  %2647 = vmatprep.mubr.msk.f32.mxu1 %vm243_vm0, %v2864_v12 }
  0x2a   : > { %2638 = vmatmul.mubr.msk.f32.gmra.mxu0 %vm243_vm0, %v2869_v13  ;;  %2648 = vmatmul.mubr.msk.f32.gmra.mxu1 %vm243_vm0, %v2869_v13 }
  0x2b   : > { %2652 = vmatprep.subr.mxu0 %v2250_v26  ;;  %2662 = vmatprep.subr.mxu1 %v2254_v27 }
  0x2c   : > { %2653 = vmatpush3.msra.mxu0 %v2250_v26  ;;  %2663 = vmatpush3.msra.mxu1 %v2254_v27 }
  0x2d   : > { %2654 = vmatprep.mubr.msk.f32.mxu0 %vm243_vm0, %v2834_v0  ;;  %2664 = vmatprep.mubr.msk.f32.mxu1 %vm243_vm0, %v2834_v0 }
  0x2e   : > { %2655 = vmatmul.mubr.msk.f32.vlgmr.msra.gmra.mxu0 %vm243_vm0, %v2855_v9  ;;  %2665 = vmatmul.mubr.msk.f32.vlgmr.msra.gmra.mxu1 %vm243_vm0, %v2855_v9 }
  0x2f   : > { %2670 = vmatprep.subr.mxu0 %v2259_v30  ;;  %2680 = vmatprep.subr.mxu1 %v2263_v31 }
  0x30   : > { %2671 = vmatpush3.msra.mxu0 %v2259_v30  ;;  %2681 = vmatpush3.msra.mxu1 %v2263_v31 }
  0x31   : > { %2657 = vmatprep.mubr.msk.f32.mxu0 %vm243_vm0, %v2864_v12  ;;  %2667 = vmatprep.mubr.msk.f32.mxu1 %vm243_vm0, %v2864_v12 }
  0x32   : > { %2658 = vmatmul.mubr.msk.f32.gmra.mxu0 %vm243_vm0, %v2869_v13  ;;  %2668 = vmatmul.mubr.msk.f32.gmra.mxu1 %vm243_vm0, %v2869_v13 }
  0x33   : > { %2672 = vmatprep.subr.mxu0 %v2258_v32  ;;  %2682 = vmatprep.subr.mxu1 %v2262_v33 }
  0x34   : > { %2673 = vmatpush3.msra.mxu0 %v2258_v32  ;;  %2683 = vmatpush3.msra.mxu1 %v2262_v33 }
  0x35   : > { %2674 = vmatprep.mubr.msk.f32.mxu0 %vm243_vm0, %v2834_v0  ;;  %2684 = vmatprep.mubr.msk.f32.mxu1 %vm243_vm0, %v2834_v0 }
  0x36   : > { %2675 = vmatmul.mubr.msk.f32.vlgmr.msra.gmra.mxu0 %vm243_vm0, %v2855_v9  ;;  %2685 = vmatmul.mubr.msk.f32.vlgmr.msra.gmra.mxu1 %vm243_vm0, %v2855_v9 }
  0x37   : > { %2690 = vmatprep.subr.mxu0 %v2267_v36  ;;  %2700 = vmatprep.subr.mxu1 %v2271_v37 }
  0x38   : > { %2691 = vmatpush3.msra.mxu0 %v2267_v36  ;;  %2701 = vmatpush3.msra.mxu1 %v2271_v37 }
  0x39   : > { %2677 = vmatprep.mubr.msk.f32.mxu0 %vm243_vm0, %v2864_v12  ;;  %2687 = vmatprep.mubr.msk.f32.mxu1 %vm243_vm0, %v2864_v12 }
  0x3a   : > { %2678 = vmatmul.mubr.msk.f32.gmra.mxu0 %vm243_vm0, %v2869_v13  ;;  %2688 = vmatmul.mubr.msk.f32.gmra.mxu1 %vm243_vm0, %v2869_v13 }
  0x3b   : > { %2692 = vmatprep.subr.mxu0 %v2266_v38  ;;  %2702 = vmatprep.subr.mxu1 %v2270_v39 }
  0x3c   : > { %2693 = vmatpush3.msra.mxu0 %v2266_v38  ;;  %2703 = vmatpush3.msra.mxu1 %v2270_v39 }
  0x3d   : > { %2694 = vmatprep.mubr.msk.f32.mxu0 %vm243_vm0, %v2834_v0  ;;  %2704 = vmatprep.mubr.msk.f32.mxu1 %vm243_vm0, %v2834_v0 }
  0x3e   : > { %2695 = vmatmul.mubr.msk.f32.vlgmr.msra.gmra.mxu0 %vm243_vm0, %v2855_v9  ;;  %2705 = vmatmul.mubr.msk.f32.vlgmr.msra.gmra.mxu1 %vm243_vm0, %v2855_v9 }
  0x3f   : > { %2710 = vmatprep.subr.mxu0 %v2275_v42  ;;  %2720 = vmatprep.subr.mxu1 %v2279_v43 }
  0x40   : > { %2711 = vmatpush3.msra.mxu0 %v2275_v42  ;;  %2721 = vmatpush3.msra.mxu1 %v2279_v43 }
  0x41   : > { %2697 = vmatprep.mubr.msk.f32.mxu0 %vm243_vm0, %v2864_v12  ;;  %2707 = vmatprep.mubr.msk.f32.mxu1 %vm243_vm0, %v2864_v12 }
  0x42   : > { %2698 = vmatmul.mubr.msk.f32.gmra.mxu0 %vm243_vm0, %v2869_v13  ;;  %2708 = vmatmul.mubr.msk.f32.gmra.mxu1 %vm243_vm0, %v2869_v13 }
  0x43   : > { %2712 = vmatprep.subr.mxu0 %v2274_v44  ;;  %2722 = vmatprep.subr.mxu1 %v2278_v45 }
  0x44   : > { %2713 = vmatpush3.msra.mxu0 %v2274_v44  ;;  %2723 = vmatpush3.msra.mxu1 %v2278_v45 }
  0x45   : > { %2714 = vmatprep.mubr.msk.f32.mxu0 %vm243_vm0, %v2834_v0  ;;  %2724 = vmatprep.mubr.msk.f32.mxu1 %vm243_vm0, %v2834_v0 }
  0x46   : > { %2715 = vmatmul.mubr.msk.f32.vlgmr.msra.gmra.mxu0 %vm243_vm0, %v2855_v9  ;;  %2725 = vmatmul.mubr.msk.f32.vlgmr.msra.gmra.mxu1 %vm243_vm0, %v2855_v9 }
  0x47   : > { %2730 = vmatprep.subr.mxu0 %v2283_v48  ;;  %2740 = vmatprep.subr.mxu1 %v2287_v49 }
  0x48   : > { %2731 = vmatpush3.msra.mxu0 %v2283_v48  ;;  %2741 = vmatpush3.msra.mxu1 %v2287_v49 }
  0x49   : > { %2717 = vmatprep.mubr.msk.f32.mxu0 %vm243_vm0, %v2864_v12  ;;  %2727 = vmatprep.mubr.msk.f32.mxu1 %vm243_vm0, %v2864_v12 }
  0x4a   : > { %2718 = vmatmul.mubr.msk.f32.gmra.mxu0 %vm243_vm0, %v2869_v13  ;;  %2728 = vmatmul.mubr.msk.f32.gmra.mxu1 %vm243_vm0, %v2869_v13 }
  0x4b   : > { %2732 = vmatprep.subr.mxu0 %v2282_v50  ;;  %2742 = vmatprep.subr.mxu1 %v2286_v51 }
  0x4c   : > { %2733 = vmatpush3.msra.mxu0 %v2282_v50  ;;  %2743 = vmatpush3.msra.mxu1 %v2286_v51 }
  0x4d   : > { %2734 = vmatprep.mubr.msk.f32.mxu0 %vm243_vm0, %v2834_v0  ;;  %2744 = vmatprep.mubr.msk.f32.mxu1 %vm243_vm0, %v2834_v0 }
  0x4e   : > { %2735 = vmatmul.mubr.msk.f32.vlgmr.msra.gmra.mxu0 %vm243_vm0, %v2855_v9  ;;  %2745 = vmatmul.mubr.msk.f32.vlgmr.msra.gmra.mxu1 %vm243_vm0, %v2855_v9 }
  0x4f   : > { %2737 = vmatprep.mubr.msk.f32.mxu0 %vm243_vm0, %v2864_v12  ;;  %2747 = vmatprep.mubr.msk.f32.mxu1 %vm243_vm0, %v2864_v12 }
  0x52   : > { %2738 = vmatmul.mubr.msk.f32.gmra.mxu0 %vm243_vm0, %v2869_v13  ;;  %2748 = vmatmul.mubr.msk.f32.gmra.mxu1 %vm243_vm0, %v2869_v13 }
  0xd6   : > { %v2596_v52 = vpop.f32.mrf.mxu0  ;;  %v2606_v53 = vpop.f32.mrf.mxu1 }
  0xd8   : > { %v322_v54 = vpop.f32.mrf.mxu0  ;;  %v407_v55 = vpop.f32.mrf.mxu1 }
  0xd9   : > { %v2291_v56 = vpack.c.bf16 %v2596_v52, %v322_v54  ;;  %v2301_v57 = vpack.c.bf16 %v2606_v53, %v407_v55 }
  0xda   : > { %v2599_v58 = vpop.f32.mrf.mxu0  ;;  %v2609_v59 = vpop.f32.mrf.mxu1 }
  0xdb   : > { %2292 = vst [vmem:[%s3007_s28] sm:$0xff] %v2291_v56   ;;  %2464 = vst [vmem:[%s3007_s28 + $0x10] sm:$0xff] %v2301_v57  }
  0xdc   : > { %v332_v60 = vpop.f32.mrf.mxu0  ;;  %v417_v61 = vpop.f32.mrf.mxu1 }
  0xdd   : > { %v2296_v62 = vpack.c.bf16 %v2599_v58, %v332_v60  ;;  %v2306_v63 = vpack.c.bf16 %v2609_v59, %v417_v61 }
  0xde   : > { %v2616_v0 = vpop.f32.mrf.mxu0  ;;  %v2626_v1 = vpop.f32.mrf.mxu1 }
  0xdf   : > { %2463 = vst [vmem:[%s3007_s28 + $0x8] sm:$0xff] %v2296_v62   ;;  %2465 = vst [vmem:[%s3007_s28 + $0x18] sm:$0xff] %v2306_v63  }
  0xe0   : > { %v492_v2 = vpop.f32.mrf.mxu0  ;;  %v577_v3 = vpop.f32.mrf.mxu1 }
  0xe1   : > { %v2311_v4 = vpack.c.bf16 %v2616_v0, %v492_v2  ;;  %v2321_v5 = vpack.c.bf16 %v2626_v1, %v577_v3 }
  0xe2   : > { %v2619_v6 = vpop.f32.mrf.mxu0  ;;  %v2629_v7 = vpop.f32.mrf.mxu1 }
  0xe3   : > { %2466 = vst [vmem:[%s3007_s28 + $0x20] sm:$0xff] %v2311_v4   ;;  %2468 = vst [vmem:[%s3007_s28 + $0x30] sm:$0xff] %v2321_v5  }
  0xe4   : > { %v502_v8 = vpop.f32.mrf.mxu0  ;;  %v587_v9 = vpop.f32.mrf.mxu1 }
  0xe5   : > { %v2316_v10 = vpack.c.bf16 %v2619_v6, %v502_v8  ;;  %v2326_v11 = vpack.c.bf16 %v2629_v7, %v587_v9 }
  0xe6   : > { %v2636_v12 = vpop.f32.mrf.mxu0  ;;  %v2646_v13 = vpop.f32.mrf.mxu1 }
  0xe7   : > { %2467 = vst [vmem:[%s3007_s28 + $0x28] sm:$0xff] %v2316_v10   ;;  %2469 = vst [vmem:[%s3007_s28 + $0x38] sm:$0xff] %v2326_v11  }
  0xe8   : > { %v662_v14 = vpop.f32.mrf.mxu0  ;;  %v747_v15 = vpop.f32.mrf.mxu1 }
  0xe9   : > { %v2331_v16 = vpack.c.bf16 %v2636_v12, %v662_v14  ;;  %v2341_v17 = vpack.c.bf16 %v2646_v13, %v747_v15 }
  0xea   : > { %v2639_v18 = vpop.f32.mrf.mxu0  ;;  %v2649_v19 = vpop.f32.mrf.mxu1 }
  0xeb   : > { %2470 = vst [vmem:[%s3007_s28 + $0x40] sm:$0xff] %v2331_v16   ;;  %2472 = vst [vmem:[%s3007_s28 + $0x50] sm:$0xff] %v2341_v17  }
  0xec   : > { %v672_v20 = vpop.f32.mrf.mxu0  ;;  %v757_v21 = vpop.f32.mrf.mxu1 }
  0xed   : > { %v2336_v22 = vpack.c.bf16 %v2639_v18, %v672_v20  ;;  %v2346_v23 = vpack.c.bf16 %v2649_v19, %v757_v21 }
  0xee   : > { %v2656_v24 = vpop.f32.mrf.mxu0  ;;  %v2666_v25 = vpop.f32.mrf.mxu1 }
  0xef   : > { %2471 = vst [vmem:[%s3007_s28 + $0x48] sm:$0xff] %v2336_v22   ;;  %2473 = vst [vmem:[%s3007_s28 + $0x58] sm:$0xff] %v2346_v23  }
  0xf0   : > { %v832_v26 = vpop.f32.mrf.mxu0  ;;  %v917_v27 = vpop.f32.mrf.mxu1 }
  0xf1   : > { %v2351_v28 = vpack.c.bf16 %v2656_v24, %v832_v26  ;;  %v2361_v29 = vpack.c.bf16 %v2666_v25, %v917_v27 }
  0xf2   : > { %v2659_v30 = vpop.f32.mrf.mxu0  ;;  %v2669_v31 = vpop.f32.mrf.mxu1 }
  0xf3   : > { %2474 = vst [vmem:[%s3007_s28 + $0x60] sm:$0xff] %v2351_v28   ;;  %2476 = vst [vmem:[%s3007_s28 + $0x70] sm:$0xff] %v2361_v29  }
  0xf4   : > { %v842_v32 = vpop.f32.mrf.mxu0  ;;  %v927_v33 = vpop.f32.mrf.mxu1 }
  0xf5   : > { %v2356_v34 = vpack.c.bf16 %v2659_v30, %v842_v32  ;;  %v2366_v35 = vpack.c.bf16 %v2669_v31, %v927_v33 }
  0xf6   : > { %v2676_v36 = vpop.f32.mrf.mxu0  ;;  %v2686_v37 = vpop.f32.mrf.mxu1 }
  0xf7   : > { %2475 = vst [vmem:[%s3007_s28 + $0x68] sm:$0xff] %v2356_v34   ;;  %2477 = vst [vmem:[%s3007_s28 + $0x78] sm:$0xff] %v2366_v35  }
  0xf8   : > { %v1002_v38 = vpop.f32.mrf.mxu0  ;;  %v1087_v39 = vpop.f32.mrf.mxu1 }
  0xf9   : > { %v2371_v40 = vpack.c.bf16 %v2676_v36, %v1002_v38  ;;  %v2381_v41 = vpack.c.bf16 %v2686_v37, %v1087_v39 }
  0xfa   : > { %v2679_v42 = vpop.f32.mrf.mxu0  ;;  %v2689_v43 = vpop.f32.mrf.mxu1 }
  0xfb   : > { %2478 = vst [vmem:[%s3007_s28 + $0x80] sm:$0xff] %v2371_v40   ;;  %2480 = vst [vmem:[%s3007_s28 + $0x90] sm:$0xff] %v2381_v41  }
  0xfc   : > { %v1012_v44 = vpop.f32.mrf.mxu0  ;;  %v1097_v45 = vpop.f32.mrf.mxu1 }
  0xfd   : > { %v2376_v46 = vpack.c.bf16 %v2679_v42, %v1012_v44  ;;  %v2386_v47 = vpack.c.bf16 %v2689_v43, %v1097_v45 }
  0xfe   : > { %v2696_v48 = vpop.f32.mrf.mxu0  ;;  %v2706_v49 = vpop.f32.mrf.mxu1 }
  0xff   : > { %2479 = vst [vmem:[%s3007_s28 + $0x88] sm:$0xff] %v2376_v46   ;;  %2481 = vst [vmem:[%s3007_s28 + $0x98] sm:$0xff] %v2386_v47  }
 0x100   : > { %v1172_v50 = vpop.f32.mrf.mxu0  ;;  %v1257_v51 = vpop.f32.mrf.mxu1 }
 0x101   : > { %v2391_v52 = vpack.c.bf16 %v2696_v48, %v1172_v50  ;;  %v2401_v53 = vpack.c.bf16 %v2706_v49, %v1257_v51 }
 0x102   : > { %v2699_v54 = vpop.f32.mrf.mxu0  ;;  %v2709_v55 = vpop.f32.mrf.mxu1 }
 0x103   : > { %2482 = vst [vmem:[%s3007_s28 + $0xa0] sm:$0xff] %v2391_v52   ;;  %2484 = vst [vmem:[%s3007_s28 + $0xb0] sm:$0xff] %v2401_v53  }
 0x104   : > { %v1182_v56 = vpop.f32.mrf.mxu0  ;;  %v1267_v57 = vpop.f32.mrf.mxu1 }
 0x105   : > { %v2396_v58 = vpack.c.bf16 %v2699_v54, %v1182_v56  ;;  %v2406_v59 = vpack.c.bf16 %v2709_v55, %v1267_v57 }
 0x106   : > { %v2716_v60 = vpop.f32.mrf.mxu0  ;;  %v2726_v61 = vpop.f32.mrf.mxu1 }
 0x107   : > { %2483 = vst [vmem:[%s3007_s28 + $0xa8] sm:$0xff] %v2396_v58   ;;  %2485 = vst [vmem:[%s3007_s28 + $0xb8] sm:$0xff] %v2406_v59  }
 0x108   : > { %v1342_v62 = vpop.f32.mrf.mxu0  ;;  %v1427_v63 = vpop.f32.mrf.mxu1 }
 0x109   : > { %v2411_v0 = vpack.c.bf16 %v2716_v60, %v1342_v62  ;;  %v2421_v1 = vpack.c.bf16 %v2726_v61, %v1427_v63 }
 0x10a   : > { %v2719_v2 = vpop.f32.mrf.mxu0  ;;  %v2729_v3 = vpop.f32.mrf.mxu1 }
 0x10b   : > { %2486 = vst [vmem:[%s3007_s28 + $0xc0] sm:$0xff] %v2411_v0   ;;  %2488 = vst [vmem:[%s3007_s28 + $0xd0] sm:$0xff] %v2421_v1  }
 0x10c   : > { %v1352_v4 = vpop.f32.mrf.mxu0  ;;  %v1437_v5 = vpop.f32.mrf.mxu1 }
 0x10d   : > { %v2416_v6 = vpack.c.bf16 %v2719_v2, %v1352_v4  ;;  %v2426_v7 = vpack.c.bf16 %v2729_v3, %v1437_v5 }
 0x10e   : > { %v2736_v8 = vpop.f32.mrf.mxu0  ;;  %v2746_v9 = vpop.f32.mrf.mxu1 }
 0x10f   : > { %2487 = vst [vmem:[%s3007_s28 + $0xc8] sm:$0xff] %v2416_v6   ;;  %2489 = vst [vmem:[%s3007_s28 + $0xd8] sm:$0xff] %v2426_v7  }
 0x110   : > { %v1512_v10 = vpop.f32.mrf.mxu0  ;;  %v1597_v11 = vpop.f32.mrf.mxu1 }
 0x111   : > { %v2431_v12 = vpack.c.bf16 %v2736_v8, %v1512_v10  ;;  %v2441_v13 = vpack.c.bf16 %v2746_v9, %v1597_v11 }
 0x112   : > { %v2739_v14 = vpop.f32.mrf.mxu0  ;;  %v2749_v15 = vpop.f32.mrf.mxu1 }
 0x113   : > { %2490 = vst [vmem:[%s3007_s28 + $0xe0] sm:$0xff] %v2431_v12   ;;  %2492 = vst [vmem:[%s3007_s28 + $0xf0] sm:$0xff] %v2441_v13  }
 0x114   : > { %v1522_v16 = vpop.f32.mrf.mxu0  ;;  %v1607_v17 = vpop.f32.mrf.mxu1 }
 0x115   : > { %v2436_v18 = vpack.c.bf16 %v2739_v14, %v1522_v16  ;;  %v2446_v19 = vpack.c.bf16 %v2749_v15, %v1607_v17 }
 0x117   : > { %2491 = vst [vmem:[%s3007_s28 + $0xe8] sm:$0xff] %v2436_v18   ;;  %2493 = vst [vmem:[%s3007_s28 + $0xf8] sm:$0xff] %v2446_v19  }
 0x118 PF: > { %s12_s11 = sadd.s32 1, %s2796_s11   ;;  %s3053_s9 = smov %s2792_s10 }
 0x119   : > { %p9_p5 = scmp.ge.s32.totalorder %s12_s11, 4   ;;  %s3054_s10 = smov %s3056_s12 }
 0x11b   :  { %11 = sbr.rel (!%p9_p5) target bundleno = 2 (0x2), region = 58 }

</bundles_post_ra>
